<compile_context>
chip_gen: v6e
topology: v6e:2x2x1
jax: 0.10.0
libtpu: 0.0.40
codegen_flags: <defaults>
</compile_context>

<pallas_src>
import functools

import jax
import jax.numpy as jnp
from jax.experimental import pallas as pl
from jax.experimental.pallas import tpu as pltpu


_OFFSETS = tuple((dh, dw) for dh in range(3) for dw in range(3))   # (kh, kw) tap order


# ---------------------------------------------------------------------------
# Fused forward kernel: conv1 -> relu -> conv2 -> relu -> fc1 -> relu -> fc2 -> tanh
# ---------------------------------------------------------------------------
def _fused_forward_kernel(x_ref, w1_ref, b1_ref, w2_ref, b2_ref,
                          w3_ref, b3_ref, w4_ref, b4_ref,
                          o_ref,
                          pad1_ref, pad2_ref, col1_ref, col2_ref, flat_ref,
                          *, bt):
    f32 = jnp.float32
    cdt = w1_ref.dtype                      # matmul operand dtype (bf16 / f32)
    M = bt * 64                             # conv-matmul rows: (batch, h, w)

    def zero_border(pref, c):
        # Only the 1-pixel border must be zero; the 8x8 interior is fully
        # overwritten below.  Done every step (cheap) so it stays correct even
        # when a 2-TC chip splits the "parallel" grid axis across cores.
        zh = jnp.zeros((bt, 1, 10, c), f32)
        pref[:, 0:1, :, :] = zh
        pref[:, 9:10, :, :] = zh
        zw = jnp.zeros((bt, 8, 1, c), f32)
        pref[:, 1:9, 0:1, :] = zw
        pref[:, 1:9, 9:10, :] = zw

    # ---- conv1 (3x3, pad=1) + ReLU as ONE im2col matmul: K = 9*12 = 108
    zero_border(pad1_ref, 12)
    pad1_ref[:, 1:9, 1:9, :] = x_ref[...]
    for idx, (dh, dw) in enumerate(_OFFSETS):
        tap = pad1_ref[:, dh:dh + 8, dw:dw + 8, :].reshape(M, 12)
        col1_ref[:, idx * 12:(idx + 1) * 12] = tap.astype(cdt)
    h1 = jnp.dot(col1_ref[...], w1_ref[...], preferred_element_type=f32)
    h1 = jnp.maximum(h1 + b1_ref[...], 0.0)                    # (M, 32) f32

    # ---- conv2 (3x3, pad=1) + ReLU as ONE im2col matmul: K = 9*32 = 288
    zero_border(pad2_ref, 32)
    pad2_ref[:, 1:9, 1:9, :] = h1.reshape(bt, 8, 8, 32)
    for idx, (dh, dw) in enumerate(_OFFSETS):
        tap = pad2_ref[:, dh:dh + 8, dw:dw + 8, :].reshape(M, 32)
        col2_ref[:, idx * 32:(idx + 1) * 32] = tap.astype(cdt)
    h2 = jnp.dot(col2_ref[...], w2_ref[...], preferred_element_type=f32)
    h2 = jnp.maximum(h2 + b2_ref[...], 0.0)                    # (M, 64) f32

    # ---- flatten (h, w, c) -> (bt, 4096): 8 lane-dense 512-wide unmasked stores
    h2_3d = h2.reshape(bt, 64, 64)          # (b, h*w, c); leading-dim split only
    for k in range(8):
        chunk = jnp.concatenate([h2_3d[:, 8 * k + j, :] for j in range(8)], axis=-1)
        flat_ref[:, k * 512:(k + 1) * 512] = chunk.astype(cdt)

    # ---- fc1 + ReLU: single (bt, 4096) @ (4096, 256) MXU matmul
    h3 = jnp.dot(flat_ref[...], w3_ref[...], preferred_element_type=f32) + b3_ref[...]
    h3 = jnp.maximum(h3, 0.0)                                  # (bt, 256) f32

    # ---- fc2 (N = 1): VPU multiply + lane reduce, then tanh (EUP)
    q = jnp.sum(h3 * w4_ref[...], axis=-1, keepdims=True) + b4_ref[...]
    o_ref[...] = jnp.tanh(q)                                   # (bt, 1)


# ---------------------------------------------------------------------------
# One-time parameter preparation (layout permutes / dtype casts, outside kernel)
# ---------------------------------------------------------------------------
def prepare_params(params, matmul_dtype=jnp.bfloat16):
    # conv weights OIHW -> (kh, kw, cin, cout) -> (9*cin, cout); row order
    # (tap-major, channel-minor) matches the im2col columns built in-kernel.
    w1 = params["conv1_w"].transpose(2, 3, 1, 0).reshape(9 * 12, 32).astype(matmul_dtype)
    w2 = params["conv2_w"].transpose(2, 3, 1, 0).reshape(9 * 32, 64).astype(matmul_dtype)
    # fc1: torch flattens NCHW as (c, h, w); the kernel flattens NHWC as (h, w, c).
    w3 = (params["fc1_w"].reshape(256, 64, 8, 8).transpose(2, 3, 1, 0)
          .reshape(4096, 256).astype(matmul_dtype))
    return {
        "w1": w1, "b1": params["conv1_b"].reshape(1, 32).astype(jnp.float32),
        "w2": w2, "b2": params["conv2_b"].reshape(1, 64).astype(jnp.float32),
        "w3": w3, "b3": params["fc1_b"].reshape(1, 256).astype(jnp.float32),
        "w4": params["fc2_w"].reshape(1, 256).astype(jnp.float32),
        "b4": params["fc2_b"].reshape(1, 1).astype(jnp.float32),
    }


# ---------------------------------------------------------------------------
# Forward pass wrapper
# ---------------------------------------------------------------------------
def chess_qnet_forward(prepped, x_nchw, *, block_batch=64):
    B = x_nchw.shape[0]
    assert x_nchw.shape[1:] == (12, 8, 8), x_nchw.shape
    cdt = prepped["w1"].dtype

    # Single boundary transpose to NHWC (channels land in lanes for the MXU).
    x = jnp.transpose(x_nchw, (0, 2, 3, 1)).astype(jnp.float32)   # (B, 8, 8, 12)

    # Batch tile: whole batch in one block when it fits; otherwise block_batch
    # rows per block (multiple of 8 so the (bt, 1) output block stays legal
    # when there is more than one block).
    if B <= block_batch:
        bt = B
    else:
        bt = max(8, (block_batch // 8) * 8)
    nb = pl.cdiv(B, bt)
    Bp = nb * bt
    if Bp != B:
        x = jnp.pad(x, ((0, Bp - B), (0, 0), (0, 0), (0, 0)))

    wbytes = (108 * 32 + 288 * 64 + 4096 * 256) * jnp.dtype(cdt).itemsize
    flops = int(2 * Bp * 64 * (108 * 32 + 288 * 64) + 2 * Bp * (4096 * 256 + 256))
    bytes_accessed = int(4 * Bp * 8 * 8 * 12 + wbytes
                         + 4 * (32 + 64 + 256 + 256 + 1) + 4 * Bp)

    out = pl.pallas_call(
        functools.partial(_fused_forward_kernel, bt=bt),
        out_shape=jax.ShapeDtypeStruct((Bp, 1), jnp.float32),
        grid=(nb,),
        in_specs=[
            pl.BlockSpec((bt, 8, 8, 12), lambda i: (i, 0, 0, 0)),   # x tile
            pl.BlockSpec((108, 32), lambda i: (0, 0)),              # conv1 w (resident)
            pl.BlockSpec((1, 32), lambda i: (0, 0)),                # conv1 b
            pl.BlockSpec((288, 64), lambda i: (0, 0)),              # conv2 w
            pl.BlockSpec((1, 64), lambda i: (0, 0)),                # conv2 b
            pl.BlockSpec((4096, 256), lambda i: (0, 0)),            # fc1 w
            pl.BlockSpec((1, 256), lambda i: (0, 0)),               # fc1 b
            pl.BlockSpec((1, 256), lambda i: (0, 0)),               # fc2 w (row)
            pl.BlockSpec((1, 1), lambda i: (0, 0)),                 # fc2 b
        ],
        out_specs=pl.BlockSpec((bt, 1), lambda i: (i, 0)),
        scratch_shapes=[
            pltpu.VMEM((bt, 10, 10, 12), jnp.float32),   # padded conv1 input
            pltpu.VMEM((bt, 10, 10, 32), jnp.float32),   # padded conv2 input
            pltpu.VMEM((bt * 64, 108), cdt),             # conv1 im2col (K = 108)
            pltpu.VMEM((bt * 64, 288), cdt),             # conv2 im2col (K = 288)
            pltpu.VMEM((bt, 4096), cdt),                 # lane-dense flatten buffer
        ],
        compiler_params=pltpu.CompilerParams(
            dimension_semantics=("parallel",),
            vmem_limit_bytes=64 * 1024 * 1024,
        ),
        cost_estimate=pl.CostEstimate(
            flops=flops, transcendentals=Bp, bytes_accessed=bytes_accessed),
    )(x, prepped["w1"], prepped["b1"], prepped["w2"], prepped["b2"],
      prepped["w3"], prepped["b3"], prepped["w4"], prepped["b4"])

    return out[:B]                                        # (B, 1)


# ---------------------------------------------------------------------------
# Parameter init (deterministic, synthetic) -- PyTorch-layout params
# ---------------------------------------------------------------------------
def init_params(key):
    ks = jax.random.split(key, 8)

    def norm(k, shape, fan_in):
        return (jax.random.normal(k, shape, jnp.float32) / jnp.sqrt(fan_in)).astype(jnp.float32)

    return {
        "conv1_w": norm(ks[0], (32, 12, 3, 3), 12 * 9),   # OIHW like PyTorch
        "conv1_b": norm(ks[1], (32,), 12 * 9),
        "conv2_w": norm(ks[2], (64, 32, 3, 3), 32 * 9),
        "conv2_b": norm(ks[3], (64,), 32 * 9),
        "fc1_w":   norm(ks[4], (256, 64 * 8 * 8), 64 * 8 * 8),   # (out, in) like torch
        "fc1_b":   norm(ks[5], (256,), 64 * 8 * 8),
        "fc2_w":   norm(ks[6], (1, 256), 256),
        "fc2_b":   norm(ks[7], (1,), 256),
    }


# ---------------------------------------------------------------------------
# Pure-JAX reference for verification
# ---------------------------------------------------------------------------
def chess_qnet_reference(params, x):
    dn = ("NCHW", "OIHW", "NCHW")
    h = jax.lax.conv_general_dilated(x, params["conv1_w"], (1, 1), "SAME",
                                     dimension_numbers=dn)
    h = jax.nn.relu(h + params["conv1_b"][None, :, None, None])
    h = jax.lax.conv_general_dilated(h, params["conv2_w"], (1, 1), "SAME",
                                     dimension_numbers=dn)
    h = jax.nn.relu(h + params["conv2_b"][None, :, None, None])
    h = h.reshape(h.shape[0], -1)
    h = jax.nn.relu(h @ params["fc1_w"].T + params["fc1_b"])
    return jnp.tanh(h @ params["fc2_w"].T + params["fc2_b"])


if __name__ == "__main__":
    key = jax.random.PRNGKey(0)
    k_params, k_x = jax.random.split(key)

    params = init_params(k_params)
    x = jax.random.normal(k_x, (2, 12, 8, 8), jnp.float32)   # (B=2, C=12, H=8, W=8)

    ref = chess_qnet_reference(params, x)
    fwd = jax.jit(chess_qnet_forward)

    # f32 verification path: exact module semantics, tight tolerance.
    out_f32 = jax.block_until_ready(fwd(prepare_params(params, jnp.float32), x))
    assert out_f32.shape == (2, 1), out_f32.shape
    assert jnp.allclose(out_f32, ref, atol=1e-4, rtol=1e-4), (out_f32, ref)

    # bf16-operand fast path (performance default): f32 accumulation / epilogues.
    out_bf16 = jax.block_until_ready(fwd(prepare_params(params, jnp.bfloat16), x))
    assert out_bf16.shape == (2, 1), out_bf16.shape
    assert jnp.allclose(out_bf16, ref, atol=5e-2, rtol=5e-2), (out_bf16, ref)

    print("KERNEL_OK")
</pallas_src>

<mosaic_0001>
module attributes {stable_mosaic.version = 11 : i64} {
  func.func @_fused_forward_kernel(%arg0: i32, %arg1: memref<2x8x8x12xf32, #tpu.memory_space<vmem>>, %arg2: memref<108x32xf32, #tpu.memory_space<vmem>>, %arg3: memref<1x32xf32, #tpu.memory_space<vmem>>, %arg4: memref<288x64xf32, #tpu.memory_space<vmem>>, %arg5: memref<1x64xf32, #tpu.memory_space<vmem>>, %arg6: memref<4096x256xf32, #tpu.memory_space<vmem>>, %arg7: memref<1x256xf32, #tpu.memory_space<vmem>>, %arg8: memref<1x256xf32, #tpu.memory_space<vmem>>, %arg9: memref<1x1xf32, #tpu.memory_space<vmem>>, %arg10: memref<2x1xf32, #tpu.memory_space<vmem>>, %arg11: memref<2x10x10x12xf32, #tpu.memory_space<vmem>>, %arg12: memref<2x10x10x32xf32, #tpu.memory_space<vmem>>, %arg13: memref<128x108xf32, #tpu.memory_space<vmem>>, %arg14: memref<128x288xf32, #tpu.memory_space<vmem>>, %arg15: memref<2x4096xf32, #tpu.memory_space<vmem>>) attributes {dimension_semantics = [#tpu.dimension_semantics<parallel>], iteration_bounds = array<i64: 1>, scalar_prefetch = 0 : i64, scratch_operands = 5 : i64, tpu.core_type = #tpu.core_type<tc>, window_params = [{transform_indices = @transform_0, window_bounds = array<i64: 2, 8, 8, 12>}, {pipeline_mode = #tpu.pipeline_mode<synchronous>, transform_indices = @transform_1, window_bounds = array<i64: 108, 32>}, {pipeline_mode = #tpu.pipeline_mode<synchronous>, transform_indices = @transform_2, window_bounds = array<i64: 1, 32>}, {pipeline_mode = #tpu.pipeline_mode<synchronous>, transform_indices = @transform_3, window_bounds = array<i64: 288, 64>}, {pipeline_mode = #tpu.pipeline_mode<synchronous>, transform_indices = @transform_4, window_bounds = array<i64: 1, 64>}, {pipeline_mode = #tpu.pipeline_mode<synchronous>, transform_indices = @transform_5, window_bounds = array<i64: 4096, 256>}, {pipeline_mode = #tpu.pipeline_mode<synchronous>, transform_indices = @transform_6, window_bounds = array<i64: 1, 256>}, {pipeline_mode = #tpu.pipeline_mode<synchronous>, transform_indices = @transform_7, window_bounds = array<i64: 1, 256>}, {pipeline_mode = #tpu.pipeline_mode<synchronous>, transform_indices = @transform_8, window_bounds = array<i64: 1, 1>}, {transform_indices = @transform_9, window_bounds = array<i64: 2, 1>}]} {
    %cst = arith.constant 0.000000e+00 : f32
    %0 = vector.broadcast %cst : f32 to vector<2x1x10x12xf32>
    %c0 = arith.constant 0 : index
    %c0_0 = arith.constant 0 : index
    %c0_1 = arith.constant 0 : index
    %c0_2 = arith.constant 0 : index
    %1 = vector.load %arg11[%c0, %c0_0, %c0_1, %c0_2] : memref<2x10x10x12xf32, #tpu.memory_space<vmem>>, vector<2x1x10x12xf32>
    tpu.vector_store %arg11[%c0, %c0_0, %c0_1, %c0_2], %0 {strides = array<i32>} : memref<2x10x10x12xf32, #tpu.memory_space<vmem>>, vector<2x1x10x12xf32>,
    %c0_3 = arith.constant 0 : index
    %c9 = arith.constant 9 : index
    %c0_4 = arith.constant 0 : index
    %c0_5 = arith.constant 0 : index
    %2 = vector.load %arg11[%c0_3, %c9, %c0_4, %c0_5] : memref<2x10x10x12xf32, #tpu.memory_space<vmem>>, vector<2x1x10x12xf32>
    tpu.vector_store %arg11[%c0_3, %c9, %c0_4, %c0_5], %0 {strides = array<i32>} : memref<2x10x10x12xf32, #tpu.memory_space<vmem>>, vector<2x1x10x12xf32>,
    %cst_6 = arith.constant 0.000000e+00 : f32
    %3 = vector.broadcast %cst_6 : f32 to vector<2x8x1x12xf32>
    %c0_7 = arith.constant 0 : index
    %c1 = arith.constant 1 : index
    %c0_8 = arith.constant 0 : index
    %c0_9 = arith.constant 0 : index
    %4 = vector.load %arg11[%c0_7, %c1, %c0_8, %c0_9] : memref<2x10x10x12xf32, #tpu.memory_space<vmem>>, vector<2x8x1x12xf32>
    tpu.vector_store %arg11[%c0_7, %c1, %c0_8, %c0_9], %3 {strides = array<i32>} : memref<2x10x10x12xf32, #tpu.memory_space<vmem>>, vector<2x8x1x12xf32>,
    %c0_10 = arith.constant 0 : index
    %c1_11 = arith.constant 1 : index
    %c9_12 = arith.constant 9 : index
    %c0_13 = arith.constant 0 : index
    %5 = vector.load %arg11[%c0_10, %c1_11, %c9_12, %c0_13] : memref<2x10x10x12xf32, #tpu.memory_space<vmem>>, vector<2x8x1x12xf32>
    tpu.vector_store %arg11[%c0_10, %c1_11, %c9_12, %c0_13], %3 {strides = array<i32>} : memref<2x10x10x12xf32, #tpu.memory_space<vmem>>, vector<2x8x1x12xf32>,
    %c0_14 = arith.constant 0 : index
    %c0_15 = arith.constant 0 : index
    %c0_16 = arith.constant 0 : index
    %c0_17 = arith.constant 0 : index
    %6 = vector.load %arg1[%c0_14, %c0_15, %c0_16, %c0_17] : memref<2x8x8x12xf32, #tpu.memory_space<vmem>>, vector<2x8x8x12xf32>
    %c0_18 = arith.constant 0 : index
    %c1_19 = arith.constant 1 : index
    %c1_20 = arith.constant 1 : index
    %c0_21 = arith.constant 0 : index
    %7 = vector.load %arg11[%c0_18, %c1_19, %c1_20, %c0_21] : memref<2x10x10x12xf32, #tpu.memory_space<vmem>>, vector<2x8x8x12xf32>
    tpu.vector_store %arg11[%c0_18, %c1_19, %c1_20, %c0_21], %6 {strides = array<i32>} : memref<2x10x10x12xf32, #tpu.memory_space<vmem>>, vector<2x8x8x12xf32>,
    %c0_22 = arith.constant 0 : index
    %c0_23 = arith.constant 0 : index
    %c0_24 = arith.constant 0 : index
    %c0_25 = arith.constant 0 : index
    %8 = vector.load %arg11[%c0_22, %c0_23, %c0_24, %c0_25] : memref<2x10x10x12xf32, #tpu.memory_space<vmem>>, vector<2x8x8x12xf32>
    %9 = vector.shape_cast %8 : vector<2x8x8x12xf32> to vector<128x12xf32>
    %c0_26 = arith.constant 0 : index
    %c0_27 = arith.constant 0 : index
    %10 = vector.load %arg13[%c0_26, %c0_27] : memref<128x108xf32, #tpu.memory_space<vmem>>, vector<128x12xf32>
    tpu.vector_store %arg13[%c0_26, %c0_27], %9 {strides = array<i32>} : memref<128x108xf32, #tpu.memory_space<vmem>>, vector<128x12xf32>,
    %c0_28 = arith.constant 0 : index
    %c0_29 = arith.constant 0 : index
    %c1_30 = arith.constant 1 : index
    %c0_31 = arith.constant 0 : index
    %11 = vector.load %arg11[%c0_28, %c0_29, %c1_30, %c0_31] : memref<2x10x10x12xf32, #tpu.memory_space<vmem>>, vector<2x8x8x12xf32>
    %12 = vector.shape_cast %11 : vector<2x8x8x12xf32> to vector<128x12xf32>
    %c0_32 = arith.constant 0 : index
    %c12 = arith.constant 12 : index
    %13 = vector.load %arg13[%c0_32, %c12] : memref<128x108xf32, #tpu.memory_space<vmem>>, vector<128x12xf32>
    tpu.vector_store %arg13[%c0_32, %c12], %12 {strides = array<i32>} : memref<128x108xf32, #tpu.memory_space<vmem>>, vector<128x12xf32>,
    %c0_33 = arith.constant 0 : index
    %c0_34 = arith.constant 0 : index
    %c2 = arith.constant 2 : index
    %c0_35 = arith.constant 0 : index
    %14 = vector.load %arg11[%c0_33, %c0_34, %c2, %c0_35] : memref<2x10x10x12xf32, #tpu.memory_space<vmem>>, vector<2x8x8x12xf32>
    %15 = vector.shape_cast %14 : vector<2x8x8x12xf32> to vector<128x12xf32>
    %c0_36 = arith.constant 0 : index
    %c24 = arith.constant 24 : index
    %16 = vector.load %arg13[%c0_36, %c24] : memref<128x108xf32, #tpu.memory_space<vmem>>, vector<128x12xf32>
    tpu.vector_store %arg13[%c0_36, %c24], %15 {strides = array<i32>} : memref<128x108xf32, #tpu.memory_space<vmem>>, vector<128x12xf32>,
    %c0_37 = arith.constant 0 : index
    %c1_38 = arith.constant 1 : index
    %c0_39 = arith.constant 0 : index
    %c0_40 = arith.constant 0 : index
    %17 = vector.load %arg11[%c0_37, %c1_38, %c0_39, %c0_40] : memref<2x10x10x12xf32, #tpu.memory_space<vmem>>, vector<2x8x8x12xf32>
    %18 = vector.shape_cast %17 : vector<2x8x8x12xf32> to vector<128x12xf32>
    %c0_41 = arith.constant 0 : index
    %c36 = arith.constant 36 : index
    %19 = vector.load %arg13[%c0_41, %c36] : memref<128x108xf32, #tpu.memory_space<vmem>>, vector<128x12xf32>
    tpu.vector_store %arg13[%c0_41, %c36], %18 {strides = array<i32>} : memref<128x108xf32, #tpu.memory_space<vmem>>, vector<128x12xf32>,
    %c0_42 = arith.constant 0 : index
    %c1_43 = arith.constant 1 : index
    %c1_44 = arith.constant 1 : index
    %c0_45 = arith.constant 0 : index
    %20 = vector.load %arg11[%c0_42, %c1_43, %c1_44, %c0_45] : memref<2x10x10x12xf32, #tpu.memory_space<vmem>>, vector<2x8x8x12xf32>
    %21 = vector.shape_cast %20 : vector<2x8x8x12xf32> to vector<128x12xf32>
    %c0_46 = arith.constant 0 : index
    %c48 = arith.constant 48 : index
    %22 = vector.load %arg13[%c0_46, %c48] : memref<128x108xf32, #tpu.memory_space<vmem>>, vector<128x12xf32>
    tpu.vector_store %arg13[%c0_46, %c48], %21 {strides = array<i32>} : memref<128x108xf32, #tpu.memory_space<vmem>>, vector<128x12xf32>,
    %c0_47 = arith.constant 0 : index
    %c1_48 = arith.constant 1 : index
    %c2_49 = arith.constant 2 : index
    %c0_50 = arith.constant 0 : index
    %23 = vector.load %arg11[%c0_47, %c1_48, %c2_49, %c0_50] : memref<2x10x10x12xf32, #tpu.memory_space<vmem>>, vector<2x8x8x12xf32>
    %24 = vector.shape_cast %23 : vector<2x8x8x12xf32> to vector<128x12xf32>
    %c0_51 = arith.constant 0 : index
    %c60 = arith.constant 60 : index
    %25 = vector.load %arg13[%c0_51, %c60] : memref<128x108xf32, #tpu.memory_space<vmem>>, vector<128x12xf32>
    tpu.vector_store %arg13[%c0_51, %c60], %24 {strides = array<i32>} : memref<128x108xf32, #tpu.memory_space<vmem>>, vector<128x12xf32>,
    %c0_52 = arith.constant 0 : index
    %c2_53 = arith.constant 2 : index
    %c0_54 = arith.constant 0 : index
    %c0_55 = arith.constant 0 : index
    %26 = vector.load %arg11[%c0_52, %c2_53, %c0_54, %c0_55] : memref<2x10x10x12xf32, #tpu.memory_space<vmem>>, vector<2x8x8x12xf32>
    %27 = vector.shape_cast %26 : vector<2x8x8x12xf32> to vector<128x12xf32>
    %c0_56 = arith.constant 0 : index
    %c72 = arith.constant 72 : index
    %28 = vector.load %arg13[%c0_56, %c72] : memref<128x108xf32, #tpu.memory_space<vmem>>, vector<128x12xf32>
    tpu.vector_store %arg13[%c0_56, %c72], %27 {strides = array<i32>} : memref<128x108xf32, #tpu.memory_space<vmem>>, vector<128x12xf32>,
    %c0_57 = arith.constant 0 : index
    %c2_58 = arith.constant 2 : index
    %c1_59 = arith.constant 1 : index
    %c0_60 = arith.constant 0 : index
    %29 = vector.load %arg11[%c0_57, %c2_58, %c1_59, %c0_60] : memref<2x10x10x12xf32, #tpu.memory_space<vmem>>, vector<2x8x8x12xf32>
    %30 = vector.shape_cast %29 : vector<2x8x8x12xf32> to vector<128x12xf32>
    %c0_61 = arith.constant 0 : index
    %c84 = arith.constant 84 : index
    %31 = vector.load %arg13[%c0_61, %c84] : memref<128x108xf32, #tpu.memory_space<vmem>>, vector<128x12xf32>
    tpu.vector_store %arg13[%c0_61, %c84], %30 {strides = array<i32>} : memref<128x108xf32, #tpu.memory_space<vmem>>, vector<128x12xf32>,
    %c0_62 = arith.constant 0 : index
    %c2_63 = arith.constant 2 : index
    %c2_64 = arith.constant 2 : index
    %c0_65 = arith.constant 0 : index
    %32 = vector.load %arg11[%c0_62, %c2_63, %c2_64, %c0_65] : memref<2x10x10x12xf32, #tpu.memory_space<vmem>>, vector<2x8x8x12xf32>
    %33 = vector.shape_cast %32 : vector<2x8x8x12xf32> to vector<128x12xf32>
    %c0_66 = arith.constant 0 : index
    %c96 = arith.constant 96 : index
    %34 = vector.load %arg13[%c0_66, %c96] : memref<128x108xf32, #tpu.memory_space<vmem>>, vector<128x12xf32>
    tpu.vector_store %arg13[%c0_66, %c96], %33 {strides = array<i32>} : memref<128x108xf32, #tpu.memory_space<vmem>>, vector<128x12xf32>,
    %c0_67 = arith.constant 0 : index
    %c0_68 = arith.constant 0 : index
    %35 = vector.load %arg13[%c0_67, %c0_68] : memref<128x108xf32, #tpu.memory_space<vmem>>, vector<128x108xf32>
    %c0_69 = arith.constant 0 : index
    %c0_70 = arith.constant 0 : index
    %36 = vector.load %arg2[%c0_69, %c0_70] : memref<108x32xf32, #tpu.memory_space<vmem>>, vector<108x32xf32>
    %cst_71 = arith.constant dense<0.000000e+00> : vector<128x32xf32>
    %37 = tpu.matmul %35, %36, %cst_71 {dimension_numbers = #tpu.dot_dimension_numbers<[1], [0], [0], [1], [0, 0, 1, 1], [], []>} : vector<128x108xf32>, vector<108x32xf32>, vector<128x32xf32> -> vector<128x32xf32>
    %c0_72 = arith.constant 0 : index
    %c0_73 = arith.constant 0 : index
    %38 = vector.load %arg3[%c0_72, %c0_73] : memref<1x32xf32, #tpu.memory_space<vmem>>, vector<1x32xf32>
    %39 = vector.broadcast %38 : vector<1x32xf32> to vector<128x32xf32>
    %40 = arith.addf %37, %39 : vector<128x32xf32>
    %cst_74 = arith.constant 0.000000e+00 : f32
    %41 = vector.broadcast %cst_74 : f32 to vector<128x32xf32>
    %42 = arith.maximumf %40, %41 : vector<128x32xf32>
    %cst_75 = arith.constant 0.000000e+00 : f32
    %43 = vector.broadcast %cst_75 : f32 to vector<2x1x10x32xf32>
    %c0_76 = arith.constant 0 : index
    %c0_77 = arith.constant 0 : index
    %c0_78 = arith.constant 0 : index
    %c0_79 = arith.constant 0 : index
    %44 = vector.load %arg12[%c0_76, %c0_77, %c0_78, %c0_79] : memref<2x10x10x32xf32, #tpu.memory_space<vmem>>, vector<2x1x10x32xf32>
    tpu.vector_store %arg12[%c0_76, %c0_77, %c0_78, %c0_79], %43 {strides = array<i32>} : memref<2x10x10x32xf32, #tpu.memory_space<vmem>>, vector<2x1x10x32xf32>,
    %c0_80 = arith.constant 0 : index
    %c9_81 = arith.constant 9 : index
    %c0_82 = arith.constant 0 : index
    %c0_83 = arith.constant 0 : index
    %45 = vector.load %arg12[%c0_80, %c9_81, %c0_82, %c0_83] : memref<2x10x10x32xf32, #tpu.memory_space<vmem>>, vector<2x1x10x32xf32>
    tpu.vector_store %arg12[%c0_80, %c9_81, %c0_82, %c0_83], %43 {strides = array<i32>} : memref<2x10x10x32xf32, #tpu.memory_space<vmem>>, vector<2x1x10x32xf32>,
    %cst_84 = arith.constant 0.000000e+00 : f32
    %46 = vector.broadcast %cst_84 : f32 to vector<2x8x1x32xf32>
    %c0_85 = arith.constant 0 : index
    %c1_86 = arith.constant 1 : index
    %c0_87 = arith.constant 0 : index
    %c0_88 = arith.constant 0 : index
    %47 = vector.load %arg12[%c0_85, %c1_86, %c0_87, %c0_88] : memref<2x10x10x32xf32, #tpu.memory_space<vmem>>, vector<2x8x1x32xf32>
    tpu.vector_store %arg12[%c0_85, %c1_86, %c0_87, %c0_88], %46 {strides = array<i32>} : memref<2x10x10x32xf32, #tpu.memory_space<vmem>>, vector<2x8x1x32xf32>,
    %c0_89 = arith.constant 0 : index
    %c1_90 = arith.constant 1 : index
    %c9_91 = arith.constant 9 : index
    %c0_92 = arith.constant 0 : index
    %48 = vector.load %arg12[%c0_89, %c1_90, %c9_91, %c0_92] : memref<2x10x10x32xf32, #tpu.memory_space<vmem>>, vector<2x8x1x32xf32>
    tpu.vector_store %arg12[%c0_89, %c1_90, %c9_91, %c0_92], %46 {strides = array<i32>} : memref<2x10x10x32xf32, #tpu.memory_space<vmem>>, vector<2x8x1x32xf32>,
    %49 = vector.shape_cast %42 : vector<128x32xf32> to vector<2x8x8x32xf32>
    %c0_93 = arith.constant 0 : index
    %c1_94 = arith.constant 1 : index
    %c1_95 = arith.constant 1 : index
    %c0_96 = arith.constant 0 : index
    %50 = vector.load %arg12[%c0_93, %c1_94, %c1_95, %c0_96] : memref<2x10x10x32xf32, #tpu.memory_space<vmem>>, vector<2x8x8x32xf32>
    tpu.vector_store %arg12[%c0_93, %c1_94, %c1_95, %c0_96], %49 {strides = array<i32>} : memref<2x10x10x32xf32, #tpu.memory_space<vmem>>, vector<2x8x8x32xf32>,
    %c0_97 = arith.constant 0 : index
    %c0_98 = arith.constant 0 : index
    %c0_99 = arith.constant 0 : index
    %c0_100 = arith.constant 0 : index
    %51 = vector.load %arg12[%c0_97, %c0_98, %c0_99, %c0_100] : memref<2x10x10x32xf32, #tpu.memory_space<vmem>>, vector<2x8x8x32xf32>
    %52 = vector.shape_cast %51 : vector<2x8x8x32xf32> to vector<128x32xf32>
    %c0_101 = arith.constant 0 : index
    %c0_102 = arith.constant 0 : index
    %53 = vector.load %arg14[%c0_101, %c0_102] : memref<128x288xf32, #tpu.memory_space<vmem>>, vector<128x32xf32>
    tpu.vector_store %arg14[%c0_101, %c0_102], %52 {strides = array<i32>} : memref<128x288xf32, #tpu.memory_space<vmem>>, vector<128x32xf32>,
    %c0_103 = arith.constant 0 : index
    %c0_104 = arith.constant 0 : index
    %c1_105 = arith.constant 1 : index
    %c0_106 = arith.constant 0 : index
    %54 = vector.load %arg12[%c0_103, %c0_104, %c1_105, %c0_106] : memref<2x10x10x32xf32, #tpu.memory_space<vmem>>, vector<2x8x8x32xf32>
    %55 = vector.shape_cast %54 : vector<2x8x8x32xf32> to vector<128x32xf32>
    %c0_107 = arith.constant 0 : index
    %c32 = arith.constant 32 : index
    %56 = vector.load %arg14[%c0_107, %c32] : memref<128x288xf32, #tpu.memory_space<vmem>>, vector<128x32xf32>
    tpu.vector_store %arg14[%c0_107, %c32], %55 {strides = array<i32>} : memref<128x288xf32, #tpu.memory_space<vmem>>, vector<128x32xf32>,
    %c0_108 = arith.constant 0 : index
    %c0_109 = arith.constant 0 : index
    %c2_110 = arith.constant 2 : index
    %c0_111 = arith.constant 0 : index
    %57 = vector.load %arg12[%c0_108, %c0_109, %c2_110, %c0_111] : memref<2x10x10x32xf32, #tpu.memory_space<vmem>>, vector<2x8x8x32xf32>
    %58 = vector.shape_cast %57 : vector<2x8x8x32xf32> to vector<128x32xf32>
    %c0_112 = arith.constant 0 : index
    %c64 = arith.constant 64 : index
    %59 = vector.load %arg14[%c0_112, %c64] : memref<128x288xf32, #tpu.memory_space<vmem>>, vector<128x32xf32>
    tpu.vector_store %arg14[%c0_112, %c64], %58 {strides = array<i32>} : memref<128x288xf32, #tpu.memory_space<vmem>>, vector<128x32xf32>,
    %c0_113 = arith.constant 0 : index
    %c1_114 = arith.constant 1 : index
    %c0_115 = arith.constant 0 : index
    %c0_116 = arith.constant 0 : index
    %60 = vector.load %arg12[%c0_113, %c1_114, %c0_115, %c0_116] : memref<2x10x10x32xf32, #tpu.memory_space<vmem>>, vector<2x8x8x32xf32>
    %61 = vector.shape_cast %60 : vector<2x8x8x32xf32> to vector<128x32xf32>
    %c0_117 = arith.constant 0 : index
    %c96_118 = arith.constant 96 : index
    %62 = vector.load %arg14[%c0_117, %c96_118] : memref<128x288xf32, #tpu.memory_space<vmem>>, vector<128x32xf32>
    tpu.vector_store %arg14[%c0_117, %c96_118], %61 {strides = array<i32>} : memref<128x288xf32, #tpu.memory_space<vmem>>, vector<128x32xf32>,
    %c0_119 = arith.constant 0 : index
    %c1_120 = arith.constant 1 : index
    %c1_121 = arith.constant 1 : index
    %c0_122 = arith.constant 0 : index
    %63 = vector.load %arg12[%c0_119, %c1_120, %c1_121, %c0_122] : memref<2x10x10x32xf32, #tpu.memory_space<vmem>>, vector<2x8x8x32xf32>
    %64 = vector.shape_cast %63 : vector<2x8x8x32xf32> to vector<128x32xf32>
    %c0_123 = arith.constant 0 : index
    %c128 = arith.constant 128 : index
    %65 = vector.load %arg14[%c0_123, %c128] : memref<128x288xf32, #tpu.memory_space<vmem>>, vector<128x32xf32>
    tpu.vector_store %arg14[%c0_123, %c128], %64 {strides = array<i32>} : memref<128x288xf32, #tpu.memory_space<vmem>>, vector<128x32xf32>,
    %c0_124 = arith.constant 0 : index
    %c1_125 = arith.constant 1 : index
    %c2_126 = arith.constant 2 : index
    %c0_127 = arith.constant 0 : index
    %66 = vector.load %arg12[%c0_124, %c1_125, %c2_126, %c0_127] : memref<2x10x10x32xf32, #tpu.memory_space<vmem>>, vector<2x8x8x32xf32>
    %67 = vector.shape_cast %66 : vector<2x8x8x32xf32> to vector<128x32xf32>
    %c0_128 = arith.constant 0 : index
    %c160 = arith.constant 160 : index
    %68 = vector.load %arg14[%c0_128, %c160] : memref<128x288xf32, #tpu.memory_space<vmem>>, vector<128x32xf32>
    tpu.vector_store %arg14[%c0_128, %c160], %67 {strides = array<i32>} : memref<128x288xf32, #tpu.memory_space<vmem>>, vector<128x32xf32>,
    %c0_129 = arith.constant 0 : index
    %c2_130 = arith.constant 2 : index
    %c0_131 = arith.constant 0 : index
    %c0_132 = arith.constant 0 : index
    %69 = vector.load %arg12[%c0_129, %c2_130, %c0_131, %c0_132] : memref<2x10x10x32xf32, #tpu.memory_space<vmem>>, vector<2x8x8x32xf32>
    %70 = vector.shape_cast %69 : vector<2x8x8x32xf32> to vector<128x32xf32>
    %c0_133 = arith.constant 0 : index
    %c192 = arith.constant 192 : index
    %71 = vector.load %arg14[%c0_133, %c192] : memref<128x288xf32, #tpu.memory_space<vmem>>, vector<128x32xf32>
    tpu.vector_store %arg14[%c0_133, %c192], %70 {strides = array<i32>} : memref<128x288xf32, #tpu.memory_space<vmem>>, vector<128x32xf32>,
    %c0_134 = arith.constant 0 : index
    %c2_135 = arith.constant 2 : index
    %c1_136 = arith.constant 1 : index
    %c0_137 = arith.constant 0 : index
    %72 = vector.load %arg12[%c0_134, %c2_135, %c1_136, %c0_137] : memref<2x10x10x32xf32, #tpu.memory_space<vmem>>, vector<2x8x8x32xf32>
    %73 = vector.shape_cast %72 : vector<2x8x8x32xf32> to vector<128x32xf32>
    %c0_138 = arith.constant 0 : index
    %c224 = arith.constant 224 : index
    %74 = vector.load %arg14[%c0_138, %c224] : memref<128x288xf32, #tpu.memory_space<vmem>>, vector<128x32xf32>
    tpu.vector_store %arg14[%c0_138, %c224], %73 {strides = array<i32>} : memref<128x288xf32, #tpu.memory_space<vmem>>, vector<128x32xf32>,
    %c0_139 = arith.constant 0 : index
    %c2_140 = arith.constant 2 : index
    %c2_141 = arith.constant 2 : index
    %c0_142 = arith.constant 0 : index
    %75 = vector.load %arg12[%c0_139, %c2_140, %c2_141, %c0_142] : memref<2x10x10x32xf32, #tpu.memory_space<vmem>>, vector<2x8x8x32xf32>
    %76 = vector.shape_cast %75 : vector<2x8x8x32xf32> to vector<128x32xf32>
    %c0_143 = arith.constant 0 : index
    %c256 = arith.constant 256 : index
    %77 = vector.load %arg14[%c0_143, %c256] : memref<128x288xf32, #tpu.memory_space<vmem>>, vector<128x32xf32>
    tpu.vector_store %arg14[%c0_143, %c256], %76 {strides = array<i32>} : memref<128x288xf32, #tpu.memory_space<vmem>>, vector<128x32xf32>,
    %c0_144 = arith.constant 0 : index
    %c0_145 = arith.constant 0 : index
    %78 = vector.load %arg14[%c0_144, %c0_145] : memref<128x288xf32, #tpu.memory_space<vmem>>, vector<128x288xf32>
    %c0_146 = arith.constant 0 : index
    %c0_147 = arith.constant 0 : index
    %79 = vector.load %arg4[%c0_146, %c0_147] : memref<288x64xf32, #tpu.memory_space<vmem>>, vector<288x64xf32>
    %cst_148 = arith.constant dense<0.000000e+00> : vector<128x64xf32>
    %80 = tpu.matmul %78, %79, %cst_148 {dimension_numbers = #tpu.dot_dimension_numbers<[1], [0], [0], [1], [0, 0, 1, 1], [], []>} : vector<128x288xf32>, vector<288x64xf32>, vector<128x64xf32> -> vector<128x64xf32>
    %c0_149 = arith.constant 0 : index
    %c0_150 = arith.constant 0 : index
    %81 = vector.load %arg5[%c0_149, %c0_150] : memref<1x64xf32, #tpu.memory_space<vmem>>, vector<1x64xf32>
    %82 = vector.broadcast %81 : vector<1x64xf32> to vector<128x64xf32>
    %83 = arith.addf %80, %82 : vector<128x64xf32>
    %cst_151 = arith.constant 0.000000e+00 : f32
    %84 = vector.broadcast %cst_151 : f32 to vector<128x64xf32>
    %85 = arith.maximumf %83, %84 : vector<128x64xf32>
    %86 = vector.shape_cast %85 : vector<128x64xf32> to vector<2x64x64xf32>
    %87 = vector.extract_strided_slice %86 {offsets = [0, 0, 0], sizes = [2, 1, 64], strides = [1, 1, 1]} : vector<2x64x64xf32> to vector<2x1x64xf32>
    %88 = vector.shape_cast %87 : vector<2x1x64xf32> to vector<2x64xf32>
    %89 = vector.extract_strided_slice %86 {offsets = [0, 1, 0], sizes = [2, 1, 64], strides = [1, 1, 1]} : vector<2x64x64xf32> to vector<2x1x64xf32>
    %90 = vector.shape_cast %89 : vector<2x1x64xf32> to vector<2x64xf32>
    %91 = vector.extract_strided_slice %86 {offsets = [0, 2, 0], sizes = [2, 1, 64], strides = [1, 1, 1]} : vector<2x64x64xf32> to vector<2x1x64xf32>
    %92 = vector.shape_cast %91 : vector<2x1x64xf32> to vector<2x64xf32>
    %93 = vector.extract_strided_slice %86 {offsets = [0, 3, 0], sizes = [2, 1, 64], strides = [1, 1, 1]} : vector<2x64x64xf32> to vector<2x1x64xf32>
    %94 = vector.shape_cast %93 : vector<2x1x64xf32> to vector<2x64xf32>
    %95 = vector.extract_strided_slice %86 {offsets = [0, 4, 0], sizes = [2, 1, 64], strides = [1, 1, 1]} : vector<2x64x64xf32> to vector<2x1x64xf32>
    %96 = vector.shape_cast %95 : vector<2x1x64xf32> to vector<2x64xf32>
    %97 = vector.extract_strided_slice %86 {offsets = [0, 5, 0], sizes = [2, 1, 64], strides = [1, 1, 1]} : vector<2x64x64xf32> to vector<2x1x64xf32>
    %98 = vector.shape_cast %97 : vector<2x1x64xf32> to vector<2x64xf32>
    %99 = vector.extract_strided_slice %86 {offsets = [0, 6, 0], sizes = [2, 1, 64], strides = [1, 1, 1]} : vector<2x64x64xf32> to vector<2x1x64xf32>
    %100 = vector.shape_cast %99 : vector<2x1x64xf32> to vector<2x64xf32>
    %101 = vector.extract_strided_slice %86 {offsets = [0, 7, 0], sizes = [2, 1, 64], strides = [1, 1, 1]} : vector<2x64x64xf32> to vector<2x1x64xf32>
    %102 = vector.shape_cast %101 : vector<2x1x64xf32> to vector<2x64xf32>
    %103 = tpu.concatenate %88, %90, %92, %94, %96, %98, %100, %102 in 1 : vector<2x64xf32>, vector<2x64xf32>, vector<2x64xf32>, vector<2x64xf32>, vector<2x64xf32>, vector<2x64xf32>, vector<2x64xf32>, vector<2x64xf32> -> vector<2x512xf32>
    %c0_152 = arith.constant 0 : index
    %c0_153 = arith.constant 0 : index
    %104 = vector.load %arg15[%c0_152, %c0_153] : memref<2x4096xf32, #tpu.memory_space<vmem>>, vector<2x512xf32>
    tpu.vector_store %arg15[%c0_152, %c0_153], %103 {strides = array<i32>} : memref<2x4096xf32, #tpu.memory_space<vmem>>, vector<2x512xf32>,
    %105 = vector.extract_strided_slice %86 {offsets = [0, 8, 0], sizes = [2, 1, 64], strides = [1, 1, 1]} : vector<2x64x64xf32> to vector<2x1x64xf32>
    %106 = vector.shape_cast %105 : vector<2x1x64xf32> to vector<2x64xf32>
    %107 = vector.extract_strided_slice %86 {offsets = [0, 9, 0], sizes = [2, 1, 64], strides = [1, 1, 1]} : vector<2x64x64xf32> to vector<2x1x64xf32>
    %108 = vector.shape_cast %107 : vector<2x1x64xf32> to vector<2x64xf32>
    %109 = vector.extract_strided_slice %86 {offsets = [0, 10, 0], sizes = [2, 1, 64], strides = [1, 1, 1]} : vector<2x64x64xf32> to vector<2x1x64xf32>
    %110 = vector.shape_cast %109 : vector<2x1x64xf32> to vector<2x64xf32>
    %111 = vector.extract_strided_slice %86 {offsets = [0, 11, 0], sizes = [2, 1, 64], strides = [1, 1, 1]} : vector<2x64x64xf32> to vector<2x1x64xf32>
    %112 = vector.shape_cast %111 : vector<2x1x64xf32> to vector<2x64xf32>
    %113 = vector.extract_strided_slice %86 {offsets = [0, 12, 0], sizes = [2, 1, 64], strides = [1, 1, 1]} : vector<2x64x64xf32> to vector<2x1x64xf32>
    %114 = vector.shape_cast %113 : vector<2x1x64xf32> to vector<2x64xf32>
    %115 = vector.extract_strided_slice %86 {offsets = [0, 13, 0], sizes = [2, 1, 64], strides = [1, 1, 1]} : vector<2x64x64xf32> to vector<2x1x64xf32>
    %116 = vector.shape_cast %115 : vector<2x1x64xf32> to vector<2x64xf32>
    %117 = vector.extract_strided_slice %86 {offsets = [0, 14, 0], sizes = [2, 1, 64], strides = [1, 1, 1]} : vector<2x64x64xf32> to vector<2x1x64xf32>
    %118 = vector.shape_cast %117 : vector<2x1x64xf32> to vector<2x64xf32>
    %119 = vector.extract_strided_slice %86 {offsets = [0, 15, 0], sizes = [2, 1, 64], strides = [1, 1, 1]} : vector<2x64x64xf32> to vector<2x1x64xf32>
    %120 = vector.shape_cast %119 : vector<2x1x64xf32> to vector<2x64xf32>
    %121 = tpu.concatenate %106, %108, %110, %112, %114, %116, %118, %120 in 1 : vector<2x64xf32>, vector<2x64xf32>, vector<2x64xf32>, vector<2x64xf32>, vector<2x64xf32>, vector<2x64xf32>, vector<2x64xf32>, vector<2x64xf32> -> vector<2x512xf32>
    %c0_154 = arith.constant 0 : index
    %c512 = arith.constant 512 : index
    %122 = vector.load %arg15[%c0_154, %c512] : memref<2x4096xf32, #tpu.memory_space<vmem>>, vector<2x512xf32>
    tpu.vector_store %arg15[%c0_154, %c512], %121 {strides = array<i32>} : memref<2x4096xf32, #tpu.memory_space<vmem>>, vector<2x512xf32>,
    %123 = vector.extract_strided_slice %86 {offsets = [0, 16, 0], sizes = [2, 1, 64], strides = [1, 1, 1]} : vector<2x64x64xf32> to vector<2x1x64xf32>
    %124 = vector.shape_cast %123 : vector<2x1x64xf32> to vector<2x64xf32>
    %125 = vector.extract_strided_slice %86 {offsets = [0, 17, 0], sizes = [2, 1, 64], strides = [1, 1, 1]} : vector<2x64x64xf32> to vector<2x1x64xf32>
    %126 = vector.shape_cast %125 : vector<2x1x64xf32> to vector<2x64xf32>
    %127 = vector.extract_strided_slice %86 {offsets = [0, 18, 0], sizes = [2, 1, 64], strides = [1, 1, 1]} : vector<2x64x64xf32> to vector<2x1x64xf32>
    %128 = vector.shape_cast %127 : vector<2x1x64xf32> to vector<2x64xf32>
    %129 = vector.extract_strided_slice %86 {offsets = [0, 19, 0], sizes = [2, 1, 64], strides = [1, 1, 1]} : vector<2x64x64xf32> to vector<2x1x64xf32>
    %130 = vector.shape_cast %129 : vector<2x1x64xf32> to vector<2x64xf32>
    %131 = vector.extract_strided_slice %86 {offsets = [0, 20, 0], sizes = [2, 1, 64], strides = [1, 1, 1]} : vector<2x64x64xf32> to vector<2x1x64xf32>
    %132 = vector.shape_cast %131 : vector<2x1x64xf32> to vector<2x64xf32>
    %133 = vector.extract_strided_slice %86 {offsets = [0, 21, 0], sizes = [2, 1, 64], strides = [1, 1, 1]} : vector<2x64x64xf32> to vector<2x1x64xf32>
    %134 = vector.shape_cast %133 : vector<2x1x64xf32> to vector<2x64xf32>
    %135 = vector.extract_strided_slice %86 {offsets = [0, 22, 0], sizes = [2, 1, 64], strides = [1, 1, 1]} : vector<2x64x64xf32> to vector<2x1x64xf32>
    %136 = vector.shape_cast %135 : vector<2x1x64xf32> to vector<2x64xf32>
    %137 = vector.extract_strided_slice %86 {offsets = [0, 23, 0], sizes = [2, 1, 64], strides = [1, 1, 1]} : vector<2x64x64xf32> to vector<2x1x64xf32>
    %138 = vector.shape_cast %137 : vector<2x1x64xf32> to vector<2x64xf32>
    %139 = tpu.concatenate %124, %126, %128, %130, %132, %134, %136, %138 in 1 : vector<2x64xf32>, vector<2x64xf32>, vector<2x64xf32>, vector<2x64xf32>, vector<2x64xf32>, vector<2x64xf32>, vector<2x64xf32>, vector<2x64xf32> -> vector<2x512xf32>
    %c0_155 = arith.constant 0 : index
    %c1024 = arith.constant 1024 : index
    %140 = vector.load %arg15[%c0_155, %c1024] : memref<2x4096xf32, #tpu.memory_space<vmem>>, vector<2x512xf32>
    tpu.vector_store %arg15[%c0_155, %c1024], %139 {strides = array<i32>} : memref<2x4096xf32, #tpu.memory_space<vmem>>, vector<2x512xf32>,
    %141 = vector.extract_strided_slice %86 {offsets = [0, 24, 0], sizes = [2, 1, 64], strides = [1, 1, 1]} : vector<2x64x64xf32> to vector<2x1x64xf32>
    %142 = vector.shape_cast %141 : vector<2x1x64xf32> to vector<2x64xf32>
    %143 = vector.extract_strided_slice %86 {offsets = [0, 25, 0], sizes = [2, 1, 64], strides = [1, 1, 1]} : vector<2x64x64xf32> to vector<2x1x64xf32>
    %144 = vector.shape_cast %143 : vector<2x1x64xf32> to vector<2x64xf32>
    %145 = vector.extract_strided_slice %86 {offsets = [0, 26, 0], sizes = [2, 1, 64], strides = [1, 1, 1]} : vector<2x64x64xf32> to vector<2x1x64xf32>
    %146 = vector.shape_cast %145 : vector<2x1x64xf32> to vector<2x64xf32>
    %147 = vector.extract_strided_slice %86 {offsets = [0, 27, 0], sizes = [2, 1, 64], strides = [1, 1, 1]} : vector<2x64x64xf32> to vector<2x1x64xf32>
    %148 = vector.shape_cast %147 : vector<2x1x64xf32> to vector<2x64xf32>
    %149 = vector.extract_strided_slice %86 {offsets = [0, 28, 0], sizes = [2, 1, 64], strides = [1, 1, 1]} : vector<2x64x64xf32> to vector<2x1x64xf32>
    %150 = vector.shape_cast %149 : vector<2x1x64xf32> to vector<2x64xf32>
    %151 = vector.extract_strided_slice %86 {offsets = [0, 29, 0], sizes = [2, 1, 64], strides = [1, 1, 1]} : vector<2x64x64xf32> to vector<2x1x64xf32>
    %152 = vector.shape_cast %151 : vector<2x1x64xf32> to vector<2x64xf32>
    %153 = vector.extract_strided_slice %86 {offsets = [0, 30, 0], sizes = [2, 1, 64], strides = [1, 1, 1]} : vector<2x64x64xf32> to vector<2x1x64xf32>
    %154 = vector.shape_cast %153 : vector<2x1x64xf32> to vector<2x64xf32>
    %155 = vector.extract_strided_slice %86 {offsets = [0, 31, 0], sizes = [2, 1, 64], strides = [1, 1, 1]} : vector<2x64x64xf32> to vector<2x1x64xf32>
    %156 = vector.shape_cast %155 : vector<2x1x64xf32> to vector<2x64xf32>
    %157 = tpu.concatenate %142, %144, %146, %148, %150, %152, %154, %156 in 1 : vector<2x64xf32>, vector<2x64xf32>, vector<2x64xf32>, vector<2x64xf32>, vector<2x64xf32>, vector<2x64xf32>, vector<2x64xf32>, vector<2x64xf32> -> vector<2x512xf32>
    %c0_156 = arith.constant 0 : index
    %c1536 = arith.constant 1536 : index
    %158 = vector.load %arg15[%c0_156, %c1536] : memref<2x4096xf32, #tpu.memory_space<vmem>>, vector<2x512xf32>
    tpu.vector_store %arg15[%c0_156, %c1536], %157 {strides = array<i32>} : memref<2x4096xf32, #tpu.memory_space<vmem>>, vector<2x512xf32>,
    %159 = vector.extract_strided_slice %86 {offsets = [0, 32, 0], sizes = [2, 1, 64], strides = [1, 1, 1]} : vector<2x64x64xf32> to vector<2x1x64xf32>
    %160 = vector.shape_cast %159 : vector<2x1x64xf32> to vector<2x64xf32>
    %161 = vector.extract_strided_slice %86 {offsets = [0, 33, 0], sizes = [2, 1, 64], strides = [1, 1, 1]} : vector<2x64x64xf32> to vector<2x1x64xf32>
    %162 = vector.shape_cast %161 : vector<2x1x64xf32> to vector<2x64xf32>
    %163 = vector.extract_strided_slice %86 {offsets = [0, 34, 0], sizes = [2, 1, 64], strides = [1, 1, 1]} : vector<2x64x64xf32> to vector<2x1x64xf32>
    %164 = vector.shape_cast %163 : vector<2x1x64xf32> to vector<2x64xf32>
    %165 = vector.extract_strided_slice %86 {offsets = [0, 35, 0], sizes = [2, 1, 64], strides = [1, 1, 1]} : vector<2x64x64xf32> to vector<2x1x64xf32>
    %166 = vector.shape_cast %165 : vector<2x1x64xf32> to vector<2x64xf32>
    %167 = vector.extract_strided_slice %86 {offsets = [0, 36, 0], sizes = [2, 1, 64], strides = [1, 1, 1]} : vector<2x64x64xf32> to vector<2x1x64xf32>
    %168 = vector.shape_cast %167 : vector<2x1x64xf32> to vector<2x64xf32>
    %169 = vector.extract_strided_slice %86 {offsets = [0, 37, 0], sizes = [2, 1, 64], strides = [1, 1, 1]} : vector<2x64x64xf32> to vector<2x1x64xf32>
    %170 = vector.shape_cast %169 : vector<2x1x64xf32> to vector<2x64xf32>
    %171 = vector.extract_strided_slice %86 {offsets = [0, 38, 0], sizes = [2, 1, 64], strides = [1, 1, 1]} : vector<2x64x64xf32> to vector<2x1x64xf32>
    %172 = vector.shape_cast %171 : vector<2x1x64xf32> to vector<2x64xf32>
    %173 = vector.extract_strided_slice %86 {offsets = [0, 39, 0], sizes = [2, 1, 64], strides = [1, 1, 1]} : vector<2x64x64xf32> to vector<2x1x64xf32>
    %174 = vector.shape_cast %173 : vector<2x1x64xf32> to vector<2x64xf32>
    %175 = tpu.concatenate %160, %162, %164, %166, %168, %170, %172, %174 in 1 : vector<2x64xf32>, vector<2x64xf32>, vector<2x64xf32>, vector<2x64xf32>, vector<2x64xf32>, vector<2x64xf32>, vector<2x64xf32>, vector<2x64xf32> -> vector<2x512xf32>
    %c0_157 = arith.constant 0 : index
    %c2048 = arith.constant 2048 : index
    %176 = vector.load %arg15[%c0_157, %c2048] : memref<2x4096xf32, #tpu.memory_space<vmem>>, vector<2x512xf32>
    tpu.vector_store %arg15[%c0_157, %c2048], %175 {strides = array<i32>} : memref<2x4096xf32, #tpu.memory_space<vmem>>, vector<2x512xf32>,
    %177 = vector.extract_strided_slice %86 {offsets = [0, 40, 0], sizes = [2, 1, 64], strides = [1, 1, 1]} : vector<2x64x64xf32> to vector<2x1x64xf32>
    %178 = vector.shape_cast %177 : vector<2x1x64xf32> to vector<2x64xf32>
    %179 = vector.extract_strided_slice %86 {offsets = [0, 41, 0], sizes = [2, 1, 64], strides = [1, 1, 1]} : vector<2x64x64xf32> to vector<2x1x64xf32>
    %180 = vector.shape_cast %179 : vector<2x1x64xf32> to vector<2x64xf32>
    %181 = vector.extract_strided_slice %86 {offsets = [0, 42, 0], sizes = [2, 1, 64], strides = [1, 1, 1]} : vector<2x64x64xf32> to vector<2x1x64xf32>
    %182 = vector.shape_cast %181 : vector<2x1x64xf32> to vector<2x64xf32>
    %183 = vector.extract_strided_slice %86 {offsets = [0, 43, 0], sizes = [2, 1, 64], strides = [1, 1, 1]} : vector<2x64x64xf32> to vector<2x1x64xf32>
    %184 = vector.shape_cast %183 : vector<2x1x64xf32> to vector<2x64xf32>
    %185 = vector.extract_strided_slice %86 {offsets = [0, 44, 0], sizes = [2, 1, 64], strides = [1, 1, 1]} : vector<2x64x64xf32> to vector<2x1x64xf32>
    %186 = vector.shape_cast %185 : vector<2x1x64xf32> to vector<2x64xf32>
    %187 = vector.extract_strided_slice %86 {offsets = [0, 45, 0], sizes = [2, 1, 64], strides = [1, 1, 1]} : vector<2x64x64xf32> to vector<2x1x64xf32>
    %188 = vector.shape_cast %187 : vector<2x1x64xf32> to vector<2x64xf32>
    %189 = vector.extract_strided_slice %86 {offsets = [0, 46, 0], sizes = [2, 1, 64], strides = [1, 1, 1]} : vector<2x64x64xf32> to vector<2x1x64xf32>
    %190 = vector.shape_cast %189 : vector<2x1x64xf32> to vector<2x64xf32>
    %191 = vector.extract_strided_slice %86 {offsets = [0, 47, 0], sizes = [2, 1, 64], strides = [1, 1, 1]} : vector<2x64x64xf32> to vector<2x1x64xf32>
    %192 = vector.shape_cast %191 : vector<2x1x64xf32> to vector<2x64xf32>
    %193 = tpu.concatenate %178, %180, %182, %184, %186, %188, %190, %192 in 1 : vector<2x64xf32>, vector<2x64xf32>, vector<2x64xf32>, vector<2x64xf32>, vector<2x64xf32>, vector<2x64xf32>, vector<2x64xf32>, vector<2x64xf32> -> vector<2x512xf32>
    %c0_158 = arith.constant 0 : index
    %c2560 = arith.constant 2560 : index
    %194 = vector.load %arg15[%c0_158, %c2560] : memref<2x4096xf32, #tpu.memory_space<vmem>>, vector<2x512xf32>
    tpu.vector_store %arg15[%c0_158, %c2560], %193 {strides = array<i32>} : memref<2x4096xf32, #tpu.memory_space<vmem>>, vector<2x512xf32>,
    %195 = vector.extract_strided_slice %86 {offsets = [0, 48, 0], sizes = [2, 1, 64], strides = [1, 1, 1]} : vector<2x64x64xf32> to vector<2x1x64xf32>
    %196 = vector.shape_cast %195 : vector<2x1x64xf32> to vector<2x64xf32>
    %197 = vector.extract_strided_slice %86 {offsets = [0, 49, 0], sizes = [2, 1, 64], strides = [1, 1, 1]} : vector<2x64x64xf32> to vector<2x1x64xf32>
    %198 = vector.shape_cast %197 : vector<2x1x64xf32> to vector<2x64xf32>
    %199 = vector.extract_strided_slice %86 {offsets = [0, 50, 0], sizes = [2, 1, 64], strides = [1, 1, 1]} : vector<2x64x64xf32> to vector<2x1x64xf32>
    %200 = vector.shape_cast %199 : vector<2x1x64xf32> to vector<2x64xf32>
    %201 = vector.extract_strided_slice %86 {offsets = [0, 51, 0], sizes = [2, 1, 64], strides = [1, 1, 1]} : vector<2x64x64xf32> to vector<2x1x64xf32>
    %202 = vector.shape_cast %201 : vector<2x1x64xf32> to vector<2x64xf32>
    %203 = vector.extract_strided_slice %86 {offsets = [0, 52, 0], sizes = [2, 1, 64], strides = [1, 1, 1]} : vector<2x64x64xf32> to vector<2x1x64xf32>
    %204 = vector.shape_cast %203 : vector<2x1x64xf32> to vector<2x64xf32>
    %205 = vector.extract_strided_slice %86 {offsets = [0, 53, 0], sizes = [2, 1, 64], strides = [1, 1, 1]} : vector<2x64x64xf32> to vector<2x1x64xf32>
    %206 = vector.shape_cast %205 : vector<2x1x64xf32> to vector<2x64xf32>
    %207 = vector.extract_strided_slice %86 {offsets = [0, 54, 0], sizes = [2, 1, 64], strides = [1, 1, 1]} : vector<2x64x64xf32> to vector<2x1x64xf32>
    %208 = vector.shape_cast %207 : vector<2x1x64xf32> to vector<2x64xf32>
    %209 = vector.extract_strided_slice %86 {offsets = [0, 55, 0], sizes = [2, 1, 64], strides = [1, 1, 1]} : vector<2x64x64xf32> to vector<2x1x64xf32>
    %210 = vector.shape_cast %209 : vector<2x1x64xf32> to vector<2x64xf32>
    %211 = tpu.concatenate %196, %198, %200, %202, %204, %206, %208, %210 in 1 : vector<2x64xf32>, vector<2x64xf32>, vector<2x64xf32>, vector<2x64xf32>, vector<2x64xf32>, vector<2x64xf32>, vector<2x64xf32>, vector<2x64xf32> -> vector<2x512xf32>
    %c0_159 = arith.constant 0 : index
    %c3072 = arith.constant 3072 : index
    %212 = vector.load %arg15[%c0_159, %c3072] : memref<2x4096xf32, #tpu.memory_space<vmem>>, vector<2x512xf32>
    tpu.vector_store %arg15[%c0_159, %c3072], %211 {strides = array<i32>} : memref<2x4096xf32, #tpu.memory_space<vmem>>, vector<2x512xf32>,
    %213 = vector.extract_strided_slice %86 {offsets = [0, 56, 0], sizes = [2, 1, 64], strides = [1, 1, 1]} : vector<2x64x64xf32> to vector<2x1x64xf32>
    %214 = vector.shape_cast %213 : vector<2x1x64xf32> to vector<2x64xf32>
    %215 = vector.extract_strided_slice %86 {offsets = [0, 57, 0], sizes = [2, 1, 64], strides = [1, 1, 1]} : vector<2x64x64xf32> to vector<2x1x64xf32>
    %216 = vector.shape_cast %215 : vector<2x1x64xf32> to vector<2x64xf32>
    %217 = vector.extract_strided_slice %86 {offsets = [0, 58, 0], sizes = [2, 1, 64], strides = [1, 1, 1]} : vector<2x64x64xf32> to vector<2x1x64xf32>
    %218 = vector.shape_cast %217 : vector<2x1x64xf32> to vector<2x64xf32>
    %219 = vector.extract_strided_slice %86 {offsets = [0, 59, 0], sizes = [2, 1, 64], strides = [1, 1, 1]} : vector<2x64x64xf32> to vector<2x1x64xf32>
    %220 = vector.shape_cast %219 : vector<2x1x64xf32> to vector<2x64xf32>
    %221 = vector.extract_strided_slice %86 {offsets = [0, 60, 0], sizes = [2, 1, 64], strides = [1, 1, 1]} : vector<2x64x64xf32> to vector<2x1x64xf32>
    %222 = vector.shape_cast %221 : vector<2x1x64xf32> to vector<2x64xf32>
    %223 = vector.extract_strided_slice %86 {offsets = [0, 61, 0], sizes = [2, 1, 64], strides = [1, 1, 1]} : vector<2x64x64xf32> to vector<2x1x64xf32>
    %224 = vector.shape_cast %223 : vector<2x1x64xf32> to vector<2x64xf32>
    %225 = vector.extract_strided_slice %86 {offsets = [0, 62, 0], sizes = [2, 1, 64], strides = [1, 1, 1]} : vector<2x64x64xf32> to vector<2x1x64xf32>
    %226 = vector.shape_cast %225 : vector<2x1x64xf32> to vector<2x64xf32>
    %227 = vector.extract_strided_slice %86 {offsets = [0, 63, 0], sizes = [2, 1, 64], strides = [1, 1, 1]} : vector<2x64x64xf32> to vector<2x1x64xf32>
    %228 = vector.shape_cast %227 : vector<2x1x64xf32> to vector<2x64xf32>
    %229 = tpu.concatenate %214, %216, %218, %220, %222, %224, %226, %228 in 1 : vector<2x64xf32>, vector<2x64xf32>, vector<2x64xf32>, vector<2x64xf32>, vector<2x64xf32>, vector<2x64xf32>, vector<2x64xf32>, vector<2x64xf32> -> vector<2x512xf32>
    %c0_160 = arith.constant 0 : index
    %c3584 = arith.constant 3584 : index
    %230 = vector.load %arg15[%c0_160, %c3584] : memref<2x4096xf32, #tpu.memory_space<vmem>>, vector<2x512xf32>
    tpu.vector_store %arg15[%c0_160, %c3584], %229 {strides = array<i32>} : memref<2x4096xf32, #tpu.memory_space<vmem>>, vector<2x512xf32>,
    %c0_161 = arith.constant 0 : index
    %c0_162 = arith.constant 0 : index
    %231 = vector.load %arg15[%c0_161, %c0_162] : memref<2x4096xf32, #tpu.memory_space<vmem>>, vector<2x4096xf32>
    %c0_163 = arith.constant 0 : index
    %c0_164 = arith.constant 0 : index
    %232 = vector.load %arg6[%c0_163, %c0_164] : memref<4096x256xf32, #tpu.memory_space<vmem>>, vector<4096x256xf32>
    %cst_165 = arith.constant dense<0.000000e+00> : vector<2x256xf32>
    %233 = tpu.matmul %231, %232, %cst_165 {dimension_numbers = #tpu.dot_dimension_numbers<[1], [0], [0], [1], [0, 0, 1, 1], [], []>} : vector<2x4096xf32>, vector<4096x256xf32>, vector<2x256xf32> -> vector<2x256xf32>
    %c0_166 = arith.constant 0 : index
    %c0_167 = arith.constant 0 : index
    %234 = vector.load %arg7[%c0_166, %c0_167] : memref<1x256xf32, #tpu.memory_space<vmem>>, vector<1x256xf32>
    %235 = vector.broadcast %234 : vector<1x256xf32> to vector<2x256xf32>
    %236 = arith.addf %233, %235 : vector<2x256xf32>
    %cst_168 = arith.constant 0.000000e+00 : f32
    %237 = vector.broadcast %cst_168 : f32 to vector<2x256xf32>
    %238 = arith.maximumf %236, %237 : vector<2x256xf32>
    %c0_169 = arith.constant 0 : index
    %c0_170 = arith.constant 0 : index
    %239 = vector.load %arg8[%c0_169, %c0_170] : memref<1x256xf32, #tpu.memory_space<vmem>>, vector<1x256xf32>
    %240 = vector.broadcast %239 : vector<1x256xf32> to vector<2x256xf32>
    %241 = arith.mulf %238, %240 : vector<2x256xf32>
    %cst_171 = arith.constant dense<0.000000e+00> : vector<2xf32>
    %242 = vector.multi_reduction <add>, %241, %cst_171 [1] : vector<2x256xf32> to vector<2xf32>
    %243 = vector.shape_cast %242 : vector<2xf32> to vector<2x1xf32>
    %c0_172 = arith.constant 0 : index
    %c0_173 = arith.constant 0 : index
    %244 = vector.load %arg9[%c0_172, %c0_173] : memref<1x1xf32, #tpu.memory_space<vmem>>, vector<1x1xf32>
    %245 = vector.broadcast %244 : vector<1x1xf32> to vector<2x1xf32>
    %246 = arith.addf %243, %245 : vector<2x1xf32>
    %247 = math.tanh %246 : vector<2x1xf32>
    %c0_174 = arith.constant 0 : index
    %c0_175 = arith.constant 0 : index
    %248 = vector.load %arg10[%c0_174, %c0_175] : memref<2x1xf32, #tpu.memory_space<vmem>>, vector<2x1xf32>
    tpu.vector_store %arg10[%c0_174, %c0_175], %247 {strides = array<i32>} : memref<2x1xf32, #tpu.memory_space<vmem>>, vector<2x1xf32>,
    return
  }
  func.func @transform_0(%arg0: i32) -> (i32, i32, i32, i32) {
    %c0_i32 = arith.constant 0 : i32
    %c0_i32_0 = arith.constant 0 : i32
    %c0_i32_1 = arith.constant 0 : i32
    %c0_i32_2 = arith.constant 0 : i32
    return %arg0, %c0_i32, %c0_i32_0, %c0_i32_1 : i32, i32, i32, i32
  }
  func.func @transform_1(%arg0: i32) -> (i32, i32) {
    %c0_i32 = arith.constant 0 : i32
    %c0_i32_0 = arith.constant 0 : i32
    %c0_i32_1 = arith.constant 0 : i32
    return %c0_i32, %c0_i32_0 : i32, i32
  }
  func.func @transform_2(%arg0: i32) -> (i32, i32) {
    %c0_i32 = arith.constant 0 : i32
    %c0_i32_0 = arith.constant 0 : i32
    %c0_i32_1 = arith.constant 0 : i32
    return %c0_i32, %c0_i32_0 : i32, i32
  }
  func.func @transform_3(%arg0: i32) -> (i32, i32) {
    %c0_i32 = arith.constant 0 : i32
    %c0_i32_0 = arith.constant 0 : i32
    %c0_i32_1 = arith.constant 0 : i32
    return %c0_i32, %c0_i32_0 : i32, i32
  }
  func.func @transform_4(%arg0: i32) -> (i32, i32) {
    %c0_i32 = arith.constant 0 : i32
    %c0_i32_0 = arith.constant 0 : i32
    %c0_i32_1 = arith.constant 0 : i32
    return %c0_i32, %c0_i32_0 : i32, i32
  }
  func.func @transform_5(%arg0: i32) -> (i32, i32) {
    %c0_i32 = arith.constant 0 : i32
    %c0_i32_0 = arith.constant 0 : i32
    %c0_i32_1 = arith.constant 0 : i32
    return %c0_i32, %c0_i32_0 : i32, i32
  }
  func.func @transform_6(%arg0: i32) -> (i32, i32) {
    %c0_i32 = arith.constant 0 : i32
    %c0_i32_0 = arith.constant 0 : i32
    %c0_i32_1 = arith.constant 0 : i32
    return %c0_i32, %c0_i32_0 : i32, i32
  }
  func.func @transform_7(%arg0: i32) -> (i32, i32) {
    %c0_i32 = arith.constant 0 : i32
    %c0_i32_0 = arith.constant 0 : i32
    %c0_i32_1 = arith.constant 0 : i32
    return %c0_i32, %c0_i32_0 : i32, i32
  }
  func.func @transform_8(%arg0: i32) -> (i32, i32) {
    %c0_i32 = arith.constant 0 : i32
    %c0_i32_0 = arith.constant 0 : i32
    %c0_i32_1 = arith.constant 0 : i32
    return %c0_i32, %c0_i32_0 : i32, i32
  }
  func.func @transform_9(%arg0: i32) -> (i32, i32) {
    %c0_i32 = arith.constant 0 : i32
    %c0_i32_0 = arith.constant 0 : i32
    return %arg0, %c0_i32 : i32, i32
  }
}

</mosaic_0001>

<bundles_post_ra>
// kernel: chess_qnet_forward.1
= control target key start
LH: loop header
LB: loop body
LE: loop exit
PB: predicated region body
PF: predicated region fallthrough
CT: control target
= control target key end

     0   :  { %s7350_s0 = inlined_call_operand.hbm [shape: f32[2,8,8,12], index: 0, kind: input, shape index: {}]   ;;  %s7351_s1 = inlined_call_operand.vmem [shape: f32[108,32], index: 1, kind: input, shape index: {}]   ;;  %s7352_s2 = inlined_call_operand.hbm [shape: f32[1,32], index: 2, kind: input, shape index: {}]   ;;  %s7353_s3 = inlined_call_operand.vmem [shape: f32[288,64], index: 3, kind: input, shape index: {}]   ;;  %s7354_s4 = inlined_call_operand.hbm [shape: f32[1,64], index: 4, kind: input, shape index: {}]   ;;  %s7355_s5 = inlined_call_operand.hbm [shape: f32[4096,256], index: 5, kind: input, shape index: {}]   ;;  %s7356_s6 = inlined_call_operand.hbm [shape: f32[1,256], index: 6, kind: input, shape index: {}]   ;;  %s7357_s7 = inlined_call_operand.hbm [shape: f32[1,256], index: 7, kind: input, shape index: {}]   ;;  %s7358_s8 = inlined_call_operand.<no memory space> [shape: f32[1,1], index: 8, kind: input, shape index: {}]   ;;  %s7359_s9 = inlined_call_operand.vmem [shape: f32[2,1], index: 9, kind: output, shape index: {}]  }
   0x1   :  { %v14_v0 = vstv %s7358_s8 }
   0x2   :  { %15 = vst [vmem:[#allocation7] sm:$0x1] %v14_v0 }
   0x3   :  { %16 = vsyncpa [#allocation9], 0 }
   0x4   :  { %17 = vsyncpa [#allocation11], 0 }
   0x5   :  { %18 = vsyncpa [#allocation14], 0 }
   0x6   :  { %19 = vsyncpa [#allocation17], 0  ;;  %s5772_s11 = smov [#allocation10]   ;;  %s5773_s13 = smov [#allocation13]  }
   0x7   :  { %s40_s12 = sshll.u32 %s5772_s11, 4  ;;  %s61_s14 = sshll.u32 %s5773_s13, 4  ;;  %s41_s12 = int_to_ptr.vmem [resolvable:$true] %s40_s12  ;;  %s62_s14 = int_to_ptr.vmem [resolvable:$true] %s61_s14 }
   0x8   :  { %s5652_s15 = scalar_lea.vmem %s41_s12, 16  ;;  %s5656_s16 = scalar_lea.vmem %s41_s12, 32 }
   0x9   :  { %p5653_p0 = scmp.ne.s32.totalorder %s41_s12, %s5652_s15  ;;  %p5657_p1 = scmp.lt.s32.totalorder %s41_s12, %s41_s12 }
   0xa   :  { %p5658_p2 = scmp.lt.s32.totalorder %s5656_s16, %s5652_s15 }
   0xc   :  { %p5659_p3 = por %p5658_p2, %p5657_p1 }
   0xe   :  { %p5660_p4 = pnand %p5659_p3, %p5653_p0 }
  0x10   :  { %5663 = shalt.err (!%p5660_p4)
}
  0x11   :  { %43 = dma.hbm_to_vmem [thread:$0]  %s7352_s2, 16, %s41_s12, [#allocation11]  }
  0x12   :  { %s5672_s18 = scalar_lea.vmem %s62_s14, 131072  ;;  %p5677_p6 = scmp.lt.s32.totalorder %s62_s14, %s62_s14 }
  0x13   :  { %p5673_p5 = scmp.ne.s32.totalorder %s62_s14, %s5672_s18  ;;  %p5678_p7 = scmp.lt.s32.totalorder %s5672_s18, %s5672_s18 }
  0x15   :  { %p5679_p8 = por %p5678_p7, %p5677_p6 }
  0x17   :  { %p5680_p9 = pnand %p5679_p8, %p5673_p5 }
  0x19   :  { %5683 = shalt.err (!%p5680_p9)
}
  0x1a   :  { %s5774_s19 = smov 256   ;;  %s5775_s20 = smov 16  }
  0x1b   :  { %67 = dma.hbm_to_vmem [thread:$0]  %s7355_s5, 131072, %s62_s14, [#allocation14], %s5774_s19, %s5774_s19, %s5775_s20  }
  0x1c   :  { %s5776_s23 = smov [#allocation8]  }
  0x1d   :  { %s25_s24 = sshll.u32 %s5776_s23, 4  ;;  %s26_s24 = int_to_ptr.vmem [resolvable:$true] %s25_s24 }
  0x1e   :  { %s5692_s25 = scalar_lea.vmem %s26_s24, 2048  ;;  %p5697_p11 = scmp.lt.s32.totalorder %s26_s24, %s26_s24 }
  0x1f   :  { %p5693_p10 = scmp.ne.s32.totalorder %s26_s24, %s5692_s25  ;;  %p5698_p12 = scmp.lt.s32.totalorder %s5692_s25, %s5692_s25 }
  0x21   :  { %p5699_p13 = por %p5698_p12, %p5697_p11 }
  0x23   :  { %p5700_p0 = pnand %p5699_p13, %p5693_p10 }
  0x25   :  { %5703 = shalt.err (!%p5700_p0)
}
  0x26   :  { %s5777_s2 = smov 128   ;;  %s5778_s26 = smov 8  }
  0x27   :  { %31 = dma.hbm_to_vmem [thread:$0]  %s7350_s0, 2048, %s26_s24, [#allocation9], %s5777_s2, %s5777_s2, %s5778_s26  }
  0x28   :  { %s5779_s29 = smov [#allocation12]   ;;  %s5780_s5 = smov [#allocation15]  }
  0x29   :  { %s52_s30 = sshll.u32 %s5779_s29, 4  ;;  %s74_s10 = sshll.u32 %s5780_s5, 4  ;;  %s53_s30 = int_to_ptr.vmem [resolvable:$true] %s52_s30  ;;  %s75_s10 = int_to_ptr.vmem [resolvable:$true] %s74_s10 }
  0x2a   :  { %s5712_s11 = scalar_lea.vmem %s53_s30, 16  ;;  %s5716_s12 = scalar_lea.vmem %s53_s30, 32 }
  0x2b   :  { %p5713_p1 = scmp.ne.s32.totalorder %s53_s30, %s5712_s11  ;;  %p5717_p2 = scmp.lt.s32.totalorder %s53_s30, %s53_s30 }
  0x2c   :  { %p5718_p3 = scmp.lt.s32.totalorder %s5716_s12, %s5712_s11 }
  0x2e   :  { %p5719_p4 = por %p5718_p3, %p5717_p2 }
  0x30   :  { %p5720_p5 = pnand %p5719_p4, %p5713_p1 }
  0x32   :  { %5723 = shalt.err (!%p5720_p5)
}
  0x33   :  { %55 = dma.hbm_to_vmem [thread:$0]  %s7354_s4, 16, %s53_s30, [#allocation11]  }
  0x34   :  { %s5732_s15 = scalar_lea.vmem %s75_s10, 32  ;;  %p5737_p7 = scmp.lt.s32.totalorder %s75_s10, %s75_s10 }
  0x35   :  { %p5733_p6 = scmp.ne.s32.totalorder %s75_s10, %s5732_s15  ;;  %p5738_p8 = scmp.lt.s32.totalorder %s5732_s15, %s5732_s15 }
  0x37   :  { %p5739_p9 = por %p5738_p8, %p5737_p7 }
  0x39   :  { %p5740_p10 = pnand %p5739_p9, %p5733_p6 }
  0x3b   :  { %5743 = shalt.err (!%p5740_p10)
}
  0x3c   :  { %77 = dma.hbm_to_vmem [thread:$0]  %s7356_s6, 32, %s75_s10, [#allocation14]  }
  0x3d   :  { %s5781_s8 = smov [#allocation16]  }
  0x3e   :  { %s84_s17 = sshll.u32 %s5781_s8, 4  ;;  %s85_s17 = int_to_ptr.vmem [resolvable:$true] %s84_s17 }
  0x3f   :  { %s5752_s18 = scalar_lea.vmem %s85_s17, 32  ;;  %p5757_p12 = scmp.lt.s32.totalorder %s85_s17, %s85_s17 }
  0x40   :  { %p5753_p11 = scmp.ne.s32.totalorder %s85_s17, %s5752_s18  ;;  %p5758_p13 = scmp.lt.s32.totalorder %s5752_s18, %s5752_s18 }
  0x42   :  { %p5759_p0 = por %p5758_p13, %p5757_p12 }
  0x44   :  { %p5760_p1 = pnand %p5759_p0, %p5753_p11 }
  0x46   :  { %5763 = shalt.err (!%p5760_p1)
}
  0x47   :  { %87 = dma.hbm_to_vmem [thread:$0]  %s7357_s7, 32, %s85_s17, [#allocation17]  }
  0x48   :  { %5764 = dma.done.wait [#allocation9], 2048  }
  0x49   :  { %5765 = vsyncadd [#allocation9], 4294965248 }
  0x4a   :  { %5766 = dma.done.wait [#allocation11], 32  }
  0x4b   :  { %5767 = vsyncadd [#allocation11], 4294967264 }
  0x4c   :  { %5768 = dma.done.wait [#allocation14], 131104  }
  0x4d   :  { %5769 = vsyncadd [#allocation14], 4294836192 }
  0x4e   :  { %5770 = dma.done.wait [#allocation17], 32  }
  0x4f   :  { %5771 = vsyncadd [#allocation17], 4294967264  ;;  %vm108_vm0 = vcmask 97280   ;;  %vm110_vm1 = vcmask 91136   ;;  %v5782_v1 = vmov 0.0   ;;  %vm120_vm2 = vcmask 90112  }
  0x50   :  { %109 = vst.msk [vmem:[#allocation2] sm:$0xff] %vm108_vm0, %v5782_v1  ;;  %112 = vst.msk [vmem:[#allocation2 + $0xa0] sm:$0xff] %vm108_vm0, %v5782_v1  ;;  %v153_v2 = vld [vmem:[#allocation8] sm:$0xff]  ;;  %v154_v3 = vld [vmem:[#allocation8 + $0x8] sm:$0xff]  ;;  %s5783_s6 = smov 24   ;;  %s5784_s7 = smov 12  }
  0x51   :  { %111 = vst.msk [vmem:[#allocation2 + $0x8] sm:$0x3] %vm110_vm1, %v5782_v1  ;;  %113 = vst.msk [vmem:[#allocation2 + $0xa8] sm:$0x3] %vm110_vm1, %v5782_v1  ;;  %v155_v4 = vld [vmem:[#allocation8 + $0x10] sm:$0xff]  ;;  %v156_v7 = vld [vmem:[#allocation8 + $0x18] sm:$0xff] }
  0x52   :  { %115 = vst.msk [vmem:[#allocation2 + $0x90] sm:$0xff] %vm108_vm0, %v5782_v1  ;;  %117 = vst.msk [vmem:[#allocation2 + $0x130] sm:$0xff] %vm108_vm0, %v5782_v1  ;;  %v157_v8 = vld [vmem:[#allocation8 + $0x20] sm:$0xff]  ;;  %v158_v9 = vld [vmem:[#allocation8 + $0x28] sm:$0xff]  ;;  %s5785_s20 = smov 36   ;;  %vm1080_vm3 = vcmask 1043456  }
  0x53   :  { %116 = vst.msk [vmem:[#allocation2 + $0x98] sm:$0x3] %vm110_vm1, %v5782_v1  ;;  %118 = vst.msk [vmem:[#allocation2 + $0x138] sm:$0x3] %vm110_vm1, %v5782_v1  ;;  %v159_v10 = vld [vmem:[#allocation8 + $0x30] sm:$0xff]  ;;  %v160_v11 = vld [vmem:[#allocation8 + $0x38] sm:$0xff] }
  0x54   :  { %137 = vst.msk [vmem:[#allocation2 + $0x19] sm:$0x1] %vm120_vm2, %v5782_v1  ;;  %121 = vst.msk [vmem:[#allocation2 + $0x10] sm:$0x1] %vm120_vm2, %v5782_v1  ;;  %v161_v13 = vld [vmem:[#allocation8 + $0x40] sm:$0xff]  ;;  %v162_v14 = vld [vmem:[#allocation8 + $0x48] sm:$0xff] }
  0x55   :  { %122 = vst.msk [vmem:[#allocation2 + $0x20] sm:$0x1] %vm120_vm2, %v5782_v1  ;;  %123 = vst.msk [vmem:[#allocation2 + $0x30] sm:$0x1] %vm120_vm2, %v5782_v1  ;;  %s5786_s21 = smov 48   ;;  %v1022_v28 = vld [vmem:[%s7351_s1 + $0x60] sm:$0xff] }
  0x56   :  { %124 = vst.msk [vmem:[#allocation2 + $0x40] sm:$0x1] %vm120_vm2, %v5782_v1  ;;  %125 = vst.msk [vmem:[#allocation2 + $0x50] sm:$0x1] %vm120_vm2, %v5782_v1  ;;  %v1023_v27 = vld [vmem:[%s7351_s1 + $0x68] sm:$0xf] }
  0x57   :  { %126 = vst.msk [vmem:[#allocation2 + $0x60] sm:$0x1] %vm120_vm2, %v5782_v1  ;;  %127 = vst.msk [vmem:[#allocation2 + $0x70] sm:$0x1] %vm120_vm2, %v5782_v1  ;;  %v185_v12 = vld [vmem:[#allocation2] sm:$0xff]  ;;  %5536 = vmatprep.subr.msk.mxu0 %vm1080_vm3, %v1023_v27  ;;  %v163_v29 = vld [vmem:[#allocation8 + $0x50] sm:$0xff] }
  0x58   :  { %128 = vst.msk [vmem:[#allocation2 + $0x80] sm:$0x1] %vm120_vm2, %v5782_v1  ;;  %129 = vst.msk [vmem:[#allocation2 + $0xb0] sm:$0x1] %vm120_vm2, %v5782_v1  ;;  %v314_v5 = vld [vmem:[#allocation2 + $0x2] sm:$0xff]  ;;  %5537 = vmatpush3.msk.msra.mxu0 %vm1080_vm3, %v1023_v27  ;;  %v1021_v30 = vld [vmem:[%s7351_s1 + $0x58] sm:$0xff] }
  0x59   :  { %130 = vst.msk [vmem:[#allocation2 + $0xc0] sm:$0x1] %vm120_vm2, %v5782_v1  ;;  %131 = vst.msk [vmem:[#allocation2 + $0xd0] sm:$0x1] %vm120_vm2, %v5782_v1  ;;  %v217_v6 = vld [vmem:[#allocation2 + $0x1] sm:$0xff]  ;;  %346 = vrot.lane.b32.xlu1 %v314_v5, %s5783_s6  ;;  %5538 = vmatprep.subr.mxu0 %v1022_v28  ;;  %s5787_s27 = smov 60  }
  0x5a   :  { %132 = vst.msk [vmem:[#allocation2 + $0xe0] sm:$0x1] %vm120_vm2, %v5782_v1  ;;  %133 = vst.msk [vmem:[#allocation2 + $0xf0] sm:$0x1] %vm120_vm2, %v5782_v1  ;;  %249 = vrot.lane.b32.xlu0 %v217_v6, %s5784_s7  ;;  %5539 = vmatpush3.msra.mxu0 %v1022_v28  ;;  %v1020_v32 = vld [vmem:[%s7351_s1 + $0x50] sm:$0xff]  ;;  %s5788_s30 = smov 72  }
  0x5b   :  { %134 = vst.msk [vmem:[#allocation2 + $0x100] sm:$0x1] %vm120_vm2, %v5782_v1  ;;  %135 = vst.msk [vmem:[#allocation2 + $0x110] sm:$0x1] %vm120_vm2, %v5782_v1  ;;  %5540 = vmatprep.subr.mxu0 %v1021_v30  ;;  %v1019_v33 = vld [vmem:[%s7351_s1 + $0x48] sm:$0xff]  ;;  %v1018_v36 = vld [vmem:[%s7351_s1 + $0x40] sm:$0xff] }
  0x5c   :  { %136 = vst.msk [vmem:[#allocation2 + $0x120] sm:$0x1] %vm120_vm2, %v5782_v1  ;;  %138 = vst.msk [vmem:[#allocation2 + $0x29] sm:$0x1] %vm120_vm2, %v5782_v1  ;;  %5541 = vmatpush3.msra.mxu0 %v1021_v30  ;;  %v1017_v37 = vld [vmem:[%s7351_s1 + $0x38] sm:$0xff]  ;;  %s5789_s15 = smov 84  }
  0x5d   :  { %139 = vst.msk [vmem:[#allocation2 + $0x39] sm:$0x1] %vm120_vm2, %v5782_v1  ;;  %140 = vst.msk [vmem:[#allocation2 + $0x49] sm:$0x1] %vm120_vm2, %v5782_v1  ;;  %5542 = vmatprep.subr.mxu0 %v1020_v32  ;;  %v1016_v38 = vld [vmem:[%s7351_s1 + $0x30] sm:$0xff]  ;;  %v1015_v40 = vld [vmem:[%s7351_s1 + $0x28] sm:$0xff] }
  0x5e   :  { %141 = vst.msk [vmem:[#allocation2 + $0x59] sm:$0x1] %vm120_vm2, %v5782_v1  ;;  %142 = vst.msk [vmem:[#allocation2 + $0x69] sm:$0x1] %vm120_vm2, %v5782_v1  ;;  %5543 = vmatpush3.msra.mxu0 %v1020_v32  ;;  %v164_v41 = vld [vmem:[#allocation8 + $0x58] sm:$0xff]  ;;  %s5790_s19 = smov 96  }
  0x5f   :  { %143 = vst.msk [vmem:[#allocation2 + $0x79] sm:$0x1] %vm120_vm2, %v5782_v1  ;;  %144 = vst.msk [vmem:[#allocation2 + $0x89] sm:$0x1] %vm120_vm2, %v5782_v1  ;;  %5544 = vmatprep.subr.mxu0 %v1019_v33  ;;  %v1014_v42 = vld [vmem:[%s7351_s1 + $0x20] sm:$0xff]  ;;  %v1013_v43 = vld [vmem:[%s7351_s1 + $0x18] sm:$0xff] }
  0x60   :  { %145 = vst.msk [vmem:[#allocation2 + $0xb9] sm:$0x1] %vm120_vm2, %v5782_v1  ;;  %146 = vst.msk [vmem:[#allocation2 + $0xc9] sm:$0x1] %vm120_vm2, %v5782_v1  ;;  %5545 = vmatpush3.msra.mxu0 %v1019_v33  ;;  %v1012_v44 = vld [vmem:[%s7351_s1 + $0x10] sm:$0xff]  ;;  %v1011_v47 = vld [vmem:[%s7351_s1 + $0x8] sm:$0xff] }
  0x61   :  { %147 = vst.msk [vmem:[#allocation2 + $0xd9] sm:$0x1] %vm120_vm2, %v5782_v1  ;;  %148 = vst.msk [vmem:[#allocation2 + $0xe9] sm:$0x1] %vm120_vm2, %v5782_v1  ;;  %5546 = vmatprep.subr.mxu0 %v1018_v36  ;;  %v165_v48 = vld [vmem:[#allocation8 + $0x60] sm:$0xff]  ;;  %v166_v54 = vld [vmem:[#allocation8 + $0x68] sm:$0xff] }
  0x62   :  { %149 = vst.msk [vmem:[#allocation2 + $0xf9] sm:$0x1] %vm120_vm2, %v5782_v1  ;;  %150 = vst.msk [vmem:[#allocation2 + $0x109] sm:$0x1] %vm120_vm2, %v5782_v1  ;;  %5547 = vmatpush3.msra.mxu0 %v1018_v36  ;;  %v1010_v49 = vld [vmem:[%s7351_s1] sm:$0xff]  ;;  %v167_v57 = vld [vmem:[#allocation8 + $0x70] sm:$0xff] }
  0x63   :  { %151 = vst.msk [vmem:[#allocation2 + $0x119] sm:$0x1] %vm120_vm2, %v5782_v1  ;;  %152 = vst.msk [vmem:[#allocation2 + $0x129] sm:$0x1] %vm120_vm2, %v5782_v1  ;;  %5548 = vmatprep.subr.mxu0 %v1017_v37  ;;  %vm1245_vm4 = vcmask 261120   ;;  %vm1247_vm5 = vcmask 254976  }
  0x64   :  { %169 = vst.msk [vmem:[#allocation2 + $0x11] sm:$0xff] %vm108_vm0, %v153_v2  ;;  %170 = vst.msk [vmem:[#allocation2 + $0x21] sm:$0xff] %vm108_vm0, %v154_v3  ;;  %5549 = vmatpush3.msra.mxu0 %v1017_v37  ;;  %v168_v63 = vld [vmem:[#allocation8 + $0x78] sm:$0xff]  ;;  %vm297_vm6 = vcmask 195680   ;;  %vm394_vm7 = vcmask 294080   ;;  %v710_v5 = vld [vmem:[#allocation2 + $0x90] sm:$0xff] }
  0x65   :  { %171 = vst.msk [vmem:[#allocation2 + $0x31] sm:$0xff] %vm108_vm0, %v155_v4  ;;  %172 = vst.msk [vmem:[#allocation2 + $0x41] sm:$0xff] %vm108_vm0, %v156_v7  ;;  %5550 = vmatprep.subr.mxu0 %v1016_v38  ;;  %v193_v6 = vld [vmem:[#allocation2 + $0xa0] sm:$0xff]  ;;  %v807_v7 = vld [vmem:[#allocation2 + $0x91] sm:$0xff]  ;;  %vm491_vm8 = vcmask 392480   ;;  %vm588_vm9 = vcmask 490880  }
  0x66   :  { %173 = vst.msk [vmem:[#allocation2 + $0x51] sm:$0xff] %vm108_vm0, %v157_v8  ;;  %174 = vst.msk [vmem:[#allocation2 + $0x61] sm:$0xff] %vm108_vm0, %v158_v9  ;;  %5551 = vmatpush3.msra.mxu0 %v1016_v38  ;;  %vm685_vm10 = vcmask 589280   ;;  %vm783_vm11 = vcmask 687680   ;;  %vm880_vm12 = vcmask 786080   ;;  %vm977_vm13 = vcmask 884480  }
  0x67   :  { %175 = vst.msk [vmem:[#allocation2 + $0x71] sm:$0xff] %vm108_vm0, %v159_v10  ;;  %176 = vst.msk [vmem:[#allocation2 + $0x81] sm:$0xff] %vm108_vm0, %v160_v11  ;;  %5552 = vmatprep.subr.mxu0 %v1015_v40  ;;  %v904_v10 = vld [vmem:[#allocation2 + $0x92] sm:$0xff]  ;;  %vm1031_vm14 = vcmask 883712   ;;  %s5791_s1 = smov 32   ;;  %s5792_s5 = smov 64  }
  0x68   :  { %201 = vst.msk [vmem:[#allocation4] sm:$0xff] %vm108_vm0, %v185_v12  ;;  %177 = vst.msk [vmem:[#allocation2 + $0xb1] sm:$0xff] %vm108_vm0, %v161_v13  ;;  %5553 = vmatpush3.msra.mxu0 %v1015_v40  ;;  %vm1257_vm15 = vcmask 253952   ;;  %vm1515_vm1 = vcmask 785920   ;;  %vm1612_vm2 = vcmask 1048320   ;;  %vm2430_vm3 = vcmask 1041409  }
  0x69   :  { %178 = vst.msk [vmem:[#allocation2 + $0xc1] sm:$0xff] %vm108_vm0, %v162_v14  ;;  %179 = vst.msk [vmem:[#allocation2 + $0xd1] sm:$0xff] %vm108_vm0, %v163_v29  ;;  %5554 = vmatprep.subr.mxu0 %v1014_v42  ;;  %v225_v14 = vld [vmem:[#allocation2 + $0xa1] sm:$0xff] }
  0x6a   :  { %180 = vst.msk [vmem:[#allocation2 + $0xe1] sm:$0xff] %vm108_vm0, %v164_v41  ;;  %5555 = vmatpush3.msra.mxu0 %v1014_v42  ;;  %181 = vst.msk [vmem:[#allocation2 + $0xf1] sm:$0xff] %vm108_vm0, %v165_v48 }
  0x6b   :  { %v315_v15 = vld [vmem:[#allocation2 + $0x12] sm:$0xff]  ;;  %v412_v17 = vld [vmem:[#allocation2 + $0x20] sm:$0xff]  ;;  %5556 = vmatprep.subr.mxu0 %v1013_v43  ;;  %182 = vst.msk [vmem:[#allocation2 + $0x101] sm:$0xff] %vm108_vm0, %v166_v54  ;;  %183 = vst.msk [vmem:[#allocation2 + $0x111] sm:$0xff] %vm108_vm0, %v167_v57 }
  0x6c   :  { %v218_v16 = vld [vmem:[#allocation2 + $0x11] sm:$0xff]  ;;  %348 = vrot.lane.b32.xlu1 %v315_v15, %s5783_s6  ;;  %203 = vst.msk [vmem:[#allocation4 + $0x10] sm:$0xff] %vm108_vm0, %v412_v17  ;;  %v5960_v20 = vld [vmem:[#allocation2 + $0x40] sm:$0xff]  ;;  %5557 = vmatpush3.msra.mxu0 %v1013_v43  ;;  %184 = vst.msk [vmem:[#allocation2 + $0x121] sm:$0xff] %vm108_vm0, %v168_v63 }
  0x6d   :  { %251 = vrot.lane.b32.xlu0 %v218_v16, %s5784_s7  ;;  %v411_v18 = vld [vmem:[#allocation2 + $0x10] sm:$0xff]  ;;  %205 = vst.msk [vmem:[#allocation4 + $0x20] sm:$0xff] %vm108_vm0, %v5960_v20  ;;  %v5970_v22 = vld [vmem:[#allocation2 + $0x60] sm:$0xff]  ;;  %5558 = vmatprep.subr.mxu0 %v1012_v44  ;;  %209 = vst.msk [vmem:[#allocation4 + $0x40] sm:$0xff] %vm108_vm0, %v193_v6 }
  0x6e   :  { %v5957_v19 = vld [vmem:[#allocation2 + $0x30] sm:$0xff]  ;;  %202 = vst.msk [vmem:[#allocation4 + $0x8] sm:$0xff] %vm108_vm0, %v411_v18  ;;  %v509_v23 = vld [vmem:[#allocation2 + $0x21] sm:$0xff]  ;;  %207 = vst.msk [vmem:[#allocation4 + $0x30] sm:$0xff] %vm108_vm0, %v5970_v22  ;;  %5559 = vmatpush3.msra.mxu0 %v1012_v44 }
  0x6f   :  { %204 = vst.msk [vmem:[#allocation4 + $0x18] sm:$0xff] %vm108_vm0, %v5957_v19  ;;  %v5964_v21 = vld [vmem:[#allocation2 + $0x50] sm:$0xff]  ;;  %v606_v31 = vld [vmem:[#allocation2 + $0x22] sm:$0xff]  ;;  %5560 = vmatprep.subr.mxu0 %v1011_v47 }
  0x70   :  { %445 = vrot.lane.b32.xlu1 %v412_v17, %s5785_s20  ;;  %206 = vst.msk [vmem:[#allocation4 + $0x28] sm:$0xff] %vm108_vm0, %v5964_v21  ;;  %v5974_v24 = vld [vmem:[#allocation2 + $0x70] sm:$0xff]  ;;  %v5982_v25 = vld [vmem:[#allocation2 + $0xc0] sm:$0xff]  ;;  %5561 = vmatpush3.msra.mxu0 %v1011_v47 }
  0x71   :  { %443 = vrot.lane.b32.xlu0 %v411_v18, %s5785_s20  ;;  %208 = vst.msk [vmem:[#allocation4 + $0x38] sm:$0xff] %vm108_vm0, %v5974_v24  ;;  %v5984_v26 = vld [vmem:[#allocation2 + $0xb0] sm:$0xff]  ;;  %211 = vst.msk [vmem:[#allocation4 + $0x50] sm:$0xff] %vm108_vm0, %v5982_v25  ;;  %v6046_v45 = vld [vmem:[#allocation2 + $0xe0] sm:$0xff]  ;;  %5562 = vmatprep.subr.mxu0 %v1010_v49 }
  0x72   :  { %210 = vst.msk [vmem:[#allocation4 + $0x48] sm:$0xff] %vm108_vm0, %v5984_v26  ;;  %v220_v34 = vld [vmem:[#allocation2 + $0x31] sm:$0xff]  ;;  %213 = vst.msk [vmem:[#allocation4 + $0x60] sm:$0xff] %vm108_vm0, %v6046_v45  ;;  %v511_v46 = vld [vmem:[#allocation2 + $0x41] sm:$0xff]  ;;  %5563 = vmatpush3.msra.mxu0 %v1010_v49 }
  0x73   :  { %v6010_v35 = vld [vmem:[#allocation2 + $0xd0] sm:$0xff]  ;;  %v608_v50 = vld [vmem:[#allocation2 + $0x42] sm:$0xff]  ;;  %1246 = vst.msk [vmem:[#allocation3] sm:$0xff] %vm1245_vm4, %v5782_v1  ;;  %1249 = vst.msk [vmem:[#allocation3 + $0xa0] sm:$0xff] %vm1245_vm4, %v5782_v1 }
  0x74   :  { %542 = vrot.lane.b32.xlu1 %v509_v23, %s5786_s21  ;;  %212 = vst.msk [vmem:[#allocation4 + $0x58] sm:$0xff] %vm108_vm0, %v6010_v35  ;;  %v317_v39 = vld [vmem:[#allocation2 + $0x32] sm:$0xff]  ;;  %v6081_v55 = vld [vmem:[#allocation2 + $0x100] sm:$0xff] }
  0x75   :  { %540 = vrot.lane.b32.xlu0 %v218_v16, %s5786_s21  ;;  %v6064_v51 = vld [vmem:[#allocation2 + $0xf0] sm:$0xff]  ;;  %215 = vst.msk [vmem:[#allocation4 + $0x70] sm:$0xff] %vm108_vm0, %v6081_v55  ;;  %v513_v56 = vld [vmem:[#allocation2 + $0x61] sm:$0xff] }
  0x76   :  { %214 = vst.msk [vmem:[#allocation4 + $0x68] sm:$0xff] %vm108_vm0, %v6064_v51  ;;  %v803_v52 = vld [vmem:[#allocation2 + $0x51] sm:$0xff]  ;;  %v610_v58 = vld [vmem:[#allocation2 + $0x62] sm:$0xff] }
  0x77   :  { %v900_v53 = vld [vmem:[#allocation2 + $0x52] sm:$0xff]  ;;  %1248 = vst.msk [vmem:[#allocation3 + $0x8] sm:$0x3] %vm1247_vm5, %v5782_v1  ;;  %1250 = vst.msk [vmem:[#allocation3 + $0xa8] sm:$0x3] %vm1247_vm5, %v5782_v1  ;;  %v418_v62 = vld [vmem:[#allocation2 + $0x80] sm:$0xff] }
  0x78   :  { %253 = vrot.lane.b32.xlu1 %v509_v23, %s5784_s7  ;;  %v6094_v59 = vld [vmem:[#allocation2 + $0x110] sm:$0xff]  ;;  %1252 = vst.msk [vmem:[#allocation3 + $0x90] sm:$0xff] %vm1245_vm4, %v5782_v1  ;;  %1254 = vst.msk [vmem:[#allocation3 + $0x130] sm:$0xff] %vm1245_vm4, %v5782_v1  ;;  %v515_v0 = vld [vmem:[#allocation2 + $0x81] sm:$0xff] }
  0x79   :  { %637 = vrot.lane.b32.xlu0 %v315_v15, %s5787_s27  ;;  %216 = vst.msk [vmem:[#allocation4 + $0x78] sm:$0xff] %vm108_vm0, %v6094_v59  ;;  %v805_v60 = vld [vmem:[#allocation2 + $0x71] sm:$0xff]  ;;  %v612_v2 = vld [vmem:[#allocation2 + $0x82] sm:$0xff]  ;;  %vm1418_vm0 = vcmask 523520  }
  0x7a   :  { %1253 = vst.msk [vmem:[#allocation3 + $0x98] sm:$0x3] %vm1247_vm5, %v5782_v1  ;;  %1255 = vst.msk [vmem:[#allocation3 + $0x138] sm:$0x3] %vm1247_vm5, %v5782_v1  ;;  %v902_v61 = vld [vmem:[#allocation2 + $0x72] sm:$0xff]  ;;  %v322_v18 = vld [vmem:[#allocation2 + $0xa2] sm:$0xff] }
  0x7b   :  { %v226_v13 = vld [vmem:[#allocation2 + $0xb1] sm:$0xff]  ;;  %v614_v28 = vld [vmem:[#allocation2 + $0xc2] sm:$0xff]  ;;  %1259 = vst.msk [vmem:[#allocation3 + $0x20] sm:$0x1] %vm1257_vm15, %v5782_v1  ;;  %1258 = vst.msk [vmem:[#allocation3 + $0x10] sm:$0x1] %vm1257_vm15, %v5782_v1 }
  0x7c   :  { %735 = vrot.lane.b32.xlu1 %v412_v17, %s5788_s30  ;;  %v323_v17 = vld [vmem:[#allocation2 + $0xb2] sm:$0xff]  ;;  %v519_v47 = vld [vmem:[#allocation2 + $0xe1] sm:$0xff]  ;;  %1260 = vst.msk [vmem:[#allocation3 + $0x30] sm:$0x1] %vm1257_vm15, %v5782_v1  ;;  %1261 = vst.msk [vmem:[#allocation3 + $0x40] sm:$0x1] %vm1257_vm15, %v5782_v1 }
  0x7d   :  { %639 = vrot.lane.b32.xlu0 %v606_v31, %s5787_s27  ;;  %v809_v32 = vld [vmem:[#allocation2 + $0xd1] sm:$0xff]  ;;  %1262 = vst.msk [vmem:[#allocation3 + $0x50] sm:$0x1] %vm1257_vm15, %v5782_v1  ;;  %1263 = vst.msk [vmem:[#allocation3 + $0x60] sm:$0x1] %vm1257_vm15, %v5782_v1  ;;  %vm5337_vm5 = vcmask 1041408  }
  0x7e   :  { %v906_v36 = vld [vmem:[#allocation2 + $0xd2] sm:$0xff]  ;;  %1264 = vst.msk [vmem:[#allocation3 + $0x70] sm:$0x1] %vm1257_vm15, %v5782_v1  ;;  %1265 = vst.msk [vmem:[#allocation3 + $0x80] sm:$0x1] %vm1257_vm15, %v5782_v1 }
  0x7f   :  { %1266 = vst.msk [vmem:[#allocation3 + $0xb0] sm:$0x1] %vm1257_vm15, %v5782_v1  ;;  %1267 = vst.msk [vmem:[#allocation3 + $0xc0] sm:$0x1] %vm1257_vm15, %v5782_v1 }
  0x80   :  { %350 = vrot.lane.b32.xlu1 %v606_v31, %s5783_s6  ;;  %1268 = vst.msk [vmem:[#allocation3 + $0xd0] sm:$0x1] %vm1257_vm15, %v5782_v1  ;;  %1269 = vst.msk [vmem:[#allocation3 + $0xe0] sm:$0x1] %vm1257_vm15, %v5782_v1 }
  0x81   :  { %255 = vrot.lane.b32.xlu0 %v220_v34, %s5784_s7  ;;  %1270 = vst.msk [vmem:[#allocation3 + $0xf0] sm:$0x1] %vm1257_vm15, %v5782_v1  ;;  %1271 = vst.msk [vmem:[#allocation3 + $0x100] sm:$0x1] %vm1257_vm15, %v5782_v1 }
  0x82   :  { %1272 = vst.msk [vmem:[#allocation3 + $0x110] sm:$0x1] %vm1257_vm15, %v5782_v1  ;;  %1273 = vst.msk [vmem:[#allocation3 + $0x120] sm:$0x1] %vm1257_vm15, %v5782_v1 }
  0x83   :  { %1274 = vst.msk [vmem:[#allocation3 + $0x19] sm:$0x1] %vm1257_vm15, %v5782_v1  ;;  %1275 = vst.msk [vmem:[#allocation3 + $0x29] sm:$0x1] %vm1257_vm15, %v5782_v1 }
  0x84   :  { %832 = vrot.lane.b32.xlu1 %v509_v23, %s5789_s15  ;;  %v517_v23 = vld [vmem:[#allocation2 + $0xc1] sm:$0xff]  ;;  %1276 = vst.msk [vmem:[#allocation3 + $0x39] sm:$0x1] %vm1257_vm15, %v5782_v1  ;;  %1277 = vst.msk [vmem:[#allocation3 + $0x49] sm:$0x1] %vm1257_vm15, %v5782_v1 }
  0x85   :  { %737 = vrot.lane.b32.xlu0 %v5957_v19, %s5788_s30  ;;  %1278 = vst.msk [vmem:[#allocation3 + $0x59] sm:$0x1] %vm1257_vm15, %v5782_v1  ;;  %1279 = vst.msk [vmem:[#allocation3 + $0x69] sm:$0x1] %vm1257_vm15, %v5782_v1 }
  0x86   :  { %1280 = vst.msk [vmem:[#allocation3 + $0x79] sm:$0x1] %vm1257_vm15, %v5782_v1  ;;  %1281 = vst.msk [vmem:[#allocation3 + $0x89] sm:$0x1] %vm1257_vm15, %v5782_v1 }
  0x87   :  { %1282 = vst.msk [vmem:[#allocation3 + $0xb9] sm:$0x1] %vm1257_vm15, %v5782_v1  ;;  %1283 = vst.msk [vmem:[#allocation3 + $0xc9] sm:$0x1] %vm1257_vm15, %v5782_v1 }
  0x88   :  { %447 = vrot.lane.b32.xlu1 %v5957_v19, %s5785_s20  ;;  %1284 = vst.msk [vmem:[#allocation3 + $0xd9] sm:$0x1] %vm1257_vm15, %v5782_v1  ;;  %1285 = vst.msk [vmem:[#allocation3 + $0xe9] sm:$0x1] %vm1257_vm15, %v5782_v1 }
  0x89   :  { %352 = vrot.lane.b32.xlu0 %v317_v39, %s5783_s6  ;;  %1286 = vst.msk [vmem:[#allocation3 + $0xf9] sm:$0x1] %vm1257_vm15, %v5782_v1  ;;  %1287 = vst.msk [vmem:[#allocation3 + $0x109] sm:$0x1] %vm1257_vm15, %v5782_v1 }
  0x8a   :  { %1288 = vst.msk [vmem:[#allocation3 + $0x119] sm:$0x1] %vm1257_vm15, %v5782_v1  ;;  %1289 = vst.msk [vmem:[#allocation3 + $0x129] sm:$0x1] %vm1257_vm15, %v5782_v1 }
  0x8c   :  { %929 = vrot.lane.b32.xlu1 %v606_v31, %s5790_s19 }
  0x8d   :  { %834 = vrot.lane.b32.xlu0 %v220_v34, %s5789_s15 }
  0x90   :  { %544 = vrot.lane.b32.xlu1 %v220_v34, %s5786_s21 }
  0x91   :  { %449 = vrot.lane.b32.xlu0 %v5960_v20, %s5785_s20 }
  0x94   :  { %546 = vrot.lane.b32.xlu1 %v511_v46, %s5786_s21 }
  0x95   :  { %931 = vrot.lane.b32.xlu0 %v317_v39, %s5790_s19 }
  0x98   :  { %643 = vrot.lane.b32.xlu1 %v608_v50, %s5787_s27 }
  0x99   :  { %641 = vrot.lane.b32.xlu0 %v317_v39, %s5787_s27 }
  0x9c   :  { %741 = vrot.lane.b32.xlu1 %v5964_v21, %s5788_s30 }
  0x9d   :  { %739 = vrot.lane.b32.xlu0 %v5960_v20, %s5788_s30 }
  0xa0   :  { %838 = vrot.lane.b32.xlu1 %v803_v52, %s5789_s15 }
  0xa1   :  { %836 = vrot.lane.b32.xlu0 %v511_v46, %s5789_s15 }
  0xa4   :  { %257 = vrot.lane.b32.xlu1 %v511_v46, %s5784_s7 }
  0xa5   :  { %933 = vrot.lane.b32.xlu0 %v608_v50, %s5790_s19 }
  0xa8   :  { %259 = vrot.lane.b32.xlu1 %v803_v52, %s5784_s7 }
  0xa9   :  { %935 = vrot.lane.b32.xlu0 %v900_v53, %s5790_s19 }
  0xac   :  { %356 = vrot.lane.b32.xlu1 %v900_v53, %s5783_s6 }
  0xad   :  { %354 = vrot.lane.b32.xlu0 %v608_v50, %s5783_s6  ;;  %v616_v50 = vld [vmem:[#allocation2 + $0xe2] sm:$0xff] }
  0xb0   :  { %453 = vrot.lane.b32.xlu1 %v5970_v22, %s5785_s20 }
  0xb1   :  { %451 = vrot.lane.b32.xlu0 %v5964_v21, %s5785_s20 }
  0xb4   :  { %550 = vrot.lane.b32.xlu1 %v513_v56, %s5786_s21 }
  0xb5   :  { %548 = vrot.lane.b32.xlu0 %v803_v52, %s5786_s21 }
  0xb8   :  { %647 = vrot.lane.b32.xlu1 %v610_v58, %s5787_s27 }
  0xb9   :  { %645 = vrot.lane.b32.xlu0 %v900_v53, %s5787_s27 }
  0xbc   :  { %745 = vrot.lane.b32.xlu1 %v5974_v24, %s5788_s30 }
  0xbd   :  { %743 = vrot.lane.b32.xlu0 %v5970_v22, %s5788_s30 }
  0xc0   :  { %842 = vrot.lane.b32.xlu1 %v805_v60, %s5789_s15 }
  0xc1   :  { %840 = vrot.lane.b32.xlu0 %v513_v56, %s5789_s15 }
  0xc4   :  { %261 = vrot.lane.b32.xlu1 %v513_v56, %s5784_s7  ;;  %v811_v56 = vld [vmem:[#allocation2 + $0xf1] sm:$0xff] }
  0xc5   :  { %937 = vrot.lane.b32.xlu0 %v610_v58, %s5790_s19 }
  0xc8   :  { %263 = vrot.lane.b32.xlu1 %v805_v60, %s5784_s7 }
  0xc9   :  { %939 = vrot.lane.b32.xlu0 %v902_v61, %s5790_s19 }
  0xcb   :  { %v347_v3 = vpop.permute.xlu1 %346 }
  0xcc   :  { %360 = vrot.lane.b32.xlu1 %v902_v61, %s5783_s6  ;;  %v250_v4 = vpop.permute.xlu0 %249 }
  0xcd   :  { %358 = vrot.lane.b32.xlu0 %v610_v58, %s5783_s6  ;;  %298 = vst.msk [vmem:[#allocation4] sm:$0xff] %vm297_vm6, %v250_v4 }
  0xce   :  { %395 = vst.msk [vmem:[#allocation4] sm:$0xff] %vm394_vm7, %v347_v3 }
  0xd0   :  { %457 = vrot.lane.b32.xlu1 %v418_v62, %s5785_s20 }
  0xd1   :  { %455 = vrot.lane.b32.xlu0 %v5974_v24, %s5785_s20 }
  0xd4   :  { %554 = vrot.lane.b32.xlu1 %v515_v0, %s5786_s21 }
  0xd5   :  { %552 = vrot.lane.b32.xlu0 %v805_v60, %s5786_s21 }
  0xd8   :  { %651 = vrot.lane.b32.xlu1 %v612_v2, %s5787_s27 }
  0xd9   :  { %649 = vrot.lane.b32.xlu0 %v902_v61, %s5787_s27  ;;  %v908_v61 = vld [vmem:[#allocation2 + $0xf2] sm:$0xff] }
  0xdc   :  { %749 = vrot.lane.b32.xlu1 %v710_v5, %s5788_s30 }
  0xdd   :  { %747 = vrot.lane.b32.xlu0 %v418_v62, %s5788_s30 }
  0xde   :  { %v349_v8 = vpop.permute.xlu1 %348 }
  0xdf   :  { %v252_v9 = vpop.permute.xlu0 %251 }
  0xe0   :  { %299 = vst.msk [vmem:[#allocation4 + $0x8] sm:$0xff] %vm297_vm6, %v252_v9  ;;  %846 = vrot.lane.b32.xlu1 %v807_v7, %s5789_s15  ;;  %v521_v7 = vld [vmem:[#allocation2 + $0x101] sm:$0xff] }
  0xe1   :  { %844 = vrot.lane.b32.xlu0 %v515_v0, %s5789_s15  ;;  %396 = vst.msk [vmem:[#allocation4 + $0x8] sm:$0xff] %vm394_vm7, %v349_v8 }
  0xe2   :  { %v446_v11 = vpop.permute.xlu1 %445 }
  0xe3   :  { %v444_v12 = vpop.permute.xlu0 %443  ;;  %493 = vst.msk [vmem:[#allocation4 + $0x8] sm:$0xff] %vm491_vm8, %v446_v11 }
  0xe4   :  { %492 = vst.msk [vmem:[#allocation4] sm:$0xff] %vm491_vm8, %v444_v12  ;;  %943 = vrot.lane.b32.xlu1 %v904_v10, %s5790_s19  ;;  %v618_v10 = vld [vmem:[#allocation2 + $0x102] sm:$0xff] }
  0xe5   :  { %941 = vrot.lane.b32.xlu0 %v612_v2, %s5790_s19 }
  0xe6   :  { %v543_v15 = vpop.permute.xlu1 %542 }
  0xe7   :  { %v541_v16 = vpop.permute.xlu0 %540  ;;  %590 = vst.msk [vmem:[#allocation4 + $0x8] sm:$0xff] %vm588_vm9, %v543_v15  ;;  %v6248_v15 = vld [vmem:[#allocation2 + $0x111] sm:$0xff] }
  0xe8   :  { %589 = vst.msk [vmem:[#allocation4] sm:$0xff] %vm588_vm9, %v541_v16  ;;  %267 = vrot.lane.b32.xlu1 %v226_v13, %s5784_s7 }
  0xe9   :  { %265 = vrot.lane.b32.xlu0 %v225_v14, %s5784_s7 }
  0xea   :  { %v254_v19 = vpop.permute.xlu1 %253 }
  0xeb   :  { %v638_v20 = vpop.permute.xlu0 %637  ;;  %300 = vst.msk [vmem:[#allocation4 + $0x10] sm:$0xff] %vm297_vm6, %v254_v19  ;;  %v6256_v19 = vld [vmem:[#allocation2 + $0x112] sm:$0xff] }
  0xec   :  { %686 = vst.msk [vmem:[#allocation4] sm:$0xff] %vm685_vm10, %v638_v20  ;;  %364 = vrot.lane.b32.xlu1 %v323_v17, %s5783_s6 }
  0xed   :  { %362 = vrot.lane.b32.xlu0 %v322_v18, %s5783_s6 }
  0xee   :  { %v736_v21 = vpop.permute.xlu1 %735 }
  0xef   :  { %v640_v22 = vpop.permute.xlu0 %639  ;;  %784 = vst.msk [vmem:[#allocation4] sm:$0xff] %vm783_vm11, %v736_v21 }
  0xf0   :  { %687 = vst.msk [vmem:[#allocation4 + $0x8] sm:$0xff] %vm685_vm10, %v640_v22  ;;  %461 = vrot.lane.b32.xlu1 %v5982_v25, %s5785_s20  ;;  %v1338_v22 = vld [vmem:[#allocation3 + $0x1] sm:$0xff] }
  0xf1   :  { %459 = vrot.lane.b32.xlu0 %v5984_v26, %s5785_s20 }
  0xf2   :  { %v351_v24 = vpop.permute.xlu1 %350 }
  0xf3   :  { %v256_v27 = vpop.permute.xlu0 %255  ;;  %397 = vst.msk [vmem:[#allocation4 + $0x10] sm:$0xff] %vm394_vm7, %v351_v24 }
  0xf4   :  { %301 = vst.msk [vmem:[#allocation4 + $0x18] sm:$0xff] %vm297_vm6, %v256_v27  ;;  %558 = vrot.lane.b32.xlu1 %v517_v23, %s5786_s21  ;;  %v1435_v27 = vld [vmem:[#allocation3 + $0x2] sm:$0xff] }
  0xf5   :  { %556 = vrot.lane.b32.xlu0 %v226_v13, %s5786_s21  ;;  %v1306_v13 = vld [vmem:[#allocation3] sm:$0xff] }
  0xf6   :  { %v833_v29 = vpop.permute.xlu1 %832  ;;  %1322 = vst.msk [vmem:[#allocation5] sm:$0xff] %vm1245_vm4, %v1306_v13 }
  0xf7   :  { %v738_v30 = vpop.permute.xlu0 %737  ;;  %881 = vst.msk [vmem:[#allocation4] sm:$0xff] %vm880_vm12, %v833_v29 }
  0xf8   :  { %785 = vst.msk [vmem:[#allocation4 + $0x8] sm:$0xff] %vm783_vm11, %v738_v30  ;;  %655 = vrot.lane.b32.xlu1 %v614_v28, %s5787_s27  ;;  %v426_v30 = vld [vmem:[#allocation2 + $0x120] sm:$0xff] }
  0xf9   :  { %653 = vrot.lane.b32.xlu0 %v323_v17, %s5787_s27 }
  0xfa   :  { %v448_v26 = vpop.permute.xlu1 %447 }
  0xfb   :  { %v353_v31 = vpop.permute.xlu0 %352  ;;  %494 = vst.msk [vmem:[#allocation4 + $0x10] sm:$0xff] %vm491_vm8, %v448_v26 }
  0xfc   :  { %398 = vst.msk [vmem:[#allocation4 + $0x18] sm:$0xff] %vm394_vm7, %v353_v31  ;;  %753 = vrot.lane.b32.xlu1 %v6010_v35, %s5788_s30 }
  0xfd   :  { %751 = vrot.lane.b32.xlu0 %v5982_v25, %s5788_s30 }
  0xfe   :  { %v930_v33 = vpop.permute.xlu1 %929 }
  0xff   :  { %v835_v34 = vpop.permute.xlu0 %834  ;;  %978 = vst.msk [vmem:[#allocation4] sm:$0xff] %vm977_vm13, %v930_v33 }
 0x100   :  { %882 = vst.msk [vmem:[#allocation4 + $0x8] sm:$0xff] %vm880_vm12, %v835_v34  ;;  %850 = vrot.lane.b32.xlu1 %v809_v32, %s5789_s15 }
 0x101   :  { %848 = vrot.lane.b32.xlu0 %v517_v23, %s5789_s15 }
 0x102   :  { %v545_v37 = vpop.permute.xlu1 %544 }
 0x103   :  { %v450_v38 = vpop.permute.xlu0 %449  ;;  %591 = vst.msk [vmem:[#allocation4 + $0x10] sm:$0xff] %vm588_vm9, %v545_v37 }
 0x104   :  { %495 = vst.msk [vmem:[#allocation4 + $0x18] sm:$0xff] %vm491_vm8, %v450_v38  ;;  %947 = vrot.lane.b32.xlu1 %v906_v36, %s5790_s19  ;;  %v718_v38 = vld [vmem:[#allocation2 + $0x130] sm:$0xff] }
 0x105   :  { %945 = vrot.lane.b32.xlu0 %v614_v28, %s5790_s19 }
 0x106   :  { %v547_v25 = vpop.permute.xlu1 %546  ;;  %v994_v40 = vld [vmem:[#allocation4] sm:$0xff] }
 0x107   :  { %v932_v39 = vpop.permute.xlu0 %931  ;;  %592 = vst.msk [vmem:[#allocation4 + $0x18] sm:$0xff] %vm588_vm9, %v547_v25  ;;  %5564 = vmatprep.mubr.msk.f32.mxu0 %vm1031_vm14, %v994_v40 }
 0x108   :  { %979 = vst.msk [vmem:[#allocation4 + $0x8] sm:$0xff] %vm977_vm13, %v932_v39  ;;  %271 = vrot.lane.b32.xlu1 %v809_v32, %s5784_s7 }
 0x109   :  { %269 = vrot.lane.b32.xlu0 %v517_v23, %s5784_s7 }
 0x10a   :  { %v644_v41 = vpop.permute.xlu1 %643 }
 0x10b   :  { %v642_v42 = vpop.permute.xlu0 %641  ;;  %689 = vst.msk [vmem:[#allocation4 + $0x18] sm:$0xff] %vm685_vm10, %v644_v41 }
 0x10c   :  { %688 = vst.msk [vmem:[#allocation4 + $0x10] sm:$0xff] %vm685_vm10, %v642_v42  ;;  %368 = vrot.lane.b32.xlu1 %v906_v36, %s5783_s6 }
 0x10d   :  { %366 = vrot.lane.b32.xlu0 %v614_v28, %s5783_s6 }
 0x10e   :  { %v742_v43 = vpop.permute.xlu1 %741 }
 0x10f   :  { %v740_v44 = vpop.permute.xlu0 %739  ;;  %v995_v46 = vld [vmem:[#allocation4 + $0x8] sm:$0xff]  ;;  %787 = vst.msk [vmem:[#allocation4 + $0x18] sm:$0xff] %vm783_vm11, %v742_v43  ;;  %v815_v43 = vld [vmem:[#allocation2 + $0x131] sm:$0xff] }
 0x110   :  { %786 = vst.msk [vmem:[#allocation4 + $0x10] sm:$0xff] %vm783_vm11, %v740_v44  ;;  %5565 = vmatmul.mubr.msk.f32.vlgmr.msra.gmra.mxu0 %vm1031_vm14, %v995_v46  ;;  %465 = vrot.lane.b32.xlu1 %v6046_v45, %s5785_s20 }
 0x111   :  { %463 = vrot.lane.b32.xlu0 %v6010_v35, %s5785_s20 }
 0x112   :  { %v839_v48 = vpop.permute.xlu1 %838 }
 0x113   :  { %v837_v49 = vpop.permute.xlu0 %836  ;;  %884 = vst.msk [vmem:[#allocation4 + $0x18] sm:$0xff] %vm880_vm12, %v839_v48 }
 0x114   :  { %883 = vst.msk [vmem:[#allocation4 + $0x10] sm:$0xff] %vm880_vm12, %v837_v49  ;;  %562 = vrot.lane.b32.xlu1 %v519_v47, %s5786_s21 }
 0x115   :  { %560 = vrot.lane.b32.xlu0 %v809_v32, %s5786_s21  ;;  %v6277_v32 = vld [vmem:[#allocation2 + $0x121] sm:$0xff] }
 0x116   :  { %v258_v52 = vpop.permute.xlu1 %257 }
 0x117   :  { %v934_v53 = vpop.permute.xlu0 %933  ;;  %302 = vst.msk [vmem:[#allocation4 + $0x20] sm:$0xff] %vm297_vm6, %v258_v52 }
 0x118   :  { %980 = vst.msk [vmem:[#allocation4 + $0x10] sm:$0xff] %vm977_vm13, %v934_v53  ;;  %659 = vrot.lane.b32.xlu1 %v616_v50, %s5787_s27 }
 0x119   :  { %657 = vrot.lane.b32.xlu0 %v906_v36, %s5787_s27 }
 0x11a   :  { %v260_v35 = vpop.permute.xlu1 %259 }
 0x11b   :  { %v936_v54 = vpop.permute.xlu0 %935  ;;  %303 = vst.msk [vmem:[#allocation4 + $0x28] sm:$0xff] %vm297_vm6, %v260_v35  ;;  %v1861_v35 = vld [vmem:[#allocation3 + $0x91] sm:$0xff] }
 0x11c   :  { %981 = vst.msk [vmem:[#allocation4 + $0x18] sm:$0xff] %vm977_vm13, %v936_v54  ;;  %757 = vrot.lane.b32.xlu1 %v6064_v51, %s5788_s30  ;;  %v1346_v54 = vld [vmem:[#allocation3 + $0xa1] sm:$0xff] }
 0x11d   :  { %755 = vrot.lane.b32.xlu0 %v6046_v45, %s5788_s30 }
 0x11e   :  { %v357_v57 = vpop.permute.xlu1 %356 }
 0x11f   :  { %v355_v58 = vpop.permute.xlu0 %354  ;;  %v996_v60 = vld [vmem:[#allocation4 + $0x10] sm:$0xff]  ;;  %400 = vst.msk [vmem:[#allocation4 + $0x28] sm:$0xff] %vm394_vm7, %v357_v57 }
 0x120   :  { %399 = vst.msk [vmem:[#allocation4 + $0x20] sm:$0xff] %vm394_vm7, %v355_v58  ;;  %5567 = vmatprep.mubr.msk.f32.mxu0 %vm1031_vm14, %v996_v60  ;;  %854 = vrot.lane.b32.xlu1 %v811_v56, %s5789_s15 }
 0x121   :  { %852 = vrot.lane.b32.xlu0 %v519_v47, %s5789_s15 }
 0x122   :  { %v454_v62 = vpop.permute.xlu1 %453 }
 0x123   :  { %v452_v63 = vpop.permute.xlu0 %451  ;;  %v997_v0 = vld [vmem:[#allocation4 + $0x18] sm:$0xff]  ;;  %497 = vst.msk [vmem:[#allocation4 + $0x28] sm:$0xff] %vm491_vm8, %v454_v62  ;;  %v2064_v62 = vld [vmem:[%s7353_s3 + $0x110] sm:$0xff] }
 0x124   :  { %496 = vst.msk [vmem:[#allocation4 + $0x20] sm:$0xff] %vm491_vm8, %v452_v63  ;;  %5568 = vmatmul.mubr.msk.f32.gmra.mxu0 %vm1031_vm14, %v997_v0  ;;  %951 = vrot.lane.b32.xlu1 %v908_v61, %s5790_s19  ;;  %v2063_v63 = vld [vmem:[%s7353_s3 + $0x108] sm:$0xff] }
 0x125   :  { %949 = vrot.lane.b32.xlu0 %v616_v50, %s5790_s19 }
 0x126   :  { %v551_v45 = vpop.permute.xlu1 %550 }
 0x127   :  { %v549_v2 = vpop.permute.xlu0 %548  ;;  %594 = vst.msk [vmem:[#allocation4 + $0x28] sm:$0xff] %vm588_vm9, %v551_v45 }
 0x128   :  { %593 = vst.msk [vmem:[#allocation4 + $0x20] sm:$0xff] %vm588_vm9, %v549_v2  ;;  %275 = vrot.lane.b32.xlu1 %v811_v56, %s5784_s7  ;;  %v2062_v2 = vld [vmem:[%s7353_s3 + $0x100] sm:$0xff] }
 0x129   :  { %273 = vrot.lane.b32.xlu0 %v519_v47, %s5784_s7  ;;  %v912_v47 = vld [vmem:[#allocation2 + $0x132] sm:$0xff] }
 0x12a   :  { %v648_v3 = vpop.permute.xlu1 %647 }
 0x12b   :  { %v646_v4 = vpop.permute.xlu0 %645  ;;  %691 = vst.msk [vmem:[#allocation4 + $0x28] sm:$0xff] %vm685_vm10, %v648_v3 }
 0x12c   :  { %690 = vst.msk [vmem:[#allocation4 + $0x20] sm:$0xff] %vm685_vm10, %v646_v4  ;;  %372 = vrot.lane.b32.xlu1 %v908_v61, %s5783_s6 }
 0x12d   :  { %370 = vrot.lane.b32.xlu0 %v616_v50, %s5783_s6  ;;  %v1765_v50 = vld [vmem:[#allocation3 + $0x90] sm:$0xff] }
 0x12e   :  { %v746_v5 = vpop.permute.xlu1 %745 }
 0x12f   :  { %v744_v6 = vpop.permute.xlu0 %743  ;;  %789 = vst.msk [vmem:[#allocation4 + $0x28] sm:$0xff] %vm783_vm11, %v746_v5 }
 0x130   :  { %788 = vst.msk [vmem:[#allocation4 + $0x20] sm:$0xff] %vm783_vm11, %v744_v6  ;;  %469 = vrot.lane.b32.xlu1 %v6081_v55, %s5785_s20 }
 0x131   :  { %467 = vrot.lane.b32.xlu0 %v6064_v51, %s5785_s20 }
 0x132   :  { %v843_v8 = vpop.permute.xlu1 %842 }
 0x133   :  { %v841_v9 = vpop.permute.xlu0 %840  ;;  %886 = vst.msk [vmem:[#allocation4 + $0x28] sm:$0xff] %vm880_vm12, %v843_v8 }
 0x134   :  { %885 = vst.msk [vmem:[#allocation4 + $0x20] sm:$0xff] %vm880_vm12, %v841_v9  ;;  %566 = vrot.lane.b32.xlu1 %v521_v7, %s5786_s21 }
 0x135   :  { %564 = vrot.lane.b32.xlu0 %v811_v56, %s5786_s21 }
 0x136   :  { %v262_v11 = vpop.permute.xlu1 %261 }
 0x137   :  { %v938_v12 = vpop.permute.xlu0 %937  ;;  %304 = vst.msk [vmem:[#allocation4 + $0x30] sm:$0xff] %vm297_vm6, %v262_v11 }
 0x138   :  { %982 = vst.msk [vmem:[#allocation4 + $0x20] sm:$0xff] %vm977_vm13, %v938_v12  ;;  %663 = vrot.lane.b32.xlu1 %v618_v10, %s5787_s27 }
 0x139   :  { %661 = vrot.lane.b32.xlu0 %v908_v61, %s5787_s27  ;;  %v2065_v61 = vld [vmem:[%s7353_s3 + $0x118] sm:$0xff] }
 0x13a   :  { %v264_v51 = vpop.permute.xlu1 %263  ;;  %5588 = vmatprep.subr.mxu0 %v2065_v61 }
 0x13b   :  { %v940_v14 = vpop.permute.xlu0 %939  ;;  %305 = vst.msk [vmem:[#allocation4 + $0x38] sm:$0xff] %vm297_vm6, %v264_v51  ;;  %5589 = vmatpush3.msra.mxu0 %v2065_v61  ;;  %v2042_v61 = vld [vmem:[%s7353_s3 + $0x60] sm:$0xff] }
 0x13c   :  { %983 = vst.msk [vmem:[#allocation4 + $0x28] sm:$0xff] %vm977_vm13, %v940_v14  ;;  %761 = vrot.lane.b32.xlu1 %v6094_v59, %s5788_s30  ;;  %5590 = vmatprep.subr.mxu0 %v2064_v62 }
 0x13d   :  { %759 = vrot.lane.b32.xlu0 %v6081_v55, %s5788_s30  ;;  %5591 = vmatpush3.msra.mxu0 %v2064_v62  ;;  %v2057_v62 = vld [vmem:[%s7353_s3 + $0xd8] sm:$0xff] }
 0x13e   :  { %v361_v16 = vpop.permute.xlu1 %360  ;;  %5592 = vmatprep.subr.mxu0 %v2063_v63 }
 0x13f   :  { %v359_v17 = vpop.permute.xlu0 %358  ;;  %v998_v18 = vld [vmem:[#allocation4 + $0x20] sm:$0xff]  ;;  %402 = vst.msk [vmem:[#allocation4 + $0x38] sm:$0xff] %vm394_vm7, %v361_v16  ;;  %5593 = vmatpush3.msra.mxu0 %v2063_v63 }
 0x140   :  { %401 = vst.msk [vmem:[#allocation4 + $0x30] sm:$0xff] %vm394_vm7, %v359_v17  ;;  %5570 = vmatprep.mubr.msk.f32.mxu0 %vm1031_vm14, %v998_v18  ;;  %858 = vrot.lane.b32.xlu1 %v6248_v15, %s5789_s15 }
 0x141   :  { %856 = vrot.lane.b32.xlu0 %v521_v7, %s5789_s15  ;;  %5594 = vmatprep.subr.mxu0 %v2062_v2 }
 0x142   :  { %v458_v20 = vpop.permute.xlu1 %457  ;;  %5595 = vmatpush3.msra.mxu0 %v2062_v2  ;;  %v2056_v2 = vld [vmem:[%s7353_s3 + $0xd0] sm:$0xff] }
 0x143   :  { %v456_v55 = vpop.permute.xlu0 %455  ;;  %v999_v21 = vld [vmem:[#allocation4 + $0x28] sm:$0xff]  ;;  %499 = vst.msk [vmem:[#allocation4 + $0x38] sm:$0xff] %vm491_vm8, %v458_v20 }
 0x144   :  { %498 = vst.msk [vmem:[#allocation4 + $0x30] sm:$0xff] %vm491_vm8, %v456_v55  ;;  %5571 = vmatmul.mubr.msk.f32.gmra.mxu0 %vm1031_vm14, %v999_v21  ;;  %955 = vrot.lane.b32.xlu1 %v6256_v19, %s5790_s19 }
 0x145   :  { %953 = vrot.lane.b32.xlu0 %v618_v10, %s5790_s19 }
 0x146   :  { %v555_v23 = vpop.permute.xlu1 %554 }
 0x147   :  { %v553_v24 = vpop.permute.xlu0 %552  ;;  %596 = vst.msk [vmem:[#allocation4 + $0x38] sm:$0xff] %vm588_vm9, %v555_v23 }
 0x148   :  { %595 = vst.msk [vmem:[#allocation4 + $0x30] sm:$0xff] %vm588_vm9, %v553_v24  ;;  %1370 = vrot.lane.b32.xlu1 %v1338_v22, %s5791_s1 }
 0x149   :  { %374 = vrot.lane.b32.xlu0 %v618_v10, %s5783_s6 }
 0x14a   :  { %v652_v28 = vpop.permute.xlu1 %651 }
 0x14b   :  { %v650_v29 = vpop.permute.xlu0 %649  ;;  %693 = vst.msk [vmem:[#allocation4 + $0x38] sm:$0xff] %vm685_vm10, %v652_v28 }
 0x14c   :  { %692 = vst.msk [vmem:[#allocation4 + $0x30] sm:$0xff] %vm685_vm10, %v650_v29  ;;  %1467 = vrot.lane.b32.xlu1 %v1435_v27, %s5792_s5 }
 0x14d   :  { %376 = vrot.lane.b32.xlu0 %v6256_v19, %s5783_s6 }
 0x14e   :  { %v750_v26 = vpop.permute.xlu1 %749 }
 0x14f   :  { %v748_v31 = vpop.permute.xlu0 %747  ;;  %791 = vst.msk [vmem:[#allocation4 + $0x38] sm:$0xff] %vm783_vm11, %v750_v26 }
 0x150   :  { %790 = vst.msk [vmem:[#allocation4 + $0x30] sm:$0xff] %vm783_vm11, %v748_v31  ;;  %277 = vrot.lane.b32.xlu1 %v521_v7, %s5784_s7 }
 0x151   :  { %473 = vrot.lane.b32.xlu0 %v426_v30, %s5785_s20 }
 0x152   :  { %v847_v33 = vpop.permute.xlu1 %846 }
 0x153   :  { %v845_v34 = vpop.permute.xlu0 %844  ;;  %888 = vst.msk [vmem:[#allocation4 + $0x38] sm:$0xff] %vm880_vm12, %v847_v33 }
 0x154   :  { %887 = vst.msk [vmem:[#allocation4 + $0x30] sm:$0xff] %vm880_vm12, %v845_v34  ;;  %279 = vrot.lane.b32.xlu1 %v6248_v15, %s5784_s7 }
 0x155   :  { %570 = vrot.lane.b32.xlu0 %v6277_v32, %s5786_s21 }
 0x156   :  { %v944_v36 = vpop.permute.xlu1 %943 }
 0x157   :  { %v942_v37 = vpop.permute.xlu0 %941  ;;  %985 = vst.msk [vmem:[#allocation4 + $0x38] sm:$0xff] %vm977_vm13, %v944_v36 }
 0x158   :  { %984 = vst.msk [vmem:[#allocation4 + $0x30] sm:$0xff] %vm977_vm13, %v942_v37  ;;  %471 = vrot.lane.b32.xlu1 %v6094_v59, %s5785_s20  ;;  %v620_v59 = vld [vmem:[#allocation2 + $0x122] sm:$0xff] }
 0x159   :  { %763 = vrot.lane.b32.xlu0 %v426_v30, %s5788_s30 }
 0x15a   :  { %v268_v25 = vpop.permute.xlu1 %267 }
 0x15b   :  { %v266_v39 = vpop.permute.xlu0 %265  ;;  %307 = vst.msk [vmem:[#allocation4 + $0x48] sm:$0xff] %vm297_vm6, %v268_v25 }
 0x15c   :  { %306 = vst.msk [vmem:[#allocation4 + $0x40] sm:$0xff] %vm297_vm6, %v266_v39  ;;  %568 = vrot.lane.b32.xlu1 %v6248_v15, %s5786_s21 }
 0x15d   :  { %765 = vrot.lane.b32.xlu0 %v718_v38, %s5788_s30 }
 0x15e   :  { %v365_v1 = vpop.permute.xlu1 %364  ;;  %v1001_v42 = vld [vmem:[#allocation4 + $0x38] sm:$0xff] }
 0x15f   :  { %v363_v40 = vpop.permute.xlu0 %362  ;;  %v1000_v41 = vld [vmem:[#allocation4 + $0x30] sm:$0xff]  ;;  %404 = vst.msk [vmem:[#allocation4 + $0x48] sm:$0xff] %vm394_vm7, %v365_v1 }
 0x160   :  { %403 = vst.msk [vmem:[#allocation4 + $0x40] sm:$0xff] %vm394_vm7, %v363_v40  ;;  %5573 = vmatprep.mubr.msk.f32.mxu0 %vm1031_vm14, %v1000_v41  ;;  %665 = vrot.lane.b32.xlu1 %v6256_v19, %s5787_s27 }
 0x161   :  { %5574 = vmatmul.mubr.msk.f32.gmra.mxu0 %vm1031_vm14, %v1001_v42  ;;  %862 = vrot.lane.b32.xlu0 %v815_v43, %s5789_s15 }
 0x162   :  { %v462_v44 = vpop.permute.xlu1 %461 }
 0x163   :  { %v460_v46 = vpop.permute.xlu0 %459  ;;  %501 = vst.msk [vmem:[#allocation4 + $0x48] sm:$0xff] %vm491_vm8, %v462_v44 }
 0x164   :  { %500 = vst.msk [vmem:[#allocation4 + $0x40] sm:$0xff] %vm491_vm8, %v460_v46  ;;  %667 = vrot.lane.b32.xlu1 %v620_v59, %s5787_s27 }
 0x165   :  { %959 = vrot.lane.b32.xlu0 %v912_v47, %s5790_s19  ;;  %v2061_v47 = vld [vmem:[%s7353_s3 + $0xf8] sm:$0xff] }
 0x166   :  { %v559_v48 = vpop.permute.xlu1 %558  ;;  %5436 = vmatprep.subr.mxu1 %v2061_v47 }
 0x167   :  { %v557_v49 = vpop.permute.xlu0 %556  ;;  %598 = vst.msk [vmem:[#allocation4 + $0x48] sm:$0xff] %vm588_vm9, %v559_v48  ;;  %v2045_v48 = vld [vmem:[%s7353_s3 + $0x78] sm:$0xff] }
 0x168   :  { %597 = vst.msk [vmem:[#allocation4 + $0x40] sm:$0xff] %vm588_vm9, %v557_v49  ;;  %860 = vrot.lane.b32.xlu1 %v6277_v32, %s5789_s15  ;;  %5437 = vmatpush3.msra.mxu1 %v2045_v48  ;;  %v2060_v49 = vld [vmem:[%s7353_s3 + $0xf0] sm:$0xff] }
 0x169   :  { %1804 = vrot.lane.b32.xlu0 %v1765_v50, %s5792_s5  ;;  %5438 = vmatprep.subr.mxu1 %v2060_v49  ;;  %v2044_v50 = vld [vmem:[%s7353_s3 + $0x70] sm:$0xff]  ;;  %v2030_v49 = vld [vmem:[%s7353_s3] sm:$0xff] }
 0x16a   :  { %v656_v52 = vpop.permute.xlu1 %655  ;;  %5439 = vmatpush3.msra.mxu1 %v2044_v50 }
 0x16b   :  { %v654_v53 = vpop.permute.xlu0 %653  ;;  %695 = vst.msk [vmem:[#allocation4 + $0x48] sm:$0xff] %vm685_vm10, %v656_v52 }
 0x16c   :  { %694 = vst.msk [vmem:[#allocation4 + $0x40] sm:$0xff] %vm685_vm10, %v654_v53  ;;  %957 = vrot.lane.b32.xlu1 %v620_v59, %s5790_s19 }
 0x16d   :  { %1900 = vrot.lane.b32.xlu0 %v1861_v35, %s5790_s19  ;;  %v2059_v35 = vld [vmem:[%s7353_s3 + $0xe8] sm:$0xff] }
 0x16e   :  { %v754_v56 = vpop.permute.xlu1 %753  ;;  %5440 = vmatprep.subr.mxu1 %v2059_v35 }
 0x16f   :  { %v752_v57 = vpop.permute.xlu0 %751  ;;  %793 = vst.msk [vmem:[#allocation4 + $0x48] sm:$0xff] %vm783_vm11, %v754_v56  ;;  %v6463_v56 = vld [vmem:[#allocation10] ss:$0 sm:$0xff] }
 0x170   :  { %792 = vst.msk [vmem:[#allocation4 + $0x40] sm:$0xff] %vm783_vm11, %v752_v57  ;;  %1386 = vrot.lane.b32.xlu1 %v1346_v54, %s5791_s1  ;;  %v2043_v54 = vld [vmem:[%s7353_s3 + $0x68] sm:$0xff]  ;;  %v2058_v57 = vld [vmem:[%s7353_s3 + $0xe0] sm:$0xff] }
 0x171   :  { %5441 = vmatpush3.msra.mxu1 %v2043_v54 }
 0x172   :  { %v851_v58 = vpop.permute.xlu1 %850  ;;  %5442 = vmatprep.subr.mxu1 %v2058_v57 }
 0x173   :  { %v849_v60 = vpop.permute.xlu0 %848  ;;  %890 = vst.msk [vmem:[#allocation4 + $0x48] sm:$0xff] %vm880_vm12, %v851_v58  ;;  %v1957_v58 = vld [vmem:[#allocation3 + $0x92] sm:$0xff]  ;;  %5443 = vmatpush3.msra.mxu1 %v2042_v61 }
 0x174   :  { %889 = vst.msk [vmem:[#allocation4 + $0x40] sm:$0xff] %vm880_vm12, %v849_v60  ;;  %v1314_v60 = vld [vmem:[#allocation3 + $0xa0] sm:$0xff]  ;;  %5444 = vmatprep.subr.mxu1 %v2057_v62 }
 0x175   :  { %1973 = vst.msk [vmem:[#allocation5 + $0xb8] sm:$0xff] %vm1245_vm4, %v1957_v58  ;;  %1330 = vst.msk [vmem:[#allocation5 + $0xc0] sm:$0xff] %vm1245_vm4, %v1314_v60 }
 0x176   :  { %v948_v0 = vpop.permute.xlu1 %947 }
 0x177   :  { %v946_v45 = vpop.permute.xlu0 %945  ;;  %987 = vst.msk [vmem:[#allocation4 + $0x48] sm:$0xff] %vm977_vm13, %v948_v0 }
 0x178   :  { %986 = vst.msk [vmem:[#allocation4 + $0x40] sm:$0xff] %vm977_vm13, %v946_v45  ;;  %v2041_v45 = vld [vmem:[%s7353_s3 + $0x58] sm:$0xff] }
 0x179   :  { %5445 = vmatpush3.msra.mxu1 %v2041_v45 }
 0x17a   :  { %v272_v3 = vpop.permute.xlu1 %271  ;;  %5446 = vmatprep.subr.mxu1 %v2056_v2 }
 0x17b   :  { %v270_v4 = vpop.permute.xlu0 %269  ;;  %309 = vst.msk [vmem:[#allocation4 + $0x58] sm:$0xff] %vm297_vm6, %v272_v3 }
 0x17c   :  { %308 = vst.msk [vmem:[#allocation4 + $0x50] sm:$0xff] %vm297_vm6, %v270_v4 }
 0x17e   :  { %v369_v5 = vpop.permute.xlu1 %368  ;;  %v1003_v8 = vld [vmem:[#allocation4 + $0x48] sm:$0xff] }
 0x17f   :  { %v367_v6 = vpop.permute.xlu0 %366  ;;  %v1002_v7 = vld [vmem:[#allocation4 + $0x40] sm:$0xff]  ;;  %406 = vst.msk [vmem:[#allocation4 + $0x58] sm:$0xff] %vm394_vm7, %v369_v5  ;;  %v2040_v5 = vld [vmem:[%s7353_s3 + $0x50] sm:$0xff] }
 0x180   :  { %405 = vst.msk [vmem:[#allocation4 + $0x50] sm:$0xff] %vm394_vm7, %v367_v6  ;;  %5576 = vmatprep.mubr.msk.f32.mxu0 %vm1031_vm14, %v1002_v7  ;;  %v2055_v7 = vld [vmem:[%s7353_s3 + $0xc8] sm:$0xff]  ;;  %5447 = vmatpush3.msra.mxu1 %v2040_v5 }
 0x181   :  { %5577 = vmatmul.mubr.msk.f32.gmra.mxu0 %vm1031_vm14, %v1003_v8  ;;  %5448 = vmatprep.subr.mxu1 %v2055_v7 }
 0x182   :  { %v466_v9 = vpop.permute.xlu1 %465 }
 0x183   :  { %v464_v10 = vpop.permute.xlu0 %463  ;;  %503 = vst.msk [vmem:[#allocation4 + $0x58] sm:$0xff] %vm491_vm8, %v466_v9 }
 0x184   :  { %502 = vst.msk [vmem:[#allocation4 + $0x50] sm:$0xff] %vm491_vm8, %v464_v10 }
 0x186   :  { %v563_v11 = vpop.permute.xlu1 %562 }
 0x187   :  { %v561_v12 = vpop.permute.xlu0 %560  ;;  %600 = vst.msk [vmem:[#allocation4 + $0x58] sm:$0xff] %vm588_vm9, %v563_v11 }
 0x188   :  { %599 = vst.msk [vmem:[#allocation4 + $0x50] sm:$0xff] %vm588_vm9, %v561_v12  ;;  %v2039_v12 = vld [vmem:[%s7353_s3 + $0x48] sm:$0xff] }
 0x189   :  { %5449 = vmatpush3.msra.mxu1 %v2039_v12 }
 0x18a   :  { %v660_v13 = vpop.permute.xlu1 %659 }
 0x18b   :  { %v658_v51 = vpop.permute.xlu0 %657  ;;  %697 = vst.msk [vmem:[#allocation4 + $0x58] sm:$0xff] %vm685_vm10, %v660_v13  ;;  %v2054_v13 = vld [vmem:[%s7353_s3 + $0xc0] sm:$0xff] }
 0x18c   :  { %696 = vst.msk [vmem:[#allocation4 + $0x50] sm:$0xff] %vm685_vm10, %v658_v51  ;;  %5450 = vmatprep.subr.mxu1 %v2054_v13 }
 0x18e   :  { %v758_v14 = vpop.permute.xlu1 %757 }
 0x18f   :  { %v756_v15 = vpop.permute.xlu0 %755  ;;  %795 = vst.msk [vmem:[#allocation4 + $0x58] sm:$0xff] %vm783_vm11, %v758_v14  ;;  %v2038_v14 = vld [vmem:[%s7353_s3 + $0x40] sm:$0xff] }
 0x190   :  { %794 = vst.msk [vmem:[#allocation4 + $0x50] sm:$0xff] %vm783_vm11, %v756_v15  ;;  %v2053_v15 = vld [vmem:[%s7353_s3 + $0xb8] sm:$0xff]  ;;  %5451 = vmatpush3.msra.mxu1 %v2038_v14 }
 0x191   :  { %5452 = vmatprep.subr.mxu1 %v2053_v15 }
 0x192   :  { %v855_v16 = vpop.permute.xlu1 %854 }
 0x193   :  { %v853_v17 = vpop.permute.xlu0 %852  ;;  %892 = vst.msk [vmem:[#allocation4 + $0x58] sm:$0xff] %vm880_vm12, %v855_v16 }
 0x194   :  { %891 = vst.msk [vmem:[#allocation4 + $0x50] sm:$0xff] %vm880_vm12, %v853_v17 }
 0x196   :  { %v952_v18 = vpop.permute.xlu1 %951 }
 0x197   :  { %v950_v19 = vpop.permute.xlu0 %949  ;;  %989 = vst.msk [vmem:[#allocation4 + $0x58] sm:$0xff] %vm977_vm13, %v952_v18  ;;  %v2037_v18 = vld [vmem:[%s7353_s3 + $0x38] sm:$0xff] }
 0x198   :  { %988 = vst.msk [vmem:[#allocation4 + $0x50] sm:$0xff] %vm977_vm13, %v950_v19  ;;  %v2052_v19 = vld [vmem:[%s7353_s3 + $0xb0] sm:$0xff]  ;;  %5453 = vmatpush3.msra.mxu1 %v2037_v18 }
 0x199   :  { %5454 = vmatprep.subr.mxu1 %v2052_v19 }
 0x19a   :  { %v276_v20 = vpop.permute.xlu1 %275 }
 0x19b   :  { %v274_v55 = vpop.permute.xlu0 %273  ;;  %311 = vst.msk [vmem:[#allocation4 + $0x68] sm:$0xff] %vm297_vm6, %v276_v20  ;;  %v2036_v20 = vld [vmem:[%s7353_s3 + $0x30] sm:$0xff] }
 0x19c   :  { %310 = vst.msk [vmem:[#allocation4 + $0x60] sm:$0xff] %vm297_vm6, %v274_v55  ;;  %v2051_v55 = vld [vmem:[%s7353_s3 + $0xa8] sm:$0xff]  ;;  %5455 = vmatpush3.msra.mxu1 %v2036_v20 }
 0x19d   :  { %5456 = vmatprep.subr.mxu1 %v2051_v55 }
 0x19e   :  { %v373_v21 = vpop.permute.xlu1 %372  ;;  %v1005_v24 = vld [vmem:[#allocation4 + $0x58] sm:$0xff] }
 0x19f   :  { %v371_v22 = vpop.permute.xlu0 %370  ;;  %v1004_v23 = vld [vmem:[#allocation4 + $0x50] sm:$0xff]  ;;  %408 = vst.msk [vmem:[#allocation4 + $0x68] sm:$0xff] %vm394_vm7, %v373_v21 }
 0x1a0   :  { %407 = vst.msk [vmem:[#allocation4 + $0x60] sm:$0xff] %vm394_vm7, %v371_v22  ;;  %5579 = vmatprep.mubr.msk.f32.mxu0 %vm1031_vm14, %v1004_v23 }
 0x1a1   :  { %5580 = vmatmul.mubr.msk.f32.gmra.mxu0 %vm1031_vm14, %v1005_v24 }
 0x1a2   :  { %v470_v27 = vpop.permute.xlu1 %469 }
 0x1a3   :  { %v468_v28 = vpop.permute.xlu0 %467  ;;  %505 = vst.msk [vmem:[#allocation4 + $0x68] sm:$0xff] %vm491_vm8, %v470_v27  ;;  %v2035_v27 = vld [vmem:[%s7353_s3 + $0x28] sm:$0xff] }
 0x1a4   :  { %504 = vst.msk [vmem:[#allocation4 + $0x60] sm:$0xff] %vm491_vm8, %v468_v28  ;;  %v2050_v28 = vld [vmem:[%s7353_s3 + $0xa0] sm:$0xff]  ;;  %5457 = vmatpush3.msra.mxu1 %v2035_v27 }
 0x1a5   :  { %5458 = vmatprep.subr.mxu1 %v2050_v28 }
 0x1a6   :  { %v567_v29 = vpop.permute.xlu1 %566 }
 0x1a7   :  { %v565_v30 = vpop.permute.xlu0 %564  ;;  %602 = vst.msk [vmem:[#allocation4 + $0x68] sm:$0xff] %vm588_vm9, %v567_v29 }
 0x1a8   :  { %601 = vst.msk [vmem:[#allocation4 + $0x60] sm:$0xff] %vm588_vm9, %v565_v30 }
 0x1aa   :  { %v664_v26 = vpop.permute.xlu1 %663 }
 0x1ab   :  { %v662_v31 = vpop.permute.xlu0 %661  ;;  %699 = vst.msk [vmem:[#allocation4 + $0x68] sm:$0xff] %vm685_vm10, %v664_v26 }
 0x1ac   :  { %698 = vst.msk [vmem:[#allocation4 + $0x60] sm:$0xff] %vm685_vm10, %v662_v31  ;;  %v2034_v31 = vld [vmem:[%s7353_s3 + $0x20] sm:$0xff] }
 0x1ad   :  { %5459 = vmatpush3.msra.mxu1 %v2034_v31 }
 0x1ae   :  { %v762_v32 = vpop.permute.xlu1 %761 }
 0x1af   :  { %v760_v33 = vpop.permute.xlu0 %759  ;;  %797 = vst.msk [vmem:[#allocation4 + $0x68] sm:$0xff] %vm783_vm11, %v762_v32  ;;  %v2049_v32 = vld [vmem:[%s7353_s3 + $0x98] sm:$0xff] }
 0x1b0   :  { %796 = vst.msk [vmem:[#allocation4 + $0x60] sm:$0xff] %vm783_vm11, %v760_v33  ;;  %v2033_v33 = vld [vmem:[%s7353_s3 + $0x18] sm:$0xff]  ;;  %5460 = vmatprep.subr.mxu1 %v2049_v32 }
 0x1b1   :  { %5461 = vmatpush3.msra.mxu1 %v2033_v33  ;;  %v1443_v33 = vld [vmem:[#allocation3 + $0xa2] sm:$0xff] }
 0x1b2   :  { %v859_v34 = vpop.permute.xlu1 %858 }
 0x1b3   :  { %v857_v36 = vpop.permute.xlu0 %856  ;;  %894 = vst.msk [vmem:[#allocation4 + $0x68] sm:$0xff] %vm880_vm12, %v859_v34  ;;  %v2048_v34 = vld [vmem:[%s7353_s3 + $0x90] sm:$0xff] }
 0x1b4   :  { %893 = vst.msk [vmem:[#allocation4 + $0x60] sm:$0xff] %vm880_vm12, %v857_v36  ;;  %5462 = vmatprep.subr.mxu1 %v2048_v34 }
 0x1b6   :  { %v956_v37 = vpop.permute.xlu1 %955 }
 0x1b7   :  { %v954_v38 = vpop.permute.xlu0 %953  ;;  %991 = vst.msk [vmem:[#allocation4 + $0x68] sm:$0xff] %vm977_vm13, %v956_v37  ;;  %v2032_v37 = vld [vmem:[%s7353_s3 + $0x10] sm:$0xff] }
 0x1b8   :  { %990 = vst.msk [vmem:[#allocation4 + $0x60] sm:$0xff] %vm977_vm13, %v954_v38  ;;  %5463 = vmatpush3.msra.mxu1 %v2032_v37 }
 0x1ba   :  { %v1371_v25 = vpop.permute.xlu1 %1370 }
 0x1bb   :  { %v375_v39 = vpop.permute.xlu0 %374  ;;  %1419 = vst.msk [vmem:[#allocation5] sm:$0xff] %vm1418_vm0, %v1371_v25  ;;  %v2047_v25 = vld [vmem:[%s7353_s3 + $0x88] sm:$0xff] }
 0x1bc   :  { %5464 = vmatprep.subr.mxu1 %v2047_v25 }
 0x1be   :  { %v1468_v1 = vpop.permute.xlu1 %1467  ;;  %v1007_v41 = vld [vmem:[#allocation4 + $0x68] sm:$0xff] }
 0x1bf   :  { %v1006_v40 = vld [vmem:[#allocation4 + $0x60] sm:$0xff]  ;;  %v377_v42 = vpop.permute.xlu0 %376  ;;  %1516 = vst.msk [vmem:[#allocation5] sm:$0xff] %vm1515_vm1, %v1468_v1  ;;  %v2031_v1 = vld [vmem:[%s7353_s3 + $0x8] sm:$0xff] }
 0x1c0   :  { %5582 = vmatprep.mubr.msk.f32.mxu0 %vm1031_vm14, %v1006_v40  ;;  %5465 = vmatpush3.msra.mxu1 %v2031_v1 }
 0x1c1   :  { %5583 = vmatmul.mubr.msk.f32.gmra.mxu0 %vm1031_vm14, %v1007_v41 }
 0x1c2   :  { %v278_v43 = vpop.permute.xlu1 %277 }
 0x1c3   :  { %v474_v59 = vpop.permute.xlu0 %473  ;;  %312 = vst.msk [vmem:[#allocation4 + $0x70] sm:$0xff] %vm297_vm6, %v278_v43 }
 0x1c4   :  { %409 = vst.msk [vmem:[#allocation4 + $0x70] sm:$0xff] %vm394_vm7, %v375_v39 }
 0x1c6   :  { %v280_v44 = vpop.permute.xlu1 %279 }
 0x1c7   :  { %v571_v46 = vpop.permute.xlu0 %570  ;;  %313 = vst.msk [vmem:[#allocation4 + $0x78] sm:$0xff] %vm297_vm6, %v280_v44  ;;  %vm5352_vm6 = vcmask 1024  }
 0x1c8   :  { %410 = vst.msk [vmem:[#allocation4 + $0x78] sm:$0xff] %vm394_vm7, %v377_v42 }
 0x1c9   :  { %507 = vst.msk [vmem:[#allocation4 + $0x78] sm:$0xff] %vm491_vm8, %v474_v59 }
 0x1ca   :  { %v472_v52 = vpop.permute.xlu1 %471  ;;  %604 = vst.msk [vmem:[#allocation4 + $0x78] sm:$0xff] %vm588_vm9, %v571_v46  ;;  %v2046_v46 = vld [vmem:[%s7353_s3 + $0x80] sm:$0xff] }
 0x1cb   :  { %v764_v53 = vpop.permute.xlu0 %763  ;;  %506 = vst.msk [vmem:[#allocation4 + $0x70] sm:$0xff] %vm491_vm8, %v472_v52  ;;  %5466 = vmatprep.subr.mxu1 %v2046_v46 }
 0x1cc   :  { %5467 = vmatpush3.msra.mxu1 %v2030_v49 }
 0x1ce   :  { %v569_v63 = vpop.permute.xlu1 %568 }
 0x1cf   :  { %v766_v0 = vpop.permute.xlu0 %765  ;;  %603 = vst.msk [vmem:[#allocation4 + $0x70] sm:$0xff] %vm588_vm9, %v569_v63 }
 0x1d0   :  { %v5566_v3 = vpop.f32.mrf.mxu0 }
 0x1d1   :  { %v1156_v4 = vadd.f32 %v5566_v3, %v6463_v56 }
 0x1d2   :  { %v1150_v6 = vpop.f32.mrf.mxu0  ;;  %v666_v10 = vpop.permute.xlu1 %665 }
 0x1d3   :  { %v1230_v8 = vmax.f32 %v1156_v4, 0.0  ;;  %v1151_v9 = vadd.f32 %v6463_v56, %v1150_v6  ;;  %700 = vst.msk [vmem:[#allocation4 + $0x70] sm:$0xff] %vm685_vm10, %v666_v10  ;;  %v863_v11 = vpop.permute.xlu0 %862 }
 0x1d4   :  { %798 = vst.msk [vmem:[#allocation4 + $0x70] sm:$0xff] %vm783_vm11, %v764_v53 }
 0x1d5   :  { %1291 = vst.msk [vmem:[#allocation3 + $0x21] sm:$0xff] %vm1245_vm4, %v1230_v8  ;;  %v1229_v51 = vmax.f32 %v1151_v9, 0.0 }
 0x1d6   :  { %v668_v16 = vpop.permute.xlu1 %667 }
 0x1d7   :  { %1290 = vst.msk [vmem:[#allocation3 + $0x11] sm:$0xff] %vm1245_vm4, %v1229_v51  ;;  %v960_v17 = vpop.permute.xlu0 %959 }
 0x1d8   :  { %701 = vst.msk [vmem:[#allocation4 + $0x78] sm:$0xff] %vm685_vm10, %v668_v16 }
 0x1d9   :  { %799 = vst.msk [vmem:[#allocation4 + $0x78] sm:$0xff] %vm783_vm11, %v766_v0 }
 0x1da   :  { %896 = vst.msk [vmem:[#allocation4 + $0x78] sm:$0xff] %vm880_vm12, %v863_v11  ;;  %v861_v21 = vpop.permute.xlu1 %860 }
 0x1db   :  { %993 = vst.msk [vmem:[#allocation4 + $0x78] sm:$0xff] %vm977_vm13, %v960_v17 }
 0x1dc   :  { %895 = vst.msk [vmem:[#allocation4 + $0x70] sm:$0xff] %vm880_vm12, %v861_v21  ;;  %v1758_v22 = vld [vmem:[#allocation3 + $0x20] sm:$0xff] }
 0x1dd   :  { %v1854_v23 = vld [vmem:[#allocation3 + $0x21] sm:$0xff]  ;;  %1790 = vrot.lane.b32.xlu0 %v1758_v22, %s5792_s5  ;;  %1566 = vrot.lane.b32.xlu1 %v1758_v22, %s5790_s19  ;;  %1324 = vst.msk [vmem:[#allocation5 + $0x30] sm:$0xff] %vm1245_vm4, %v1758_v22 }
 0x1de   :  { %v1662_v24 = vld [vmem:[#allocation3 + $0x22] sm:$0xff]  ;;  %1646 = vst.msk [vmem:[#allocation5 + $0x20] sm:$0xff] %vm1245_vm4, %v1854_v23  ;;  %v1532_v29 = vld [vmem:[#allocation3 + $0x10] sm:$0xff]  ;;  %v958_v26 = vpop.permute.xlu1 %957 }
 0x1df   :  { %1966 = vst.msk [vmem:[#allocation5 + $0x10] sm:$0xff] %vm1245_vm4, %v1662_v24  ;;  %v1339_v30 = vld [vmem:[#allocation3 + $0x11] sm:$0xff]  ;;  %1323 = vst.msk [vmem:[#allocation5 + $0x18] sm:$0xff] %vm1245_vm4, %v1532_v29 }
 0x1e0   :  { %1645 = vst.msk [vmem:[#allocation5 + $0x8] sm:$0xff] %vm1245_vm4, %v1339_v30  ;;  %v1661_v44 = vld [vmem:[#allocation3 + $0x12] sm:$0xff] }
 0x1e1   :  { %992 = vst.msk [vmem:[#allocation4 + $0x70] sm:$0xff] %vm977_vm13, %v958_v26  ;;  %1886 = vrot.lane.b32.xlu0 %v1854_v23, %s5790_s19  ;;  %1374 = vrot.lane.b32.xlu1 %v1854_v23, %s5791_s1  ;;  %v2005_v23 = vld [vmem:[#allocation5 + $0xb8] sm:$0xff] }
 0x1e2   :  { %v1387_v36 = vpop.permute.xlu1 %1386  ;;  %v1009_v41 = vld [vmem:[#allocation4 + $0x78] sm:$0xff] }
 0x1e3   :  { %1427 = vst.msk [vmem:[#allocation5 + $0xc0] sm:$0xff] %vm1418_vm0, %v1387_v36 }
 0x1e4   :  { %v5569_v38 = vpop.f32.mrf.mxu0 }
 0x1e5   :  { %v1166_v39 = vadd.f32 %v5569_v38, %v6463_v56  ;;  %1695 = vrot.lane.b32.xlu0 %v1662_v24, %s5791_s1  ;;  %1471 = vrot.lane.b32.xlu1 %v1662_v24, %s5792_s5 }
 0x1e6   :  { %v1160_v40 = vpop.f32.mrf.mxu0  ;;  %v1984_v48 = vld [vmem:[#allocation5 + $0x10] sm:$0xff] }
 0x1e7   :  { %v1232_v42 = vmax.f32 %v1166_v39, 0.0  ;;  %v1161_v43 = vadd.f32 %v6463_v56, %v1160_v40 }
 0x1e8   :  { %v1008_v59 = vld [vmem:[#allocation4 + $0x70] sm:$0xff] }
 0x1e9   :  { %5585 = vmatprep.mubr.msk.f32.mxu0 %vm1031_vm14, %v1008_v59  ;;  %1293 = vst.msk [vmem:[#allocation3 + $0x41] sm:$0xff] %vm1245_vm4, %v1232_v42  ;;  %v1231_v47 = vmax.f32 %v1161_v43, 0.0  ;;  %1693 = vrot.lane.b32.xlu0 %v1661_v44, %s5791_s1 }
 0x1ea   :  { %5586 = vmatmul.mubr.msk.f32.gmra.mxu0 %vm1031_vm14, %v1009_v41  ;;  %1564 = vrot.lane.b32.xlu1 %v1532_v29, %s5790_s19  ;;  %v6646_v29 = vpop.permute.xlu0 %1804 }
 0x1eb   :  { %5596 = vmatprep.mubr.msk.f32.mxu0 %vm1245_vm4, %v1984_v48  ;;  %1292 = vst.msk [vmem:[#allocation3 + $0x31] sm:$0xff] %vm1245_vm4, %v1231_v47 }
 0x1ee   :  { %1372 = vrot.lane.b32.xlu1 %v1339_v30, %s5791_s1  ;;  %v6653_v32 = vpop.permute.xlu0 %1900 }
 0x1f0   :  { %v1760_v50 = vld [vmem:[#allocation3 + $0x40] sm:$0xff] }
 0x1f1   :  { %v1856_v52 = vld [vmem:[#allocation3 + $0x41] sm:$0xff]  ;;  %1794 = vrot.lane.b32.xlu0 %v1760_v50, %s5792_s5  ;;  %1326 = vst.msk [vmem:[#allocation5 + $0x60] sm:$0xff] %vm1245_vm4, %v1760_v50 }
 0x1f2   :  { %v1664_v53 = vld [vmem:[#allocation3 + $0x42] sm:$0xff]  ;;  %1648 = vst.msk [vmem:[#allocation5 + $0x50] sm:$0xff] %vm1245_vm4, %v1856_v52  ;;  %v1951_v35 = vld [vmem:[#allocation3 + $0x32] sm:$0xff]  ;;  %1469 = vrot.lane.b32.xlu1 %v1661_v44, %s5792_s5 }
 0x1f3   :  { %1968 = vst.msk [vmem:[#allocation5 + $0x40] sm:$0xff] %vm1245_vm4, %v1664_v53  ;;  %v1759_v54 = vld [vmem:[#allocation3 + $0x30] sm:$0xff]  ;;  %1967 = vst.msk [vmem:[#allocation5 + $0x28] sm:$0xff] %vm1245_vm4, %v1951_v35 }
 0x1f4   :  { %v1855_v57 = vld [vmem:[#allocation3 + $0x31] sm:$0xff]  ;;  %1325 = vst.msk [vmem:[#allocation5 + $0x48] sm:$0xff] %vm1245_vm4, %v1759_v54 }
 0x1f5   :  { %1647 = vst.msk [vmem:[#allocation5 + $0x38] sm:$0xff] %vm1245_vm4, %v1855_v57  ;;  %1890 = vrot.lane.b32.xlu0 %v1856_v52, %s5790_s19 }
 0x1f6   :  { %1699 = vrot.lane.b32.xlu1 %v1664_v53, %s5791_s1 }
 0x1f9   :  { %1570 = vrot.lane.b32.xlu0 %v1760_v50, %s5790_s19 }
 0x1fa   :  { %v1987_v58 = vld [vmem:[#allocation5 + $0x28] sm:$0xff]  ;;  %v1990_v60 = vld [vmem:[#allocation5 + $0x40] sm:$0xff] }
 0x1fb   :  { %5597 = vmatmul.mubr.msk.f32.vlgmr.msra.gmra.mxu0 %vm1245_vm4, %v1987_v58 }
 0x1fc   :  { %5599 = vmatprep.mubr.msk.f32.mxu0 %vm1245_vm4, %v1990_v60 }
 0x1fd   :  { %1378 = vrot.lane.b32.xlu0 %v1856_v52, %s5791_s1 }
 0x201   :  { %1475 = vrot.lane.b32.xlu0 %v1664_v53, %s5792_s5 }
 0x204   :  { %v5572_v61 = vpop.f32.mrf.mxu0 }
 0x205   :  { %v1176_v62 = vadd.f32 %v5572_v61, %v6463_v56  ;;  %1792 = vrot.lane.b32.xlu0 %v1759_v54, %s5792_s5 }
 0x206   :  { %v1170_v63 = vpop.f32.mrf.mxu0 }
 0x207   :  { %v1234_v0 = vmax.f32 %v1176_v62, 0.0  ;;  %v1171_v45 = vadd.f32 %v6463_v56, %v1170_v63 }
 0x209   :  { %1295 = vst.msk [vmem:[#allocation3 + $0x61] sm:$0xff] %vm1245_vm4, %v1234_v0  ;;  %v1233_v2 = vmax.f32 %v1171_v45, 0.0  ;;  %1888 = vrot.lane.b32.xlu0 %v1855_v57, %s5790_s19 }
 0x20b   :  { %1294 = vst.msk [vmem:[#allocation3 + $0x51] sm:$0xff] %vm1245_vm4, %v1233_v2 }
 0x20d   :  { %1697 = vrot.lane.b32.xlu0 %v1951_v35, %s5791_s1 }
 0x210   :  { %v1954_v3 = vld [vmem:[#allocation3 + $0x62] sm:$0xff] }
 0x211   :  { %v1762_v4 = vld [vmem:[#allocation3 + $0x60] sm:$0xff]  ;;  %1970 = vst.msk [vmem:[#allocation5 + $0x70] sm:$0xff] %vm1245_vm4, %v1954_v3  ;;  %1568 = vrot.lane.b32.xlu0 %v1759_v54, %s5790_s19 }
 0x212   :  { %v1858_v5 = vld [vmem:[#allocation3 + $0x61] sm:$0xff]  ;;  %1798 = vrot.lane.b32.xlu1 %v1762_v4, %s5792_s5  ;;  %1328 = vst.msk [vmem:[#allocation5 + $0x90] sm:$0xff] %vm1245_vm4, %v1762_v4  ;;  %v1953_v6 = vld [vmem:[#allocation3 + $0x52] sm:$0xff] }
 0x213   :  { %1650 = vst.msk [vmem:[#allocation5 + $0x80] sm:$0xff] %vm1245_vm4, %v1858_v5  ;;  %v1761_v7 = vld [vmem:[#allocation3 + $0x50] sm:$0xff]  ;;  %1969 = vst.msk [vmem:[#allocation5 + $0x58] sm:$0xff] %vm1245_vm4, %v1953_v6 }
 0x214   :  { %v1857_v8 = vld [vmem:[#allocation3 + $0x51] sm:$0xff]  ;;  %1327 = vst.msk [vmem:[#allocation5 + $0x78] sm:$0xff] %vm1245_vm4, %v1761_v7 }
 0x215   :  { %1649 = vst.msk [vmem:[#allocation5 + $0x68] sm:$0xff] %vm1245_vm4, %v1857_v8  ;;  %1376 = vrot.lane.b32.xlu0 %v1855_v57, %s5791_s1 }
 0x216   :  { %1894 = vrot.lane.b32.xlu1 %v1858_v5, %s5790_s19 }
 0x218   :  { %v1996_v10 = vld [vmem:[#allocation5 + $0x70] sm:$0xff] }
 0x219   :  { %1473 = vrot.lane.b32.xlu0 %v1951_v35, %s5792_s5 }
 0x21a   :  { %1574 = vrot.lane.b32.xlu1 %v1762_v4, %s5790_s19  ;;  %v1993_v9 = vld [vmem:[#allocation5 + $0x58] sm:$0xff] }
 0x21b   :  { %5600 = vmatmul.mubr.msk.f32.gmra.mxu0 %vm1245_vm4, %v1993_v9 }
 0x21c   :  { %5602 = vmatprep.mubr.msk.f32.mxu0 %vm1245_vm4, %v1996_v10 }
 0x21d   :  { %1703 = vrot.lane.b32.xlu0 %v1954_v3, %s5791_s1 }
 0x21e   :  { %1382 = vrot.lane.b32.xlu1 %v1858_v5, %s5791_s1 }
 0x221   :  { %v5575_v11 = vpop.f32.mrf.mxu0 }
 0x222   :  { %1479 = vrot.lane.b32.xlu1 %v1954_v3, %s5792_s5  ;;  %v1186_v12 = vadd.f32 %v5575_v11, %v6463_v56 }
 0x223   :  { %v1180_v13 = vpop.f32.mrf.mxu0 }
 0x224   :  { %v1236_v51 = vmax.f32 %v1186_v12, 0.0  ;;  %v1181_v14 = vadd.f32 %v6463_v56, %v1180_v13 }
 0x226   :  { %1796 = vrot.lane.b32.xlu1 %v1761_v7, %s5792_s5  ;;  %1297 = vst.msk [vmem:[#allocation3 + $0x81] sm:$0xff] %vm1245_vm4, %v1236_v51  ;;  %v1235_v15 = vmax.f32 %v1181_v14, 0.0 }
 0x228   :  { %1296 = vst.msk [vmem:[#allocation3 + $0x71] sm:$0xff] %vm1245_vm4, %v1235_v15 }
 0x22a   :  { %1892 = vrot.lane.b32.xlu1 %v1857_v8, %s5790_s19 }
 0x22d   :  { %v1764_v16 = vld [vmem:[#allocation3 + $0x80] sm:$0xff] }
 0x22e   :  { %1701 = vrot.lane.b32.xlu1 %v1953_v6, %s5791_s1  ;;  %v1860_v17 = vld [vmem:[#allocation3 + $0x81] sm:$0xff]  ;;  %1802 = vrot.lane.b32.xlu0 %v1764_v16, %s5792_s5 }
 0x22f   :  { %v1668_v18 = vld [vmem:[#allocation3 + $0x82] sm:$0xff]  ;;  %1652 = vst.msk [vmem:[#allocation5 + $0xb0] sm:$0xff] %vm1245_vm4, %v1860_v17  ;;  %v1955_v19 = vld [vmem:[#allocation3 + $0x72] sm:$0xff] }
 0x230   :  { %1972 = vst.msk [vmem:[#allocation5 + $0xa0] sm:$0xff] %vm1245_vm4, %v1668_v18  ;;  %v1763_v20 = vld [vmem:[#allocation3 + $0x70] sm:$0xff]  ;;  %1971 = vst.msk [vmem:[#allocation5 + $0x88] sm:$0xff] %vm1245_vm4, %v1955_v19 }
 0x231   :  { %v1859_v55 = vld [vmem:[#allocation3 + $0x71] sm:$0xff]  ;;  %1329 = vst.msk [vmem:[#allocation5 + $0xa8] sm:$0xff] %vm1245_vm4, %v1763_v20 }
 0x232   :  { %1651 = vst.msk [vmem:[#allocation5 + $0x98] sm:$0xff] %vm1245_vm4, %v1859_v55  ;;  %1572 = vrot.lane.b32.xlu1 %v1761_v7, %s5790_s19  ;;  %1898 = vrot.lane.b32.xlu0 %v1860_v17, %s5790_s19 }
 0x236   :  { %1380 = vrot.lane.b32.xlu1 %v1857_v8, %s5791_s1  ;;  %1707 = vrot.lane.b32.xlu0 %v1668_v18, %s5791_s1 }
 0x237   :  { %v1999_v21 = vld [vmem:[#allocation5 + $0x88] sm:$0xff]  ;;  %v2002_v22 = vld [vmem:[#allocation5 + $0xa0] sm:$0xff] }
 0x238   :  { %5603 = vmatmul.mubr.msk.f32.gmra.mxu0 %vm1245_vm4, %v1999_v21 }
 0x239   :  { %5605 = vmatprep.mubr.msk.f32.mxu0 %vm1245_vm4, %v2002_v22 }
 0x23a   :  { %1477 = vrot.lane.b32.xlu1 %v1953_v6, %s5792_s5  ;;  %1800 = vrot.lane.b32.xlu0 %v1763_v20, %s5792_s5 }
 0x23c   :  { %5606 = vmatmul.mubr.msk.f32.gmra.mxu0 %vm1245_vm4, %v2005_v23 }
 0x23e   :  { %1578 = vrot.lane.b32.xlu1 %v1764_v16, %s5790_s19  ;;  %1896 = vrot.lane.b32.xlu0 %v1859_v55, %s5790_s19 }
 0x241   :  { %v5578_v24 = vpop.f32.mrf.mxu0 }
 0x242   :  { %1576 = vrot.lane.b32.xlu1 %v1763_v20, %s5790_s19  ;;  %v1196_v27 = vadd.f32 %v5578_v24, %v6463_v56  ;;  %1705 = vrot.lane.b32.xlu0 %v1955_v19, %s5791_s1 }
 0x243   :  { %v1190_v28 = vpop.f32.mrf.mxu0 }
 0x244   :  { %v1238_v30 = vmax.f32 %v1196_v27, 0.0  ;;  %v1191_v26 = vadd.f32 %v6463_v56, %v1190_v28 }
 0x246   :  { %1384 = vrot.lane.b32.xlu1 %v1859_v55, %s5791_s1  ;;  %1299 = vst.msk [vmem:[#allocation3 + $0xc1] sm:$0xff] %vm1245_vm4, %v1238_v30  ;;  %v1237_v31 = vmax.f32 %v1191_v26, 0.0 }
 0x248   :  { %1298 = vst.msk [vmem:[#allocation3 + $0xb1] sm:$0xff] %vm1245_vm4, %v1237_v31 }
 0x24a   :  { %1481 = vrot.lane.b32.xlu1 %v1955_v19, %s5792_s5 }
 0x24d   :  { %v1958_v34 = vld [vmem:[#allocation3 + $0xc2] sm:$0xff] }
 0x24e   :  { %1483 = vrot.lane.b32.xlu1 %v1443_v33, %s5792_s5  ;;  %v1766_v36 = vld [vmem:[#allocation3 + $0xc0] sm:$0xff]  ;;  %1974 = vst.msk [vmem:[#allocation5 + $0xd0] sm:$0xff] %vm1245_vm4, %v1958_v34 }
 0x24f   :  { %v1862_v37 = vld [vmem:[#allocation3 + $0xc1] sm:$0xff]  ;;  %1806 = vrot.lane.b32.xlu0 %v1766_v36, %s5792_s5  ;;  %1332 = vst.msk [vmem:[#allocation5 + $0xf0] sm:$0xff] %vm1245_vm4, %v1766_v36  ;;  %v1791_v38 = vpop.permute.xlu0 %1790  ;;  %v1567_v25 = vpop.permute.xlu1 %1566  ;;  %v1540_v39 = vld [vmem:[#allocation3 + $0xb0] sm:$0xff] }
 0x250   :  { %1654 = vst.msk [vmem:[#allocation5 + $0xe0] sm:$0xff] %vm1245_vm4, %v1862_v37  ;;  %v1347_v1 = vld [vmem:[#allocation3 + $0xb1] sm:$0xff]  ;;  %1331 = vst.msk [vmem:[#allocation5 + $0xd8] sm:$0xff] %vm1245_vm4, %v1540_v39 }
 0x251   :  { %1653 = vst.msk [vmem:[#allocation5 + $0xc8] sm:$0xff] %vm1245_vm4, %v1347_v1  ;;  %v1669_v40 = vld [vmem:[#allocation3 + $0xb2] sm:$0xff] }
 0x252   :  { %1580 = vrot.lane.b32.xlu1 %v1540_v39, %s5790_s19 }
 0x253   :  { %1709 = vrot.lane.b32.xlu0 %v1669_v40, %s5791_s1  ;;  %v1887_v41 = vpop.permute.xlu0 %1886  ;;  %v1375_v42 = vpop.permute.xlu1 %1374 }
 0x254   :  { %1421 = vst.msk [vmem:[#allocation5 + $0x30] sm:$0xff] %vm1418_vm0, %v1375_v42 }
 0x255   :  { %v2008_v43 = vld [vmem:[#allocation5 + $0xd0] sm:$0xff] }
 0x256   :  { %1388 = vrot.lane.b32.xlu1 %v1347_v1, %s5791_s1  ;;  %5608 = vmatprep.mubr.msk.f32.mxu0 %vm1245_vm4, %v2008_v43 }
 0x257   :  { %1902 = vrot.lane.b32.xlu0 %v1862_v37, %s5790_s19  ;;  %v1696_v59 = vpop.permute.xlu0 %1695  ;;  %v1472_v44 = vpop.permute.xlu1 %1471 }
 0x258   :  { %1742 = vst.msk [vmem:[#allocation5 + $0x20] sm:$0xff] %vm1418_vm0, %v1696_v59 }
 0x259   :  { %1518 = vst.msk [vmem:[#allocation5 + $0x30] sm:$0xff] %vm1515_vm1, %v1472_v44 }
 0x25a   :  { %1485 = vrot.lane.b32.xlu1 %v1669_v40, %s5792_s5 }
 0x25b   :  { %1711 = vrot.lane.b32.xlu0 %v1958_v34, %s5791_s1  ;;  %v1694_v46 = vpop.permute.xlu0 %1693 }
 0x25c   :  { %1741 = vst.msk [vmem:[#allocation5 + $0x8] sm:$0xff] %vm1418_vm0, %v1694_v46  ;;  %v1565_v47 = vpop.permute.xlu1 %1564 }
 0x25d   :  { %1838 = vst.msk [vmem:[#allocation5 + $0x8] sm:$0xff] %vm1515_vm1, %v1791_v38 }
 0x25e   :  { %1613 = vst.msk [vmem:[#allocation5] sm:$0xff] %vm1612_vm2, %v1565_v47  ;;  %1582 = vrot.lane.b32.xlu1 %v1766_v36, %s5790_s19  ;;  %1934 = vst.msk [vmem:[#allocation5 + $0x8] sm:$0xff] %vm1612_vm2, %v1887_v41 }
 0x260   :  { %v1373_v48 = vpop.permute.xlu1 %1372 }
 0x261   :  { %1420 = vst.msk [vmem:[#allocation5 + $0x18] sm:$0xff] %vm1418_vm0, %v1373_v48  ;;  %v5581_v49 = vpop.f32.mrf.mxu0 }
 0x262   :  { %1390 = vrot.lane.b32.xlu1 %v1862_v37, %s5791_s1  ;;  %v1206_v50 = vadd.f32 %v5581_v49, %v6463_v56 }
 0x263   :  { %v1200_v52 = vpop.f32.mrf.mxu0  ;;  %v1795_v53 = vpop.permute.xlu0 %1794 }
 0x264   :  { %v1240_v35 = vmax.f32 %v1206_v50, 0.0  ;;  %v1201_v54 = vadd.f32 %v6463_v56, %v1200_v52  ;;  %v1470_v57 = vpop.permute.xlu1 %1469 }
 0x265   :  { %1517 = vst.msk [vmem:[#allocation5 + $0x18] sm:$0xff] %vm1515_vm1, %v1470_v57  ;;  %v1983_v58 = vld [vmem:[#allocation5 + $0x8] sm:$0xff]  ;;  %v1982_v61 = vld [vmem:[#allocation5] sm:$0xff] }
 0x266   :  { %1487 = vrot.lane.b32.xlu1 %v1958_v34, %s5792_s5  ;;  %1301 = vst.msk [vmem:[#allocation3 + $0xe1] sm:$0xff] %vm1245_vm4, %v1240_v35  ;;  %v1239_v60 = vmax.f32 %v1201_v54, 0.0  ;;  %2185 = vmatprep.mubr.f32.mxu1 %v1983_v58 }
 0x267   :  { %1614 = vst.msk [vmem:[#allocation5 + $0x18] sm:$0xff] %vm1612_vm2, %v1567_v25  ;;  %v1891_v62 = vpop.permute.xlu0 %1890  ;;  %2186 = vmatmul.mubr.f32.vlgmr.msra.gmra.mxu1 %v1982_v61 }
 0x268   :  { %1300 = vst.msk [vmem:[#allocation3 + $0xd1] sm:$0xff] %vm1245_vm4, %v1239_v60  ;;  %v1700_v63 = vpop.permute.xlu1 %1699 }
 0x269   :  { %1744 = vst.msk [vmem:[#allocation5 + $0x50] sm:$0xff] %vm1418_vm0, %v1700_v63 }
 0x26b   :  { %v6687_v0 = vpop.permute.xlu0 %1570 }
 0x26d   :  { %v1768_v45 = vld [vmem:[#allocation3 + $0xe0] sm:$0xff] }
 0x26e   :  { %v1864_v2 = vld [vmem:[#allocation3 + $0xe1] sm:$0xff]  ;;  %1334 = vst.msk [vmem:[#allocation5 + $0x120] sm:$0xff] %vm1245_vm4, %v1768_v45  ;;  %v1985_v55 = vld [vmem:[#allocation5 + $0x18] sm:$0xff] }
 0x26f   :  { %v1672_v3 = vld [vmem:[#allocation3 + $0xe2] sm:$0xff]  ;;  %1656 = vst.msk [vmem:[#allocation5 + $0x110] sm:$0xff] %vm1245_vm4, %v1864_v2  ;;  %v1379_v4 = vpop.permute.xlu0 %1378  ;;  %v1767_v5 = vld [vmem:[#allocation3 + $0xd0] sm:$0xff] }
 0x270   :  { %v1863_v6 = vld [vmem:[#allocation3 + $0xd1] sm:$0xff]  ;;  %1976 = vst.msk [vmem:[#allocation5 + $0x100] sm:$0xff] %vm1245_vm4, %v1672_v3  ;;  %1808 = vrot.lane.b32.xlu0 %v1767_v5, %s5792_s5  ;;  %1584 = vrot.lane.b32.xlu1 %v1767_v5, %s5790_s19  ;;  %1333 = vst.msk [vmem:[#allocation5 + $0x108] sm:$0xff] %vm1245_vm4, %v1767_v5 }
 0x271   :  { %v1671_v7 = vld [vmem:[#allocation3 + $0xd2] sm:$0xff]  ;;  %1423 = vst.msk [vmem:[#allocation5 + $0x60] sm:$0xff] %vm1418_vm0, %v1379_v4 }
 0x272   :  { %1975 = vst.msk [vmem:[#allocation5 + $0xe8] sm:$0xff] %vm1245_vm4, %v1671_v7  ;;  %1655 = vst.msk [vmem:[#allocation5 + $0xf8] sm:$0xff] %vm1245_vm4, %v1863_v6 }
 0x273   :  { %v1476_v8 = vpop.permute.xlu0 %1475 }
 0x274   :  { %1520 = vst.msk [vmem:[#allocation5 + $0x60] sm:$0xff] %vm1515_vm1, %v1476_v8  ;;  %1904 = vrot.lane.b32.xlu0 %v1863_v6, %s5790_s19  ;;  %1392 = vrot.lane.b32.xlu1 %v1863_v6, %s5791_s1 }
 0x277   :  { %v1793_v9 = vpop.permute.xlu0 %1792  ;;  %v2014_v11 = vld [vmem:[#allocation5 + $0x100] sm:$0xff] }
 0x278   :  { %1839 = vst.msk [vmem:[#allocation5 + $0x20] sm:$0xff] %vm1515_vm1, %v1793_v9  ;;  %1713 = vrot.lane.b32.xlu0 %v1671_v7, %s5791_s1  ;;  %1489 = vrot.lane.b32.xlu1 %v1671_v7, %s5792_s5 }
 0x279   :  { %v2011_v10 = vld [vmem:[#allocation5 + $0xe8] sm:$0xff] }
 0x27a   :  { %5609 = vmatmul.mubr.msk.f32.gmra.mxu0 %vm1245_vm4, %v2011_v10 }
 0x27b   :  { %5611 = vmatprep.mubr.msk.f32.mxu0 %vm1245_vm4, %v2014_v11  ;;  %v1889_v12 = vpop.permute.xlu0 %1888 }
 0x27c   :  { %1935 = vst.msk [vmem:[#allocation5 + $0x20] sm:$0xff] %vm1612_vm2, %v1889_v12  ;;  %1810 = vrot.lane.b32.xlu0 %v1768_v45, %s5792_s5  ;;  %1586 = vrot.lane.b32.xlu1 %v1768_v45, %s5790_s19 }
 0x27f   :  { %v1698_v13 = vpop.permute.xlu0 %1697 }
 0x280   :  { %1743 = vst.msk [vmem:[#allocation5 + $0x38] sm:$0xff] %vm1418_vm0, %v1698_v13  ;;  %1906 = vrot.lane.b32.xlu0 %v1864_v2, %s5790_s19  ;;  %1394 = vrot.lane.b32.xlu1 %v1864_v2, %s5791_s1 }
 0x281   :  { %1840 = vst.msk [vmem:[#allocation5 + $0x38] sm:$0xff] %vm1515_vm1, %v1795_v53  ;;  %v5584_v51 = vpop.f32.mrf.mxu0 }
 0x282   :  { %1936 = vst.msk [vmem:[#allocation5 + $0x38] sm:$0xff] %vm1612_vm2, %v1891_v62  ;;  %v1216_v14 = vadd.f32 %v5584_v51, %v6463_v56 }
 0x283   :  { %v1210_v15 = vpop.f32.mrf.mxu0  ;;  %v1569_v16 = vpop.permute.xlu0 %1568  ;;  %v1986_v17 = vld [vmem:[#allocation5 + $0x20] sm:$0xff] }
 0x284   :  { %v1242_v18 = vmax.f32 %v1216_v14, 0.0  ;;  %v1211_v19 = vadd.f32 %v6463_v56, %v1210_v15  ;;  %1615 = vst.msk [vmem:[#allocation5 + $0x30] sm:$0xff] %vm1612_vm2, %v1569_v16  ;;  %v1799_v20 = vpop.permute.xlu1 %1798  ;;  %2190 = vmatprep.mubr.f32.mxu1 %v1986_v17  ;;  %1715 = vrot.lane.b32.xlu0 %v1672_v3, %s5791_s1  ;;  %v1965_v16 = vld [vmem:[#allocation3 + $0x132] sm:$0xff] }
 0x285   :  { %2191 = vmatmul.mubr.f32.gmra.mxu1 %v1985_v55  ;;  %1491 = vrot.lane.b32.xlu1 %v1672_v3, %s5792_s5  ;;  %1981 = vst.msk [vmem:[#allocation5 + $0x178] sm:$0xff] %vm1245_vm4, %v1965_v16 }
 0x286   :  { %1303 = vst.msk [vmem:[#allocation3 + $0x101] sm:$0xff] %vm1245_vm4, %v1242_v18  ;;  %v1241_v21 = vmax.f32 %v1211_v19, 0.0 }
 0x287   :  { %v1377_v22 = vpop.permute.xlu0 %1376 }
 0x288   :  { %1302 = vst.msk [vmem:[#allocation3 + $0xf1] sm:$0xff] %vm1245_vm4, %v1241_v21  ;;  %v1895_v23 = vpop.permute.xlu1 %1894 }
 0x289   :  { %1422 = vst.msk [vmem:[#allocation5 + $0x48] sm:$0xff] %vm1418_vm0, %v1377_v22  ;;  %v1989_v24 = vld [vmem:[#allocation5 + $0x38] sm:$0xff] }
 0x28a   :  { %2195 = vmatprep.mubr.f32.mxu1 %v1989_v24 }
 0x28b   :  { %v1474_v27 = vpop.permute.xlu0 %1473  ;;  %v1988_v28 = vld [vmem:[#allocation5 + $0x30] sm:$0xff] }
 0x28c   :  { %1519 = vst.msk [vmem:[#allocation5 + $0x48] sm:$0xff] %vm1515_vm1, %v1474_v27  ;;  %v6723_v30 = vpop.permute.xlu1 %1574  ;;  %2196 = vmatmul.mubr.f32.gmra.mxu1 %v1988_v28  ;;  %v2029_v22 = vld [vmem:[#allocation5 + $0x178] sm:$0xff]  ;;  %v1773_v27 = vld [vmem:[#allocation3 + $0x130] sm:$0xff] }
 0x28d   :  { %1616 = vst.msk [vmem:[#allocation5 + $0x48] sm:$0xff] %vm1612_vm2, %v6687_v0  ;;  %v1770_v26 = vld [vmem:[#allocation3 + $0x100] sm:$0xff] }
 0x28e   :  { %v1866_v31 = vld [vmem:[#allocation3 + $0x101] sm:$0xff]  ;;  %1336 = vst.msk [vmem:[#allocation5 + $0x150] sm:$0xff] %vm1245_vm4, %v1770_v26 }
 0x28f   :  { %v1674_v33 = vld [vmem:[#allocation3 + $0x102] sm:$0xff]  ;;  %1658 = vst.msk [vmem:[#allocation5 + $0x140] sm:$0xff] %vm1245_vm4, %v1866_v31  ;;  %v1704_v34 = vpop.permute.xlu0 %1703  ;;  %v1769_v36 = vld [vmem:[#allocation3 + $0xf0] sm:$0xff] }
 0x290   :  { %1978 = vst.msk [vmem:[#allocation5 + $0x130] sm:$0xff] %vm1245_vm4, %v1674_v33  ;;  %v1865_v37 = vld [vmem:[#allocation3 + $0xf1] sm:$0xff]  ;;  %v1383_v25 = vpop.permute.xlu1 %1382  ;;  %1812 = vrot.lane.b32.xlu0 %v1769_v36, %s5792_s5  ;;  %1588 = vrot.lane.b32.xlu1 %v1769_v36, %s5790_s19  ;;  %1335 = vst.msk [vmem:[#allocation5 + $0x138] sm:$0xff] %vm1245_vm4, %v1769_v36 }
 0x291   :  { %v1673_v38 = vld [vmem:[#allocation3 + $0xf2] sm:$0xff]  ;;  %1746 = vst.msk [vmem:[#allocation5 + $0x80] sm:$0xff] %vm1418_vm0, %v1704_v34  ;;  %1425 = vst.msk [vmem:[#allocation5 + $0x90] sm:$0xff] %vm1418_vm0, %v1383_v25 }
 0x292   :  { %1977 = vst.msk [vmem:[#allocation5 + $0x118] sm:$0xff] %vm1245_vm4, %v1673_v38  ;;  %1657 = vst.msk [vmem:[#allocation5 + $0x128] sm:$0xff] %vm1245_vm4, %v1865_v37 }
 0x294   :  { %v1480_v39 = vpop.permute.xlu1 %1479  ;;  %1908 = vrot.lane.b32.xlu0 %v1865_v37, %s5790_s19  ;;  %1396 = vrot.lane.b32.xlu1 %v1865_v37, %s5791_s1  ;;  %v1991_v48 = vld [vmem:[#allocation5 + $0x48] sm:$0xff] }
 0x295   :  { %1522 = vst.msk [vmem:[#allocation5 + $0x90] sm:$0xff] %vm1515_vm1, %v1480_v39 }
 0x297   :  { %v2020_v40 = vld [vmem:[#allocation5 + $0x130] sm:$0xff] }
 0x298   :  { %v1797_v41 = vpop.permute.xlu1 %1796  ;;  %1717 = vrot.lane.b32.xlu0 %v1673_v38, %s5791_s1  ;;  %1493 = vrot.lane.b32.xlu1 %v1673_v38, %s5792_s5 }
 0x299   :  { %v2017_v1 = vld [vmem:[#allocation5 + $0x118] sm:$0xff]  ;;  %1841 = vst.msk [vmem:[#allocation5 + $0x50] sm:$0xff] %vm1515_vm1, %v1797_v41 }
 0x29a   :  { %5612 = vmatmul.mubr.msk.f32.gmra.mxu0 %vm1245_vm4, %v2017_v1 }
 0x29b   :  { %5614 = vmatprep.mubr.msk.f32.mxu0 %vm1245_vm4, %v2020_v40 }
 0x29c   :  { %v1893_v42 = vpop.permute.xlu1 %1892  ;;  %1814 = vrot.lane.b32.xlu0 %v1770_v26, %s5792_s5  ;;  %1590 = vrot.lane.b32.xlu1 %v1770_v26, %s5790_s19 }
 0x29d   :  { %1937 = vst.msk [vmem:[#allocation5 + $0x50] sm:$0xff] %vm1612_vm2, %v1893_v42 }
 0x2a0   :  { %v1702_v43 = vpop.permute.xlu1 %1701  ;;  %1910 = vrot.lane.b32.xlu0 %v1866_v31, %s5790_s19  ;;  %v1803_v59 = vpop.permute.xlu0 %1802  ;;  %1398 = vrot.lane.b32.xlu1 %v1866_v31, %s5791_s1  ;;  %v1869_v31 = vld [vmem:[#allocation3 + $0x131] sm:$0xff] }
 0x2a1   :  { %1745 = vst.msk [vmem:[#allocation5 + $0x68] sm:$0xff] %vm1418_vm0, %v1702_v43 }
 0x2a2   :  { %1842 = vst.msk [vmem:[#allocation5 + $0x68] sm:$0xff] %vm1515_vm1, %v1799_v20 }
 0x2a3   :  { %1938 = vst.msk [vmem:[#allocation5 + $0x68] sm:$0xff] %vm1612_vm2, %v1895_v23 }
 0x2a4   :  { %v1573_v44 = vpop.permute.xlu1 %1572  ;;  %v1899_v46 = vpop.permute.xlu0 %1898  ;;  %v1992_v47 = vld [vmem:[#allocation5 + $0x50] sm:$0xff]  ;;  %1719 = vrot.lane.b32.xlu0 %v1674_v33, %s5791_s1  ;;  %1495 = vrot.lane.b32.xlu1 %v1674_v33, %s5792_s5 }
 0x2a5   :  { %1617 = vst.msk [vmem:[#allocation5 + $0x60] sm:$0xff] %vm1612_vm2, %v1573_v44  ;;  %2200 = vmatprep.mubr.f32.mxu1 %v1992_v47 }
 0x2a6   :  { %2201 = vmatmul.mubr.f32.gmra.mxu1 %v1991_v48 }
 0x2a8   :  { %v1381_v49 = vpop.permute.xlu1 %1380  ;;  %v1708_v50 = vpop.permute.xlu0 %1707 }
 0x2a9   :  { %1424 = vst.msk [vmem:[#allocation5 + $0x78] sm:$0xff] %vm1418_vm0, %v1381_v49  ;;  %1748 = vst.msk [vmem:[#allocation5 + $0xb0] sm:$0xff] %vm1418_vm0, %v1708_v50 }
 0x2aa   :  { %v5587_v52 = vpop.f32.mrf.mxu0  ;;  %1845 = vst.msk [vmem:[#allocation5 + $0xb0] sm:$0xff] %vm1515_vm1, %v6646_v29  ;;  %v1995_v35 = vld [vmem:[#allocation5 + $0x68] sm:$0xff] }
 0x2ab   :  { %v1226_v53 = vadd.f32 %v5587_v52, %v6463_v56  ;;  %1941 = vst.msk [vmem:[#allocation5 + $0xb0] sm:$0xff] %vm1612_vm2, %v6653_v32  ;;  %2205 = vmatprep.mubr.f32.mxu1 %v1995_v35 }
 0x2ac   :  { %v1220_v54 = vpop.f32.mrf.mxu0  ;;  %v1478_v60 = vpop.permute.xlu1 %1477  ;;  %v1994_v62 = vld [vmem:[#allocation5 + $0x60] sm:$0xff] }
 0x2ad   :  { %v1244_v57 = vmax.f32 %v1226_v53, 0.0  ;;  %v1221_v58 = vadd.f32 %v6463_v56, %v1220_v54  ;;  %v1801_v61 = vpop.permute.xlu0 %1800  ;;  %1521 = vst.msk [vmem:[#allocation5 + $0x78] sm:$0xff] %vm1515_vm1, %v1478_v60  ;;  %2206 = vmatmul.mubr.f32.gmra.mxu1 %v1994_v62 }
 0x2ae   :  { %1843 = vst.msk [vmem:[#allocation5 + $0x80] sm:$0xff] %vm1515_vm1, %v1801_v61 }
 0x2af   :  { %1305 = vst.msk [vmem:[#allocation3 + $0x121] sm:$0xff] %vm1245_vm4, %v1244_v57  ;;  %v1243_v29 = vmax.f32 %v1221_v58, 0.0 }
 0x2b0   :  { %1618 = vst.msk [vmem:[#allocation5 + $0x78] sm:$0xff] %vm1612_vm2, %v6723_v30  ;;  %v1579_v32 = vpop.permute.xlu1 %1578 }
 0x2b1   :  { %1304 = vst.msk [vmem:[#allocation3 + $0x111] sm:$0xff] %vm1245_vm4, %v1243_v29  ;;  %v1897_v63 = vpop.permute.xlu0 %1896 }
 0x2b2   :  { %1939 = vst.msk [vmem:[#allocation5 + $0x80] sm:$0xff] %vm1612_vm2, %v1897_v63  ;;  %v2004_v14 = vld [vmem:[#allocation5 + $0xb0] sm:$0xff] }
 0x2b4   :  { %v1577_v56 = vpop.permute.xlu1 %1576 }
 0x2b5   :  { %v1706_v0 = vpop.permute.xlu0 %1705  ;;  %1619 = vst.msk [vmem:[#allocation5 + $0x90] sm:$0xff] %vm1612_vm2, %v1577_v56 }
 0x2b6   :  { %1747 = vst.msk [vmem:[#allocation5 + $0x98] sm:$0xff] %vm1418_vm0, %v1706_v0  ;;  %v1868_v45 = vld [vmem:[#allocation3 + $0x121] sm:$0xff] }
 0x2b7   :  { %1844 = vst.msk [vmem:[#allocation5 + $0x98] sm:$0xff] %vm1515_vm1, %v1803_v59  ;;  %v1676_v2 = vld [vmem:[#allocation3 + $0x122] sm:$0xff]  ;;  %v1997_v8 = vld [vmem:[#allocation5 + $0x78] sm:$0xff] }
 0x2b8   :  { %1660 = vst.msk [vmem:[#allocation5 + $0x170] sm:$0xff] %vm1245_vm4, %v1868_v45  ;;  %v1771_v3 = vld [vmem:[#allocation3 + $0x110] sm:$0xff]  ;;  %1980 = vst.msk [vmem:[#allocation5 + $0x160] sm:$0xff] %vm1245_vm4, %v1676_v2  ;;  %v1385_v6 = vpop.permute.xlu1 %1384  ;;  %v1772_v17 = vld [vmem:[#allocation3 + $0x120] sm:$0xff] }
 0x2b9   :  { %1940 = vst.msk [vmem:[#allocation5 + $0x98] sm:$0xff] %vm1612_vm2, %v1899_v46  ;;  %v1867_v4 = vld [vmem:[#allocation3 + $0x111] sm:$0xff]  ;;  %1816 = vrot.lane.b32.xlu0 %v1771_v3, %s5792_s5  ;;  %v1998_v7 = vld [vmem:[#allocation5 + $0x80] sm:$0xff]  ;;  %1592 = vrot.lane.b32.xlu1 %v1771_v3, %s5790_s19 }
 0x2ba   :  { %v1675_v5 = vld [vmem:[#allocation3 + $0x112] sm:$0xff]  ;;  %1659 = vst.msk [vmem:[#allocation5 + $0x158] sm:$0xff] %vm1245_vm4, %v1867_v4  ;;  %1337 = vst.msk [vmem:[#allocation5 + $0x168] sm:$0xff] %vm1245_vm4, %v1771_v3  ;;  %2210 = vmatprep.mubr.f32.mxu1 %v1998_v7 }
 0x2bb   :  { %1979 = vst.msk [vmem:[#allocation5 + $0x148] sm:$0xff] %vm1245_vm4, %v1675_v5  ;;  %2211 = vmatmul.mubr.f32.gmra.mxu1 %v1997_v8 }
 0x2bc   :  { %1426 = vst.msk [vmem:[#allocation5 + $0xa8] sm:$0xff] %vm1418_vm0, %v1385_v6  ;;  %v1482_v9 = vpop.permute.xlu1 %1481  ;;  %v2000_v11 = vld [vmem:[#allocation5 + $0x90] sm:$0xff] }
 0x2bd   :  { %1912 = vrot.lane.b32.xlu0 %v1867_v4, %s5790_s19  ;;  %1400 = vrot.lane.b32.xlu1 %v1867_v4, %s5791_s1  ;;  %1523 = vst.msk [vmem:[#allocation5 + $0xa8] sm:$0xff] %vm1515_vm1, %v1482_v9 }
 0x2be   :  { %1620 = vst.msk [vmem:[#allocation5 + $0xa8] sm:$0xff] %vm1612_vm2, %v1579_v32 }
 0x2bf   :  { %v2026_v15 = vld [vmem:[#allocation5 + $0x160] sm:$0xff] }
 0x2c0   :  { %v2001_v10 = vld [vmem:[#allocation5 + $0x98] sm:$0xff]  ;;  %v1484_v13 = vpop.permute.xlu1 %1483 }
 0x2c1   :  { %2215 = vmatprep.mubr.f32.mxu1 %v2001_v10  ;;  %1721 = vrot.lane.b32.xlu0 %v1675_v5, %s5791_s1  ;;  %v1807_v51 = vpop.permute.xlu0 %1806  ;;  %1524 = vst.msk [vmem:[#allocation5 + $0xc0] sm:$0xff] %vm1515_vm1, %v1484_v13 }
 0x2c2   :  { %v2023_v12 = vld [vmem:[#allocation5 + $0x148] sm:$0xff]  ;;  %2216 = vmatmul.mubr.f32.gmra.mxu1 %v2000_v11  ;;  %1497 = vrot.lane.b32.xlu1 %v1675_v5, %s5792_s5 }
 0x2c3   :  { %2220 = vmatprep.mubr.f32.mxu1 %v2004_v14  ;;  %5615 = vmatmul.mubr.msk.f32.gmra.mxu0 %vm1245_vm4, %v2023_v12 }
 0x2c4   :  { %5617 = vmatprep.mubr.msk.f32.mxu0 %vm1245_vm4, %v2026_v15  ;;  %v1581_v18 = vpop.permute.xlu1 %1580 }
 0x2c5   :  { %1818 = vrot.lane.b32.xlu0 %v1772_v17, %s5792_s5  ;;  %v1710_v19 = vpop.permute.xlu0 %1709  ;;  %1621 = vst.msk [vmem:[#allocation5 + $0xc0] sm:$0xff] %vm1612_vm2, %v1581_v18  ;;  %v2003_v20 = vld [vmem:[#allocation5 + $0xa8] sm:$0xff] }
 0x2c6   :  { %1749 = vst.msk [vmem:[#allocation5 + $0xc8] sm:$0xff] %vm1418_vm0, %v1710_v19  ;;  %1594 = vrot.lane.b32.xlu1 %v1772_v17, %s5790_s19  ;;  %2221 = vmatmul.mubr.f32.gmra.mxu1 %v2003_v20 }
 0x2c7   :  { %1846 = vst.msk [vmem:[#allocation5 + $0xc8] sm:$0xff] %vm1515_vm1, %v1807_v51  ;;  %5618 = vmatmul.mubr.msk.f32.gmra.mxu0 %vm1245_vm4, %v2029_v22  ;;  %vm2468_vm4 = vcmask 523264  }
 0x2c8   :  { %v1389_v55 = vpop.permute.xlu1 %1388 }
 0x2c9   :  { %1914 = vrot.lane.b32.xlu0 %v1868_v45, %s5790_s19  ;;  %v1903_v21 = vpop.permute.xlu0 %1902  ;;  %1428 = vst.msk [vmem:[#allocation5 + $0xd8] sm:$0xff] %vm1418_vm0, %v1389_v55 }
 0x2ca   :  { %1942 = vst.msk [vmem:[#allocation5 + $0xc8] sm:$0xff] %vm1612_vm2, %v1903_v21 }
 0x2cc   :  { %v1486_v23 = vpop.permute.xlu1 %1485  ;;  %v2006_v26 = vld [vmem:[#allocation5 + $0xc0] sm:$0xff] }
 0x2cd   :  { %1723 = vrot.lane.b32.xlu0 %v1676_v2, %s5791_s1  ;;  %v1712_v24 = vpop.permute.xlu0 %1711  ;;  %1525 = vst.msk [vmem:[#allocation5 + $0xd8] sm:$0xff] %vm1515_vm1, %v1486_v23 }
 0x2ce   :  { %1750 = vst.msk [vmem:[#allocation5 + $0xe0] sm:$0xff] %vm1418_vm0, %v1712_v24 }
 0x2d0   :  { %v1583_v28 = vpop.permute.xlu1 %1582 }
 0x2d1   :  { %1820 = vrot.lane.b32.xlu0 %v1773_v27, %s5792_s5  ;;  %v2007_v30 = vld [vmem:[#allocation5 + $0xc8] sm:$0xff]  ;;  %1622 = vst.msk [vmem:[#allocation5 + $0xd8] sm:$0xff] %vm1612_vm2, %v1583_v28  ;;  %v3004_v27 = vld [vmem:[#allocation13 + $0xf8] sm:$0xff] }
 0x2d2   :  { %2225 = vmatprep.mubr.f32.mxu1 %v2007_v30  ;;  %v3068_v28 = vld [vmem:[#allocation13 + $0x2f8] sm:$0xff]  ;;  %4185 = vmatprep.subr.mxu1 %v3004_v27  ;;  %v3003_v30 = vld [vmem:[#allocation13 + $0xf0] sm:$0xff] }
 0x2d3   :  { %2226 = vmatmul.mubr.f32.gmra.mxu1 %v2006_v26  ;;  %4256 = vmatprep.subr.mxu0 %v3068_v28  ;;  %v3067_v26 = vld [vmem:[#allocation13 + $0x2f0] sm:$0xff] }
 0x2d4   :  { %v1391_v33 = vpop.permute.xlu1 %1390  ;;  %4186 = vmatpush1.msra.mxu1 %v3003_v30  ;;  %4257 = vmatpush1.msra.mxu0 %v3067_v26  ;;  %v3043_v27 = vld [vmem:[#allocation13 + $0x230] sm:$0xff]  ;;  %v2978_v30 = vld [vmem:[#allocation13 + $0x28] sm:$0xff] }
 0x2d5   :  { %1916 = vrot.lane.b32.xlu0 %v1869_v31, %s5790_s19  ;;  %1429 = vst.msk [vmem:[#allocation5 + $0xf0] sm:$0xff] %vm1418_vm0, %v1391_v33  ;;  %v3002_v31 = vld [vmem:[#allocation13 + $0xe8] sm:$0xff] }
 0x2d6   :  { %v3066_v33 = vld [vmem:[#allocation13 + $0x2e8] sm:$0xff]  ;;  %4187 = vmatprep.subr.mxu1 %v3002_v31 }
 0x2d7   :  { %4258 = vmatprep.subr.mxu0 %v3066_v33  ;;  %v3042_v26 = vld [vmem:[#allocation13 + $0x228] sm:$0xff]  ;;  %v2977_v33 = vld [vmem:[#allocation13 + $0x20] sm:$0xff] }
 0x2d8   :  { %v1488_v34 = vpop.permute.xlu1 %1487  ;;  %v2009_v43 = vld [vmem:[#allocation5 + $0xd8] sm:$0xff] }
 0x2d9   :  { %1526 = vst.msk [vmem:[#allocation5 + $0xf0] sm:$0xff] %vm1515_vm1, %v1488_v34  ;;  %v3001_v34 = vld [vmem:[#allocation13 + $0xe0] sm:$0xff] }
 0x2da   :  { %4188 = vmatpush1.msra.mxu1 %v3001_v34  ;;  %v3041_v34 = vld [vmem:[#allocation13 + $0x220] sm:$0xff] }
 0x2e2   :  { %v1809_v36 = vpop.permute.xlu0 %1808  ;;  %v1585_v37 = vpop.permute.xlu1 %1584 }
 0x2e3   :  { %1847 = vst.msk [vmem:[#allocation5 + $0xe0] sm:$0xff] %vm1515_vm1, %v1809_v36  ;;  %v3065_v36 = vld [vmem:[#allocation13 + $0x2e0] sm:$0xff] }
 0x2e4   :  { %1623 = vst.msk [vmem:[#allocation5 + $0xf0] sm:$0xff] %vm1612_vm2, %v1585_v37  ;;  %v3000_v37 = vld [vmem:[#allocation13 + $0xd8] sm:$0xff]  ;;  %4259 = vmatpush1.msra.mxu0 %v3065_v36 }
 0x2e5   :  { %4189 = vmatprep.subr.mxu1 %v3000_v37  ;;  %v2976_v37 = vld [vmem:[#allocation13 + $0x18] sm:$0xff] }
 0x2e6   :  { %v1905_v38 = vpop.permute.xlu0 %1904  ;;  %v1393_v25 = vpop.permute.xlu1 %1392 }
 0x2e7   :  { %1943 = vst.msk [vmem:[#allocation5 + $0xe0] sm:$0xff] %vm1612_vm2, %v1905_v38 }
 0x2e8   :  { %1430 = vst.msk [vmem:[#allocation5 + $0x108] sm:$0xff] %vm1418_vm0, %v1393_v25  ;;  %v3064_v25 = vld [vmem:[#allocation13 + $0x2d8] sm:$0xff] }
 0x2e9   :  { %4260 = vmatprep.subr.mxu0 %v3064_v25  ;;  %v2975_v25 = vld [vmem:[#allocation13 + $0x10] sm:$0xff] }
 0x2ea   :  { %v1714_v39 = vpop.permute.xlu0 %1713  ;;  %v1490_v1 = vpop.permute.xlu1 %1489 }
 0x2eb   :  { %1751 = vst.msk [vmem:[#allocation5 + $0xf8] sm:$0xff] %vm1418_vm0, %v1714_v39  ;;  %v2012_v48 = vld [vmem:[#allocation5 + $0xf0] sm:$0xff] }
 0x2ec   :  { %1527 = vst.msk [vmem:[#allocation5 + $0x108] sm:$0xff] %vm1515_vm1, %v1490_v1  ;;  %v2999_v39 = vld [vmem:[#allocation13 + $0xd0] sm:$0xff] }
 0x2ed   :  { %v3063_v1 = vld [vmem:[#allocation13 + $0x2d0] sm:$0xff]  ;;  %4190 = vmatpush1.msra.mxu1 %v2999_v39 }
 0x2ee   :  { %v1811_v40 = vpop.permute.xlu0 %1810  ;;  %v2010_v41 = vld [vmem:[#allocation5 + $0xe0] sm:$0xff]  ;;  %v1587_v42 = vpop.permute.xlu1 %1586  ;;  %4261 = vmatpush1.msra.mxu0 %v3063_v1  ;;  %v3039_v39 = vld [vmem:[#allocation13 + $0x210] sm:$0xff] }
 0x2ef   :  { %1848 = vst.msk [vmem:[#allocation5 + $0xf8] sm:$0xff] %vm1515_vm1, %v1811_v40  ;;  %2230 = vmatprep.mubr.f32.mxu1 %v2010_v41  ;;  %v2998_v40 = vld [vmem:[#allocation13 + $0xc8] sm:$0xff] }
 0x2f0   :  { %1624 = vst.msk [vmem:[#allocation5 + $0x108] sm:$0xff] %vm1612_vm2, %v1587_v42  ;;  %2231 = vmatmul.mubr.f32.gmra.mxu1 %v2009_v43  ;;  %v3062_v41 = vld [vmem:[#allocation13 + $0x2c8] sm:$0xff]  ;;  %v2997_v43 = vld [vmem:[#allocation13 + $0xc0] sm:$0xff]  ;;  %4191 = vmatprep.subr.mxu1 %v2998_v40 }
 0x2f1   :  { %4262 = vmatprep.subr.mxu0 %v3062_v41  ;;  %4192 = vmatpush1.msra.mxu1 %v2997_v43  ;;  %v2974_v41 = vld [vmem:[#allocation13 + $0x8] sm:$0xff]  ;;  %v2973_v43 = vld [vmem:[#allocation13] sm:$0xff] }
 0x2f2   :  { %v1907_v59 = vpop.permute.xlu0 %1906  ;;  %v1395_v44 = vpop.permute.xlu1 %1394 }
 0x2f3   :  { %1944 = vst.msk [vmem:[#allocation5 + $0xf8] sm:$0xff] %vm1612_vm2, %v1907_v59  ;;  %v3061_v59 = vld [vmem:[#allocation13 + $0x2c0] sm:$0xff] }
 0x2f4   :  { %1431 = vst.msk [vmem:[#allocation5 + $0x120] sm:$0xff] %vm1418_vm0, %v1395_v44  ;;  %v2996_v44 = vld [vmem:[#allocation13 + $0xb8] sm:$0xff]  ;;  %4263 = vmatpush1.msra.mxu0 %v3061_v59  ;;  %v3037_v59 = vld [vmem:[#allocation13 + $0x200] sm:$0xff] }
 0x2f5   :  { %4193 = vmatprep.subr.mxu1 %v2996_v44  ;;  %v3036_v44 = vld [vmem:[#allocation13 + $0x1f8] sm:$0xff] }
 0x2f6   :  { %v1716_v46 = vpop.permute.xlu0 %1715 }
 0x2f7   :  { %1752 = vst.msk [vmem:[#allocation5 + $0x110] sm:$0xff] %vm1418_vm0, %v1716_v46  ;;  %v1492_v47 = vpop.permute.xlu1 %1491  ;;  %v2015_v62 = vld [vmem:[#allocation5 + $0x108] sm:$0xff] }
 0x2f8   :  { %1528 = vst.msk [vmem:[#allocation5 + $0x120] sm:$0xff] %vm1515_vm1, %v1492_v47  ;;  %v3060_v47 = vld [vmem:[#allocation13 + $0x2b8] sm:$0xff] }
 0x2f9   :  { %4264 = vmatprep.subr.mxu0 %v3060_v47 }
 0x2fa   :  { %v2013_v49 = vld [vmem:[#allocation5 + $0xf8] sm:$0xff] }
 0x2fb   :  { %2235 = vmatprep.mubr.f32.mxu1 %v2013_v49  ;;  %v3059_v49 = vld [vmem:[#allocation13 + $0x2b0] sm:$0xff] }
 0x2fc   :  { %2236 = vmatmul.mubr.f32.gmra.mxu1 %v2012_v48  ;;  %v2995_v48 = vld [vmem:[#allocation13 + $0xb0] sm:$0xff]  ;;  %4265 = vmatpush1.msra.mxu0 %v3059_v49 }
 0x2fd   :  { %4194 = vmatpush1.msra.mxu1 %v2995_v48  ;;  %v3100_v48 = vld [vmem:[#allocation13 + $0x3f8] sm:$0xff]  ;;  %v3035_v49 = vld [vmem:[#allocation13 + $0x1f0] sm:$0xff] }
 0x302   :  { %v1813_v50 = vpop.permute.xlu0 %1812  ;;  %v1589_v52 = vpop.permute.xlu1 %1588 }
 0x303   :  { %1849 = vst.msk [vmem:[#allocation5 + $0x110] sm:$0xff] %vm1515_vm1, %v1813_v50  ;;  %v2994_v50 = vld [vmem:[#allocation13 + $0xa8] sm:$0xff] }
 0x304   :  { %1625 = vst.msk [vmem:[#allocation5 + $0x120] sm:$0xff] %vm1612_vm2, %v1589_v52  ;;  %v3058_v52 = vld [vmem:[#allocation13 + $0x2a8] sm:$0xff]  ;;  %4195 = vmatprep.subr.mxu1 %v2994_v50  ;;  %v3099_v50 = vld [vmem:[#allocation13 + $0x3f0] sm:$0xff] }
 0x305   :  { %4266 = vmatprep.subr.mxu0 %v3058_v52 }
 0x306   :  { %v1909_v53 = vpop.permute.xlu0 %1908  ;;  %v1397_v35 = vpop.permute.xlu1 %1396 }
 0x307   :  { %1945 = vst.msk [vmem:[#allocation5 + $0x110] sm:$0xff] %vm1612_vm2, %v1909_v53  ;;  %v2993_v53 = vld [vmem:[#allocation13 + $0xa0] sm:$0xff] }
 0x308   :  { %1432 = vst.msk [vmem:[#allocation5 + $0x138] sm:$0xff] %vm1418_vm0, %v1397_v35  ;;  %v3057_v35 = vld [vmem:[#allocation13 + $0x2a0] sm:$0xff]  ;;  %4196 = vmatpush1.msra.mxu1 %v2993_v53 }
 0x309   :  { %4267 = vmatpush1.msra.mxu0 %v3057_v35  ;;  %v3034_v35 = vld [vmem:[#allocation13 + $0x1e8] sm:$0xff] }
 0x30a   :  { %v1718_v54 = vpop.permute.xlu0 %1717  ;;  %v1494_v57 = vpop.permute.xlu1 %1493 }
 0x30b   :  { %1753 = vst.msk [vmem:[#allocation5 + $0x128] sm:$0xff] %vm1418_vm0, %v1718_v54  ;;  %v2018_v0 = vld [vmem:[#allocation5 + $0x120] sm:$0xff] }
 0x30c   :  { %1529 = vst.msk [vmem:[#allocation5 + $0x138] sm:$0xff] %vm1515_vm1, %v1494_v57  ;;  %v2992_v54 = vld [vmem:[#allocation13 + $0x98] sm:$0xff] }
 0x30d   :  { %4197 = vmatprep.subr.mxu1 %v2992_v54  ;;  %v3098_v54 = vld [vmem:[#allocation13 + $0x3e8] sm:$0xff] }
 0x30e   :  { %v1815_v58 = vpop.permute.xlu0 %1814  ;;  %v2016_v60 = vld [vmem:[#allocation5 + $0x110] sm:$0xff]  ;;  %v1591_v61 = vpop.permute.xlu1 %1590 }
 0x30f   :  { %1850 = vst.msk [vmem:[#allocation5 + $0x128] sm:$0xff] %vm1515_vm1, %v1815_v58  ;;  %2240 = vmatprep.mubr.f32.mxu1 %v2016_v60  ;;  %v3056_v58 = vld [vmem:[#allocation13 + $0x298] sm:$0xff]  ;;  %v2991_v60 = vld [vmem:[#allocation13 + $0x90] sm:$0xff] }
 0x310   :  { %1626 = vst.msk [vmem:[#allocation5 + $0x138] sm:$0xff] %vm1612_vm2, %v1591_v61  ;;  %2241 = vmatmul.mubr.f32.gmra.mxu1 %v2015_v62  ;;  %v3055_v61 = vld [vmem:[#allocation13 + $0x290] sm:$0xff]  ;;  %v2990_v62 = vld [vmem:[#allocation13 + $0x88] sm:$0xff]  ;;  %4268 = vmatprep.subr.mxu0 %v3056_v58  ;;  %v3097_v58 = vld [vmem:[#allocation13 + $0x3e0] sm:$0xff] }
 0x311   :  { %4198 = vmatpush1.msra.mxu1 %v2991_v60  ;;  %4269 = vmatpush1.msra.mxu0 %v3055_v61 }
 0x312   :  { %v1911_v29 = vpop.permute.xlu0 %1910  ;;  %v1399_v32 = vpop.permute.xlu1 %1398  ;;  %4199 = vmatprep.subr.mxu1 %v2990_v62  ;;  %v3032_v62 = vld [vmem:[#allocation13 + $0x1d8] sm:$0xff] }
 0x313   :  { %1946 = vst.msk [vmem:[#allocation5 + $0x128] sm:$0xff] %vm1612_vm2, %v1911_v29 }
 0x314   :  { %1433 = vst.msk [vmem:[#allocation5 + $0x150] sm:$0xff] %vm1418_vm0, %v1399_v32  ;;  %v3054_v32 = vld [vmem:[#allocation13 + $0x288] sm:$0xff] }
 0x315   :  { %4270 = vmatprep.subr.mxu0 %v3054_v32  ;;  %v3031_v32 = vld [vmem:[#allocation13 + $0x1d0] sm:$0xff] }
 0x316   :  { %v1720_v63 = vpop.permute.xlu0 %1719  ;;  %v1496_v56 = vpop.permute.xlu1 %1495 }
 0x317   :  { %1754 = vst.msk [vmem:[#allocation5 + $0x140] sm:$0xff] %vm1418_vm0, %v1720_v63  ;;  %v2021_v8 = vld [vmem:[#allocation5 + $0x138] sm:$0xff]  ;;  %v2989_v63 = vld [vmem:[#allocation13 + $0x80] sm:$0xff] }
 0x318   :  { %1530 = vst.msk [vmem:[#allocation5 + $0x150] sm:$0xff] %vm1515_vm1, %v1496_v56  ;;  %v3053_v56 = vld [vmem:[#allocation13 + $0x280] sm:$0xff]  ;;  %4200 = vmatpush1.msra.mxu1 %v2989_v63  ;;  %v3095_v63 = vld [vmem:[#allocation13 + $0x3d0] sm:$0xff] }
 0x319   :  { %4271 = vmatpush1.msra.mxu0 %v3053_v56  ;;  %v3030_v56 = vld [vmem:[#allocation13 + $0x1c8] sm:$0xff] }
 0x31a   :  { %v2019_v45 = vld [vmem:[#allocation5 + $0x128] sm:$0xff] }
 0x31b   :  { %2245 = vmatprep.mubr.f32.mxu1 %v2019_v45  ;;  %v2988_v45 = vld [vmem:[#allocation13 + $0x78] sm:$0xff] }
 0x31c   :  { %2246 = vmatmul.mubr.f32.gmra.mxu1 %v2018_v0  ;;  %4201 = vmatprep.subr.mxu1 %v2988_v45 }
 0x327   :  { %v6844_v51 = vpop.f32.mrf.mxu1 }
 0x329   :  { %v6847_v17 = vpop.f32.mrf.mxu1 }
 0x32b   :  { %v1817_v2 = vpop.permute.xlu0 %1816  ;;  %v1593_v3 = vpop.permute.xlu1 %1592 }
 0x32c   :  { %1851 = vst.msk [vmem:[#allocation5 + $0x140] sm:$0xff] %vm1515_vm1, %v1817_v2  ;;  %v3052_v2 = vld [vmem:[#allocation13 + $0x278] sm:$0xff] }
 0x32d   :  { %1627 = vst.msk [vmem:[#allocation5 + $0x150] sm:$0xff] %vm1612_vm2, %v1593_v3  ;;  %v2987_v3 = vld [vmem:[#allocation13 + $0x70] sm:$0xff]  ;;  %4272 = vmatprep.subr.mxu0 %v3052_v2  ;;  %v3094_v2 = vld [vmem:[#allocation13 + $0x3c8] sm:$0xff] }
 0x32e   :  { %4202 = vmatpush1.msra.mxu1 %v2987_v3  ;;  %v3029_v3 = vld [vmem:[#allocation13 + $0x1c0] sm:$0xff] }
 0x32f   :  { %v1913_v4 = vpop.permute.xlu0 %1912  ;;  %v1401_v5 = vpop.permute.xlu1 %1400 }
 0x330   :  { %1947 = vst.msk [vmem:[#allocation5 + $0x140] sm:$0xff] %vm1612_vm2, %v1913_v4  ;;  %v3051_v4 = vld [vmem:[#allocation13 + $0x270] sm:$0xff] }
 0x331   :  { %1434 = vst.msk [vmem:[#allocation5 + $0x168] sm:$0xff] %vm1418_vm0, %v1401_v5  ;;  %v2986_v5 = vld [vmem:[#allocation13 + $0x68] sm:$0xff]  ;;  %4273 = vmatpush1.msra.mxu0 %v3051_v4  ;;  %v3093_v4 = vld [vmem:[#allocation13 + $0x3c0] sm:$0xff] }
 0x332   :  { %4203 = vmatprep.subr.mxu1 %v2986_v5 }
 0x333   :  { %v1722_v6 = vpop.permute.xlu0 %1721 }
 0x334   :  { %1755 = vst.msk [vmem:[#allocation5 + $0x158] sm:$0xff] %vm1418_vm0, %v1722_v6  ;;  %v1498_v7 = vpop.permute.xlu1 %1497  ;;  %v2024_v14 = vld [vmem:[#allocation5 + $0x150] sm:$0xff] }
 0x335   :  { %1531 = vst.msk [vmem:[#allocation5 + $0x168] sm:$0xff] %vm1515_vm1, %v1498_v7  ;;  %v3050_v6 = vld [vmem:[#allocation13 + $0x268] sm:$0xff]  ;;  %v2985_v7 = vld [vmem:[#allocation13 + $0x60] sm:$0xff] }
 0x336   :  { %4274 = vmatprep.subr.mxu0 %v3050_v6  ;;  %4204 = vmatpush1.msra.mxu1 %v2985_v7  ;;  %v3028_v7 = vld [vmem:[#allocation13 + $0x1b8] sm:$0xff] }
 0x337   :  { %v1819_v9 = vpop.permute.xlu0 %1818  ;;  %v2022_v10 = vld [vmem:[#allocation5 + $0x140] sm:$0xff] }
 0x338   :  { %1852 = vst.msk [vmem:[#allocation5 + $0x158] sm:$0xff] %vm1515_vm1, %v1819_v9  ;;  %2250 = vmatprep.mubr.f32.mxu1 %v2022_v10  ;;  %v1595_v11 = vpop.permute.xlu1 %1594  ;;  %v2984_v9 = vld [vmem:[#allocation13 + $0x58] sm:$0xff] }
 0x339   :  { %2251 = vmatmul.mubr.f32.gmra.mxu1 %v2021_v8  ;;  %1628 = vst.msk [vmem:[#allocation5 + $0x168] sm:$0xff] %vm1612_vm2, %v1595_v11  ;;  %v3049_v8 = vld [vmem:[#allocation13 + $0x260] sm:$0xff]  ;;  %v3048_v10 = vld [vmem:[#allocation13 + $0x258] sm:$0xff]  ;;  %v2983_v11 = vld [vmem:[#allocation13 + $0x50] sm:$0xff]  ;;  %4205 = vmatprep.subr.mxu1 %v2984_v9  ;;  %v5470_v9 = vadd.f32 %v6847_v17, %v6844_v51 }
 0x33a   :  { %4275 = vmatpush1.msra.mxu0 %v3049_v8  ;;  %4206 = vmatpush1.msra.mxu1 %v2983_v11  ;;  %v3092_v8 = vld [vmem:[#allocation13 + $0x3b8] sm:$0xff]  ;;  %v3091_v11 = vld [vmem:[#allocation13 + $0x3b0] sm:$0xff] }
 0x33b   :  { %v1915_v12 = vpop.permute.xlu0 %1914  ;;  %4276 = vmatprep.subr.mxu0 %v3048_v10  ;;  %v3027_v10 = vld [vmem:[#allocation13 + $0x1b0] sm:$0xff]  ;;  %v3088_v51 = vld [vmem:[#allocation13 + $0x398] sm:$0xff] }
 0x33c   :  { %1948 = vst.msk [vmem:[#allocation5 + $0x158] sm:$0xff] %vm1612_vm2, %v1915_v12  ;;  %v3047_v12 = vld [vmem:[#allocation13 + $0x250] sm:$0xff] }
 0x33d   :  { %4277 = vmatpush1.msra.mxu0 %v3047_v12  ;;  %v6880_v12 = vld [vmem:[#allocation12] ss:$0 sm:$0xff]  ;;  %v3023_v17 = vld [vmem:[#allocation13 + $0x190] sm:$0xff] }
 0x33f   :  { %v1724_v13 = vpop.permute.xlu0 %1723 }
 0x340   :  { %1756 = vst.msk [vmem:[#allocation5 + $0x170] sm:$0xff] %vm1418_vm0, %v1724_v13  ;;  %v2027_v21 = vld [vmem:[#allocation5 + $0x168] sm:$0xff] }
 0x341   :  { %v2982_v13 = vld [vmem:[#allocation13 + $0x48] sm:$0xff] }
 0x342   :  { %4207 = vmatprep.subr.mxu1 %v2982_v13 }
 0x343   :  { %v1821_v15 = vpop.permute.xlu0 %1820  ;;  %v2025_v16 = vld [vmem:[#allocation5 + $0x158] sm:$0xff] }
 0x344   :  { %1853 = vst.msk [vmem:[#allocation5 + $0x170] sm:$0xff] %vm1515_vm1, %v1821_v15  ;;  %2255 = vmatprep.mubr.f32.mxu1 %v2025_v16  ;;  %v2981_v15 = vld [vmem:[#allocation13 + $0x40] sm:$0xff] }
 0x345   :  { %2256 = vmatmul.mubr.f32.gmra.mxu1 %v2024_v14  ;;  %v6849_v18 = vpop.f32.mrf.mxu1  ;;  %v3046_v14 = vld [vmem:[#allocation13 + $0x248] sm:$0xff]  ;;  %v3045_v16 = vld [vmem:[#allocation13 + $0x240] sm:$0xff] }
 0x346   :  { %4278 = vmatprep.subr.mxu0 %v3046_v14  ;;  %4208 = vmatpush1.msra.mxu1 %v2981_v15  ;;  %v3026_v14 = vld [vmem:[#allocation13 + $0x1a8] sm:$0xff] }
 0x347   :  { %v1917_v19 = vpop.permute.xlu0 %1916  ;;  %v6852_v20 = vpop.f32.mrf.mxu1  ;;  %4279 = vmatpush1.msra.mxu0 %v3045_v16  ;;  %v3090_v15 = vld [vmem:[#allocation13 + $0x3a8] sm:$0xff]  ;;  %v3025_v16 = vld [vmem:[#allocation13 + $0x1a0] sm:$0xff] }
 0x348   :  { %1949 = vst.msk [vmem:[#allocation5 + $0x170] sm:$0xff] %vm1612_vm2, %v1917_v19  ;;  %v6860_v19 = vpop.f32.mrf.mxu0 }
 0x34a   :  { %v6864_v36 = vpop.f32.mrf.mxu0 }
 0x34c   :  { %v5474_v55 = vpop.f32.mrf.mxu1  ;;  %v6866_v1 = vpop.f32.mrf.mxu0 }
 0x34e   :  { %v5475_v22 = vpop.f32.mrf.mxu1  ;;  %v6870_v53 = vpop.f32.mrf.mxu0 }
 0x34f   :  { %v2028_v23 = vld [vmem:[#allocation5 + $0x170] sm:$0xff]  ;;  %v6854_v24 = vadd.f32 %v5475_v22, %v5474_v55  ;;  %v3044_v22 = vld [vmem:[#allocation13 + $0x238] sm:$0xff] }
 0x350   :  { %2260 = vmatprep.mubr.f32.mxu1 %v2028_v23  ;;  %4280 = vmatprep.subr.mxu0 %v3044_v22  ;;  %v2979_v23 = vld [vmem:[#allocation13 + $0x30] sm:$0xff]  ;;  %v6872_v60 = vpop.f32.mrf.mxu0 }
 0x351   :  { %2261 = vmatmul.mubr.f32.gmra.mxu1 %v2027_v21  ;;  %v2980_v21 = vld [vmem:[#allocation13 + $0x38] sm:$0xff]  ;;  %4281 = vmatpush1.msra.mxu0 %v3043_v27  ;;  %v3087_v22 = vld [vmem:[#allocation13 + $0x390] sm:$0xff] }
 0x352   :  { %4209 = vmatprep.subr.mxu1 %v2980_v21  ;;  %4282 = vmatprep.subr.mxu0 %v3042_v26  ;;  %v6876_v6 = vpop.f32.mrf.mxu0  ;;  %v3024_v21 = vld [vmem:[#allocation13 + $0x198] sm:$0xff]  ;;  %v3021_v26 = vld [vmem:[#allocation13 + $0x180] sm:$0xff] }
 0x353   :  { %4210 = vmatpush1.msra.mxu1 %v2979_v23  ;;  %4283 = vmatpush1.msra.mxu0 %v3041_v34  ;;  %v2188_v23 = vadd.f32 %v5470_v9, %v6880_v12  ;;  %v3074_v9 = vld [vmem:[#allocation13 + $0x328] sm:$0xff] }
 0x354   :  { %4211 = vmatprep.subr.mxu1 %v2978_v30  ;;  %v6882_v13 = vpop.f32.mrf.mxu0  ;;  %v3086_v30 = vld [vmem:[#allocation13 + $0x388] sm:$0xff] }
 0x355   :  { %4212 = vmatpush1.msra.mxu1 %v2977_v33  ;;  %v3085_v33 = vld [vmem:[#allocation13 + $0x380] sm:$0xff] }
 0x356   :  { %4213 = vmatprep.subr.mxu1 %v2976_v37  ;;  %v6885_v27 = vpop.f32.mrf.mxu0  ;;  %v3020_v37 = vld [vmem:[#allocation13 + $0x178] sm:$0xff] }
 0x357   :  { %4214 = vmatpush1.msra.mxu1 %v2975_v25  ;;  %v2333_v25 = vadd.f32 %v6864_v36, %v2188_v23  ;;  %v3080_v36 = vld [vmem:[#allocation13 + $0x358] sm:$0xff] }
 0x358   :  { %4215 = vmatprep.subr.mxu1 %v2974_v41  ;;  %v6888_v41 = vpop.f32.mrf.mxu0 }
 0x359   :  { %4216 = vmatpush1.msra.mxu1 %v2973_v43  ;;  %v3018_v43 = vld [vmem:[#allocation13 + $0x168] sm:$0xff] }
 0x35a   :  { %4217 = vmatprep.subr.mxu1 %v3036_v44 }
 0x35b   :  { %4218 = vmatpush2.msra.mxu1 %v3035_v49  ;;  %v3016_v49 = vld [vmem:[#allocation13 + $0x158] sm:$0xff] }
 0x35c   :  { %4219 = vmatprep.subr.mxu1 %v3034_v35 }
 0x366   :  { %v5477_v38 = vpop.f32.mrf.mxu1 }
 0x368   :  { %v5478_v42 = vpop.f32.mrf.mxu1 }
 0x369   :  { %v6856_v46 = vadd.f32 %v5478_v42, %v5477_v38  ;;  %v3040_v38 = vld [vmem:[#allocation13 + $0x218] sm:$0xff]  ;;  %v3038_v42 = vld [vmem:[#allocation13 + $0x208] sm:$0xff] }
 0x36a   :  { %4284 = vmatprep.subr.mxu0 %v3040_v38  ;;  %v3084_v38 = vld [vmem:[#allocation13 + $0x378] sm:$0xff] }
 0x36b   :  { %4285 = vmatpush1.msra.mxu0 %v3039_v39  ;;  %v3019_v39 = vld [vmem:[#allocation13 + $0x170] sm:$0xff] }
 0x36c   :  { %4286 = vmatprep.subr.mxu0 %v3038_v42 }
 0x36d   :  { %v5480_v57 = vpop.f32.mrf.mxu1  ;;  %4287 = vmatpush1.msra.mxu0 %v3037_v59  ;;  %v3082_v59 = vld [vmem:[#allocation13 + $0x368] sm:$0xff] }
 0x36e   :  { %4288 = vmatprep.subr.mxu0 %v3100_v48  ;;  %v3081_v48 = vld [vmem:[#allocation13 + $0x360] sm:$0xff] }
 0x36f   :  { %v5481_v29 = vpop.f32.mrf.mxu1  ;;  %4289 = vmatpush2.msra.mxu0 %v3099_v50  ;;  %v6890_v50 = vmax.f32 %v2333_v25, 0.0  ;;  %v3069_v25 = vld [vmem:[#allocation13 + $0x300] sm:$0xff] }
 0x370   :  { %v6858_v0 = vadd.f32 %v5481_v29, %v5480_v57  ;;  %v3033_v57 = vld [vmem:[#allocation13 + $0x1e0] sm:$0xff]  ;;  %4290 = vmatprep.subr.mxu0 %v3098_v54  ;;  %v3096_v29 = vld [vmem:[#allocation13 + $0x3d8] sm:$0xff]  ;;  %v3015_v54 = vld [vmem:[#allocation13 + $0x150] sm:$0xff] }
 0x371   :  { %4220 = vmatpush2.msra.mxu1 %v3033_v57  ;;  %4291 = vmatpush2.msra.mxu0 %v3097_v58  ;;  %v3079_v57 = vld [vmem:[#allocation13 + $0x350] sm:$0xff]  ;;  %v2372_v58 = vpop.f32.mrf.mxu0  ;;  %v2452_v23 = vrot.slane %v6890_v50, 5 }
 0x372   :  { %4221 = vmatprep.subr.mxu1 %v3032_v62  ;;  %4292 = vmatprep.subr.mxu0 %v3096_v29  ;;  %v3078_v62 = vld [vmem:[#allocation13 + $0x348] sm:$0xff] }
 0x373   :  { %4222 = vmatpush2.msra.mxu1 %v3031_v32  ;;  %4293 = vmatpush2.msra.mxu0 %v3095_v63  ;;  %v3013_v32 = vld [vmem:[#allocation13 + $0x140] sm:$0xff] }
 0x374   :  { %4223 = vmatprep.subr.mxu1 %v3030_v56  ;;  %4294 = vmatprep.subr.mxu0 %v3094_v2  ;;  %v3077_v63 = vld [vmem:[#allocation13 + $0x340] sm:$0xff]  ;;  %v3012_v56 = vld [vmem:[#allocation13 + $0x138] sm:$0xff] }
 0x375   :  { %4224 = vmatpush2.msra.mxu1 %v3029_v3  ;;  %4295 = vmatpush2.msra.mxu0 %v3093_v4  ;;  %v2433_v3 = vrot.slane %v6890_v50, 1  ;;  %v3011_v4 = vld [vmem:[#allocation13 + $0x130] sm:$0xff] }
 0x376   :  { %4225 = vmatprep.subr.mxu1 %v3028_v7  ;;  %4296 = vmatprep.subr.mxu0 %v3092_v8  ;;  %v3075_v7 = vld [vmem:[#allocation13 + $0x330] sm:$0xff]  ;;  %v3010_v8 = vld [vmem:[#allocation13 + $0x128] sm:$0xff] }
 0x377   :  { %4226 = vmatpush2.msra.mxu1 %v3027_v10  ;;  %4297 = vmatpush2.msra.mxu0 %v3091_v11  ;;  %v3009_v10 = vld [vmem:[#allocation13 + $0x120] sm:$0xff] }
 0x378   :  { %4227 = vmatprep.subr.mxu1 %v3026_v14  ;;  %4298 = vmatprep.subr.mxu0 %v3090_v15  ;;  %v2442_v14 = vrot.slane %v6890_v50, 3 }
 0x379   :  { %4228 = vmatpush2.msra.mxu1 %v3025_v16 }
 0x37a   :  { %4229 = vmatprep.subr.mxu1 %v3024_v21  ;;  %v3008_v21 = vld [vmem:[#allocation13 + $0x118] sm:$0xff] }
 0x37b   :  { %v5483_v55 = vpop.f32.mrf.mxu1  ;;  %4230 = vmatpush2.msra.mxu1 %v3023_v17  ;;  %v3007_v17 = vld [vmem:[#allocation13 + $0x110] sm:$0xff] }
 0x37d   :  { %v5484_v28 = vpop.f32.mrf.mxu1 }
 0x37e   :  { %v6862_v31 = vadd.f32 %v5484_v28, %v5483_v55  ;;  %v3089_v55 = vld [vmem:[#allocation13 + $0x3a0] sm:$0xff]  ;;  %v3022_v28 = vld [vmem:[#allocation13 + $0x188] sm:$0xff] }
 0x37f   :  { %4299 = vmatpush2.msra.mxu0 %v3089_v55  ;;  %4231 = vmatprep.subr.mxu1 %v3022_v28  ;;  %v3073_v55 = vld [vmem:[#allocation13 + $0x320] sm:$0xff] }
 0x380   :  { %4300 = vmatprep.subr.mxu0 %v3088_v51  ;;  %4232 = vmatpush2.msra.mxu1 %v3021_v26  ;;  %v3072_v51 = vld [vmem:[#allocation13 + $0x318] sm:$0xff]  ;;  %v3006_v26 = vld [vmem:[#allocation13 + $0x108] sm:$0xff] }
 0x381   :  { %4301 = vmatpush2.msra.mxu0 %v3087_v22  ;;  %4233 = vmatprep.subr.mxu1 %v3020_v37  ;;  %v2462_v37 = vrot.slane %v6890_v50, 7 }
 0x382   :  { %v5486_v40 = vpop.f32.mrf.mxu1  ;;  %4302 = vmatprep.subr.mxu0 %v3086_v30  ;;  %4234 = vmatpush2.msra.mxu1 %v3019_v39  ;;  %v3071_v30 = vld [vmem:[#allocation13 + $0x310] sm:$0xff]  ;;  %v3132_v39 = vld [vmem:[#allocation13 + $0x4f8] sm:$0xff] }
 0x383   :  { %4303 = vmatpush2.msra.mxu0 %v3085_v33  ;;  %4235 = vmatprep.subr.mxu1 %v3018_v43  ;;  %v3070_v33 = vld [vmem:[#allocation13 + $0x308] sm:$0xff]  ;;  %v5473_v43 = vadd.f32 %v6852_v20, %v6849_v18 }
 0x384   :  { %v5487_v47 = vpop.f32.mrf.mxu1  ;;  %4304 = vmatprep.subr.mxu0 %v3084_v38  ;;  %v3005_v38 = vld [vmem:[#allocation13 + $0x100] sm:$0xff] }
 0x385   :  { %v6868_v52 = vadd.f32 %v5487_v47, %v5486_v40  ;;  %v3083_v40 = vld [vmem:[#allocation13 + $0x370] sm:$0xff]  ;;  %v3017_v47 = vld [vmem:[#allocation13 + $0x160] sm:$0xff] }
 0x386   :  { %v5489_v61 = vpop.f32.mrf.mxu1  ;;  %4305 = vmatpush2.msra.mxu0 %v3083_v40  ;;  %4236 = vmatpush2.msra.mxu1 %v3017_v47 }
 0x387   :  { %4306 = vmatprep.subr.mxu0 %v3082_v59  ;;  %4237 = vmatprep.subr.mxu1 %v3016_v49  ;;  %v2193_v59 = vadd.f32 %v5473_v43, %v6880_v12  ;;  %v2208_v43 = vadd.f32 %v6858_v0, %v6880_v12 }
 0x388   :  { %v5490_v45 = vpop.f32.mrf.mxu1  ;;  %4307 = vmatpush2.msra.mxu0 %v3081_v48  ;;  %4238 = vmatpush2.msra.mxu1 %v3015_v54 }
 0x389   :  { %v6874_v5 = vadd.f32 %v5490_v45, %v5489_v61  ;;  %4308 = vmatprep.subr.mxu0 %v3080_v36  ;;  %v3014_v61 = vld [vmem:[#allocation13 + $0x148] sm:$0xff]  ;;  %v3076_v45 = vld [vmem:[#allocation13 + $0x338] sm:$0xff]  ;;  %v2338_v47 = vadd.f32 %v6860_v19, %v2193_v59 }
 0x38a   :  { %4309 = vmatpush2.msra.mxu0 %v3079_v57  ;;  %4239 = vmatprep.subr.mxu1 %v3014_v61  ;;  %v2198_v57 = vadd.f32 %v6854_v24, %v6880_v12 }
 0x38b   :  { %4310 = vmatprep.subr.mxu0 %v3078_v62  ;;  %4240 = vmatpush2.msra.mxu1 %v3013_v32  ;;  %v6915_v36 = vmax.f32 %v2338_v47, 0.0 }
 0x38c   :  { %4311 = vmatpush2.msra.mxu0 %v3077_v63  ;;  %4241 = vmatprep.subr.mxu1 %v3012_v56  ;;  %v2343_v32 = vadd.f32 %v6870_v53, %v2198_v57 }
 0x38d   :  { %4312 = vmatprep.subr.mxu0 %v3076_v45  ;;  %4242 = vmatpush2.msra.mxu1 %v3011_v4  ;;  %v2501_v18 = vrot.slane %v6915_v36, 1  ;;  %v2510_v19 = vrot.slane %v6915_v36, 3  ;;  %v2520_v63 = vrot.slane %v6915_v36, 5 }
 0x38e   :  { %4313 = vmatpush2.msra.mxu0 %v3075_v7  ;;  %4243 = vmatprep.subr.mxu1 %v3010_v8  ;;  %v2530_v7 = vrot.slane %v6915_v36, 7 }
 0x38f   :  { %4314 = vmatprep.subr.mxu0 %v3074_v9  ;;  %4244 = vmatpush2.msra.mxu1 %v3009_v10  ;;  %v6938_v9 = vmax.f32 %v2343_v32, 0.0 }
 0x390   :  { %4315 = vmatpush2.msra.mxu0 %v3073_v55  ;;  %4245 = vmatprep.subr.mxu1 %v3008_v21 }
 0x391   :  { %4316 = vmatprep.subr.mxu0 %v3072_v51  ;;  %4246 = vmatpush2.msra.mxu1 %v3007_v17  ;;  %v2577_v55 = vrot.slane %v6938_v9, 3 }
 0x392   :  { %4317 = vmatpush2.msra.mxu0 %v3071_v30  ;;  %4247 = vmatprep.subr.mxu1 %v3006_v26  ;;  %v2597_v30 = vrot.slane %v6938_v9, 7  ;;  %v2203_v26 = vadd.f32 %v6856_v46, %v6880_v12 }
 0x393   :  { %v5492_v34 = vpop.f32.mrf.mxu1  ;;  %4318 = vmatprep.subr.mxu0 %v3070_v33  ;;  %4248 = vmatpush2.msra.mxu1 %v3005_v38 }
 0x394   :  { %4319 = vmatpush2.msra.mxu0 %v3069_v25  ;;  %4327 = vmatprep.subr.mxu1 %v3132_v39 }
 0x395   :  { %v5493_v42 = vpop.f32.mrf.mxu1 }
 0x396   :  { %v5494_v44 = vadd.f32 %v5493_v42, %v5492_v34  ;;  %v3196_v42 = vld [vmem:[#allocation13 + $0x6f8] sm:$0xff] }
 0x397   :  { %4398 = vmatprep.subr.mxu0 %v3196_v42 }
 0x398   :  { %v2228_v35 = vadd.f32 %v5494_v44, %v6880_v12 }
 0x39a   :  { %v2373_v29 = vadd.f32 %v2372_v58, %v2228_v35 }
 0x39c   :  { %v6893_v2 = vmax.f32 %v2373_v29, 0.0 }
 0x39e   :  { %v2434_v11 = vsel %vm2430_vm3, %v6893_v2, %v2433_v3  ;;  %v2443_v15 = vrot.slane %v6893_v2, 2  ;;  %v2453_v16 = vrot.slane %v6893_v2, 4  ;;  %v2463_v28 = vrot.slane %v6893_v2, 6 }
 0x39f   :  { %2435 = vrot.lane.b32.xlu0 %v2434_v11, %s5792_s5 }
 0x3a0   :  { %v2444_v22 = vsel %vm2430_vm3, %v2443_v15, %v2442_v14  ;;  %v2454_v34 = vsel %vm2430_vm3, %v2453_v16, %v2452_v23  ;;  %v2464_v40 = vsel %vm2430_vm3, %v2463_v28, %v2462_v37  ;;  %v2568_v15 = vrot.slane %v6938_v9, 1 }
 0x3a1   :  { %2445 = vrot.lane.b32.xlu1 %v2444_v22, %s5792_s5  ;;  %v2587_v22 = vrot.slane %v6938_v9, 5  ;;  %v2348_v37 = vadd.f32 %v6866_v1, %v2203_v26  ;;  %v2218_v26 = vadd.f32 %v6868_v52, %v6880_v12 }
 0x3a3   :  { %2455 = vrot.lane.b32.xlu0 %v2454_v34, %s5792_s5  ;;  %v6964_v39 = vmax.f32 %v2348_v37, 0.0  ;;  %v2363_v52 = vadd.f32 %v6885_v27, %v2218_v26 }
 0x3a5   :  { %2465 = vrot.lane.b32.xlu1 %v2464_v40, %s5792_s5  ;;  %v2635_v46 = vrot.slane %v6964_v39, 1  ;;  %v2644_v47 = vrot.slane %v6964_v39, 3  ;;  %v2654_v57 = vrot.slane %v6964_v39, 5 }
 0x3b0   :  { %v5495_v44 = vpop.f32.mrf.mxu1 }
 0x3b2   :  { %v5496_v48 = vpop.f32.mrf.mxu1 }
 0x3b3   :  { %v5497_v49 = vadd.f32 %v5496_v48, %v5495_v44 }
 0x3b5   :  { %v2233_v35 = vadd.f32 %v5497_v49, %v6880_v12 }
 0x3b7   :  { %v2378_v54 = vadd.f32 %v6888_v41, %v2233_v35  ;;  %v5613_v41 = vpop.f32.mrf.mxu0 }
 0x3b9   :  { %v6921_v58 = vmax.f32 %v2378_v54, 0.0  ;;  %v2382_v8 = vpop.f32.mrf.mxu0  ;;  %v2353_v54 = vadd.f32 %v6876_v6, %v2208_v43 }
 0x3bb   :  { %v2502_v20 = vsel %vm2430_vm3, %v6921_v58, %v2501_v18  ;;  %v2511_v61 = vrot.slane %v6921_v58, 2  ;;  %v2521_v62 = vrot.slane %v6921_v58, 4  ;;  %v2531_v56 = vrot.slane %v6921_v58, 6  ;;  %v5616_v35 = vpop.f32.mrf.mxu0 }
 0x3bc   :  { %v5498_v29 = vpop.f32.mrf.mxu1  ;;  %2503 = vrot.lane.b32.xlu0 %v2502_v20, %s5792_s5 }
 0x3bd   :  { %v2512_v24 = vsel %vm2430_vm3, %v2511_v61, %v2510_v19  ;;  %v2522_v4 = vsel %vm2430_vm3, %v2521_v62, %v2520_v63  ;;  %v2532_v10 = vsel %vm2430_vm3, %v2531_v56, %v2530_v7  ;;  %v2664_v62 = vrot.slane %v6964_v39, 7 }
 0x3be   :  { %v5499_v45 = vpop.f32.mrf.mxu1  ;;  %2513 = vrot.lane.b32.xlu1 %v2512_v24, %s5792_s5 }
 0x3bf   :  { %v5500_v3 = vadd.f32 %v5499_v45, %v5498_v29  ;;  %v2392_v29 = vpop.f32.mrf.mxu0 }
 0x3c0   :  { %2523 = vrot.lane.b32.xlu0 %v2522_v4, %s5792_s5 }
 0x3c1   :  { %v2238_v53 = vadd.f32 %v5500_v3, %v6880_v12 }
 0x3c2   :  { %2533 = vrot.lane.b32.xlu1 %v2532_v10, %s5792_s5 }
 0x3c3   :  { %v2383_v11 = vadd.f32 %v2382_v8, %v2238_v53 }
 0x3c5   :  { %v6943_v14 = vmax.f32 %v2383_v11, 0.0 }
 0x3c7   :  { %v2569_v16 = vsel %vm2430_vm3, %v6943_v14, %v2568_v15  ;;  %v2578_v21 = vrot.slane %v6943_v14, 2  ;;  %v2588_v51 = vrot.slane %v6943_v14, 4  ;;  %v2598_v23 = vrot.slane %v6943_v14, 6 }
 0x3c8   :  { %2570 = vrot.lane.b32.xlu0 %v2569_v16, %s5792_s5 }
 0x3c9   :  { %v2579_v17 = vsel %vm2430_vm3, %v2578_v21, %v2577_v55  ;;  %v2589_v28 = vsel %vm2430_vm3, %v2588_v51, %v2587_v22  ;;  %v2599_v33 = vsel %vm2430_vm3, %v2598_v23, %v2597_v30  ;;  %v2213_v55 = vadd.f32 %v6862_v31, %v6880_v12 }
 0x3ca   :  { %2580 = vrot.lane.b32.xlu1 %v2579_v17, %s5792_s5 }
 0x3cb   :  { %v2358_v51 = vadd.f32 %v6872_v60, %v2213_v55 }
 0x3cc   :  { %2590 = vrot.lane.b32.xlu0 %v2589_v28, %s5792_s5 }
 0x3cd   :  { %v7012_v23 = vmax.f32 %v2358_v51, 0.0  ;;  %v2459_v51 = vrot.slane %v6893_v2, 5 }
 0x3ce   :  { %2600 = vrot.lane.b32.xlu1 %v2599_v33, %s5792_s5 }
 0x3cf   :  { %v2778_v37 = vrot.slane %v7012_v23, 3  ;;  %v2788_v43 = vrot.slane %v7012_v23, 5 }
 0x3d0   :  { %v5501_v34 = vpop.f32.mrf.mxu1 }
 0x3d2   :  { %v5502_v38 = vpop.f32.mrf.mxu1 }
 0x3d3   :  { %v5503_v25 = vadd.f32 %v5502_v38, %v5501_v34  ;;  %v2769_v34 = vrot.slane %v7012_v23, 1 }
 0x3d5   :  { %v2243_v40 = vadd.f32 %v5503_v25, %v6880_v12 }
 0x3d7   :  { %v2388_v42 = vadd.f32 %v5613_v41, %v2243_v40  ;;  %v6986_v41 = vmax.f32 %v2353_v54, 0.0  ;;  %v7026_v40 = vpop.f32.mrf.mxu0 }
 0x3d9   :  { %v6969_v59 = vmax.f32 %v2388_v42, 0.0  ;;  %v2702_v56 = vrot.slane %v6986_v41, 1  ;;  %v2711_v3 = vrot.slane %v6986_v41, 3  ;;  %v2721_v53 = vrot.slane %v6986_v41, 5 }
 0x3da   :  { %v2731_v15 = vrot.slane %v6986_v41, 7 }
 0x3db   :  { %v2636_v44 = vsel %vm2430_vm3, %v6969_v59, %v2635_v46  ;;  %v2645_v1 = vrot.slane %v6969_v59, 2  ;;  %v2655_v48 = vrot.slane %v6969_v59, 4  ;;  %v2665_v18 = vrot.slane %v6969_v59, 6 }
 0x3dc   :  { %v5504_v49 = vpop.f32.mrf.mxu1  ;;  %2637 = vrot.lane.b32.xlu0 %v2636_v44, %s5792_s5 }
 0x3dd   :  { %v2646_v0 = vsel %vm2430_vm3, %v2645_v1, %v2644_v47  ;;  %v2656_v61 = vsel %vm2430_vm3, %v2655_v48, %v2654_v57  ;;  %v2666_v32 = vsel %vm2430_vm3, %v2665_v18, %v2664_v62  ;;  %v2798_v48 = vrot.slane %v7012_v23, 7 }
 0x3de   :  { %v5505_v20 = vpop.f32.mrf.mxu1  ;;  %2647 = vrot.lane.b32.xlu1 %v2646_v0, %s5792_s5  ;;  %v2223_v57 = vadd.f32 %v6874_v5, %v6880_v12  ;;  %v2482_v62 = vlaneseq }
 0x3df   :  { %v5506_v19 = vadd.f32 %v5505_v20, %v5504_v49  ;;  %v2402_v49 = vpop.f32.mrf.mxu0 }
 0x3e0   :  { %2657 = vrot.lane.b32.xlu0 %v2656_v61, %s5792_s5  ;;  %v2368_v5 = vadd.f32 %v6882_v13, %v2223_v57 }
 0x3e1   :  { %v2248_v6 = vadd.f32 %v5506_v19, %v6880_v12  ;;  %v5793_v19 = vmov 1983009808  }
 0x3e2   :  { %2667 = vrot.lane.b32.xlu1 %v2666_v32, %s5792_s5  ;;  %v2480_v61 = vunpack.c.l.s4 %v5793_v19 }
 0x3e3   :  { %v2393_v24 = vadd.f32 %v2392_v29, %v2248_v6  ;;  %v2439_v29 = vrot.slane %v6893_v2, 1 }
 0x3e5   :  { %v6991_v63 = vmax.f32 %v2393_v24, 0.0 }
 0x3e7   :  { %v2703_v45 = vsel %vm2430_vm3, %v6991_v63, %v2702_v56  ;;  %v2712_v4 = vrot.slane %v6991_v63, 2  ;;  %v2722_v7 = vrot.slane %v6991_v63, 4  ;;  %v2732_v10 = vrot.slane %v6991_v63, 6 }
 0x3e8   :  { %2704 = vrot.lane.b32.xlu0 %v2703_v45, %s5792_s5 }
 0x3e9   :  { %v2713_v8 = vsel %vm2430_vm3, %v2712_v4, %v2711_v3  ;;  %v2723_v11 = vsel %vm2430_vm3, %v2722_v7, %v2721_v53  ;;  %v2733_v16 = vsel %vm2430_vm3, %v2732_v10, %v2731_v15  ;;  %v2429_v4 = vrot.slane %v6893_v2, 7 }
 0x3ea   :  { %2714 = vrot.lane.b32.xlu1 %v2713_v8, %s5792_s5  ;;  %v2438_v7 = vrot.slane %v6890_v50, 2  ;;  %v2481_v53 = vunpack.c.0.s8 %v2480_v61 }
 0x3eb   :  { %v2431_v26 = vsel %vm2430_vm3, %v2429_v4, %v6890_v50  ;;  %v3131_v4 = vld [vmem:[#allocation13 + $0x4f0] sm:$0xff] }
 0x3ec   :  { %2724 = vrot.lane.b32.xlu0 %v2723_v11, %s5792_s5  ;;  %v2440_v55 = vsel %vm2430_vm3, %v2439_v29, %v2438_v7 }
 0x3ee   :  { %2734 = vrot.lane.b32.xlu1 %v2733_v16, %s5792_s5  ;;  %v7059_v16 = vshrl.u32 %v2482_v62, 7 }
 0x3f9   :  { %v5507_v21 = vpop.f32.mrf.mxu1 }
 0x3fb   :  { %v5508_v17 = vpop.f32.mrf.mxu1 }
 0x3fc   :  { %v5509_v22 = vadd.f32 %v5508_v17, %v5507_v21  ;;  %v2449_v21 = vrot.slane %v6893_v2, 3 }
 0x3fe   :  { %v2253_v28 = vadd.f32 %v5509_v22, %v6880_v12 }
 0x400   :  { %v2398_v30 = vadd.f32 %v5616_v35, %v2253_v28  ;;  %v7036_v35 = vmax.f32 %v2363_v52, 0.0  ;;  %v7079_v52 = vsub.s32 %v2481_v53, %v7059_v16  ;;  %v3130_v53 = vld [vmem:[#allocation13 + $0x4e8] sm:$0xff] }
 0x402   :  { %v7017_v33 = vmax.f32 %v2398_v30, 0.0  ;;  %v2836_v20 = vrot.slane %v7036_v35, 1  ;;  %v2845_v32 = vrot.slane %v7036_v35, 3  ;;  %v2855_v8 = vrot.slane %v7036_v35, 5 }
 0x403   :  { %v2865_v30 = vrot.slane %v7036_v35, 7 }
 0x404   :  { %v2770_v31 = vsel %vm2430_vm3, %v7017_v33, %v2769_v34  ;;  %v2779_v60 = vrot.slane %v7017_v33, 2  ;;  %v2789_v38 = vrot.slane %v7017_v33, 4  ;;  %v2799_v46 = vrot.slane %v7017_v33, 6 }
 0x405   :  { %v5510_v25 = vpop.f32.mrf.mxu1  ;;  %2771 = vrot.lane.b32.xlu0 %v2770_v31, %s5792_s5  ;;  %v2448_v34 = vrot.slane %v6890_v50, 4 }
 0x406   :  { %v2780_v42 = vsel %vm2430_vm3, %v2779_v60, %v2778_v37  ;;  %v2790_v1 = vsel %vm2430_vm3, %v2789_v38, %v2788_v43  ;;  %v2800_v54 = vsel %vm2430_vm3, %v2799_v46, %v2798_v48  ;;  %v2458_v37 = vrot.slane %v6890_v50, 6 }
 0x407   :  { %v5511_v44 = vpop.f32.mrf.mxu1  ;;  %2781 = vrot.lane.b32.xlu1 %v2780_v42, %s5792_s5  ;;  %v7073_v60 = vmax.f32 %v2368_v5, 0.0  ;;  %v2450_v43 = vsel %vm2430_vm3, %v2449_v21, %v2448_v34  ;;  %v3127_v21 = vld [vmem:[#allocation13 + $0x4d0] sm:$0xff]  ;;  %v3188_v34 = vld [vmem:[#allocation13 + $0x6b8] sm:$0xff] }
 0x408   :  { %v5512_v47 = vadd.f32 %v5511_v44, %v5510_v25  ;;  %v2460_v46 = vsel %vm2430_vm3, %v2459_v51, %v2458_v37  ;;  %v3191_v51 = vld [vmem:[#allocation13 + $0x6d0] sm:$0xff] }
 0x409   :  { %2791 = vrot.lane.b32.xlu0 %v2790_v1, %s5792_s5  ;;  %v2912_v57 = vrot.slane %v7073_v60, 3  ;;  %v2922_v29 = vrot.slane %v7073_v60, 5  ;;  %v3187_v37 = vld [vmem:[#allocation13 + $0x6b0] sm:$0xff] }
 0x40a   :  { %v2258_v27 = vadd.f32 %v5512_v47, %v6880_v12 }
 0x40b   :  { %2801 = vrot.lane.b32.xlu1 %v2800_v54, %s5792_s5 }
 0x40c   :  { %v2403_v0 = vadd.f32 %v2402_v49, %v2258_v27  ;;  %v2903_v49 = vrot.slane %v7073_v60, 1 }
 0x40e   :  { %v7043_v18 = vmax.f32 %v2403_v0, 0.0 }
 0x410   :  { %v2837_v6 = vsel %vm2430_vm3, %v7043_v18, %v2836_v20  ;;  %v2846_v24 = vrot.slane %v7043_v18, 2  ;;  %v2856_v56 = vrot.slane %v7043_v18, 4  ;;  %v2866_v11 = vrot.slane %v7043_v18, 6 }
 0x411   :  { %v5513_v45 = vpop.f32.mrf.mxu1  ;;  %v2436_v3 = vpop.permute.xlu0 %2435  ;;  %2838 = vrot.lane.b32.xlu0 %v2837_v6, %s5792_s5 }
 0x412   :  { %v2847_v10 = vsel %vm2430_vm3, %v2846_v24, %v2845_v32  ;;  %v2857_v28 = vsel %vm2430_vm3, %v2856_v56, %v2855_v8  ;;  %v2469_v2 = vsel %vm2468_vm4, %v2431_v26, %v2436_v3  ;;  %v2867_v25 = vsel %vm2430_vm3, %v2866_v11, %v2865_v30  ;;  %v3195_v8 = vld [vmem:[#allocation13 + $0x6f0] sm:$0xff]  ;;  %v3129_v11 = vld [vmem:[#allocation13 + $0x4e0] sm:$0xff]  ;;  %v3124_v26 = vld [vmem:[#allocation13 + $0x4b8] sm:$0xff] }
 0x413   :  { %v5514_v15 = vpop.f32.mrf.mxu1  ;;  %v2446_v13 = vpop.permute.xlu1 %2445  ;;  %2848 = vrot.lane.b32.xlu1 %v2847_v10, %s5792_s5  ;;  %v2932_v3 = vrot.slane %v7073_v60, 7  ;;  %v3194_v10 = vld [vmem:[#allocation13 + $0x6e8] sm:$0xff]  ;;  %v3189_v30 = vld [vmem:[#allocation13 + $0x6c0] sm:$0xff] }
 0x414   :  { %v5515_v17 = vadd.f32 %v5514_v15, %v5513_v45  ;;  %v2470_v22 = vsel %vm2468_vm4, %v2440_v55, %v2446_v13  ;;  %v3193_v15 = vld [vmem:[#allocation13 + $0x6e0] sm:$0xff]  ;;  %v3128_v13 = vld [vmem:[#allocation13 + $0x4d8] sm:$0xff] }
 0x415   :  { %v2456_v31 = vpop.permute.xlu0 %2455  ;;  %2858 = vrot.lane.b32.xlu0 %v2857_v28, %s5792_s5  ;;  %v2477_v42 = vcombine.low %v2469_v2, %v2470_v22  ;;  %v3192_v55 = vld [vmem:[#allocation13 + $0x6d8] sm:$0xff]  ;;  %v3190_v22 = vld [vmem:[#allocation13 + $0x6c8] sm:$0xff]  ;;  %v3125_v28 = vld [vmem:[#allocation13 + $0x4c0] sm:$0xff] }
 0x416   :  { %v2263_v38 = vadd.f32 %v5515_v17, %v6880_v12  ;;  %v2471_v47 = vsel %vm2468_vm4, %v2450_v43, %v2456_v31  ;;  %v3126_v17 = vld [vmem:[#allocation13 + $0x4c8] sm:$0xff]  ;;  %v3123_v31 = vld [vmem:[#allocation13 + $0x4b0] sm:$0xff]  ;;  %v3120_v43 = vld [vmem:[#allocation13 + $0x498] sm:$0xff] }
 0x417   :  { %v2466_v44 = vpop.permute.xlu1 %2465  ;;  %2868 = vrot.lane.b32.xlu1 %v2867_v25, %s5792_s5  ;;  %v2485_v27 = vrot.slane %v2477_v42, %v7079_v52  ;;  %v3122_v2 = vld [vmem:[#allocation13 + $0x4a8] sm:$0xff]  ;;  %v3121_v25 = vld [vmem:[#allocation13 + $0x4a0] sm:$0xff] }
 0x418   :  { %v2408_v50 = vadd.f32 %v7026_v40, %v2263_v38  ;;  %v2472_v1 = vsel %vm2468_vm4, %v2460_v46, %v2466_v44  ;;  %v3186_v38 = vld [vmem:[#allocation13 + $0x6a8] sm:$0xff]  ;;  %v3185_v42 = vld [vmem:[#allocation13 + $0x6a0] sm:$0xff]  ;;  %v2507_v46 = vrot.slane %v6921_v58, 1  ;;  %v3184_v44 = vld [vmem:[#allocation13 + $0x698] sm:$0xff] }
 0x419   :  { %v2478_v12 = vcombine.low %v2471_v47, %v2472_v1  ;;  %v2498_v47 = vrot.slane %v6921_v58, 7 }
 0x41a   :  { %v7087_v48 = vmax.f32 %v2408_v50, 0.0  ;;  %v3119_v50 = vld [vmem:[#allocation13 + $0x490] sm:$0xff] }
 0x41b   :  { %v2492_v54 = vrot.slane %v2478_v12, %v7079_v52  ;;  %v3183_v12 = vld [vmem:[#allocation13 + $0x690] sm:$0xff] }
 0x41c   :  { %v2904_v0 = vsel %vm2430_vm3, %v7087_v48, %v2903_v49  ;;  %v2913_v40 = vrot.slane %v7087_v48, 2  ;;  %v2923_v20 = vrot.slane %v7087_v48, 4  ;;  %v2933_v24 = vrot.slane %v7087_v48, 6  ;;  %v3118_v49 = vld [vmem:[#allocation13 + $0x488] sm:$0xff] }
 0x41d   :  { %v2493_v19 = vcombine.low %v2485_v27, %v2492_v54  ;;  %v5398_v61 = vcombine.low %v2492_v54, %v2492_v54  ;;  %2905 = vrot.lane.b32.xlu0 %v2904_v0, %s5792_s5  ;;  %v2506_v27 = vrot.slane %v6915_v36, 2  ;;  %v3182_v54 = vld [vmem:[#allocation13 + $0x688] sm:$0xff]  ;;  %v3117_v0 = vld [vmem:[#allocation13 + $0x480] sm:$0xff] }
 0x41e   :  { %v2914_v62 = vsel %vm2430_vm3, %v2913_v40, %v2912_v57  ;;  %v2924_v56 = vsel %vm2430_vm3, %v2923_v20, %v2922_v29  ;;  %v2934_v7 = vsel %vm2430_vm3, %v2933_v24, %v2932_v3  ;;  %v3181_v20 = vld [vmem:[#allocation13 + $0x680] sm:$0xff]  ;;  %v2499_v24 = vsel %vm2430_vm3, %v2498_v47, %v6915_v36  ;;  %v3114_v3 = vld [vmem:[#allocation13 + $0x468] sm:$0xff] }
 0x41f   :  { %2915 = vrot.lane.b32.xlu1 %v2914_v62, %s5792_s5  ;;  %v4024_v6 = vrot.slane %v2493_v19, %v7079_v52  ;;  %v4031_v32 = vrot.slane %v5398_v61, %v7079_v52  ;;  %v2508_v40 = vsel %vm2430_vm3, %v2507_v46, %v2506_v27  ;;  %v3116_v19 = vld [vmem:[#allocation13 + $0x478] sm:$0xff]  ;;  %v2517_v61 = vrot.slane %v6921_v58, 3  ;;  %v3170_v47 = vld [vmem:[#allocation13 + $0x628] sm:$0xff] }
 0x420   :  { %v2527_v62 = vrot.slane %v6921_v58, 5 }
 0x421   :  { %2925 = vrot.lane.b32.xlu0 %v2924_v56, %s5792_s5  ;;  %v4032_v5 = vcombine.high %v4024_v6, %v4024_v6  ;;  %v4033_v45 = vcombine.high %v4031_v32, %v4031_v32  ;;  %v2516_v56 = vrot.slane %v6915_v36, 4 }
 0x423   :  { %4249 = vmatprep.mubr.f32.mxu1 %v4032_v5  ;;  %4320 = vmatprep.mubr.f32.mxu0 %v4033_v45  ;;  %v3179_v45 = vld [vmem:[#allocation13 + $0x670] sm:$0xff] }
 0x424   :  { %2935 = vrot.lane.b32.xlu1 %v2934_v7, %s5792_s5  ;;  %4250 = vmatmul.mubr.f32.vlgmr.msra.gmra.mxu1 %v4024_v6  ;;  %v3180_v6 = vld [vmem:[#allocation13 + $0x678] sm:$0xff]  ;;  %v3178_v7 = vld [vmem:[#allocation13 + $0x668] sm:$0xff] }
 0x425   :  { %4321 = vmatmul.mubr.f32.vlgmr.msra.gmra.mxu0 %v4031_v32  ;;  %4328 = vmatpush1.msra.mxu1 %v3131_v4  ;;  %v3115_v32 = vld [vmem:[#allocation13 + $0x470] sm:$0xff]  ;;  %v2526_v4 = vrot.slane %v6915_v36, 6 }
 0x426   :  { %4399 = vmatpush1.msra.mxu0 %v3195_v8  ;;  %4329 = vmatprep.subr.mxu1 %v3130_v53  ;;  %v3113_v8 = vld [vmem:[#allocation13 + $0x460] sm:$0xff] }
 0x427   :  { %4400 = vmatprep.subr.mxu0 %v3194_v10  ;;  %4330 = vmatpush1.msra.mxu1 %v3129_v11  ;;  %v2518_v10 = vsel %vm2430_vm3, %v2517_v61, %v2516_v56  ;;  %v2528_v11 = vsel %vm2430_vm3, %v2527_v62, %v2526_v4  ;;  %v3166_v61 = vld [vmem:[#allocation13 + $0x608] sm:$0xff]  ;;  %v3163_v56 = vld [vmem:[#allocation13 + $0x5f0] sm:$0xff]  ;;  %v3161_v4 = vld [vmem:[#allocation13 + $0x5e0] sm:$0xff] }
 0x428   :  { %4401 = vmatpush1.msra.mxu0 %v3193_v15  ;;  %4331 = vmatprep.subr.mxu1 %v3128_v13  ;;  %v3177_v13 = vld [vmem:[#allocation13 + $0x660] sm:$0xff] }
 0x429   :  { %4402 = vmatprep.subr.mxu0 %v3192_v55  ;;  %4332 = vmatpush1.msra.mxu1 %v3127_v21  ;;  %v3112_v55 = vld [vmem:[#allocation13 + $0x458] sm:$0xff] }
 0x42a   :  { %4403 = vmatpush1.msra.mxu0 %v3191_v51  ;;  %4333 = vmatprep.subr.mxu1 %v3126_v17  ;;  %v3176_v51 = vld [vmem:[#allocation13 + $0x658] sm:$0xff]  ;;  %v3111_v17 = vld [vmem:[#allocation13 + $0x450] sm:$0xff] }
 0x42b   :  { %4404 = vmatprep.subr.mxu0 %v3190_v22  ;;  %4334 = vmatpush1.msra.mxu1 %v3125_v28  ;;  %v3175_v28 = vld [vmem:[#allocation13 + $0x650] sm:$0xff] }
 0x42c   :  { %4405 = vmatpush1.msra.mxu0 %v3189_v30  ;;  %4335 = vmatprep.subr.mxu1 %v3124_v26  ;;  %v3110_v30 = vld [vmem:[#allocation13 + $0x448] sm:$0xff] }
 0x42d   :  { %4406 = vmatprep.subr.mxu0 %v3188_v34  ;;  %4336 = vmatpush1.msra.mxu1 %v3123_v31  ;;  %v3174_v26 = vld [vmem:[#allocation13 + $0x648] sm:$0xff]  ;;  %v3109_v34 = vld [vmem:[#allocation13 + $0x440] sm:$0xff] }
 0x42e   :  { %4407 = vmatpush1.msra.mxu0 %v3187_v37  ;;  %4337 = vmatprep.subr.mxu1 %v3122_v2  ;;  %v2504_v1 = vpop.permute.xlu0 %2503  ;;  %v3173_v2 = vld [vmem:[#allocation13 + $0x640] sm:$0xff] }
 0x42f   :  { %4408 = vmatprep.subr.mxu0 %v3186_v38  ;;  %4338 = vmatpush1.msra.mxu1 %v3121_v25  ;;  %v2536_v58 = vsel %vm2468_vm4, %v2499_v24, %v2504_v1  ;;  %v3108_v38 = vld [vmem:[#allocation13 + $0x438] sm:$0xff]  ;;  %v3105_v1 = vld [vmem:[#allocation13 + $0x420] sm:$0xff] }
 0x430   :  { %4409 = vmatpush1.msra.mxu0 %v3185_v42  ;;  %4339 = vmatprep.subr.mxu1 %v3120_v43  ;;  %v2514_v57 = vpop.permute.xlu1 %2513  ;;  %v3172_v25 = vld [vmem:[#allocation13 + $0x638] sm:$0xff]  ;;  %v3107_v42 = vld [vmem:[#allocation13 + $0x430] sm:$0xff] }
 0x431   :  { %4410 = vmatprep.subr.mxu0 %v3184_v44  ;;  %4340 = vmatpush1.msra.mxu1 %v3119_v50  ;;  %v2537_v29 = vsel %vm2468_vm4, %v2508_v40, %v2514_v57  ;;  %v3171_v44 = vld [vmem:[#allocation13 + $0x630] sm:$0xff]  ;;  %v3106_v50 = vld [vmem:[#allocation13 + $0x428] sm:$0xff]  ;;  %v3228_v24 = vld [vmem:[#allocation13 + $0x7f8] sm:$0xff] }
 0x432   :  { %4411 = vmatpush1.msra.mxu0 %v3183_v12  ;;  %4341 = vmatprep.subr.mxu1 %v3118_v49  ;;  %v2524_v5 = vpop.permute.xlu0 %2523  ;;  %v2544_v53 = vcombine.low %v2536_v58, %v2537_v29  ;;  %v3169_v12 = vld [vmem:[#allocation13 + $0x620] sm:$0xff]  ;;  %v3104_v49 = vld [vmem:[#allocation13 + $0x418] sm:$0xff]  ;;  %v3103_v57 = vld [vmem:[#allocation13 + $0x410] sm:$0xff] }
 0x433   :  { %4412 = vmatprep.subr.mxu0 %v3182_v54  ;;  %4342 = vmatpush1.msra.mxu1 %v3117_v0  ;;  %v2538_v21 = vsel %vm2468_vm4, %v2518_v10, %v2524_v5  ;;  %v3168_v0 = vld [vmem:[#allocation13 + $0x618] sm:$0xff]  ;;  %v3167_v40 = vld [vmem:[#allocation13 + $0x610] sm:$0xff]  ;;  %v3101_v29 = vld [vmem:[#allocation13 + $0x400] sm:$0xff] }
 0x434   :  { %4413 = vmatpush1.msra.mxu0 %v3181_v20  ;;  %4343 = vmatprep.subr.mxu1 %v3116_v19  ;;  %v2534_v15 = vpop.permute.xlu1 %2533  ;;  %v2552_v31 = vrot.slane %v2544_v53, %v7079_v52  ;;  %v3102_v20 = vld [vmem:[#allocation13 + $0x408] sm:$0xff]  ;;  %v3227_v5 = vld [vmem:[#allocation13 + $0x7f0] sm:$0xff]  ;;  %v3225_v58 = vld [vmem:[#allocation13 + $0x7e0] sm:$0xff] }
 0x435   :  { %4414 = vmatprep.subr.mxu0 %v3180_v6  ;;  %4344 = vmatpush1.msra.mxu1 %v3115_v32  ;;  %v2539_v36 = vsel %vm2468_vm4, %v2528_v11, %v2534_v15  ;;  %v3165_v6 = vld [vmem:[#allocation13 + $0x600] sm:$0xff]  ;;  %v3164_v32 = vld [vmem:[#allocation13 + $0x5f8] sm:$0xff]  ;;  %v3159_v53 = vld [vmem:[#allocation13 + $0x5d0] sm:$0xff] }
 0x436   :  { %4415 = vmatpush1.msra.mxu0 %v3179_v45  ;;  %4345 = vmatprep.subr.mxu1 %v3114_v3  ;;  %v2545_v22 = vcombine.low %v2538_v21, %v2539_v36  ;;  %v3162_v45 = vld [vmem:[#allocation13 + $0x5e8] sm:$0xff]  ;;  %v3223_v10 = vld [vmem:[#allocation13 + $0x7d0] sm:$0xff]  ;;  %v3221_v21 = vld [vmem:[#allocation13 + $0x7c0] sm:$0xff] }
 0x437   :  { %4416 = vmatprep.subr.mxu0 %v3178_v7  ;;  %4346 = vmatpush1.msra.mxu1 %v3113_v8  ;;  %v3226_v3 = vld [vmem:[#allocation13 + $0x7e8] sm:$0xff]  ;;  %v3160_v7 = vld [vmem:[#allocation13 + $0x5d8] sm:$0xff] }
 0x438   :  { %4417 = vmatpush1.msra.mxu0 %v3177_v13  ;;  %4347 = vmatprep.subr.mxu1 %v3112_v55  ;;  %v2559_v37 = vrot.slane %v2545_v22, %v7079_v52  ;;  %v3224_v8 = vld [vmem:[#allocation13 + $0x7d8] sm:$0xff]  ;;  %v3158_v11 = vld [vmem:[#allocation13 + $0x5c8] sm:$0xff]  ;;  %v3157_v13 = vld [vmem:[#allocation13 + $0x5c0] sm:$0xff] }
 0x439   :  { %4418 = vmatprep.subr.mxu0 %v3176_v51  ;;  %4348 = vmatpush1.msra.mxu1 %v3111_v17  ;;  %v3222_v15 = vld [vmem:[#allocation13 + $0x7c8] sm:$0xff]  ;;  %v3156_v36 = vld [vmem:[#allocation13 + $0x5b8] sm:$0xff]  ;;  %v3155_v17 = vld [vmem:[#allocation13 + $0x5b0] sm:$0xff] }
 0x43a   :  { %4419 = vmatpush1.msra.mxu0 %v3175_v28  ;;  %4349 = vmatprep.subr.mxu1 %v3110_v30  ;;  %v2560_v43 = vcombine.low %v2552_v31, %v2559_v37  ;;  %v5399_v46 = vcombine.low %v2559_v37, %v2559_v37  ;;  %v3220_v51 = vld [vmem:[#allocation13 + $0x7b8] sm:$0xff]  ;;  %v7137_v22 = vpop.permute.xlu0 %2570  ;;  %v3219_v28 = vld [vmem:[#allocation13 + $0x7b0] sm:$0xff]  ;;  %v3154_v30 = vld [vmem:[#allocation13 + $0x5a8] sm:$0xff]  ;;  %v2594_v31 = vrot.slane %v6943_v14, 5 }
 0x43b   :  { %4420 = vmatprep.subr.mxu0 %v3174_v26  ;;  %4350 = vmatpush1.msra.mxu1 %v3109_v34  ;;  %v3218_v26 = vld [vmem:[#allocation13 + $0x7a8] sm:$0xff]  ;;  %v3153_v34 = vld [vmem:[#allocation13 + $0x5a0] sm:$0xff] }
 0x43c   :  { %4421 = vmatpush1.msra.mxu0 %v3173_v2  ;;  %4351 = vmatprep.subr.mxu1 %v3108_v38  ;;  %v7128_v27 = vrot.slane %v2560_v43, %v7079_v52  ;;  %v7131_v54 = vrot.slane %v5399_v46, %v7079_v52  ;;  %v2581_v55 = vpop.permute.xlu1 %2580  ;;  %v3217_v37 = vld [vmem:[#allocation13 + $0x7a0] sm:$0xff]  ;;  %v3152_v2 = vld [vmem:[#allocation13 + $0x598] sm:$0xff]  ;;  %v2584_v43 = vrot.slane %v6943_v14, 3  ;;  %v2593_v46 = vrot.slane %v6938_v9, 6 }
 0x43d   :  { %4422 = vmatprep.subr.mxu0 %v3172_v25  ;;  %4352 = vmatpush1.msra.mxu1 %v3107_v42  ;;  %v3216_v38 = vld [vmem:[#allocation13 + $0x798] sm:$0xff]  ;;  %v3151_v25 = vld [vmem:[#allocation13 + $0x590] sm:$0xff]  ;;  %v2574_v42 = vrot.slane %v6943_v14, 1 }
 0x43e   :  { %4423 = vmatpush1.msra.mxu0 %v3171_v44  ;;  %4353 = vmatprep.subr.mxu1 %v3106_v50  ;;  %v4049_v19 = vcombine.high %v7128_v27, %v7128_v27  ;;  %v4050_v62 = vcombine.high %v7131_v54, %v7131_v54  ;;  %v3215_v50 = vld [vmem:[#allocation13 + $0x790] sm:$0xff] }
 0x43f   :  { %4424 = vmatprep.subr.mxu0 %v3170_v47  ;;  %4354 = vmatpush1.msra.mxu1 %v3105_v1  ;;  %v3150_v47 = vld [vmem:[#allocation13 + $0x588] sm:$0xff] }
 0x440   :  { %4425 = vmatpush1.msra.mxu0 %v3169_v12  ;;  %4355 = vmatprep.subr.mxu1 %v3104_v49  ;;  %v2601_v44 = vpop.permute.xlu1 %2600  ;;  %v3214_v1 = vld [vmem:[#allocation13 + $0x788] sm:$0xff]  ;;  %v3149_v12 = vld [vmem:[#allocation13 + $0x580] sm:$0xff]  ;;  %v2565_v49 = vrot.slane %v6943_v14, 7 }
 0x441   :  { %4426 = vmatprep.subr.mxu0 %v3168_v0  ;;  %4356 = vmatpush1.msra.mxu1 %v3103_v57  ;;  %v2573_v0 = vrot.slane %v6938_v9, 2  ;;  %v2583_v57 = vrot.slane %v6938_v9, 4 }
 0x442   :  { %4427 = vmatpush1.msra.mxu0 %v3167_v40  ;;  %4357 = vmatprep.subr.mxu1 %v3102_v20  ;;  %v2591_v40 = vpop.permute.xlu0 %2590  ;;  %v2595_v20 = vsel %vm2430_vm3, %v2594_v31, %v2593_v46  ;;  %v3138_v31 = vld [vmem:[#allocation13 + $0x528] sm:$0xff]  ;;  %v3200_v46 = vld [vmem:[#allocation13 + $0x718] sm:$0xff] }
 0x443   :  { %4428 = vmatprep.subr.mxu0 %v3166_v61  ;;  %4391 = vmatprep.mubr.f32.mxu1 %v4049_v19  ;;  %v3213_v19 = vld [vmem:[#allocation13 + $0x780] sm:$0xff]  ;;  %v3148_v61 = vld [vmem:[#allocation13 + $0x578] sm:$0xff]  ;;  %v2585_v14 = vsel %vm2430_vm3, %v2584_v43, %v2583_v57 }
 0x444   :  { %4462 = vmatprep.mubr.f32.mxu0 %v4050_v62  ;;  %4358 = vmatpush1.msra.mxu1 %v3101_v29  ;;  %v2606_v62 = vsel %vm2468_vm4, %v2595_v20, %v2601_v44  ;;  %v3212_v29 = vld [vmem:[#allocation13 + $0x778] sm:$0xff]  ;;  %v3135_v44 = vld [vmem:[#allocation13 + $0x510] sm:$0xff] }
 0x445   :  { %4429 = vmatpush1.msra.mxu0 %v3165_v6  ;;  %4359 = vmatprep.subr.mxu1 %v3164_v32  ;;  %v3147_v6 = vld [vmem:[#allocation13 + $0x570] sm:$0xff]  ;;  %v2575_v32 = vsel %vm2430_vm3, %v2574_v42, %v2573_v0  ;;  %v3136_v42 = vld [vmem:[#allocation13 + $0x518] sm:$0xff] }
 0x446   :  { %4430 = vmatprep.subr.mxu0 %v3228_v24  ;;  %4360 = vmatpush2.msra.mxu1 %v3163_v56  ;;  %v3211_v24 = vld [vmem:[#allocation13 + $0x770] sm:$0xff]  ;;  %v3146_v56 = vld [vmem:[#allocation13 + $0x568] sm:$0xff]  ;;  %v3260_v57 = vld [vmem:[#allocation13 + $0x8f8] sm:$0xff] }
 0x447   :  { %4431 = vmatpush2.msra.mxu0 %v3227_v5  ;;  %4361 = vmatprep.subr.mxu1 %v3162_v45  ;;  %v2604_v5 = vsel %vm2468_vm4, %v2575_v32, %v2581_v55  ;;  %v2605_v45 = vsel %vm2468_vm4, %v2585_v14, %v2591_v40  ;;  %v3207_v55 = vld [vmem:[#allocation13 + $0x750] sm:$0xff]  ;;  %v3324_v20 = vld [vmem:[#allocation13 + $0xaf8] sm:$0xff]  ;;  %v3322_v32 = vld [vmem:[#allocation13 + $0xae8] sm:$0xff] }
 0x448   :  { %4432 = vmatprep.subr.mxu0 %v3226_v3  ;;  %4362 = vmatpush2.msra.mxu1 %v3161_v4  ;;  %v3210_v3 = vld [vmem:[#allocation13 + $0x768] sm:$0xff]  ;;  %v3145_v4 = vld [vmem:[#allocation13 + $0x560] sm:$0xff] }
 0x449   :  { %4433 = vmatpush2.msra.mxu0 %v3225_v58  ;;  %4363 = vmatprep.subr.mxu1 %v3160_v7  ;;  %v2566_v58 = vsel %vm2430_vm3, %v2565_v49, %v6938_v9  ;;  %v2612_v7 = vcombine.low %v2605_v45, %v2606_v62  ;;  %v3206_v9 = vld [vmem:[#allocation13 + $0x748] sm:$0xff]  ;;  %v3197_v49 = vld [vmem:[#allocation13 + $0x700] sm:$0xff] }
 0x44a   :  { %4434 = vmatprep.subr.mxu0 %v3224_v8  ;;  %4364 = vmatpush2.msra.mxu1 %v3159_v53  ;;  %v3209_v8 = vld [vmem:[#allocation13 + $0x760] sm:$0xff]  ;;  %v3144_v53 = vld [vmem:[#allocation13 + $0x558] sm:$0xff]  ;;  %v3254_v45 = vld [vmem:[#allocation13 + $0x8c8] sm:$0xff] }
 0x44b   :  { %4435 = vmatpush2.msra.mxu0 %v3223_v10  ;;  %4365 = vmatprep.subr.mxu1 %v3158_v11  ;;  %v2603_v10 = vsel %vm2468_vm4, %v2566_v58, %v7137_v22  ;;  %v3208_v11 = vld [vmem:[#allocation13 + $0x758] sm:$0xff]  ;;  %v3257_v14 = vld [vmem:[#allocation13 + $0x8e0] sm:$0xff] }
 0x44c   :  { %4436 = vmatprep.subr.mxu0 %v3222_v15  ;;  %4366 = vmatpush2.msra.mxu1 %v3157_v13  ;;  %v3143_v15 = vld [vmem:[#allocation13 + $0x550] sm:$0xff]  ;;  %v2611_v13 = vcombine.low %v2603_v10, %v2604_v5  ;;  %v3204_v22 = vld [vmem:[#allocation13 + $0x738] sm:$0xff]  ;;  %v3317_v58 = vld [vmem:[#allocation13 + $0xac0] sm:$0xff] }
 0x44d   :  { %4437 = vmatpush2.msra.mxu0 %v3221_v21  ;;  %4367 = vmatprep.subr.mxu1 %v3156_v36  ;;  %v3142_v21 = vld [vmem:[#allocation13 + $0x548] sm:$0xff]  ;;  %v3141_v36 = vld [vmem:[#allocation13 + $0x540] sm:$0xff]  ;;  %v3319_v5 = vld [vmem:[#allocation13 + $0xad0] sm:$0xff] }
 0x44e   :  { %4438 = vmatprep.subr.mxu0 %v3220_v51  ;;  %4368 = vmatpush2.msra.mxu1 %v3155_v17  ;;  %v2626_v51 = vrot.slane %v2612_v7, %v7079_v52  ;;  %v3205_v17 = vld [vmem:[#allocation13 + $0x740] sm:$0xff]  ;;  %v3252_v7 = vld [vmem:[#allocation13 + $0x8b8] sm:$0xff]  ;;  %v3315_v10 = vld [vmem:[#allocation13 + $0xab0] sm:$0xff] }
 0x44f   :  { %4439 = vmatpush2.msra.mxu0 %v3219_v28  ;;  %4369 = vmatprep.subr.mxu1 %v3154_v30  ;;  %v3140_v28 = vld [vmem:[#allocation13 + $0x538] sm:$0xff]  ;;  %v3139_v30 = vld [vmem:[#allocation13 + $0x530] sm:$0xff] }
 0x450   :  { %4440 = vmatprep.subr.mxu0 %v3218_v26  ;;  %4370 = vmatpush2.msra.mxu1 %v3153_v34  ;;  %v2619_v26 = vrot.slane %v2611_v13, %v7079_v52  ;;  %v3203_v34 = vld [vmem:[#allocation13 + $0x730] sm:$0xff]  ;;  %v5400_v43 = vcombine.low %v2626_v51, %v2626_v51  ;;  %v3249_v13 = vld [vmem:[#allocation13 + $0x8a0] sm:$0xff] }
 0x451   :  { %4441 = vmatpush2.msra.mxu0 %v3217_v37  ;;  %4371 = vmatprep.subr.mxu1 %v3152_v2  ;;  %v3202_v37 = vld [vmem:[#allocation13 + $0x728] sm:$0xff]  ;;  %v3137_v2 = vld [vmem:[#allocation13 + $0x520] sm:$0xff] }
 0x452   :  { %4442 = vmatprep.subr.mxu0 %v3216_v38  ;;  %4372 = vmatpush2.msra.mxu1 %v3151_v25  ;;  %v2627_v38 = vcombine.low %v2619_v26, %v2626_v51  ;;  %v3201_v25 = vld [vmem:[#allocation13 + $0x720] sm:$0xff]  ;;  %v7162_v40 = vrot.slane %v5400_v43, %v7079_v52  ;;  %v3311_v51 = vld [vmem:[#allocation13 + $0xa90] sm:$0xff]  ;;  %v3244_v26 = vld [vmem:[#allocation13 + $0x878] sm:$0xff] }
 0x453   :  { %4443 = vmatpush2.msra.mxu0 %v3215_v50  ;;  %4373 = vmatprep.subr.mxu1 %v3150_v47  ;;  %v3199_v50 = vld [vmem:[#allocation13 + $0x710] sm:$0xff]  ;;  %v3134_v47 = vld [vmem:[#allocation13 + $0x508] sm:$0xff]  ;;  %v3240_v43 = vld [vmem:[#allocation13 + $0x858] sm:$0xff] }
 0x454   :  { %4444 = vmatprep.subr.mxu0 %v3214_v1  ;;  %4374 = vmatpush2.msra.mxu1 %v3149_v12  ;;  %v3198_v1 = vld [vmem:[#allocation13 + $0x708] sm:$0xff]  ;;  %v3133_v12 = vld [vmem:[#allocation13 + $0x500] sm:$0xff]  ;;  %v7159_v0 = vrot.slane %v2627_v38, %v7079_v52 }
 0x455   :  { %4445 = vmatpush2.msra.mxu0 %v3213_v19  ;;  %4375 = vmatprep.subr.mxu1 %v3148_v61  ;;  %v3259_v19 = vld [vmem:[#allocation13 + $0x8f0] sm:$0xff]  ;;  %v3306_v38 = vld [vmem:[#allocation13 + $0xa68] sm:$0xff] }
 0x456   :  { %4446 = vmatprep.subr.mxu0 %v3212_v29  ;;  %4376 = vmatpush2.msra.mxu1 %v3147_v6  ;;  %v3323_v61 = vld [vmem:[#allocation13 + $0xaf0] sm:$0xff]  ;;  %v4066_v62 = vcombine.high %v7159_v0, %v7159_v0  ;;  %v3258_v29 = vld [vmem:[#allocation13 + $0x8e8] sm:$0xff]  ;;  %v4067_v6 = vcombine.high %v7162_v40, %v7162_v40 }
 0x457   :  { %4447 = vmatpush2.msra.mxu0 %v3211_v24  ;;  %4377 = vmatprep.subr.mxu1 %v3146_v56  ;;  %v3321_v24 = vld [vmem:[#allocation13 + $0xae0] sm:$0xff]  ;;  %v3256_v56 = vld [vmem:[#allocation13 + $0x8d8] sm:$0xff] }
 0x458   :  { %4448 = vmatprep.subr.mxu0 %v3210_v3  ;;  %4378 = vmatpush2.msra.mxu1 %v3145_v4  ;;  %v3318_v3 = vld [vmem:[#allocation13 + $0xac8] sm:$0xff]  ;;  %v3253_v4 = vld [vmem:[#allocation13 + $0x8c0] sm:$0xff] }
 0x459   :  { %4449 = vmatpush2.msra.mxu0 %v3209_v8  ;;  %4379 = vmatprep.subr.mxu1 %v3144_v53  ;;  %v3316_v8 = vld [vmem:[#allocation13 + $0xab8] sm:$0xff]  ;;  %v3251_v53 = vld [vmem:[#allocation13 + $0x8b0] sm:$0xff] }
 0x45a   :  { %4450 = vmatprep.subr.mxu0 %v3208_v11  ;;  %4380 = vmatpush2.msra.mxu1 %v3143_v15  ;;  %v3250_v11 = vld [vmem:[#allocation13 + $0x8a8] sm:$0xff] }
 0x45b   :  { %4451 = vmatpush2.msra.mxu0 %v3207_v55  ;;  %4381 = vmatprep.subr.mxu1 %v3142_v21  ;;  %v3314_v15 = vld [vmem:[#allocation13 + $0xaa8] sm:$0xff]  ;;  %v3313_v55 = vld [vmem:[#allocation13 + $0xaa0] sm:$0xff]  ;;  %v3248_v21 = vld [vmem:[#allocation13 + $0x898] sm:$0xff] }
 0x45c   :  { %4452 = vmatprep.subr.mxu0 %v3206_v9  ;;  %4382 = vmatpush2.msra.mxu1 %v3141_v36  ;;  %v3312_v9 = vld [vmem:[#allocation13 + $0xa98] sm:$0xff]  ;;  %v3247_v36 = vld [vmem:[#allocation13 + $0x890] sm:$0xff] }
 0x45d   :  { %4453 = vmatpush2.msra.mxu0 %v3205_v17  ;;  %4383 = vmatprep.subr.mxu1 %v3140_v28  ;;  %v3246_v17 = vld [vmem:[#allocation13 + $0x888] sm:$0xff] }
 0x45e   :  { %4454 = vmatprep.subr.mxu0 %v3204_v22  ;;  %4384 = vmatpush2.msra.mxu1 %v3139_v30  ;;  %v3310_v28 = vld [vmem:[#allocation13 + $0xa88] sm:$0xff]  ;;  %v3245_v22 = vld [vmem:[#allocation13 + $0x880] sm:$0xff] }
 0x45f   :  { %4455 = vmatpush2.msra.mxu0 %v3203_v34  ;;  %4385 = vmatprep.subr.mxu1 %v3138_v31  ;;  %v3309_v30 = vld [vmem:[#allocation13 + $0xa80] sm:$0xff]  ;;  %v3308_v34 = vld [vmem:[#allocation13 + $0xa78] sm:$0xff]  ;;  %v3243_v31 = vld [vmem:[#allocation13 + $0x870] sm:$0xff] }
 0x460   :  { %4456 = vmatprep.subr.mxu0 %v3202_v37  ;;  %4386 = vmatpush2.msra.mxu1 %v3137_v2  ;;  %v3307_v37 = vld [vmem:[#allocation13 + $0xa70] sm:$0xff]  ;;  %v3242_v2 = vld [vmem:[#allocation13 + $0x868] sm:$0xff] }
 0x461   :  { %4457 = vmatpush2.msra.mxu0 %v3201_v25  ;;  %4387 = vmatprep.subr.mxu1 %v3136_v42  ;;  %v3241_v25 = vld [vmem:[#allocation13 + $0x860] sm:$0xff] }
 0x462   :  { %4458 = vmatprep.subr.mxu0 %v3200_v46  ;;  %4388 = vmatpush2.msra.mxu1 %v3135_v44  ;;  %v3305_v42 = vld [vmem:[#allocation13 + $0xa60] sm:$0xff]  ;;  %v3304_v46 = vld [vmem:[#allocation13 + $0xa58] sm:$0xff]  ;;  %v3239_v44 = vld [vmem:[#allocation13 + $0x850] sm:$0xff] }
 0x463   :  { %4459 = vmatpush2.msra.mxu0 %v3199_v50  ;;  %4389 = vmatprep.subr.mxu1 %v3134_v47  ;;  %v3303_v50 = vld [vmem:[#allocation13 + $0xa50] sm:$0xff]  ;;  %v3238_v47 = vld [vmem:[#allocation13 + $0x848] sm:$0xff] }
 0x464   :  { %4460 = vmatprep.subr.mxu0 %v3198_v1  ;;  %4390 = vmatpush2.msra.mxu1 %v3133_v12  ;;  %v3302_v1 = vld [vmem:[#allocation13 + $0xa48] sm:$0xff]  ;;  %v3237_v12 = vld [vmem:[#allocation13 + $0x840] sm:$0xff] }
 0x465   :  { %4461 = vmatpush2.msra.mxu0 %v3197_v49  ;;  %4392 = vmatmul.mubr.f32.vlgmr.msra.gmra.mxu1 %v7128_v27  ;;  %v3320_v27 = vld [vmem:[#allocation13 + $0xad8] sm:$0xff]  ;;  %v3301_v49 = vld [vmem:[#allocation13 + $0xa40] sm:$0xff] }
 0x466   :  { %4463 = vmatmul.mubr.f32.vlgmr.msra.gmra.mxu0 %v7131_v54  ;;  %4469 = vmatprep.subr.mxu1 %v3260_v57  ;;  %v3255_v54 = vld [vmem:[#allocation13 + $0x8d0] sm:$0xff]  ;;  %v3236_v57 = vld [vmem:[#allocation13 + $0x838] sm:$0xff] }
 0x467   :  { %4540 = vmatprep.subr.mxu0 %v3324_v20  ;;  %4470 = vmatpush1.msra.mxu1 %v3259_v19  ;;  %v3300_v20 = vld [vmem:[#allocation13 + $0xa38] sm:$0xff]  ;;  %v3235_v19 = vld [vmem:[#allocation13 + $0x830] sm:$0xff] }
 0x468   :  { %4533 = vmatprep.mubr.f32.mxu1 %v4066_v62  ;;  %4541 = vmatpush1.msra.mxu0 %v3323_v61  ;;  %v3299_v61 = vld [vmem:[#allocation13 + $0xa30] sm:$0xff]  ;;  %v3234_v62 = vld [vmem:[#allocation13 + $0x828] sm:$0xff] }
 0x469   :  { %4604 = vmatprep.mubr.f32.mxu0 %v4067_v6  ;;  %4471 = vmatprep.subr.mxu1 %v3258_v29  ;;  %v3298_v29 = vld [vmem:[#allocation13 + $0xa28] sm:$0xff]  ;;  %v3233_v6 = vld [vmem:[#allocation13 + $0x820] sm:$0xff] }
 0x46a   :  { %4542 = vmatprep.subr.mxu0 %v3322_v32  ;;  %4472 = vmatpush1.msra.mxu1 %v3257_v14  ;;  %v3297_v32 = vld [vmem:[#allocation13 + $0xa20] sm:$0xff]  ;;  %v3232_v14 = vld [vmem:[#allocation13 + $0x818] sm:$0xff] }
 0x46b   :  { %4543 = vmatpush1.msra.mxu0 %v3321_v24  ;;  %4473 = vmatprep.subr.mxu1 %v3256_v56  ;;  %v3296_v24 = vld [vmem:[#allocation13 + $0xa18] sm:$0xff]  ;;  %v3231_v56 = vld [vmem:[#allocation13 + $0x810] sm:$0xff] }
 0x46c   :  { %4544 = vmatprep.subr.mxu0 %v3320_v27  ;;  %4474 = vmatpush1.msra.mxu1 %v3255_v54  ;;  %v3295_v27 = vld [vmem:[#allocation13 + $0xa10] sm:$0xff]  ;;  %v3230_v54 = vld [vmem:[#allocation13 + $0x808] sm:$0xff] }
 0x46d   :  { %4545 = vmatpush1.msra.mxu0 %v3319_v5  ;;  %4475 = vmatprep.subr.mxu1 %v3254_v45  ;;  %v3294_v5 = vld [vmem:[#allocation13 + $0xa08] sm:$0xff]  ;;  %v3229_v45 = vld [vmem:[#allocation13 + $0x800] sm:$0xff] }
 0x46e   :  { %4546 = vmatprep.subr.mxu0 %v3318_v3  ;;  %4476 = vmatpush1.msra.mxu1 %v3253_v4  ;;  %v3293_v3 = vld [vmem:[#allocation13 + $0xa00] sm:$0xff]  ;;  %v3292_v4 = vld [vmem:[#allocation13 + $0x9f8] sm:$0xff] }
 0x46f   :  { %4547 = vmatpush1.msra.mxu0 %v3317_v58  ;;  %4477 = vmatprep.subr.mxu1 %v3252_v7  ;;  %v3356_v58 = vld [vmem:[#allocation13 + $0xbf8] sm:$0xff]  ;;  %v3291_v7 = vld [vmem:[#allocation13 + $0x9f0] sm:$0xff] }
 0x470   :  { %4548 = vmatprep.subr.mxu0 %v3316_v8  ;;  %4478 = vmatpush1.msra.mxu1 %v3251_v53  ;;  %v3355_v8 = vld [vmem:[#allocation13 + $0xbf0] sm:$0xff]  ;;  %v3290_v53 = vld [vmem:[#allocation13 + $0x9e8] sm:$0xff] }
 0x471   :  { %4549 = vmatpush1.msra.mxu0 %v3315_v10  ;;  %4479 = vmatprep.subr.mxu1 %v3250_v11  ;;  %v3354_v10 = vld [vmem:[#allocation13 + $0xbe8] sm:$0xff]  ;;  %v3289_v11 = vld [vmem:[#allocation13 + $0x9e0] sm:$0xff] }
 0x472   :  { %4550 = vmatprep.subr.mxu0 %v3314_v15  ;;  %4480 = vmatpush1.msra.mxu1 %v3249_v13  ;;  %v3353_v15 = vld [vmem:[#allocation13 + $0xbe0] sm:$0xff]  ;;  %v3288_v13 = vld [vmem:[#allocation13 + $0x9d8] sm:$0xff] }
 0x473   :  { %4551 = vmatpush1.msra.mxu0 %v3313_v55  ;;  %4481 = vmatprep.subr.mxu1 %v3248_v21  ;;  %v3352_v55 = vld [vmem:[#allocation13 + $0xbd8] sm:$0xff]  ;;  %v3287_v21 = vld [vmem:[#allocation13 + $0x9d0] sm:$0xff] }
 0x474   :  { %4552 = vmatprep.subr.mxu0 %v3312_v9  ;;  %4482 = vmatpush1.msra.mxu1 %v3247_v36  ;;  %v3351_v9 = vld [vmem:[#allocation13 + $0xbd0] sm:$0xff]  ;;  %v3286_v36 = vld [vmem:[#allocation13 + $0x9c8] sm:$0xff] }
 0x475   :  { %4553 = vmatpush1.msra.mxu0 %v3311_v51  ;;  %4483 = vmatprep.subr.mxu1 %v3246_v17  ;;  %v3350_v51 = vld [vmem:[#allocation13 + $0xbc8] sm:$0xff]  ;;  %v3285_v17 = vld [vmem:[#allocation13 + $0x9c0] sm:$0xff] }
 0x476   :  { %4554 = vmatprep.subr.mxu0 %v3310_v28  ;;  %4484 = vmatpush1.msra.mxu1 %v3245_v22  ;;  %v2648_v28 = vpop.permute.xlu1 %2647  ;;  %v3349_v22 = vld [vmem:[#allocation13 + $0xbc0] sm:$0xff] }
 0x477   :  { %4555 = vmatpush1.msra.mxu0 %v3309_v30  ;;  %4485 = vmatprep.subr.mxu1 %v3244_v26  ;;  %v3284_v30 = vld [vmem:[#allocation13 + $0x9b8] sm:$0xff] }
 0x478   :  { %4556 = vmatprep.subr.mxu0 %v3308_v34  ;;  %4486 = vmatpush1.msra.mxu1 %v3243_v31  ;;  %v3348_v26 = vld [vmem:[#allocation13 + $0xbb8] sm:$0xff]  ;;  %v3283_v34 = vld [vmem:[#allocation13 + $0x9b0] sm:$0xff]  ;;  %v7170_v31 = vpop.permute.xlu0 %2637 }
 0x479   :  { %4557 = vmatpush1.msra.mxu0 %v3307_v37  ;;  %4487 = vmatprep.subr.mxu1 %v3242_v2  ;;  %v3347_v37 = vld [vmem:[#allocation13 + $0xbb0] sm:$0xff]  ;;  %v3282_v2 = vld [vmem:[#allocation13 + $0x9a8] sm:$0xff] }
 0x47a   :  { %4558 = vmatprep.subr.mxu0 %v3306_v38  ;;  %4488 = vmatpush1.msra.mxu1 %v3241_v25  ;;  %v3346_v38 = vld [vmem:[#allocation13 + $0xba8] sm:$0xff]  ;;  %v3281_v25 = vld [vmem:[#allocation13 + $0x9a0] sm:$0xff] }
 0x47b   :  { %4559 = vmatpush1.msra.mxu0 %v3305_v42  ;;  %4489 = vmatprep.subr.mxu1 %v3240_v43  ;;  %v2661_v42 = vrot.slane %v6969_v59, 5  ;;  %v3345_v43 = vld [vmem:[#allocation13 + $0xba0] sm:$0xff] }
 0x47c   :  { %4560 = vmatprep.subr.mxu0 %v3304_v46  ;;  %4490 = vmatpush1.msra.mxu1 %v3239_v44  ;;  %v3280_v46 = vld [vmem:[#allocation13 + $0x998] sm:$0xff] }
 0x47d   :  { %4561 = vmatpush1.msra.mxu0 %v3303_v50  ;;  %4491 = vmatprep.subr.mxu1 %v3238_v47  ;;  %v3344_v44 = vld [vmem:[#allocation13 + $0xb98] sm:$0xff]  ;;  %v3279_v50 = vld [vmem:[#allocation13 + $0x990] sm:$0xff]  ;;  %v2641_v47 = vrot.slane %v6969_v59, 1 }
 0x47e   :  { %4562 = vmatprep.subr.mxu0 %v3302_v1  ;;  %4492 = vmatpush1.msra.mxu1 %v3237_v12  ;;  %v2651_v1 = vrot.slane %v6969_v59, 3  ;;  %v2660_v12 = vrot.slane %v6964_v39, 6 }
 0x47f   :  { %4563 = vmatpush1.msra.mxu0 %v3301_v49  ;;  %4493 = vmatprep.subr.mxu1 %v3236_v57  ;;  %v2668_v49 = vpop.permute.xlu1 %2667  ;;  %v3343_v57 = vld [vmem:[#allocation13 + $0xb90] sm:$0xff] }
 0x480   :  { %4564 = vmatprep.subr.mxu0 %v3300_v20  ;;  %4494 = vmatpush1.msra.mxu1 %v3235_v19  ;;  %v3278_v20 = vld [vmem:[#allocation13 + $0x988] sm:$0xff] }
 0x481   :  { %4565 = vmatpush1.msra.mxu0 %v3299_v61  ;;  %4495 = vmatprep.subr.mxu1 %v3234_v62  ;;  %v3342_v19 = vld [vmem:[#allocation13 + $0xb88] sm:$0xff]  ;;  %v3277_v61 = vld [vmem:[#allocation13 + $0x980] sm:$0xff]  ;;  %v2632_v62 = vrot.slane %v6969_v59, 7 }
 0x482   :  { %4566 = vmatprep.subr.mxu0 %v3298_v29  ;;  %4496 = vmatpush1.msra.mxu1 %v3233_v6  ;;  %v2640_v29 = vrot.slane %v6964_v39, 2  ;;  %v2650_v6 = vrot.slane %v6964_v39, 4 }
 0x483   :  { %4567 = vmatpush1.msra.mxu0 %v3297_v32  ;;  %4497 = vmatprep.subr.mxu1 %v3232_v14  ;;  %v2658_v32 = vpop.permute.xlu0 %2657  ;;  %v2662_v14 = vsel %vm2430_vm3, %v2661_v42, %v2660_v12  ;;  %v3265_v42 = vld [vmem:[#allocation13 + $0x920] sm:$0xff]  ;;  %v3327_v12 = vld [vmem:[#allocation13 + $0xb10] sm:$0xff] }
 0x484   :  { %4568 = vmatprep.subr.mxu0 %v3296_v24  ;;  %4498 = vmatpush1.msra.mxu1 %v3231_v56  ;;  %v3341_v24 = vld [vmem:[#allocation13 + $0xb80] sm:$0xff]  ;;  %v3276_v56 = vld [vmem:[#allocation13 + $0x978] sm:$0xff]  ;;  %v2652_v59 = vsel %vm2430_vm3, %v2651_v1, %v2650_v6  ;;  %v3263_v1 = vld [vmem:[#allocation13 + $0x910] sm:$0xff] }
 0x485   :  { %4569 = vmatpush1.msra.mxu0 %v3295_v27  ;;  %4499 = vmatprep.subr.mxu1 %v3230_v54  ;;  %v2673_v27 = vsel %vm2468_vm4, %v2662_v14, %v2668_v49  ;;  %v3340_v54 = vld [vmem:[#allocation13 + $0xb78] sm:$0xff]  ;;  %v3262_v49 = vld [vmem:[#allocation13 + $0x908] sm:$0xff]  ;;  %v3451_v14 = vld [vmem:[#allocation13 + $0xef0] sm:$0xff] }
 0x486   :  { %4570 = vmatprep.subr.mxu0 %v3294_v5  ;;  %4500 = vmatpush1.msra.mxu1 %v3229_v45  ;;  %v3275_v5 = vld [vmem:[#allocation13 + $0x970] sm:$0xff]  ;;  %v2642_v45 = vsel %vm2430_vm3, %v2641_v47, %v2640_v29  ;;  %v3328_v47 = vld [vmem:[#allocation13 + $0xb18] sm:$0xff] }
 0x487   :  { %4571 = vmatpush1.msra.mxu0 %v3293_v3  ;;  %4501 = vmatprep.subr.mxu1 %v3292_v4  ;;  %v3339_v3 = vld [vmem:[#allocation13 + $0xb70] sm:$0xff]  ;;  %v3274_v4 = vld [vmem:[#allocation13 + $0x968] sm:$0xff]  ;;  %v3452_v6 = vld [vmem:[#allocation13 + $0xef8] sm:$0xff] }
 0x488   :  { %4572 = vmatprep.subr.mxu0 %v3356_v58  ;;  %4502 = vmatpush2.msra.mxu1 %v3291_v7  ;;  %v2671_v58 = vsel %vm2468_vm4, %v2642_v45, %v2648_v28  ;;  %v2672_v7 = vsel %vm2468_vm4, %v2652_v59, %v2658_v32  ;;  %v3269_v28 = vld [vmem:[#allocation13 + $0x940] sm:$0xff]  ;;  %v3387_v32 = vld [vmem:[#allocation13 + $0xcf0] sm:$0xff]  ;;  %v3384_v59 = vld [vmem:[#allocation13 + $0xcd8] sm:$0xff] }
 0x489   :  { %4573 = vmatpush2.msra.mxu0 %v3355_v8  ;;  %4503 = vmatprep.subr.mxu1 %v3290_v53  ;;  %v3338_v8 = vld [vmem:[#allocation13 + $0xb68] sm:$0xff]  ;;  %v3273_v53 = vld [vmem:[#allocation13 + $0x960] sm:$0xff] }
 0x48a   :  { %4574 = vmatprep.subr.mxu0 %v3354_v10  ;;  %4504 = vmatpush2.msra.mxu1 %v3289_v11  ;;  %v2633_v10 = vsel %vm2430_vm3, %v2632_v62, %v6964_v39  ;;  %v2679_v11 = vcombine.low %v2672_v7, %v2673_v27  ;;  %v3334_v39 = vld [vmem:[#allocation13 + $0xb48] sm:$0xff]  ;;  %v3388_v62 = vld [vmem:[#allocation13 + $0xcf8] sm:$0xff]  ;;  %v3449_v45 = vld [vmem:[#allocation13 + $0xee0] sm:$0xff] }
 0x48b   :  { %4575 = vmatpush2.msra.mxu0 %v3353_v15  ;;  %4505 = vmatprep.subr.mxu1 %v3288_v13  ;;  %v3337_v15 = vld [vmem:[#allocation13 + $0xb60] sm:$0xff]  ;;  %v3272_v13 = vld [vmem:[#allocation13 + $0x958] sm:$0xff] }
 0x48c   :  { %4576 = vmatprep.subr.mxu0 %v3352_v55  ;;  %4506 = vmatpush2.msra.mxu1 %v3287_v21  ;;  %v2670_v55 = vsel %vm2468_vm4, %v2633_v10, %v7170_v31  ;;  %v3336_v21 = vld [vmem:[#allocation13 + $0xb58] sm:$0xff]  ;;  %v3267_v31 = vld [vmem:[#allocation13 + $0x930] sm:$0xff]  ;;  %v3381_v7 = vld [vmem:[#allocation13 + $0xcc0] sm:$0xff] }
 0x48d   :  { %4577 = vmatpush2.msra.mxu0 %v3351_v9  ;;  %4507 = vmatprep.subr.mxu1 %v3286_v36  ;;  %v3271_v9 = vld [vmem:[#allocation13 + $0x950] sm:$0xff]  ;;  %v2678_v36 = vcombine.low %v2670_v55, %v2671_v58  ;;  %v3446_v58 = vld [vmem:[#allocation13 + $0xec8] sm:$0xff]  ;;  %v3444_v10 = vld [vmem:[#allocation13 + $0xeb8] sm:$0xff] }
 0x48e   :  { %4578 = vmatprep.subr.mxu0 %v3350_v51  ;;  %4508 = vmatpush2.msra.mxu1 %v3285_v17  ;;  %v3335_v51 = vld [vmem:[#allocation13 + $0xb50] sm:$0xff]  ;;  %v3270_v17 = vld [vmem:[#allocation13 + $0x948] sm:$0xff] }
 0x48f   :  { %4579 = vmatpush2.msra.mxu0 %v3349_v22  ;;  %4509 = vmatprep.subr.mxu1 %v3284_v30  ;;  %v2693_v22 = vrot.slane %v2679_v11, %v7079_v52  ;;  %v3333_v30 = vld [vmem:[#allocation13 + $0xb40] sm:$0xff]  ;;  %v3379_v11 = vld [vmem:[#allocation13 + $0xcb0] sm:$0xff]  ;;  %v3442_v55 = vld [vmem:[#allocation13 + $0xea8] sm:$0xff] }
 0x490   :  { %4580 = vmatprep.subr.mxu0 %v3348_v26  ;;  %4510 = vmatpush2.msra.mxu1 %v3283_v34  ;;  %v3268_v26 = vld [vmem:[#allocation13 + $0x938] sm:$0xff] }
 0x491   :  { %4581 = vmatpush2.msra.mxu0 %v3347_v37  ;;  %4511 = vmatprep.subr.mxu1 %v3282_v2  ;;  %v3332_v34 = vld [vmem:[#allocation13 + $0xb38] sm:$0xff]  ;;  %v2686_v37 = vrot.slane %v2678_v36, %v7079_v52  ;;  %v3331_v2 = vld [vmem:[#allocation13 + $0xb30] sm:$0xff] }
 0x492   :  { %4582 = vmatprep.subr.mxu0 %v3346_v38  ;;  %4512 = vmatpush2.msra.mxu1 %v3281_v25  ;;  %v3266_v38 = vld [vmem:[#allocation13 + $0x928] sm:$0xff]  ;;  %v3376_v36 = vld [vmem:[#allocation13 + $0xc98] sm:$0xff] }
 0x493   :  { %4583 = vmatpush2.msra.mxu0 %v3345_v43  ;;  %4513 = vmatprep.subr.mxu1 %v3280_v46  ;;  %v3330_v25 = vld [vmem:[#allocation13 + $0xb28] sm:$0xff]  ;;  %v2694_v43 = vcombine.low %v2686_v37, %v2693_v22  ;;  %v3329_v46 = vld [vmem:[#allocation13 + $0xb20] sm:$0xff]  ;;  %v3371_v37 = vld [vmem:[#allocation13 + $0xc70] sm:$0xff] }
 0x494   :  { %4584 = vmatprep.subr.mxu0 %v3344_v44  ;;  %4514 = vmatpush2.msra.mxu1 %v3279_v50  ;;  %v3264_v44 = vld [vmem:[#allocation13 + $0x918] sm:$0xff]  ;;  %v5401_v50 = vcombine.low %v2693_v22, %v2693_v22  ;;  %v3438_v22 = vld [vmem:[#allocation13 + $0xe88] sm:$0xff] }
 0x495   :  { %4585 = vmatpush2.msra.mxu0 %v3343_v57  ;;  %4515 = vmatprep.subr.mxu1 %v3278_v20  ;;  %v3326_v57 = vld [vmem:[#allocation13 + $0xb08] sm:$0xff]  ;;  %v3261_v20 = vld [vmem:[#allocation13 + $0x900] sm:$0xff] }
 0x496   :  { %4586 = vmatprep.subr.mxu0 %v3342_v19  ;;  %4516 = vmatpush2.msra.mxu1 %v3277_v61  ;;  %v3325_v19 = vld [vmem:[#allocation13 + $0xb00] sm:$0xff]  ;;  %v7192_v61 = vrot.slane %v2694_v43, %v7079_v52  ;;  %v7195_v29 = vrot.slane %v5401_v50, %v7079_v52  ;;  %v3367_v50 = vld [vmem:[#allocation13 + $0xc50] sm:$0xff] }
 0x497   :  { %4587 = vmatpush2.msra.mxu0 %v3341_v24  ;;  %4517 = vmatprep.subr.mxu1 %v3276_v56  ;;  %v3386_v56 = vld [vmem:[#allocation13 + $0xce8] sm:$0xff]  ;;  %v3433_v43 = vld [vmem:[#allocation13 + $0xe60] sm:$0xff] }
 0x498   :  { %4588 = vmatprep.subr.mxu0 %v3340_v54  ;;  %4518 = vmatpush2.msra.mxu1 %v3275_v5  ;;  %v4083_v24 = vcombine.high %v7192_v61, %v7192_v61  ;;  %v4084_v27 = vcombine.high %v7195_v29, %v7195_v29  ;;  %v3450_v54 = vld [vmem:[#allocation13 + $0xee8] sm:$0xff]  ;;  %v3385_v5 = vld [vmem:[#allocation13 + $0xce0] sm:$0xff] }
 0x499   :  { %4589 = vmatpush2.msra.mxu0 %v3339_v3  ;;  %4519 = vmatprep.subr.mxu1 %v3274_v4  ;;  %v3447_v3 = vld [vmem:[#allocation13 + $0xed0] sm:$0xff]  ;;  %v3382_v4 = vld [vmem:[#allocation13 + $0xcc8] sm:$0xff] }
 0x49a   :  { %4590 = vmatprep.subr.mxu0 %v3338_v8  ;;  %4520 = vmatpush2.msra.mxu1 %v3273_v53  ;;  %v3445_v8 = vld [vmem:[#allocation13 + $0xec0] sm:$0xff]  ;;  %v3380_v53 = vld [vmem:[#allocation13 + $0xcb8] sm:$0xff] }
 0x49b   :  { %4591 = vmatpush2.msra.mxu0 %v3337_v15  ;;  %4521 = vmatprep.subr.mxu1 %v3272_v13  ;;  %v3443_v15 = vld [vmem:[#allocation13 + $0xeb0] sm:$0xff]  ;;  %v3378_v13 = vld [vmem:[#allocation13 + $0xca8] sm:$0xff] }
 0x49c   :  { %4592 = vmatprep.subr.mxu0 %v3336_v21  ;;  %4522 = vmatpush2.msra.mxu1 %v3271_v9  ;;  %v3377_v21 = vld [vmem:[#allocation13 + $0xca0] sm:$0xff] }
 0x49d   :  { %4593 = vmatpush2.msra.mxu0 %v3335_v51  ;;  %4523 = vmatprep.subr.mxu1 %v3270_v17  ;;  %v3441_v9 = vld [vmem:[#allocation13 + $0xea0] sm:$0xff]  ;;  %v3440_v51 = vld [vmem:[#allocation13 + $0xe98] sm:$0xff]  ;;  %v3375_v17 = vld [vmem:[#allocation13 + $0xc90] sm:$0xff] }
 0x49e   :  { %4594 = vmatprep.subr.mxu0 %v3334_v39  ;;  %4524 = vmatpush2.msra.mxu1 %v3269_v28  ;;  %v3439_v39 = vld [vmem:[#allocation13 + $0xe90] sm:$0xff]  ;;  %v3374_v28 = vld [vmem:[#allocation13 + $0xc88] sm:$0xff] }
 0x49f   :  { %4595 = vmatpush2.msra.mxu0 %v3333_v30  ;;  %4525 = vmatprep.subr.mxu1 %v3268_v26  ;;  %v3373_v30 = vld [vmem:[#allocation13 + $0xc80] sm:$0xff] }
 0x4a0   :  { %4596 = vmatprep.subr.mxu0 %v3332_v34  ;;  %4526 = vmatpush2.msra.mxu1 %v3267_v31  ;;  %v3437_v26 = vld [vmem:[#allocation13 + $0xe80] sm:$0xff]  ;;  %v3372_v34 = vld [vmem:[#allocation13 + $0xc78] sm:$0xff] }
 0x4a1   :  { %4597 = vmatpush2.msra.mxu0 %v3331_v2  ;;  %4527 = vmatprep.subr.mxu1 %v3266_v38  ;;  %v3436_v31 = vld [vmem:[#allocation13 + $0xe78] sm:$0xff]  ;;  %v3435_v2 = vld [vmem:[#allocation13 + $0xe70] sm:$0xff]  ;;  %v3370_v38 = vld [vmem:[#allocation13 + $0xc68] sm:$0xff] }
 0x4a2   :  { %4598 = vmatprep.subr.mxu0 %v3330_v25  ;;  %4528 = vmatpush2.msra.mxu1 %v3265_v42  ;;  %v3434_v25 = vld [vmem:[#allocation13 + $0xe68] sm:$0xff]  ;;  %v3369_v42 = vld [vmem:[#allocation13 + $0xc60] sm:$0xff] }
 0x4a3   :  { %4599 = vmatpush2.msra.mxu0 %v3329_v46  ;;  %4529 = vmatprep.subr.mxu1 %v3264_v44  ;;  %v3368_v46 = vld [vmem:[#allocation13 + $0xc58] sm:$0xff] }
 0x4a4   :  { %4600 = vmatprep.subr.mxu0 %v3328_v47  ;;  %4530 = vmatpush2.msra.mxu1 %v3263_v1  ;;  %v3432_v44 = vld [vmem:[#allocation13 + $0xe58] sm:$0xff]  ;;  %v3431_v47 = vld [vmem:[#allocation13 + $0xe50] sm:$0xff]  ;;  %v3366_v1 = vld [vmem:[#allocation13 + $0xc48] sm:$0xff] }
 0x4a5   :  { %4601 = vmatpush2.msra.mxu0 %v3327_v12  ;;  %4531 = vmatprep.subr.mxu1 %v3262_v49  ;;  %v3430_v12 = vld [vmem:[#allocation13 + $0xe48] sm:$0xff]  ;;  %v3365_v49 = vld [vmem:[#allocation13 + $0xc40] sm:$0xff] }
 0x4a6   :  { %4602 = vmatprep.subr.mxu0 %v3326_v57  ;;  %4532 = vmatpush2.msra.mxu1 %v3261_v20  ;;  %v3429_v57 = vld [vmem:[#allocation13 + $0xe40] sm:$0xff]  ;;  %v3364_v20 = vld [vmem:[#allocation13 + $0xc38] sm:$0xff] }
 0x4a7   :  { %4603 = vmatpush2.msra.mxu0 %v3325_v19  ;;  %4534 = vmatmul.mubr.f32.vlgmr.msra.gmra.mxu1 %v7159_v0  ;;  %v3448_v0 = vld [vmem:[#allocation13 + $0xed8] sm:$0xff] }
 0x4a8   :  { %4605 = vmatmul.mubr.f32.vlgmr.msra.gmra.mxu0 %v7162_v40  ;;  %4611 = vmatprep.subr.mxu1 %v3388_v62  ;;  %v3383_v40 = vld [vmem:[#allocation13 + $0xcd0] sm:$0xff]  ;;  %v3428_v19 = vld [vmem:[#allocation13 + $0xe38] sm:$0xff] }
 0x4a9   :  { %4682 = vmatprep.subr.mxu0 %v3452_v6  ;;  %4612 = vmatpush1.msra.mxu1 %v3387_v32  ;;  %v3363_v62 = vld [vmem:[#allocation13 + $0xc30] sm:$0xff]  ;;  %v3362_v32 = vld [vmem:[#allocation13 + $0xc28] sm:$0xff] }
 0x4aa   :  { %4675 = vmatprep.mubr.f32.mxu1 %v4083_v24  ;;  %4683 = vmatpush1.msra.mxu0 %v3451_v14  ;;  %v3427_v6 = vld [vmem:[#allocation13 + $0xe30] sm:$0xff]  ;;  %v3426_v14 = vld [vmem:[#allocation13 + $0xe28] sm:$0xff]  ;;  %v3361_v24 = vld [vmem:[#allocation13 + $0xc20] sm:$0xff] }
 0x4ab   :  { %4746 = vmatprep.mubr.f32.mxu0 %v4084_v27  ;;  %4613 = vmatprep.subr.mxu1 %v3386_v56  ;;  %v3425_v56 = vld [vmem:[#allocation13 + $0xe20] sm:$0xff]  ;;  %v3360_v27 = vld [vmem:[#allocation13 + $0xc18] sm:$0xff] }
 0x4ac   :  { %4684 = vmatprep.subr.mxu0 %v3450_v54  ;;  %4614 = vmatpush1.msra.mxu1 %v3385_v5  ;;  %v3424_v54 = vld [vmem:[#allocation13 + $0xe18] sm:$0xff]  ;;  %v3359_v5 = vld [vmem:[#allocation13 + $0xc10] sm:$0xff] }
 0x4ad   :  { %4685 = vmatpush1.msra.mxu0 %v3449_v45  ;;  %4615 = vmatprep.subr.mxu1 %v3384_v59  ;;  %v3423_v45 = vld [vmem:[#allocation13 + $0xe10] sm:$0xff]  ;;  %v3358_v59 = vld [vmem:[#allocation13 + $0xc08] sm:$0xff] }
 0x4ae   :  { %4686 = vmatprep.subr.mxu0 %v3448_v0  ;;  %4616 = vmatpush1.msra.mxu1 %v3383_v40  ;;  %v3422_v0 = vld [vmem:[#allocation13 + $0xe08] sm:$0xff]  ;;  %v3357_v40 = vld [vmem:[#allocation13 + $0xc00] sm:$0xff] }
 0x4af   :  { %4687 = vmatpush1.msra.mxu0 %v3447_v3  ;;  %4617 = vmatprep.subr.mxu1 %v3382_v4  ;;  %v3421_v3 = vld [vmem:[#allocation13 + $0xe00] sm:$0xff]  ;;  %v3420_v4 = vld [vmem:[#allocation13 + $0xdf8] sm:$0xff] }
 0x4b0   :  { %4688 = vmatprep.subr.mxu0 %v3446_v58  ;;  %4618 = vmatpush1.msra.mxu1 %v3381_v7  ;;  %v3484_v58 = vld [vmem:[#allocation13 + $0xff8] sm:$0xff]  ;;  %v3419_v7 = vld [vmem:[#allocation13 + $0xdf0] sm:$0xff] }
 0x4b1   :  { %4689 = vmatpush1.msra.mxu0 %v3445_v8  ;;  %4619 = vmatprep.subr.mxu1 %v3380_v53  ;;  %v3483_v8 = vld [vmem:[#allocation13 + $0xff0] sm:$0xff]  ;;  %v3418_v53 = vld [vmem:[#allocation13 + $0xde8] sm:$0xff] }
 0x4b2   :  { %4690 = vmatprep.subr.mxu0 %v3444_v10  ;;  %4620 = vmatpush1.msra.mxu1 %v3379_v11  ;;  %v3482_v10 = vld [vmem:[#allocation13 + $0xfe8] sm:$0xff]  ;;  %v3417_v11 = vld [vmem:[#allocation13 + $0xde0] sm:$0xff] }
 0x4b3   :  { %4691 = vmatpush1.msra.mxu0 %v3443_v15  ;;  %4621 = vmatprep.subr.mxu1 %v3378_v13  ;;  %v3481_v15 = vld [vmem:[#allocation13 + $0xfe0] sm:$0xff]  ;;  %v3416_v13 = vld [vmem:[#allocation13 + $0xdd8] sm:$0xff] }
 0x4b4   :  { %4692 = vmatprep.subr.mxu0 %v3442_v55  ;;  %4622 = vmatpush1.msra.mxu1 %v3377_v21  ;;  %v3480_v55 = vld [vmem:[#allocation13 + $0xfd8] sm:$0xff]  ;;  %v3415_v21 = vld [vmem:[#allocation13 + $0xdd0] sm:$0xff] }
 0x4b5   :  { %4693 = vmatpush1.msra.mxu0 %v3441_v9  ;;  %4623 = vmatprep.subr.mxu1 %v3376_v36  ;;  %v3479_v9 = vld [vmem:[#allocation13 + $0xfd0] sm:$0xff]  ;;  %v3414_v36 = vld [vmem:[#allocation13 + $0xdc8] sm:$0xff] }
 0x4b6   :  { %4694 = vmatprep.subr.mxu0 %v3440_v51  ;;  %4624 = vmatpush1.msra.mxu1 %v3375_v17  ;;  %v3478_v51 = vld [vmem:[#allocation13 + $0xfc8] sm:$0xff]  ;;  %v3413_v17 = vld [vmem:[#allocation13 + $0xdc0] sm:$0xff] }
 0x4b7   :  { %4695 = vmatpush1.msra.mxu0 %v3439_v39  ;;  %4625 = vmatprep.subr.mxu1 %v3374_v28  ;;  %v2715_v39 = vpop.permute.xlu1 %2714  ;;  %v3477_v28 = vld [vmem:[#allocation13 + $0xfc0] sm:$0xff] }
 0x4b8   :  { %4696 = vmatprep.subr.mxu0 %v3438_v22  ;;  %4626 = vmatpush1.msra.mxu1 %v3373_v30  ;;  %v3412_v22 = vld [vmem:[#allocation13 + $0xdb8] sm:$0xff] }
 0x4b9   :  { %4697 = vmatpush1.msra.mxu0 %v3437_v26  ;;  %4627 = vmatprep.subr.mxu1 %v3372_v34  ;;  %v3476_v30 = vld [vmem:[#allocation13 + $0xfb8] sm:$0xff]  ;;  %v3411_v26 = vld [vmem:[#allocation13 + $0xdb0] sm:$0xff]  ;;  %v7203_v34 = vpop.permute.xlu0 %2704 }
 0x4ba   :  { %4698 = vmatprep.subr.mxu0 %v3436_v31  ;;  %4628 = vmatpush1.msra.mxu1 %v3371_v37  ;;  %v3475_v31 = vld [vmem:[#allocation13 + $0xfb0] sm:$0xff]  ;;  %v3410_v37 = vld [vmem:[#allocation13 + $0xda8] sm:$0xff] }
 0x4bb   :  { %4699 = vmatpush1.msra.mxu0 %v3435_v2  ;;  %4629 = vmatprep.subr.mxu1 %v3370_v38  ;;  %v3474_v2 = vld [vmem:[#allocation13 + $0xfa8] sm:$0xff]  ;;  %v3409_v38 = vld [vmem:[#allocation13 + $0xda0] sm:$0xff] }
 0x4bc   :  { %4700 = vmatprep.subr.mxu0 %v3434_v25  ;;  %4630 = vmatpush1.msra.mxu1 %v3369_v42  ;;  %v2728_v25 = vrot.slane %v6991_v63, 5  ;;  %v3473_v42 = vld [vmem:[#allocation13 + $0xfa0] sm:$0xff] }
 0x4bd   :  { %4701 = vmatpush1.msra.mxu0 %v3433_v43  ;;  %4631 = vmatprep.subr.mxu1 %v3368_v46  ;;  %v3408_v43 = vld [vmem:[#allocation13 + $0xd98] sm:$0xff] }
 0x4be   :  { %4702 = vmatprep.subr.mxu0 %v3432_v44  ;;  %4632 = vmatpush1.msra.mxu1 %v3367_v50  ;;  %v3472_v46 = vld [vmem:[#allocation13 + $0xf98] sm:$0xff]  ;;  %v3407_v44 = vld [vmem:[#allocation13 + $0xd90] sm:$0xff]  ;;  %v2708_v50 = vrot.slane %v6991_v63, 1 }
 0x4bf   :  { %4703 = vmatpush1.msra.mxu0 %v3431_v47  ;;  %4633 = vmatprep.subr.mxu1 %v3366_v1  ;;  %v2718_v47 = vrot.slane %v6991_v63, 3  ;;  %v2727_v1 = vrot.slane %v6986_v41, 6 }
 0x4c0   :  { %4704 = vmatprep.subr.mxu0 %v3430_v12  ;;  %4634 = vmatpush1.msra.mxu1 %v3365_v49  ;;  %v2735_v12 = vpop.permute.xlu1 %2734  ;;  %v3471_v49 = vld [vmem:[#allocation13 + $0xf90] sm:$0xff] }
 0x4c1   :  { %4705 = vmatpush1.msra.mxu0 %v3429_v57  ;;  %4635 = vmatprep.subr.mxu1 %v3364_v20  ;;  %v3406_v57 = vld [vmem:[#allocation13 + $0xd88] sm:$0xff] }
 0x4c2   :  { %4706 = vmatprep.subr.mxu0 %v3428_v19  ;;  %4636 = vmatpush1.msra.mxu1 %v3363_v62  ;;  %v3470_v20 = vld [vmem:[#allocation13 + $0xf88] sm:$0xff]  ;;  %v3405_v19 = vld [vmem:[#allocation13 + $0xd80] sm:$0xff]  ;;  %v2699_v62 = vrot.slane %v6991_v63, 7 }
 0x4c3   :  { %4707 = vmatpush1.msra.mxu0 %v3427_v6  ;;  %4637 = vmatprep.subr.mxu1 %v3362_v32  ;;  %v2707_v6 = vrot.slane %v6986_v41, 2  ;;  %v2717_v32 = vrot.slane %v6986_v41, 4 }
 0x4c4   :  { %4708 = vmatprep.subr.mxu0 %v3426_v14  ;;  %4638 = vmatpush1.msra.mxu1 %v3361_v24  ;;  %v2725_v14 = vpop.permute.xlu0 %2724  ;;  %v2729_v24 = vsel %vm2430_vm3, %v2728_v25, %v2727_v1  ;;  %v3457_v25 = vld [vmem:[#allocation13 + $0xf20] sm:$0xff]  ;;  %v3454_v1 = vld [vmem:[#allocation13 + $0xf08] sm:$0xff] }
 0x4c5   :  { %4709 = vmatpush1.msra.mxu0 %v3425_v56  ;;  %4639 = vmatprep.subr.mxu1 %v3360_v27  ;;  %v3469_v56 = vld [vmem:[#allocation13 + $0xf80] sm:$0xff]  ;;  %v3404_v27 = vld [vmem:[#allocation13 + $0xd78] sm:$0xff]  ;;  %v2719_v63 = vsel %vm2430_vm3, %v2718_v47, %v2717_v32  ;;  %v3390_v47 = vld [vmem:[#allocation13 + $0xd08] sm:$0xff] }
 0x4c6   :  { %4710 = vmatprep.subr.mxu0 %v3424_v54  ;;  %4640 = vmatpush1.msra.mxu1 %v3359_v5  ;;  %v2740_v54 = vsel %vm2468_vm4, %v2729_v24, %v2735_v12  ;;  %v3468_v5 = vld [vmem:[#allocation13 + $0xf78] sm:$0xff]  ;;  %v3389_v12 = vld [vmem:[#allocation13 + $0xd00] sm:$0xff]  ;;  %v3579_v32 = vld [vmem:[#allocation13 + $0x12f0] sm:$0xff] }
 0x4c7   :  { %4711 = vmatpush1.msra.mxu0 %v3423_v45  ;;  %4641 = vmatprep.subr.mxu1 %v3358_v59  ;;  %v3403_v45 = vld [vmem:[#allocation13 + $0xd70] sm:$0xff]  ;;  %v2709_v59 = vsel %vm2430_vm3, %v2708_v50, %v2707_v6  ;;  %v3514_v24 = vld [vmem:[#allocation13 + $0x10e8] sm:$0xff] }
 0x4c8   :  { %4712 = vmatprep.subr.mxu0 %v3422_v0  ;;  %4642 = vmatpush1.msra.mxu1 %v3357_v40  ;;  %v3467_v0 = vld [vmem:[#allocation13 + $0xf70] sm:$0xff]  ;;  %v3402_v40 = vld [vmem:[#allocation13 + $0xd68] sm:$0xff] }
 0x4c9   :  { %4713 = vmatpush1.msra.mxu0 %v3421_v3  ;;  %4643 = vmatprep.subr.mxu1 %v3420_v4  ;;  %v2738_v3 = vsel %vm2468_vm4, %v2709_v59, %v2715_v39  ;;  %v2739_v4 = vsel %vm2468_vm4, %v2719_v63, %v2725_v14  ;;  %v3461_v39 = vld [vmem:[#allocation13 + $0xf40] sm:$0xff]  ;;  %v3455_v50 = vld [vmem:[#allocation13 + $0xf10] sm:$0xff]  ;;  %v3510_v63 = vld [vmem:[#allocation13 + $0x10c8] sm:$0xff] }
 0x4ca   :  { %4714 = vmatprep.subr.mxu0 %v3484_v58  ;;  %4644 = vmatpush2.msra.mxu1 %v3419_v7  ;;  %v3466_v58 = vld [vmem:[#allocation13 + $0xf68] sm:$0xff]  ;;  %v3401_v7 = vld [vmem:[#allocation13 + $0xd60] sm:$0xff]  ;;  %v3515_v6 = vld [vmem:[#allocation13 + $0x10f0] sm:$0xff] }
 0x4cb   :  { %4715 = vmatpush2.msra.mxu0 %v3483_v8  ;;  %4645 = vmatprep.subr.mxu1 %v3418_v53  ;;  %v2700_v8 = vsel %vm2430_vm3, %v2699_v62, %v6986_v41  ;;  %v2746_v53 = vcombine.low %v2739_v4, %v2740_v54  ;;  %v3462_v41 = vld [vmem:[#allocation13 + $0xf48] sm:$0xff]  ;;  %v3580_v62 = vld [vmem:[#allocation13 + $0x12f8] sm:$0xff]  ;;  %v3513_v54 = vld [vmem:[#allocation13 + $0x10e0] sm:$0xff] }
 0x4cc   :  { %4716 = vmatprep.subr.mxu0 %v3482_v10  ;;  %4646 = vmatpush2.msra.mxu1 %v3417_v11  ;;  %v3465_v10 = vld [vmem:[#allocation13 + $0xf60] sm:$0xff]  ;;  %v3400_v11 = vld [vmem:[#allocation13 + $0xd58] sm:$0xff]  ;;  %v3575_v59 = vld [vmem:[#allocation13 + $0x12d0] sm:$0xff] }
 0x4cd   :  { %4717 = vmatpush2.msra.mxu0 %v3481_v15  ;;  %4647 = vmatprep.subr.mxu1 %v3416_v13  ;;  %v2737_v15 = vsel %vm2468_vm4, %v2700_v8, %v7203_v34  ;;  %v3464_v13 = vld [vmem:[#allocation13 + $0xf58] sm:$0xff]  ;;  %v3459_v34 = vld [vmem:[#allocation13 + $0xf30] sm:$0xff] }
 0x4ce   :  { %4718 = vmatprep.subr.mxu0 %v3480_v55  ;;  %4648 = vmatpush2.msra.mxu1 %v3415_v21  ;;  %v3399_v55 = vld [vmem:[#allocation13 + $0xd50] sm:$0xff]  ;;  %v2745_v21 = vcombine.low %v2737_v15, %v2738_v3  ;;  %v3573_v3 = vld [vmem:[#allocation13 + $0x12c0] sm:$0xff]  ;;  %v3508_v4 = vld [vmem:[#allocation13 + $0x10b8] sm:$0xff] }
 0x4cf   :  { %4719 = vmatpush2.msra.mxu0 %v3479_v9  ;;  %4649 = vmatprep.subr.mxu1 %v3414_v36  ;;  %v3463_v9 = vld [vmem:[#allocation13 + $0xf50] sm:$0xff]  ;;  %v3398_v36 = vld [vmem:[#allocation13 + $0xd48] sm:$0xff]  ;;  %v3569_v15 = vld [vmem:[#allocation13 + $0x12a0] sm:$0xff] }
 0x4d0   :  { %4720 = vmatprep.subr.mxu0 %v3478_v51  ;;  %4650 = vmatpush2.msra.mxu1 %v3413_v17  ;;  %v3397_v51 = vld [vmem:[#allocation13 + $0xd40] sm:$0xff]  ;;  %v2760_v17 = vrot.slane %v2746_v53, %v7079_v52  ;;  %v3571_v8 = vld [vmem:[#allocation13 + $0x12b0] sm:$0xff]  ;;  %v3506_v53 = vld [vmem:[#allocation13 + $0x10a8] sm:$0xff] }
 0x4d1   :  { %4721 = vmatpush2.msra.mxu0 %v3477_v28  ;;  %4651 = vmatprep.subr.mxu1 %v3412_v22  ;;  %v3396_v28 = vld [vmem:[#allocation13 + $0xd38] sm:$0xff] }
 0x4d2   :  { %4722 = vmatprep.subr.mxu0 %v3476_v30  ;;  %4652 = vmatpush2.msra.mxu1 %v3411_v26  ;;  %v3460_v22 = vld [vmem:[#allocation13 + $0xf38] sm:$0xff]  ;;  %v3395_v30 = vld [vmem:[#allocation13 + $0xd30] sm:$0xff]  ;;  %v2753_v26 = vrot.slane %v2745_v21, %v7079_v52 }
 0x4d3   :  { %4723 = vmatpush2.msra.mxu0 %v3475_v31  ;;  %4653 = vmatprep.subr.mxu1 %v3410_v37  ;;  %v3394_v31 = vld [vmem:[#allocation13 + $0xd28] sm:$0xff]  ;;  %v3503_v21 = vld [vmem:[#allocation13 + $0x1090] sm:$0xff] }
 0x4d4   :  { %4724 = vmatprep.subr.mxu0 %v3474_v2  ;;  %4654 = vmatpush2.msra.mxu1 %v3409_v38  ;;  %v3458_v37 = vld [vmem:[#allocation13 + $0xf28] sm:$0xff]  ;;  %v3393_v2 = vld [vmem:[#allocation13 + $0xd20] sm:$0xff]  ;;  %v2761_v38 = vcombine.low %v2753_v26, %v2760_v17 }
 0x4d5   :  { %4725 = vmatpush2.msra.mxu0 %v3473_v42  ;;  %4655 = vmatprep.subr.mxu1 %v3408_v43  ;;  %v3392_v42 = vld [vmem:[#allocation13 + $0xd18] sm:$0xff]  ;;  %v5402_v43 = vcombine.low %v2760_v17, %v2760_v17  ;;  %v3565_v17 = vld [vmem:[#allocation13 + $0x1280] sm:$0xff]  ;;  %v3498_v26 = vld [vmem:[#allocation13 + $0x1068] sm:$0xff] }
 0x4d6   :  { %4726 = vmatprep.subr.mxu0 %v3472_v46  ;;  %4656 = vmatpush2.msra.mxu1 %v3407_v44  ;;  %v3456_v46 = vld [vmem:[#allocation13 + $0xf18] sm:$0xff]  ;;  %v3391_v44 = vld [vmem:[#allocation13 + $0xd10] sm:$0xff] }
 0x4d7   :  { %4727 = vmatpush2.msra.mxu0 %v3471_v49  ;;  %4657 = vmatprep.subr.mxu1 %v3406_v57  ;;  %v3453_v49 = vld [vmem:[#allocation13 + $0xf00] sm:$0xff]  ;;  %v7225_v57 = vrot.slane %v2761_v38, %v7079_v52  ;;  %v3560_v38 = vld [vmem:[#allocation13 + $0x1258] sm:$0xff] }
 0x4d8   :  { %4728 = vmatprep.subr.mxu0 %v3470_v20  ;;  %4658 = vmatpush2.msra.mxu1 %v3405_v19  ;;  %v3516_v20 = vld [vmem:[#allocation13 + $0x10f8] sm:$0xff]  ;;  %v7228_v19 = vrot.slane %v5402_v43, %v7079_v52  ;;  %v3494_v43 = vld [vmem:[#allocation13 + $0x1048] sm:$0xff] }
 0x4d9   :  { %4729 = vmatpush2.msra.mxu0 %v3469_v56  ;;  %4659 = vmatprep.subr.mxu1 %v3404_v27  ;;  %v4100_v14 = vcombine.high %v7225_v57, %v7225_v57  ;;  %v3578_v27 = vld [vmem:[#allocation13 + $0x12e8] sm:$0xff] }
 0x4da   :  { %4730 = vmatprep.subr.mxu0 %v3468_v5  ;;  %4660 = vmatpush2.msra.mxu1 %v3403_v45  ;;  %v4101_v56 = vcombine.high %v7228_v19, %v7228_v19  ;;  %v3577_v5 = vld [vmem:[#allocation13 + $0x12e0] sm:$0xff]  ;;  %v3512_v45 = vld [vmem:[#allocation13 + $0x10d8] sm:$0xff] }
 0x4db   :  { %4731 = vmatpush2.msra.mxu0 %v3467_v0  ;;  %4661 = vmatprep.subr.mxu1 %v3402_v40  ;;  %v3574_v0 = vld [vmem:[#allocation13 + $0x12c8] sm:$0xff]  ;;  %v3509_v40 = vld [vmem:[#allocation13 + $0x10c0] sm:$0xff] }
 0x4dc   :  { %4732 = vmatprep.subr.mxu0 %v3466_v58  ;;  %4662 = vmatpush2.msra.mxu1 %v3401_v7  ;;  %v3572_v58 = vld [vmem:[#allocation13 + $0x12b8] sm:$0xff]  ;;  %v3507_v7 = vld [vmem:[#allocation13 + $0x10b0] sm:$0xff] }
 0x4dd   :  { %4733 = vmatpush2.msra.mxu0 %v3465_v10  ;;  %4663 = vmatprep.subr.mxu1 %v3400_v11  ;;  %v3570_v10 = vld [vmem:[#allocation13 + $0x12a8] sm:$0xff]  ;;  %v3505_v11 = vld [vmem:[#allocation13 + $0x10a0] sm:$0xff] }
 0x4de   :  { %4734 = vmatprep.subr.mxu0 %v3464_v13  ;;  %4664 = vmatpush2.msra.mxu1 %v3399_v55  ;;  %v3504_v13 = vld [vmem:[#allocation13 + $0x1098] sm:$0xff] }
 0x4df   :  { %4735 = vmatpush2.msra.mxu0 %v3463_v9  ;;  %4665 = vmatprep.subr.mxu1 %v3398_v36  ;;  %v3568_v55 = vld [vmem:[#allocation13 + $0x1298] sm:$0xff]  ;;  %v3567_v9 = vld [vmem:[#allocation13 + $0x1290] sm:$0xff]  ;;  %v3502_v36 = vld [vmem:[#allocation13 + $0x1088] sm:$0xff] }
 0x4e0   :  { %4736 = vmatprep.subr.mxu0 %v3462_v41  ;;  %4666 = vmatpush2.msra.mxu1 %v3397_v51  ;;  %v3566_v41 = vld [vmem:[#allocation13 + $0x1288] sm:$0xff]  ;;  %v3501_v51 = vld [vmem:[#allocation13 + $0x1080] sm:$0xff] }
 0x4e1   :  { %4737 = vmatpush2.msra.mxu0 %v3461_v39  ;;  %4667 = vmatprep.subr.mxu1 %v3396_v28  ;;  %v3500_v39 = vld [vmem:[#allocation13 + $0x1078] sm:$0xff] }
 0x4e2   :  { %4738 = vmatprep.subr.mxu0 %v3460_v22  ;;  %4668 = vmatpush2.msra.mxu1 %v3395_v30  ;;  %v3564_v28 = vld [vmem:[#allocation13 + $0x1278] sm:$0xff]  ;;  %v3499_v22 = vld [vmem:[#allocation13 + $0x1070] sm:$0xff] }
 0x4e3   :  { %4739 = vmatpush2.msra.mxu0 %v3459_v34  ;;  %4669 = vmatprep.subr.mxu1 %v3394_v31  ;;  %v3563_v30 = vld [vmem:[#allocation13 + $0x1270] sm:$0xff]  ;;  %v3562_v34 = vld [vmem:[#allocation13 + $0x1268] sm:$0xff]  ;;  %v3497_v31 = vld [vmem:[#allocation13 + $0x1060] sm:$0xff] }
 0x4e4   :  { %4740 = vmatprep.subr.mxu0 %v3458_v37  ;;  %4670 = vmatpush2.msra.mxu1 %v3393_v2  ;;  %v3561_v37 = vld [vmem:[#allocation13 + $0x1260] sm:$0xff]  ;;  %v3496_v2 = vld [vmem:[#allocation13 + $0x1058] sm:$0xff] }
 0x4e5   :  { %4741 = vmatpush2.msra.mxu0 %v3457_v25  ;;  %4671 = vmatprep.subr.mxu1 %v3392_v42  ;;  %v3495_v25 = vld [vmem:[#allocation13 + $0x1050] sm:$0xff] }
 0x4e6   :  { %4742 = vmatprep.subr.mxu0 %v3456_v46  ;;  %4672 = vmatpush2.msra.mxu1 %v3391_v44  ;;  %v3559_v42 = vld [vmem:[#allocation13 + $0x1250] sm:$0xff]  ;;  %v3558_v46 = vld [vmem:[#allocation13 + $0x1248] sm:$0xff]  ;;  %v3493_v44 = vld [vmem:[#allocation13 + $0x1040] sm:$0xff] }
 0x4e7   :  { %4743 = vmatpush2.msra.mxu0 %v3455_v50  ;;  %4673 = vmatprep.subr.mxu1 %v3390_v47  ;;  %v3557_v50 = vld [vmem:[#allocation13 + $0x1240] sm:$0xff]  ;;  %v3492_v47 = vld [vmem:[#allocation13 + $0x1038] sm:$0xff] }
 0x4e8   :  { %4744 = vmatprep.subr.mxu0 %v3454_v1  ;;  %4674 = vmatpush2.msra.mxu1 %v3389_v12  ;;  %v3556_v1 = vld [vmem:[#allocation13 + $0x1238] sm:$0xff]  ;;  %v3491_v12 = vld [vmem:[#allocation13 + $0x1030] sm:$0xff] }
 0x4e9   :  { %4745 = vmatpush2.msra.mxu0 %v3453_v49  ;;  %4676 = vmatmul.mubr.f32.vlgmr.msra.gmra.mxu1 %v7192_v61  ;;  %v3576_v61 = vld [vmem:[#allocation13 + $0x12d8] sm:$0xff]  ;;  %v3555_v49 = vld [vmem:[#allocation13 + $0x1230] sm:$0xff] }
 0x4ea   :  { %4747 = vmatmul.mubr.f32.vlgmr.msra.gmra.mxu0 %v7195_v29  ;;  %4753 = vmatprep.subr.mxu1 %v3516_v20  ;;  %v3511_v29 = vld [vmem:[#allocation13 + $0x10d0] sm:$0xff]  ;;  %v3490_v20 = vld [vmem:[#allocation13 + $0x1028] sm:$0xff] }
 0x4eb   :  { %4824 = vmatprep.subr.mxu0 %v3580_v62  ;;  %4754 = vmatpush1.msra.mxu1 %v3515_v6  ;;  %v3554_v62 = vld [vmem:[#allocation13 + $0x1228] sm:$0xff]  ;;  %v3489_v6 = vld [vmem:[#allocation13 + $0x1020] sm:$0xff] }
 0x4ec   :  { %4817 = vmatprep.mubr.f32.mxu1 %v4100_v14  ;;  %4825 = vmatpush1.msra.mxu0 %v3579_v32  ;;  %v3553_v32 = vld [vmem:[#allocation13 + $0x1220] sm:$0xff]  ;;  %v3488_v14 = vld [vmem:[#allocation13 + $0x1018] sm:$0xff] }
 0x4ed   :  { %4888 = vmatprep.mubr.f32.mxu0 %v4101_v56  ;;  %4755 = vmatprep.subr.mxu1 %v3514_v24  ;;  %v3552_v24 = vld [vmem:[#allocation13 + $0x1218] sm:$0xff]  ;;  %v3487_v56 = vld [vmem:[#allocation13 + $0x1010] sm:$0xff] }
 0x4ee   :  { %4826 = vmatprep.subr.mxu0 %v3578_v27  ;;  %4756 = vmatpush1.msra.mxu1 %v3513_v54  ;;  %v3551_v27 = vld [vmem:[#allocation13 + $0x1210] sm:$0xff]  ;;  %v3486_v54 = vld [vmem:[#allocation13 + $0x1008] sm:$0xff] }
 0x4ef   :  { %4827 = vmatpush1.msra.mxu0 %v3577_v5  ;;  %4757 = vmatprep.subr.mxu1 %v3512_v45  ;;  %v3550_v5 = vld [vmem:[#allocation13 + $0x1208] sm:$0xff]  ;;  %v3485_v45 = vld [vmem:[#allocation13 + $0x1000] sm:$0xff] }
 0x4f0   :  { %4828 = vmatprep.subr.mxu0 %v3576_v61  ;;  %4758 = vmatpush1.msra.mxu1 %v3511_v29  ;;  %v3549_v61 = vld [vmem:[#allocation13 + $0x1200] sm:$0xff]  ;;  %v3548_v29 = vld [vmem:[#allocation13 + $0x11f8] sm:$0xff] }
 0x4f1   :  { %4829 = vmatpush1.msra.mxu0 %v3575_v59  ;;  %4759 = vmatprep.subr.mxu1 %v3510_v63  ;;  %v3612_v59 = vld [vmem:[#allocation13 + $0x13f8] sm:$0xff]  ;;  %v3547_v63 = vld [vmem:[#allocation13 + $0x11f0] sm:$0xff] }
 0x4f2   :  { %4830 = vmatprep.subr.mxu0 %v3574_v0  ;;  %4760 = vmatpush1.msra.mxu1 %v3509_v40  ;;  %v3611_v0 = vld [vmem:[#allocation13 + $0x13f0] sm:$0xff]  ;;  %v3546_v40 = vld [vmem:[#allocation13 + $0x11e8] sm:$0xff] }
 0x4f3   :  { %4831 = vmatpush1.msra.mxu0 %v3573_v3  ;;  %4761 = vmatprep.subr.mxu1 %v3508_v4  ;;  %v3610_v3 = vld [vmem:[#allocation13 + $0x13e8] sm:$0xff]  ;;  %v3545_v4 = vld [vmem:[#allocation13 + $0x11e0] sm:$0xff] }
 0x4f4   :  { %4832 = vmatprep.subr.mxu0 %v3572_v58  ;;  %4762 = vmatpush1.msra.mxu1 %v3507_v7  ;;  %v3609_v58 = vld [vmem:[#allocation13 + $0x13e0] sm:$0xff]  ;;  %v3544_v7 = vld [vmem:[#allocation13 + $0x11d8] sm:$0xff] }
 0x4f5   :  { %4833 = vmatpush1.msra.mxu0 %v3571_v8  ;;  %4763 = vmatprep.subr.mxu1 %v3506_v53  ;;  %v3608_v8 = vld [vmem:[#allocation13 + $0x13d8] sm:$0xff]  ;;  %v3543_v53 = vld [vmem:[#allocation13 + $0x11d0] sm:$0xff] }
 0x4f6   :  { %4834 = vmatprep.subr.mxu0 %v3570_v10  ;;  %4764 = vmatpush1.msra.mxu1 %v3505_v11  ;;  %v3607_v10 = vld [vmem:[#allocation13 + $0x13d0] sm:$0xff]  ;;  %v3542_v11 = vld [vmem:[#allocation13 + $0x11c8] sm:$0xff] }
 0x4f7   :  { %4835 = vmatpush1.msra.mxu0 %v3569_v15  ;;  %4765 = vmatprep.subr.mxu1 %v3504_v13  ;;  %v3606_v15 = vld [vmem:[#allocation13 + $0x13c8] sm:$0xff]  ;;  %v3541_v13 = vld [vmem:[#allocation13 + $0x11c0] sm:$0xff] }
 0x4f8   :  { %4836 = vmatprep.subr.mxu0 %v3568_v55  ;;  %4766 = vmatpush1.msra.mxu1 %v3503_v21  ;;  %v2782_v55 = vpop.permute.xlu1 %2781  ;;  %v3605_v21 = vld [vmem:[#allocation13 + $0x13c0] sm:$0xff] }
 0x4f9   :  { %4837 = vmatpush1.msra.mxu0 %v3567_v9  ;;  %4767 = vmatprep.subr.mxu1 %v3502_v36  ;;  %v3540_v9 = vld [vmem:[#allocation13 + $0x11b8] sm:$0xff] }
 0x4fa   :  { %4838 = vmatprep.subr.mxu0 %v3566_v41  ;;  %4768 = vmatpush1.msra.mxu1 %v3501_v51  ;;  %v3604_v36 = vld [vmem:[#allocation13 + $0x13b8] sm:$0xff]  ;;  %v3539_v41 = vld [vmem:[#allocation13 + $0x11b0] sm:$0xff]  ;;  %v7236_v51 = vpop.permute.xlu0 %2771 }
 0x4fb   :  { %4839 = vmatpush1.msra.mxu0 %v3565_v17  ;;  %4769 = vmatprep.subr.mxu1 %v3500_v39  ;;  %v3603_v17 = vld [vmem:[#allocation13 + $0x13b0] sm:$0xff]  ;;  %v3538_v39 = vld [vmem:[#allocation13 + $0x11a8] sm:$0xff] }
 0x4fc   :  { %4840 = vmatprep.subr.mxu0 %v3564_v28  ;;  %4770 = vmatpush1.msra.mxu1 %v3499_v22  ;;  %v3602_v28 = vld [vmem:[#allocation13 + $0x13a8] sm:$0xff]  ;;  %v3537_v22 = vld [vmem:[#allocation13 + $0x11a0] sm:$0xff] }
 0x4fd   :  { %4841 = vmatpush1.msra.mxu0 %v3563_v30  ;;  %4771 = vmatprep.subr.mxu1 %v3498_v26  ;;  %v2795_v30 = vrot.slane %v7017_v33, 5  ;;  %v3601_v26 = vld [vmem:[#allocation13 + $0x13a0] sm:$0xff] }
 0x4fe   :  { %4842 = vmatprep.subr.mxu0 %v3562_v34  ;;  %4772 = vmatpush1.msra.mxu1 %v3497_v31  ;;  %v3536_v34 = vld [vmem:[#allocation13 + $0x1198] sm:$0xff] }
 0x4ff   :  { %4843 = vmatpush1.msra.mxu0 %v3561_v37  ;;  %4773 = vmatprep.subr.mxu1 %v3496_v2  ;;  %v3600_v31 = vld [vmem:[#allocation13 + $0x1398] sm:$0xff]  ;;  %v3535_v37 = vld [vmem:[#allocation13 + $0x1190] sm:$0xff]  ;;  %v2775_v2 = vrot.slane %v7017_v33, 1 }
 0x500   :  { %4844 = vmatprep.subr.mxu0 %v3560_v38  ;;  %4774 = vmatpush1.msra.mxu1 %v3495_v25  ;;  %v2785_v38 = vrot.slane %v7017_v33, 3  ;;  %v2794_v25 = vrot.slane %v7012_v23, 6 }
 0x501   :  { %4845 = vmatpush1.msra.mxu0 %v3559_v42  ;;  %4775 = vmatprep.subr.mxu1 %v3494_v43  ;;  %v2802_v42 = vpop.permute.xlu1 %2801  ;;  %v3599_v43 = vld [vmem:[#allocation13 + $0x1390] sm:$0xff] }
 0x502   :  { %4846 = vmatprep.subr.mxu0 %v3558_v46  ;;  %4776 = vmatpush1.msra.mxu1 %v3493_v44  ;;  %v3534_v46 = vld [vmem:[#allocation13 + $0x1188] sm:$0xff] }
 0x503   :  { %4847 = vmatpush1.msra.mxu0 %v3557_v50  ;;  %4777 = vmatprep.subr.mxu1 %v3492_v47  ;;  %v3598_v44 = vld [vmem:[#allocation13 + $0x1388] sm:$0xff]  ;;  %v3533_v50 = vld [vmem:[#allocation13 + $0x1180] sm:$0xff]  ;;  %v2766_v47 = vrot.slane %v7017_v33, 7 }
 0x504   :  { %4848 = vmatprep.subr.mxu0 %v3556_v1  ;;  %4778 = vmatpush1.msra.mxu1 %v3491_v12  ;;  %v2774_v1 = vrot.slane %v7012_v23, 2  ;;  %v2784_v12 = vrot.slane %v7012_v23, 4 }
 0x505   :  { %4849 = vmatpush1.msra.mxu0 %v3555_v49  ;;  %4779 = vmatprep.subr.mxu1 %v3490_v20  ;;  %v2792_v49 = vpop.permute.xlu0 %2791  ;;  %v2796_v20 = vsel %vm2430_vm3, %v2795_v30, %v2794_v25  ;;  %v3581_v25 = vld [vmem:[#allocation13 + $0x1300] sm:$0xff] }
 0x506   :  { %4850 = vmatprep.subr.mxu0 %v3554_v62  ;;  %4780 = vmatpush1.msra.mxu1 %v3489_v6  ;;  %v3597_v62 = vld [vmem:[#allocation13 + $0x1380] sm:$0xff]  ;;  %v3532_v6 = vld [vmem:[#allocation13 + $0x1178] sm:$0xff]  ;;  %v2786_v33 = vsel %vm2430_vm3, %v2785_v38, %v2784_v12  ;;  %v3642_v12 = vld [vmem:[#allocation13 + $0x14e8] sm:$0xff] }
 0x507   :  { %4851 = vmatpush1.msra.mxu0 %v3553_v32  ;;  %4781 = vmatprep.subr.mxu1 %v3488_v14  ;;  %v2807_v32 = vsel %vm2468_vm4, %v2796_v20, %v2802_v42  ;;  %v3596_v14 = vld [vmem:[#allocation13 + $0x1378] sm:$0xff]  ;;  %v3517_v38 = vld [vmem:[#allocation13 + $0x1100] sm:$0xff]  ;;  %v3706_v20 = vld [vmem:[#allocation13 + $0x16e8] sm:$0xff] }
 0x508   :  { %4852 = vmatprep.subr.mxu0 %v3552_v24  ;;  %4782 = vmatpush1.msra.mxu1 %v3487_v56  ;;  %v3531_v24 = vld [vmem:[#allocation13 + $0x1170] sm:$0xff]  ;;  %v2776_v56 = vsel %vm2430_vm3, %v2775_v2, %v2774_v1  ;;  %v3582_v2 = vld [vmem:[#allocation13 + $0x1308] sm:$0xff] }
 0x509   :  { %4853 = vmatpush1.msra.mxu0 %v3551_v27  ;;  %4783 = vmatprep.subr.mxu1 %v3486_v54  ;;  %v3595_v27 = vld [vmem:[#allocation13 + $0x1370] sm:$0xff]  ;;  %v3530_v54 = vld [vmem:[#allocation13 + $0x1168] sm:$0xff] }
 0x50a   :  { %4854 = vmatprep.subr.mxu0 %v3550_v5  ;;  %4784 = vmatpush1.msra.mxu1 %v3485_v45  ;;  %v2805_v5 = vsel %vm2468_vm4, %v2776_v56, %v2782_v55  ;;  %v2806_v45 = vsel %vm2468_vm4, %v2786_v33, %v2792_v49  ;;  %v3588_v55 = vld [vmem:[#allocation13 + $0x1338] sm:$0xff]  ;;  %v3702_v56 = vld [vmem:[#allocation13 + $0x16c8] sm:$0xff]  ;;  %v3637_v33 = vld [vmem:[#allocation13 + $0x14c0] sm:$0xff] }
 0x50b   :  { %4855 = vmatpush1.msra.mxu0 %v3549_v61  ;;  %4785 = vmatprep.subr.mxu1 %v3548_v29  ;;  %v3594_v61 = vld [vmem:[#allocation13 + $0x1368] sm:$0xff]  ;;  %v3529_v29 = vld [vmem:[#allocation13 + $0x1160] sm:$0xff] }
 0x50c   :  { %4856 = vmatprep.subr.mxu0 %v3612_v59  ;;  %4786 = vmatpush2.msra.mxu1 %v3547_v63  ;;  %v2767_v59 = vsel %vm2430_vm3, %v2766_v47, %v7012_v23  ;;  %v2813_v63 = vcombine.low %v2806_v45, %v2807_v32  ;;  %v3590_v23 = vld [vmem:[#allocation13 + $0x1348] sm:$0xff]  ;;  %v3707_v47 = vld [vmem:[#allocation13 + $0x16f0] sm:$0xff]  ;;  %v3640_v32 = vld [vmem:[#allocation13 + $0x14d8] sm:$0xff] }
 0x50d   :  { %4857 = vmatpush2.msra.mxu0 %v3611_v0  ;;  %4787 = vmatprep.subr.mxu1 %v3546_v40  ;;  %v3593_v0 = vld [vmem:[#allocation13 + $0x1360] sm:$0xff]  ;;  %v3528_v40 = vld [vmem:[#allocation13 + $0x1158] sm:$0xff]  ;;  %v3635_v45 = vld [vmem:[#allocation13 + $0x14b0] sm:$0xff] }
 0x50e   :  { %4858 = vmatprep.subr.mxu0 %v3610_v3  ;;  %4788 = vmatpush2.msra.mxu1 %v3545_v4  ;;  %v2804_v3 = vsel %vm2468_vm4, %v2767_v59, %v7236_v51  ;;  %v3592_v4 = vld [vmem:[#allocation13 + $0x1358] sm:$0xff]  ;;  %v3586_v51 = vld [vmem:[#allocation13 + $0x1328] sm:$0xff] }
 0x50f   :  { %4859 = vmatpush2.msra.mxu0 %v3609_v58  ;;  %4789 = vmatprep.subr.mxu1 %v3544_v7  ;;  %v3527_v58 = vld [vmem:[#allocation13 + $0x1150] sm:$0xff]  ;;  %v2812_v7 = vcombine.low %v2804_v3, %v2805_v5  ;;  %v3700_v5 = vld [vmem:[#allocation13 + $0x16b8] sm:$0xff]  ;;  %v3698_v59 = vld [vmem:[#allocation13 + $0x16a8] sm:$0xff] }
 0x510   :  { %4860 = vmatprep.subr.mxu0 %v3608_v8  ;;  %4790 = vmatpush2.msra.mxu1 %v3543_v53  ;;  %v3591_v8 = vld [vmem:[#allocation13 + $0x1350] sm:$0xff]  ;;  %v3526_v53 = vld [vmem:[#allocation13 + $0x1148] sm:$0xff]  ;;  %v3696_v3 = vld [vmem:[#allocation13 + $0x1698] sm:$0xff] }
 0x511   :  { %4861 = vmatpush2.msra.mxu0 %v3607_v10  ;;  %4791 = vmatprep.subr.mxu1 %v3542_v11  ;;  %v3525_v10 = vld [vmem:[#allocation13 + $0x1140] sm:$0xff]  ;;  %v2827_v11 = vrot.slane %v2813_v63, %v7079_v52 }
 0x512   :  { %4862 = vmatprep.subr.mxu0 %v3606_v15  ;;  %4792 = vmatpush2.msra.mxu1 %v3541_v13  ;;  %v3589_v15 = vld [vmem:[#allocation13 + $0x1340] sm:$0xff]  ;;  %v3524_v13 = vld [vmem:[#allocation13 + $0x1138] sm:$0xff] }
 0x513   :  { %4863 = vmatpush2.msra.mxu0 %v3605_v21  ;;  %4793 = vmatprep.subr.mxu1 %v3540_v9  ;;  %v3523_v21 = vld [vmem:[#allocation13 + $0x1130] sm:$0xff]  ;;  %v2820_v9 = vrot.slane %v2812_v7, %v7079_v52  ;;  %v5403_v30 = vcombine.low %v2827_v11, %v2827_v11  ;;  %v3633_v63 = vld [vmem:[#allocation13 + $0x14a0] sm:$0xff]  ;;  %v3630_v7 = vld [vmem:[#allocation13 + $0x1488] sm:$0xff] }
 0x514   :  { %4864 = vmatprep.subr.mxu0 %v3604_v36  ;;  %4794 = vmatpush2.msra.mxu1 %v3539_v41  ;;  %v3587_v36 = vld [vmem:[#allocation13 + $0x1330] sm:$0xff]  ;;  %v3522_v41 = vld [vmem:[#allocation13 + $0x1128] sm:$0xff] }
 0x515   :  { %4865 = vmatpush2.msra.mxu0 %v3603_v17  ;;  %4795 = vmatprep.subr.mxu1 %v3538_v39  ;;  %v3521_v17 = vld [vmem:[#allocation13 + $0x1120] sm:$0xff]  ;;  %v2828_v39 = vcombine.low %v2820_v9, %v2827_v11  ;;  %v3692_v11 = vld [vmem:[#allocation13 + $0x1678] sm:$0xff] }
 0x516   :  { %4866 = vmatprep.subr.mxu0 %v3602_v28  ;;  %4796 = vmatpush2.msra.mxu1 %v3537_v22  ;;  %v3585_v28 = vld [vmem:[#allocation13 + $0x1320] sm:$0xff]  ;;  %v3520_v22 = vld [vmem:[#allocation13 + $0x1118] sm:$0xff] }
 0x517   :  { %4867 = vmatpush2.msra.mxu0 %v3601_v26  ;;  %4797 = vmatprep.subr.mxu1 %v3536_v34  ;;  %v3584_v26 = vld [vmem:[#allocation13 + $0x1318] sm:$0xff]  ;;  %v3519_v34 = vld [vmem:[#allocation13 + $0x1110] sm:$0xff]  ;;  %v7258_v42 = vrot.slane %v2828_v39, %v7079_v52  ;;  %v3625_v9 = vld [vmem:[#allocation13 + $0x1460] sm:$0xff] }
 0x518   :  { %4868 = vmatprep.subr.mxu0 %v3600_v31  ;;  %4798 = vmatpush2.msra.mxu1 %v3535_v37  ;;  %v3583_v31 = vld [vmem:[#allocation13 + $0x1310] sm:$0xff]  ;;  %v3518_v37 = vld [vmem:[#allocation13 + $0x1108] sm:$0xff] }
 0x519   :  { %4869 = vmatpush2.msra.mxu0 %v3599_v43  ;;  %4799 = vmatprep.subr.mxu1 %v3534_v46  ;;  %v3644_v43 = vld [vmem:[#allocation13 + $0x14f8] sm:$0xff]  ;;  %v7261_v46 = vrot.slane %v5403_v30, %v7079_v52  ;;  %v4117_v1 = vcombine.high %v7258_v42, %v7258_v42  ;;  %v3687_v39 = vld [vmem:[#allocation13 + $0x1650] sm:$0xff]  ;;  %v3621_v30 = vld [vmem:[#allocation13 + $0x1440] sm:$0xff] }
 0x51a   :  { %4870 = vmatprep.subr.mxu0 %v3598_v44  ;;  %4800 = vmatpush2.msra.mxu1 %v3533_v50  ;;  %v3708_v44 = vld [vmem:[#allocation13 + $0x16f8] sm:$0xff]  ;;  %v3643_v50 = vld [vmem:[#allocation13 + $0x14f0] sm:$0xff] }
 0x51b   :  { %4871 = vmatpush2.msra.mxu0 %v3597_v62  ;;  %4801 = vmatprep.subr.mxu1 %v3532_v6  ;;  %v4118_v49 = vcombine.high %v7261_v46, %v7261_v46  ;;  %v3641_v62 = vld [vmem:[#allocation13 + $0x14e0] sm:$0xff] }
 0x51c   :  { %4872 = vmatprep.subr.mxu0 %v3596_v14  ;;  %4802 = vmatpush2.msra.mxu1 %v3531_v24  ;;  %v3705_v6 = vld [vmem:[#allocation13 + $0x16e0] sm:$0xff]  ;;  %v3703_v14 = vld [vmem:[#allocation13 + $0x16d0] sm:$0xff]  ;;  %v3638_v24 = vld [vmem:[#allocation13 + $0x14c8] sm:$0xff] }
 0x51d   :  { %4873 = vmatpush2.msra.mxu0 %v3595_v27  ;;  %4803 = vmatprep.subr.mxu1 %v3530_v54  ;;  %v3701_v27 = vld [vmem:[#allocation13 + $0x16c0] sm:$0xff]  ;;  %v3636_v54 = vld [vmem:[#allocation13 + $0x14b8] sm:$0xff] }
 0x51e   :  { %4874 = vmatprep.subr.mxu0 %v3594_v61  ;;  %4804 = vmatpush2.msra.mxu1 %v3529_v29  ;;  %v3699_v61 = vld [vmem:[#allocation13 + $0x16b0] sm:$0xff]  ;;  %v3634_v29 = vld [vmem:[#allocation13 + $0x14a8] sm:$0xff] }
 0x51f   :  { %4875 = vmatpush2.msra.mxu0 %v3593_v0  ;;  %4805 = vmatprep.subr.mxu1 %v3528_v40  ;;  %v3697_v0 = vld [vmem:[#allocation13 + $0x16a0] sm:$0xff]  ;;  %v3632_v40 = vld [vmem:[#allocation13 + $0x1498] sm:$0xff] }
 0x520   :  { %4876 = vmatprep.subr.mxu0 %v3592_v4  ;;  %4806 = vmatpush2.msra.mxu1 %v3527_v58  ;;  %v3631_v4 = vld [vmem:[#allocation13 + $0x1490] sm:$0xff] }
 0x521   :  { %4877 = vmatpush2.msra.mxu0 %v3591_v8  ;;  %4807 = vmatprep.subr.mxu1 %v3526_v53  ;;  %v3695_v58 = vld [vmem:[#allocation13 + $0x1690] sm:$0xff]  ;;  %v3694_v8 = vld [vmem:[#allocation13 + $0x1688] sm:$0xff]  ;;  %v3629_v53 = vld [vmem:[#allocation13 + $0x1480] sm:$0xff] }
 0x522   :  { %4878 = vmatprep.subr.mxu0 %v3590_v23  ;;  %4808 = vmatpush2.msra.mxu1 %v3525_v10  ;;  %v3693_v23 = vld [vmem:[#allocation13 + $0x1680] sm:$0xff]  ;;  %v3628_v10 = vld [vmem:[#allocation13 + $0x1478] sm:$0xff] }
 0x523   :  { %4879 = vmatpush2.msra.mxu0 %v3589_v15  ;;  %4809 = vmatprep.subr.mxu1 %v3524_v13  ;;  %v3627_v15 = vld [vmem:[#allocation13 + $0x1470] sm:$0xff] }
 0x524   :  { %4880 = vmatprep.subr.mxu0 %v3588_v55  ;;  %4810 = vmatpush2.msra.mxu1 %v3523_v21  ;;  %v3691_v13 = vld [vmem:[#allocation13 + $0x1670] sm:$0xff]  ;;  %v3626_v55 = vld [vmem:[#allocation13 + $0x1468] sm:$0xff] }
 0x525   :  { %4881 = vmatpush2.msra.mxu0 %v3587_v36  ;;  %4811 = vmatprep.subr.mxu1 %v3522_v41  ;;  %v3690_v21 = vld [vmem:[#allocation13 + $0x1668] sm:$0xff]  ;;  %v3689_v36 = vld [vmem:[#allocation13 + $0x1660] sm:$0xff]  ;;  %v3624_v41 = vld [vmem:[#allocation13 + $0x1458] sm:$0xff] }
 0x526   :  { %4882 = vmatprep.subr.mxu0 %v3586_v51  ;;  %4812 = vmatpush2.msra.mxu1 %v3521_v17  ;;  %v3688_v51 = vld [vmem:[#allocation13 + $0x1658] sm:$0xff]  ;;  %v3623_v17 = vld [vmem:[#allocation13 + $0x1450] sm:$0xff] }
 0x527   :  { %4883 = vmatpush2.msra.mxu0 %v3585_v28  ;;  %4813 = vmatprep.subr.mxu1 %v3520_v22  ;;  %v3622_v28 = vld [vmem:[#allocation13 + $0x1448] sm:$0xff] }
 0x528   :  { %4884 = vmatprep.subr.mxu0 %v3584_v26  ;;  %4814 = vmatpush2.msra.mxu1 %v3519_v34  ;;  %v3686_v22 = vld [vmem:[#allocation13 + $0x1648] sm:$0xff]  ;;  %v3685_v26 = vld [vmem:[#allocation13 + $0x1640] sm:$0xff]  ;;  %v3620_v34 = vld [vmem:[#allocation13 + $0x1438] sm:$0xff] }
 0x529   :  { %4885 = vmatpush2.msra.mxu0 %v3583_v31  ;;  %4815 = vmatprep.subr.mxu1 %v3518_v37  ;;  %v3684_v31 = vld [vmem:[#allocation13 + $0x1638] sm:$0xff]  ;;  %v3619_v37 = vld [vmem:[#allocation13 + $0x1430] sm:$0xff] }
 0x52a   :  { %4886 = vmatprep.subr.mxu0 %v3582_v2  ;;  %4816 = vmatpush2.msra.mxu1 %v3517_v38  ;;  %v3683_v2 = vld [vmem:[#allocation13 + $0x1630] sm:$0xff]  ;;  %v3618_v38 = vld [vmem:[#allocation13 + $0x1428] sm:$0xff] }
 0x52b   :  { %4887 = vmatpush2.msra.mxu0 %v3581_v25  ;;  %4818 = vmatmul.mubr.f32.vlgmr.msra.gmra.mxu1 %v7225_v57  ;;  %v3704_v57 = vld [vmem:[#allocation13 + $0x16d8] sm:$0xff]  ;;  %v3682_v25 = vld [vmem:[#allocation13 + $0x1628] sm:$0xff] }
 0x52c   :  { %4889 = vmatmul.mubr.f32.vlgmr.msra.gmra.mxu0 %v7228_v19  ;;  %4895 = vmatprep.subr.mxu1 %v3644_v43  ;;  %v3639_v19 = vld [vmem:[#allocation13 + $0x14d0] sm:$0xff]  ;;  %v3617_v43 = vld [vmem:[#allocation13 + $0x1420] sm:$0xff] }
 0x52d   :  { %4966 = vmatprep.subr.mxu0 %v3708_v44  ;;  %4896 = vmatpush1.msra.mxu1 %v3643_v50  ;;  %v3681_v44 = vld [vmem:[#allocation13 + $0x1620] sm:$0xff]  ;;  %v3616_v50 = vld [vmem:[#allocation13 + $0x1418] sm:$0xff] }
 0x52e   :  { %4959 = vmatprep.mubr.f32.mxu1 %v4117_v1  ;;  %4967 = vmatpush1.msra.mxu0 %v3707_v47  ;;  %v3680_v47 = vld [vmem:[#allocation13 + $0x1618] sm:$0xff]  ;;  %v3615_v1 = vld [vmem:[#allocation13 + $0x1410] sm:$0xff] }
 0x52f   :  { %5030 = vmatprep.mubr.f32.mxu0 %v4118_v49  ;;  %4897 = vmatprep.subr.mxu1 %v3642_v12  ;;  %v3679_v12 = vld [vmem:[#allocation13 + $0x1610] sm:$0xff]  ;;  %v3614_v49 = vld [vmem:[#allocation13 + $0x1408] sm:$0xff] }
 0x530   :  { %4968 = vmatprep.subr.mxu0 %v3706_v20  ;;  %4898 = vmatpush1.msra.mxu1 %v3641_v62  ;;  %v3678_v20 = vld [vmem:[#allocation13 + $0x1608] sm:$0xff]  ;;  %v3613_v62 = vld [vmem:[#allocation13 + $0x1400] sm:$0xff] }
 0x531   :  { %4969 = vmatpush1.msra.mxu0 %v3705_v6  ;;  %4899 = vmatprep.subr.mxu1 %v3640_v32  ;;  %v3677_v6 = vld [vmem:[#allocation13 + $0x1600] sm:$0xff]  ;;  %v3676_v32 = vld [vmem:[#allocation13 + $0x15f8] sm:$0xff] }
 0x532   :  { %4970 = vmatprep.subr.mxu0 %v3704_v57  ;;  %4900 = vmatpush1.msra.mxu1 %v3639_v19  ;;  %v3740_v57 = vld [vmem:[#allocation13 + $0x17f8] sm:$0xff]  ;;  %v3675_v19 = vld [vmem:[#allocation13 + $0x15f0] sm:$0xff] }
 0x533   :  { %4971 = vmatpush1.msra.mxu0 %v3703_v14  ;;  %4901 = vmatprep.subr.mxu1 %v3638_v24  ;;  %v3739_v14 = vld [vmem:[#allocation13 + $0x17f0] sm:$0xff]  ;;  %v3674_v24 = vld [vmem:[#allocation13 + $0x15e8] sm:$0xff] }
 0x534   :  { %4972 = vmatprep.subr.mxu0 %v3702_v56  ;;  %4902 = vmatpush1.msra.mxu1 %v3637_v33  ;;  %v3738_v56 = vld [vmem:[#allocation13 + $0x17e8] sm:$0xff]  ;;  %v3673_v33 = vld [vmem:[#allocation13 + $0x15e0] sm:$0xff] }
 0x535   :  { %4973 = vmatpush1.msra.mxu0 %v3701_v27  ;;  %4903 = vmatprep.subr.mxu1 %v3636_v54  ;;  %v3737_v27 = vld [vmem:[#allocation13 + $0x17e0] sm:$0xff]  ;;  %v3672_v54 = vld [vmem:[#allocation13 + $0x15d8] sm:$0xff] }
 0x536   :  { %4974 = vmatprep.subr.mxu0 %v3700_v5  ;;  %4904 = vmatpush1.msra.mxu1 %v3635_v45  ;;  %v3736_v5 = vld [vmem:[#allocation13 + $0x17d8] sm:$0xff]  ;;  %v3671_v45 = vld [vmem:[#allocation13 + $0x15d0] sm:$0xff] }
 0x537   :  { %4975 = vmatpush1.msra.mxu0 %v3699_v61  ;;  %4905 = vmatprep.subr.mxu1 %v3634_v29  ;;  %v3735_v61 = vld [vmem:[#allocation13 + $0x17d0] sm:$0xff]  ;;  %v3670_v29 = vld [vmem:[#allocation13 + $0x15c8] sm:$0xff] }
 0x538   :  { %4976 = vmatprep.subr.mxu0 %v3698_v59  ;;  %4906 = vmatpush1.msra.mxu1 %v3633_v63  ;;  %v3734_v59 = vld [vmem:[#allocation13 + $0x17c8] sm:$0xff]  ;;  %v3669_v63 = vld [vmem:[#allocation13 + $0x15c0] sm:$0xff] }
 0x539   :  { %4977 = vmatpush1.msra.mxu0 %v3697_v0  ;;  %4907 = vmatprep.subr.mxu1 %v3632_v40  ;;  %v2849_v0 = vpop.permute.xlu1 %2848  ;;  %v3733_v40 = vld [vmem:[#allocation13 + $0x17c0] sm:$0xff] }
 0x53a   :  { %4978 = vmatprep.subr.mxu0 %v3696_v3  ;;  %4908 = vmatpush1.msra.mxu1 %v3631_v4  ;;  %v3668_v3 = vld [vmem:[#allocation13 + $0x15b8] sm:$0xff] }
 0x53b   :  { %4979 = vmatpush1.msra.mxu0 %v3695_v58  ;;  %4909 = vmatprep.subr.mxu1 %v3630_v7  ;;  %v3732_v4 = vld [vmem:[#allocation13 + $0x17b8] sm:$0xff]  ;;  %v3667_v58 = vld [vmem:[#allocation13 + $0x15b0] sm:$0xff]  ;;  %v7269_v7 = vpop.permute.xlu0 %2838 }
 0x53c   :  { %4980 = vmatprep.subr.mxu0 %v3694_v8  ;;  %4910 = vmatpush1.msra.mxu1 %v3629_v53  ;;  %v3731_v8 = vld [vmem:[#allocation13 + $0x17b0] sm:$0xff]  ;;  %v3666_v53 = vld [vmem:[#allocation13 + $0x15a8] sm:$0xff] }
 0x53d   :  { %4981 = vmatpush1.msra.mxu0 %v3693_v23  ;;  %4911 = vmatprep.subr.mxu1 %v3628_v10  ;;  %v3730_v23 = vld [vmem:[#allocation13 + $0x17a8] sm:$0xff]  ;;  %v3665_v10 = vld [vmem:[#allocation13 + $0x15a0] sm:$0xff] }
 0x53e   :  { %4982 = vmatprep.subr.mxu0 %v3692_v11  ;;  %4912 = vmatpush1.msra.mxu1 %v3627_v15  ;;  %v2862_v11 = vrot.slane %v7043_v18, 5  ;;  %v3729_v15 = vld [vmem:[#allocation13 + $0x17a0] sm:$0xff] }
 0x53f   :  { %4983 = vmatpush1.msra.mxu0 %v3691_v13  ;;  %4913 = vmatprep.subr.mxu1 %v3626_v55  ;;  %v3664_v13 = vld [vmem:[#allocation13 + $0x1598] sm:$0xff] }
 0x540   :  { %4984 = vmatprep.subr.mxu0 %v3690_v21  ;;  %4914 = vmatpush1.msra.mxu1 %v3625_v9  ;;  %v3728_v55 = vld [vmem:[#allocation13 + $0x1798] sm:$0xff]  ;;  %v3663_v21 = vld [vmem:[#allocation13 + $0x1590] sm:$0xff]  ;;  %v2842_v9 = vrot.slane %v7043_v18, 1 }
 0x541   :  { %4985 = vmatpush1.msra.mxu0 %v3689_v36  ;;  %4915 = vmatprep.subr.mxu1 %v3624_v41  ;;  %v2852_v36 = vrot.slane %v7043_v18, 3  ;;  %v2861_v41 = vrot.slane %v7036_v35, 6 }
 0x542   :  { %4986 = vmatprep.subr.mxu0 %v3688_v51  ;;  %4916 = vmatpush1.msra.mxu1 %v3623_v17  ;;  %v2869_v51 = vpop.permute.xlu1 %2868  ;;  %v3727_v17 = vld [vmem:[#allocation13 + $0x1790] sm:$0xff] }
 0x543   :  { %4987 = vmatpush1.msra.mxu0 %v3687_v39  ;;  %4917 = vmatprep.subr.mxu1 %v3622_v28  ;;  %v3662_v39 = vld [vmem:[#allocation13 + $0x1588] sm:$0xff] }
 0x544   :  { %4988 = vmatprep.subr.mxu0 %v3686_v22  ;;  %4918 = vmatpush1.msra.mxu1 %v3621_v30  ;;  %v3726_v28 = vld [vmem:[#allocation13 + $0x1788] sm:$0xff]  ;;  %v3661_v22 = vld [vmem:[#allocation13 + $0x1580] sm:$0xff]  ;;  %v2833_v30 = vrot.slane %v7043_v18, 7 }
 0x545   :  { %4989 = vmatpush1.msra.mxu0 %v3685_v26  ;;  %4919 = vmatprep.subr.mxu1 %v3620_v34  ;;  %v2841_v26 = vrot.slane %v7036_v35, 2  ;;  %v2851_v34 = vrot.slane %v7036_v35, 4 }
 0x546   :  { %4990 = vmatprep.subr.mxu0 %v3684_v31  ;;  %4920 = vmatpush1.msra.mxu1 %v3619_v37  ;;  %v2859_v31 = vpop.permute.xlu0 %2858  ;;  %v2863_v37 = vsel %vm2430_vm3, %v2862_v11, %v2861_v41  ;;  %v3647_v11 = vld [vmem:[#allocation13 + $0x1510] sm:$0xff]  ;;  %v3772_v41 = vld [vmem:[#allocation13 + $0x18f8] sm:$0xff] }
 0x547   :  { %4991 = vmatpush1.msra.mxu0 %v3683_v2  ;;  %4921 = vmatprep.subr.mxu1 %v3618_v38  ;;  %v3725_v2 = vld [vmem:[#allocation13 + $0x1780] sm:$0xff]  ;;  %v3660_v38 = vld [vmem:[#allocation13 + $0x1578] sm:$0xff]  ;;  %v2853_v18 = vsel %vm2430_vm3, %v2852_v36, %v2851_v34  ;;  %v3834_v34 = vld [vmem:[#allocation13 + $0x1ae8] sm:$0xff] }
 0x548   :  { %4992 = vmatprep.subr.mxu0 %v3682_v25  ;;  %4922 = vmatpush1.msra.mxu1 %v3617_v43  ;;  %v2874_v25 = vsel %vm2468_vm4, %v2863_v37, %v2869_v51  ;;  %v3724_v43 = vld [vmem:[#allocation13 + $0x1778] sm:$0xff]  ;;  %v3833_v37 = vld [vmem:[#allocation13 + $0x1ae0] sm:$0xff] }
 0x549   :  { %4993 = vmatpush1.msra.mxu0 %v3681_v44  ;;  %4923 = vmatprep.subr.mxu1 %v3616_v50  ;;  %v3659_v44 = vld [vmem:[#allocation13 + $0x1570] sm:$0xff]  ;;  %v2843_v50 = vsel %vm2430_vm3, %v2842_v9, %v2841_v26  ;;  %v3709_v9 = vld [vmem:[#allocation13 + $0x1700] sm:$0xff] }
 0x54a   :  { %4994 = vmatprep.subr.mxu0 %v3680_v47  ;;  %4924 = vmatpush1.msra.mxu1 %v3615_v1  ;;  %v3723_v47 = vld [vmem:[#allocation13 + $0x1770] sm:$0xff]  ;;  %v3658_v1 = vld [vmem:[#allocation13 + $0x1568] sm:$0xff] }
 0x54b   :  { %4995 = vmatpush1.msra.mxu0 %v3679_v12  ;;  %4925 = vmatprep.subr.mxu1 %v3614_v49  ;;  %v2872_v12 = vsel %vm2468_vm4, %v2843_v50, %v2849_v0  ;;  %v2873_v49 = vsel %vm2468_vm4, %v2853_v18, %v2859_v31  ;;  %v3769_v31 = vld [vmem:[#allocation13 + $0x18e0] sm:$0xff]  ;;  %v3764_v18 = vld [vmem:[#allocation13 + $0x18b8] sm:$0xff] }
 0x54c   :  { %4996 = vmatprep.subr.mxu0 %v3678_v20  ;;  %4926 = vmatpush1.msra.mxu1 %v3613_v62  ;;  %v3722_v20 = vld [vmem:[#allocation13 + $0x1768] sm:$0xff]  ;;  %v3657_v62 = vld [vmem:[#allocation13 + $0x1560] sm:$0xff] }
 0x54d   :  { %4997 = vmatpush1.msra.mxu0 %v3677_v6  ;;  %4927 = vmatprep.subr.mxu1 %v3676_v32  ;;  %v2834_v6 = vsel %vm2430_vm3, %v2833_v30, %v7036_v35  ;;  %v2880_v32 = vcombine.low %v2873_v49, %v2874_v25  ;;  %v3718_v35 = vld [vmem:[#allocation13 + $0x1748] sm:$0xff]  ;;  %v3829_v50 = vld [vmem:[#allocation13 + $0x1ac0] sm:$0xff] }
 0x54e   :  { %4998 = vmatprep.subr.mxu0 %v3740_v57  ;;  %4928 = vmatpush2.msra.mxu1 %v3675_v19  ;;  %v3721_v57 = vld [vmem:[#allocation13 + $0x1760] sm:$0xff]  ;;  %v3656_v19 = vld [vmem:[#allocation13 + $0x1558] sm:$0xff]  ;;  %v3770_v30 = vld [vmem:[#allocation13 + $0x18e8] sm:$0xff] }
 0x54f   :  { %4999 = vmatpush2.msra.mxu0 %v3739_v14  ;;  %4929 = vmatprep.subr.mxu1 %v3674_v24  ;;  %v2871_v14 = vsel %vm2468_vm4, %v2834_v6, %v7269_v7  ;;  %v3720_v24 = vld [vmem:[#allocation13 + $0x1758] sm:$0xff]  ;;  %v3766_v25 = vld [vmem:[#allocation13 + $0x18c8] sm:$0xff]  ;;  %v3825_v6 = vld [vmem:[#allocation13 + $0x1aa0] sm:$0xff] }
 0x550   :  { %5000 = vmatprep.subr.mxu0 %v3738_v56  ;;  %4930 = vmatpush2.msra.mxu1 %v3673_v33  ;;  %v3655_v56 = vld [vmem:[#allocation13 + $0x1550] sm:$0xff]  ;;  %v2879_v33 = vcombine.low %v2871_v14, %v2872_v12  ;;  %v3762_v49 = vld [vmem:[#allocation13 + $0x18a8] sm:$0xff] }
 0x551   :  { %5001 = vmatpush2.msra.mxu0 %v3737_v27  ;;  %4931 = vmatprep.subr.mxu1 %v3672_v54  ;;  %v3719_v27 = vld [vmem:[#allocation13 + $0x1750] sm:$0xff]  ;;  %v3654_v54 = vld [vmem:[#allocation13 + $0x1548] sm:$0xff] }
 0x552   :  { %5002 = vmatprep.subr.mxu0 %v3736_v5  ;;  %4932 = vmatpush2.msra.mxu1 %v3671_v45  ;;  %v3653_v5 = vld [vmem:[#allocation13 + $0x1540] sm:$0xff]  ;;  %v2894_v45 = vrot.slane %v2880_v32, %v7079_v52  ;;  %v2887_v0 = vrot.slane %v2879_v33, %v7079_v52  ;;  %v3827_v12 = vld [vmem:[#allocation13 + $0x1ab0] sm:$0xff]  ;;  %v3760_v32 = vld [vmem:[#allocation13 + $0x1898] sm:$0xff] }
 0x553   :  { %5003 = vmatpush2.msra.mxu0 %v3735_v61  ;;  %4933 = vmatprep.subr.mxu1 %v3670_v29  ;;  %v3717_v61 = vld [vmem:[#allocation13 + $0x1740] sm:$0xff]  ;;  %v3652_v29 = vld [vmem:[#allocation13 + $0x1538] sm:$0xff]  ;;  %v3823_v14 = vld [vmem:[#allocation13 + $0x1a90] sm:$0xff] }
 0x554   :  { %5004 = vmatprep.subr.mxu0 %v3734_v59  ;;  %4934 = vmatpush2.msra.mxu1 %v3669_v63  ;;  %v3716_v59 = vld [vmem:[#allocation13 + $0x1738] sm:$0xff]  ;;  %v3651_v63 = vld [vmem:[#allocation13 + $0x1530] sm:$0xff]  ;;  %v2895_v7 = vcombine.low %v2887_v0, %v2894_v45  ;;  %v3757_v33 = vld [vmem:[#allocation13 + $0x1880] sm:$0xff] }
 0x555   :  { %5005 = vmatpush2.msra.mxu0 %v3733_v40  ;;  %4935 = vmatprep.subr.mxu1 %v3668_v3  ;;  %v3715_v40 = vld [vmem:[#allocation13 + $0x1730] sm:$0xff]  ;;  %v3650_v3 = vld [vmem:[#allocation13 + $0x1528] sm:$0xff]  ;;  %v3752_v0 = vld [vmem:[#allocation13 + $0x1858] sm:$0xff] }
 0x556   :  { %5006 = vmatprep.subr.mxu0 %v3732_v4  ;;  %4936 = vmatpush2.msra.mxu1 %v3667_v58  ;;  %v3714_v4 = vld [vmem:[#allocation13 + $0x1728] sm:$0xff]  ;;  %v3649_v58 = vld [vmem:[#allocation13 + $0x1520] sm:$0xff]  ;;  %v7291_v36 = vrot.slane %v2895_v7, %v7079_v52 }
 0x557   :  { %5007 = vmatpush2.msra.mxu0 %v3731_v8  ;;  %4937 = vmatprep.subr.mxu1 %v3666_v53  ;;  %v3713_v8 = vld [vmem:[#allocation13 + $0x1720] sm:$0xff]  ;;  %v3648_v53 = vld [vmem:[#allocation13 + $0x1518] sm:$0xff]  ;;  %v3814_v7 = vld [vmem:[#allocation13 + $0x1a48] sm:$0xff] }
 0x558   :  { %5008 = vmatprep.subr.mxu0 %v3730_v23  ;;  %4938 = vmatpush2.msra.mxu1 %v3665_v10  ;;  %v5404_v23 = vcombine.low %v2894_v45, %v2894_v45  ;;  %v3712_v10 = vld [vmem:[#allocation13 + $0x1718] sm:$0xff]  ;;  %v3819_v45 = vld [vmem:[#allocation13 + $0x1a70] sm:$0xff] }
 0x559   :  { %5009 = vmatpush2.msra.mxu0 %v3729_v15  ;;  %4939 = vmatprep.subr.mxu1 %v3664_v13  ;;  %v3711_v15 = vld [vmem:[#allocation13 + $0x1710] sm:$0xff]  ;;  %v3646_v13 = vld [vmem:[#allocation13 + $0x1508] sm:$0xff] }
 0x55a   :  { %5010 = vmatprep.subr.mxu0 %v3728_v55  ;;  %4940 = vmatpush2.msra.mxu1 %v3663_v21  ;;  %v3710_v55 = vld [vmem:[#allocation13 + $0x1708] sm:$0xff]  ;;  %v3645_v21 = vld [vmem:[#allocation13 + $0x1500] sm:$0xff]  ;;  %v7294_v51 = vrot.slane %v5404_v23, %v7079_v52  ;;  %v3748_v23 = vld [vmem:[#allocation13 + $0x1838] sm:$0xff] }
 0x55b   :  { %5011 = vmatpush2.msra.mxu0 %v3727_v17  ;;  %4941 = vmatprep.subr.mxu1 %v3662_v39  ;;  %v3836_v17 = vld [vmem:[#allocation13 + $0x1af8] sm:$0xff]  ;;  %v3771_v39 = vld [vmem:[#allocation13 + $0x18f0] sm:$0xff] }
 0x55c   :  { %5012 = vmatprep.subr.mxu0 %v3726_v28  ;;  %4942 = vmatpush2.msra.mxu1 %v3661_v22  ;;  %v3835_v28 = vld [vmem:[#allocation13 + $0x1af0] sm:$0xff]  ;;  %v4134_v22 = vcombine.high %v7291_v36, %v7291_v36  ;;  %v4135_v26 = vcombine.high %v7294_v51, %v7294_v51 }
 0x55d   :  { %5013 = vmatpush2.msra.mxu0 %v3725_v2  ;;  %4943 = vmatprep.subr.mxu1 %v3660_v38  ;;  %v3768_v2 = vld [vmem:[#allocation13 + $0x18d8] sm:$0xff]  ;;  %v3831_v38 = vld [vmem:[#allocation13 + $0x1ad0] sm:$0xff] }
 0x55e   :  { %5014 = vmatprep.subr.mxu0 %v3724_v43  ;;  %4944 = vmatpush2.msra.mxu1 %v3659_v44  ;;  %v3830_v43 = vld [vmem:[#allocation13 + $0x1ac8] sm:$0xff]  ;;  %v3765_v44 = vld [vmem:[#allocation13 + $0x18c0] sm:$0xff] }
 0x55f   :  { %5015 = vmatpush2.msra.mxu0 %v3723_v47  ;;  %4945 = vmatprep.subr.mxu1 %v3658_v1  ;;  %v3828_v47 = vld [vmem:[#allocation13 + $0x1ab8] sm:$0xff]  ;;  %v3763_v1 = vld [vmem:[#allocation13 + $0x18b0] sm:$0xff] }
 0x560   :  { %5016 = vmatprep.subr.mxu0 %v3722_v20  ;;  %4946 = vmatpush2.msra.mxu1 %v3657_v62  ;;  %v3826_v20 = vld [vmem:[#allocation13 + $0x1aa8] sm:$0xff]  ;;  %v3761_v62 = vld [vmem:[#allocation13 + $0x18a0] sm:$0xff] }
 0x561   :  { %5017 = vmatpush2.msra.mxu0 %v3721_v57  ;;  %4947 = vmatprep.subr.mxu1 %v3656_v19  ;;  %v3824_v57 = vld [vmem:[#allocation13 + $0x1a98] sm:$0xff]  ;;  %v3759_v19 = vld [vmem:[#allocation13 + $0x1890] sm:$0xff] }
 0x562   :  { %5018 = vmatprep.subr.mxu0 %v3720_v24  ;;  %4948 = vmatpush2.msra.mxu1 %v3655_v56  ;;  %v3758_v24 = vld [vmem:[#allocation13 + $0x1888] sm:$0xff] }
 0x563   :  { %5019 = vmatpush2.msra.mxu0 %v3719_v27  ;;  %4949 = vmatprep.subr.mxu1 %v3654_v54  ;;  %v3822_v56 = vld [vmem:[#allocation13 + $0x1a88] sm:$0xff]  ;;  %v3821_v27 = vld [vmem:[#allocation13 + $0x1a80] sm:$0xff]  ;;  %v3756_v54 = vld [vmem:[#allocation13 + $0x1878] sm:$0xff] }
 0x564   :  { %5020 = vmatprep.subr.mxu0 %v3718_v35  ;;  %4950 = vmatpush2.msra.mxu1 %v3653_v5  ;;  %v3820_v35 = vld [vmem:[#allocation13 + $0x1a78] sm:$0xff]  ;;  %v3755_v5 = vld [vmem:[#allocation13 + $0x1870] sm:$0xff] }
 0x565   :  { %5021 = vmatpush2.msra.mxu0 %v3717_v61  ;;  %4951 = vmatprep.subr.mxu1 %v3652_v29  ;;  %v3754_v61 = vld [vmem:[#allocation13 + $0x1868] sm:$0xff] }
 0x566   :  { %5022 = vmatprep.subr.mxu0 %v3716_v59  ;;  %4952 = vmatpush2.msra.mxu1 %v3651_v63  ;;  %v3818_v29 = vld [vmem:[#allocation13 + $0x1a68] sm:$0xff]  ;;  %v3753_v59 = vld [vmem:[#allocation13 + $0x1860] sm:$0xff] }
 0x567   :  { %5023 = vmatpush2.msra.mxu0 %v3715_v40  ;;  %4953 = vmatprep.subr.mxu1 %v3650_v3  ;;  %v3817_v63 = vld [vmem:[#allocation13 + $0x1a60] sm:$0xff]  ;;  %v3816_v40 = vld [vmem:[#allocation13 + $0x1a58] sm:$0xff]  ;;  %v3751_v3 = vld [vmem:[#allocation13 + $0x1850] sm:$0xff] }
 0x568   :  { %5024 = vmatprep.subr.mxu0 %v3714_v4  ;;  %4954 = vmatpush2.msra.mxu1 %v3649_v58  ;;  %v3815_v4 = vld [vmem:[#allocation13 + $0x1a50] sm:$0xff]  ;;  %v3750_v58 = vld [vmem:[#allocation13 + $0x1848] sm:$0xff] }
 0x569   :  { %5025 = vmatpush2.msra.mxu0 %v3713_v8  ;;  %4955 = vmatprep.subr.mxu1 %v3648_v53  ;;  %v3749_v8 = vld [vmem:[#allocation13 + $0x1840] sm:$0xff] }
 0x56a   :  { %5026 = vmatprep.subr.mxu0 %v3712_v10  ;;  %4956 = vmatpush2.msra.mxu1 %v3647_v11  ;;  %v3813_v53 = vld [vmem:[#allocation13 + $0x1a40] sm:$0xff]  ;;  %v3812_v10 = vld [vmem:[#allocation13 + $0x1a38] sm:$0xff]  ;;  %v3747_v11 = vld [vmem:[#allocation13 + $0x1830] sm:$0xff] }
 0x56b   :  { %5027 = vmatpush2.msra.mxu0 %v3711_v15  ;;  %4957 = vmatprep.subr.mxu1 %v3646_v13  ;;  %v3811_v15 = vld [vmem:[#allocation13 + $0x1a30] sm:$0xff]  ;;  %v3746_v13 = vld [vmem:[#allocation13 + $0x1828] sm:$0xff] }
 0x56c   :  { %5028 = vmatprep.subr.mxu0 %v3710_v55  ;;  %4958 = vmatpush2.msra.mxu1 %v3645_v21  ;;  %v3810_v55 = vld [vmem:[#allocation13 + $0x1a28] sm:$0xff]  ;;  %v3745_v21 = vld [vmem:[#allocation13 + $0x1820] sm:$0xff] }
 0x56d   :  { %5029 = vmatpush2.msra.mxu0 %v3709_v9  ;;  %4960 = vmatmul.mubr.f32.vlgmr.msra.gmra.mxu1 %v7258_v42  ;;  %v3832_v42 = vld [vmem:[#allocation13 + $0x1ad8] sm:$0xff]  ;;  %v3809_v9 = vld [vmem:[#allocation13 + $0x1a20] sm:$0xff] }
 0x56e   :  { %5031 = vmatmul.mubr.f32.vlgmr.msra.gmra.mxu0 %v7261_v46  ;;  %5037 = vmatprep.subr.mxu1 %v3772_v41  ;;  %v3767_v46 = vld [vmem:[#allocation13 + $0x18d0] sm:$0xff]  ;;  %v3744_v41 = vld [vmem:[#allocation13 + $0x1818] sm:$0xff] }
 0x56f   :  { %5108 = vmatprep.subr.mxu0 %v3836_v17  ;;  %5038 = vmatpush1.msra.mxu1 %v3771_v39  ;;  %v3808_v17 = vld [vmem:[#allocation13 + $0x1a18] sm:$0xff]  ;;  %v3743_v39 = vld [vmem:[#allocation13 + $0x1810] sm:$0xff] }
 0x570   :  { %5101 = vmatprep.mubr.f32.mxu1 %v4134_v22  ;;  %5109 = vmatpush1.msra.mxu0 %v3835_v28  ;;  %v3807_v28 = vld [vmem:[#allocation13 + $0x1a10] sm:$0xff]  ;;  %v3742_v22 = vld [vmem:[#allocation13 + $0x1808] sm:$0xff] }
 0x571   :  { %5172 = vmatprep.mubr.f32.mxu0 %v4135_v26  ;;  %5039 = vmatprep.subr.mxu1 %v3770_v30  ;;  %v3806_v30 = vld [vmem:[#allocation13 + $0x1a08] sm:$0xff]  ;;  %v3741_v26 = vld [vmem:[#allocation13 + $0x1800] sm:$0xff] }
 0x572   :  { %5110 = vmatprep.subr.mxu0 %v3834_v34  ;;  %5040 = vmatpush1.msra.mxu1 %v3769_v31  ;;  %v3805_v34 = vld [vmem:[#allocation13 + $0x1a00] sm:$0xff]  ;;  %v3804_v31 = vld [vmem:[#allocation13 + $0x19f8] sm:$0xff] }
 0x573   :  { %5111 = vmatpush1.msra.mxu0 %v3833_v37  ;;  %5041 = vmatprep.subr.mxu1 %v3768_v2  ;;  %v3868_v37 = vld [vmem:[#allocation13 + $0x1bf8] sm:$0xff]  ;;  %v3803_v2 = vld [vmem:[#allocation13 + $0x19f0] sm:$0xff] }
 0x574   :  { %5112 = vmatprep.subr.mxu0 %v3832_v42  ;;  %5042 = vmatpush1.msra.mxu1 %v3767_v46  ;;  %v3867_v42 = vld [vmem:[#allocation13 + $0x1bf0] sm:$0xff]  ;;  %v3802_v46 = vld [vmem:[#allocation13 + $0x19e8] sm:$0xff] }
 0x575   :  { %5113 = vmatpush1.msra.mxu0 %v3831_v38  ;;  %5043 = vmatprep.subr.mxu1 %v3766_v25  ;;  %v3866_v38 = vld [vmem:[#allocation13 + $0x1be8] sm:$0xff]  ;;  %v3801_v25 = vld [vmem:[#allocation13 + $0x19e0] sm:$0xff] }
 0x576   :  { %5114 = vmatprep.subr.mxu0 %v3830_v43  ;;  %5044 = vmatpush1.msra.mxu1 %v3765_v44  ;;  %v3865_v43 = vld [vmem:[#allocation13 + $0x1be0] sm:$0xff]  ;;  %v3800_v44 = vld [vmem:[#allocation13 + $0x19d8] sm:$0xff] }
 0x577   :  { %5115 = vmatpush1.msra.mxu0 %v3829_v50  ;;  %5045 = vmatprep.subr.mxu1 %v3764_v18  ;;  %v3864_v50 = vld [vmem:[#allocation13 + $0x1bd8] sm:$0xff]  ;;  %v3799_v18 = vld [vmem:[#allocation13 + $0x19d0] sm:$0xff] }
 0x578   :  { %5116 = vmatprep.subr.mxu0 %v3828_v47  ;;  %5046 = vmatpush1.msra.mxu1 %v3763_v1  ;;  %v3863_v47 = vld [vmem:[#allocation13 + $0x1bd0] sm:$0xff]  ;;  %v3798_v1 = vld [vmem:[#allocation13 + $0x19c8] sm:$0xff] }
 0x579   :  { %5117 = vmatpush1.msra.mxu0 %v3827_v12  ;;  %5047 = vmatprep.subr.mxu1 %v3762_v49  ;;  %v3862_v12 = vld [vmem:[#allocation13 + $0x1bc8] sm:$0xff]  ;;  %v3797_v49 = vld [vmem:[#allocation13 + $0x19c0] sm:$0xff] }
 0x57a   :  { %5118 = vmatprep.subr.mxu0 %v3826_v20  ;;  %5048 = vmatpush1.msra.mxu1 %v3761_v62  ;;  %v2916_v20 = vpop.permute.xlu1 %2915  ;;  %v3861_v62 = vld [vmem:[#allocation13 + $0x1bc0] sm:$0xff] }
 0x57b   :  { %5119 = vmatpush1.msra.mxu0 %v3825_v6  ;;  %5049 = vmatprep.subr.mxu1 %v3760_v32  ;;  %v3796_v6 = vld [vmem:[#allocation13 + $0x19b8] sm:$0xff] }
 0x57c   :  { %5120 = vmatprep.subr.mxu0 %v3824_v57  ;;  %5050 = vmatpush1.msra.mxu1 %v3759_v19  ;;  %v3860_v32 = vld [vmem:[#allocation13 + $0x1bb8] sm:$0xff]  ;;  %v3795_v57 = vld [vmem:[#allocation13 + $0x19b0] sm:$0xff]  ;;  %v7302_v19 = vpop.permute.xlu0 %2905 }
 0x57d   :  { %5121 = vmatpush1.msra.mxu0 %v3823_v14  ;;  %5051 = vmatprep.subr.mxu1 %v3758_v24  ;;  %v3859_v14 = vld [vmem:[#allocation13 + $0x1bb0] sm:$0xff]  ;;  %v3794_v24 = vld [vmem:[#allocation13 + $0x19a8] sm:$0xff] }
 0x57e   :  { %5122 = vmatprep.subr.mxu0 %v3822_v56  ;;  %5052 = vmatpush1.msra.mxu1 %v3757_v33  ;;  %v3858_v56 = vld [vmem:[#allocation13 + $0x1ba8] sm:$0xff]  ;;  %v3793_v33 = vld [vmem:[#allocation13 + $0x19a0] sm:$0xff] }
 0x57f   :  { %5123 = vmatpush1.msra.mxu0 %v3821_v27  ;;  %5053 = vmatprep.subr.mxu1 %v3756_v54  ;;  %v2929_v27 = vrot.slane %v7087_v48, 5  ;;  %v3857_v54 = vld [vmem:[#allocation13 + $0x1ba0] sm:$0xff] }
 0x580   :  { %5124 = vmatprep.subr.mxu0 %v3820_v35  ;;  %5054 = vmatpush1.msra.mxu1 %v3755_v5  ;;  %v3792_v35 = vld [vmem:[#allocation13 + $0x1998] sm:$0xff] }
 0x581   :  { %5125 = vmatpush1.msra.mxu0 %v3819_v45  ;;  %5055 = vmatprep.subr.mxu1 %v3754_v61  ;;  %v3856_v5 = vld [vmem:[#allocation13 + $0x1b98] sm:$0xff]  ;;  %v3791_v45 = vld [vmem:[#allocation13 + $0x1990] sm:$0xff]  ;;  %v2909_v61 = vrot.slane %v7087_v48, 1 }
 0x582   :  { %5126 = vmatprep.subr.mxu0 %v3818_v29  ;;  %5056 = vmatpush1.msra.mxu1 %v3753_v59  ;;  %v2919_v29 = vrot.slane %v7087_v48, 3  ;;  %v2928_v59 = vrot.slane %v7073_v60, 6 }
 0x583   :  { %5127 = vmatpush1.msra.mxu0 %v3817_v63  ;;  %5057 = vmatprep.subr.mxu1 %v3752_v0  ;;  %v2936_v63 = vpop.permute.xlu1 %2935  ;;  %v3855_v0 = vld [vmem:[#allocation13 + $0x1b90] sm:$0xff] }
 0x584   :  { %5128 = vmatprep.subr.mxu0 %v3816_v40  ;;  %5058 = vmatpush1.msra.mxu1 %v3751_v3  ;;  %v3790_v40 = vld [vmem:[#allocation13 + $0x1988] sm:$0xff] }
 0x585   :  { %5129 = vmatpush1.msra.mxu0 %v3815_v4  ;;  %5059 = vmatprep.subr.mxu1 %v3750_v58  ;;  %v3854_v3 = vld [vmem:[#allocation13 + $0x1b88] sm:$0xff]  ;;  %v3789_v4 = vld [vmem:[#allocation13 + $0x1980] sm:$0xff]  ;;  %v2900_v58 = vrot.slane %v7087_v48, 7 }
 0x586   :  { %5130 = vmatprep.subr.mxu0 %v3814_v7  ;;  %5060 = vmatpush1.msra.mxu1 %v3749_v8  ;;  %v2908_v7 = vrot.slane %v7073_v60, 2  ;;  %v2918_v8 = vrot.slane %v7073_v60, 4 }
 0x587   :  { %5131 = vmatpush1.msra.mxu0 %v3813_v53  ;;  %5061 = vmatprep.subr.mxu1 %v3748_v23  ;;  %v2926_v53 = vpop.permute.xlu0 %2925  ;;  %v2930_v23 = vsel %vm2430_vm3, %v2929_v27, %v2928_v59  ;;  %v3774_v27 = vld [vmem:[#allocation13 + $0x1908] sm:$0xff]  ;;  %v3964_v59 = vld [vmem:[#allocation13 + $0x1ef8] sm:$0xff] }
 0x588   :  { %5132 = vmatprep.subr.mxu0 %v3812_v10  ;;  %5062 = vmatpush1.msra.mxu1 %v3747_v11  ;;  %v3853_v10 = vld [vmem:[#allocation13 + $0x1b80] sm:$0xff]  ;;  %v3788_v11 = vld [vmem:[#allocation13 + $0x1978] sm:$0xff]  ;;  %v2920_v48 = vsel %vm2430_vm3, %v2919_v29, %v2918_v8 }
 0x589   :  { %5133 = vmatpush1.msra.mxu0 %v3811_v15  ;;  %5063 = vmatprep.subr.mxu1 %v3746_v13  ;;  %v2941_v15 = vsel %vm2468_vm4, %v2930_v23, %v2936_v63  ;;  %v3852_v13 = vld [vmem:[#allocation13 + $0x1b78] sm:$0xff]  ;;  %v3899_v63 = vld [vmem:[#allocation13 + $0x1cf0] sm:$0xff]  ;;  %v3894_v23 = vld [vmem:[#allocation13 + $0x1cc8] sm:$0xff] }
 0x58a   :  { %5134 = vmatprep.subr.mxu0 %v3810_v55  ;;  %5064 = vmatpush1.msra.mxu1 %v3745_v21  ;;  %v3787_v55 = vld [vmem:[#allocation13 + $0x1970] sm:$0xff]  ;;  %v2910_v21 = vsel %vm2430_vm3, %v2909_v61, %v2908_v7  ;;  %v3900_v61 = vld [vmem:[#allocation13 + $0x1cf8] sm:$0xff]  ;;  %v3961_v7 = vld [vmem:[#allocation13 + $0x1ee0] sm:$0xff] }
 0x58b   :  { %5135 = vmatpush1.msra.mxu0 %v3809_v9  ;;  %5065 = vmatprep.subr.mxu1 %v3744_v41  ;;  %v3851_v9 = vld [vmem:[#allocation13 + $0x1b70] sm:$0xff]  ;;  %v3786_v41 = vld [vmem:[#allocation13 + $0x1968] sm:$0xff]  ;;  %v3896_v8 = vld [vmem:[#allocation13 + $0x1cd8] sm:$0xff] }
 0x58c   :  { %5136 = vmatprep.subr.mxu0 %v3808_v17  ;;  %5066 = vmatpush1.msra.mxu1 %v3743_v39  ;;  %v2939_v17 = vsel %vm2468_vm4, %v2910_v21, %v2916_v20  ;;  %v2940_v39 = vsel %vm2468_vm4, %v2920_v48, %v2926_v53  ;;  %v3778_v20 = vld [vmem:[#allocation13 + $0x1928] sm:$0xff]  ;;  %v3959_v53 = vld [vmem:[#allocation13 + $0x1ed0] sm:$0xff] }
 0x58d   :  { %5137 = vmatpush1.msra.mxu0 %v3807_v28  ;;  %5067 = vmatprep.subr.mxu1 %v3742_v22  ;;  %v3850_v28 = vld [vmem:[#allocation13 + $0x1b68] sm:$0xff]  ;;  %v3785_v22 = vld [vmem:[#allocation13 + $0x1960] sm:$0xff]  ;;  %v3891_v21 = vld [vmem:[#allocation13 + $0x1cb0] sm:$0xff] }
 0x58e   :  { %5138 = vmatprep.subr.mxu0 %v3806_v30  ;;  %5068 = vmatpush1.msra.mxu1 %v3741_v26  ;;  %v2901_v30 = vsel %vm2430_vm3, %v2900_v58, %v7073_v60  ;;  %v2947_v26 = vcombine.low %v2940_v39, %v2941_v15  ;;  %v3846_v60 = vld [vmem:[#allocation13 + $0x1b48] sm:$0xff]  ;;  %v3897_v58 = vld [vmem:[#allocation13 + $0x1ce0] sm:$0xff]  ;;  %v3955_v48 = vld [vmem:[#allocation13 + $0x1eb0] sm:$0xff] }
 0x58f   :  { %5139 = vmatpush1.msra.mxu0 %v3805_v34  ;;  %5069 = vmatprep.subr.mxu1 %v3804_v31  ;;  %v3849_v34 = vld [vmem:[#allocation13 + $0x1b60] sm:$0xff]  ;;  %v3784_v31 = vld [vmem:[#allocation13 + $0x1958] sm:$0xff] }
 0x590   :  { %5140 = vmatprep.subr.mxu0 %v3868_v37  ;;  %5070 = vmatpush2.msra.mxu1 %v3803_v2  ;;  %v2938_v37 = vsel %vm2468_vm4, %v2901_v30, %v7302_v19  ;;  %v3848_v2 = vld [vmem:[#allocation13 + $0x1b58] sm:$0xff]  ;;  %v3957_v15 = vld [vmem:[#allocation13 + $0x1ec0] sm:$0xff]  ;;  %v3887_v30 = vld [vmem:[#allocation13 + $0x1c90] sm:$0xff] }
 0x591   :  { %5141 = vmatpush2.msra.mxu0 %v3867_v42  ;;  %5071 = vmatprep.subr.mxu1 %v3802_v46  ;;  %v3783_v42 = vld [vmem:[#allocation13 + $0x1950] sm:$0xff]  ;;  %v2946_v46 = vcombine.low %v2938_v37, %v2939_v17  ;;  %v3776_v19 = vld [vmem:[#allocation13 + $0x1918] sm:$0xff]  ;;  %v3889_v17 = vld [vmem:[#allocation13 + $0x1ca0] sm:$0xff] }
 0x592   :  { %5142 = vmatprep.subr.mxu0 %v3866_v38  ;;  %5072 = vmatpush2.msra.mxu1 %v3801_v25  ;;  %v3847_v38 = vld [vmem:[#allocation13 + $0x1b50] sm:$0xff]  ;;  %v3782_v25 = vld [vmem:[#allocation13 + $0x1948] sm:$0xff]  ;;  %v3953_v39 = vld [vmem:[#allocation13 + $0x1ea0] sm:$0xff] }
 0x593   :  { %5143 = vmatpush2.msra.mxu0 %v3865_v43  ;;  %5073 = vmatprep.subr.mxu1 %v3800_v44  ;;  %v3781_v43 = vld [vmem:[#allocation13 + $0x1940] sm:$0xff]  ;;  %v2961_v44 = vrot.slane %v2947_v26, %v7079_v52  ;;  %v3951_v26 = vld [vmem:[#allocation13 + $0x1e90] sm:$0xff] }
 0x594   :  { %5144 = vmatprep.subr.mxu0 %v3864_v50  ;;  %5074 = vmatpush2.msra.mxu1 %v3799_v18  ;;  %v3845_v50 = vld [vmem:[#allocation13 + $0x1b40] sm:$0xff]  ;;  %v3780_v18 = vld [vmem:[#allocation13 + $0x1938] sm:$0xff] }
 0x595   :  { %5145 = vmatpush2.msra.mxu0 %v3863_v47  ;;  %5075 = vmatprep.subr.mxu1 %v3798_v1  ;;  %v3844_v47 = vld [vmem:[#allocation13 + $0x1b38] sm:$0xff]  ;;  %v3779_v1 = vld [vmem:[#allocation13 + $0x1930] sm:$0xff]  ;;  %v3885_v37 = vld [vmem:[#allocation13 + $0x1c80] sm:$0xff] }
 0x596   :  { %5146 = vmatprep.subr.mxu0 %v3862_v12  ;;  %5076 = vmatpush2.msra.mxu1 %v3797_v49  ;;  %v2954_v12 = vrot.slane %v2946_v46, %v7079_v52  ;;  %v3843_v49 = vld [vmem:[#allocation13 + $0x1b30] sm:$0xff]  ;;  %v3948_v46 = vld [vmem:[#allocation13 + $0x1e78] sm:$0xff] }
 0x597   :  { %5147 = vmatpush2.msra.mxu0 %v3861_v62  ;;  %5077 = vmatprep.subr.mxu1 %v3796_v6  ;;  %v3842_v62 = vld [vmem:[#allocation13 + $0x1b28] sm:$0xff]  ;;  %v3777_v6 = vld [vmem:[#allocation13 + $0x1920] sm:$0xff] }
 0x598   :  { %5148 = vmatprep.subr.mxu0 %v3860_v32  ;;  %5078 = vmatpush2.msra.mxu1 %v3795_v57  ;;  %v2962_v32 = vcombine.low %v2954_v12, %v2961_v44  ;;  %v3841_v57 = vld [vmem:[#allocation13 + $0x1b20] sm:$0xff]  ;;  %v3943_v12 = vld [vmem:[#allocation13 + $0x1e50] sm:$0xff] }
 0x599   :  { %5149 = vmatpush2.msra.mxu0 %v3859_v14  ;;  %5079 = vmatprep.subr.mxu1 %v3794_v24  ;;  %v5405_v14 = vcombine.low %v2961_v44, %v2961_v44  ;;  %v3840_v24 = vld [vmem:[#allocation13 + $0x1b18] sm:$0xff]  ;;  %v3881_v44 = vld [vmem:[#allocation13 + $0x1c60] sm:$0xff] }
 0x59a   :  { %5150 = vmatprep.subr.mxu0 %v3858_v56  ;;  %5080 = vmatpush2.msra.mxu1 %v3793_v33  ;;  %v3775_v56 = vld [vmem:[#allocation13 + $0x1910] sm:$0xff] }
 0x59b   :  { %5151 = vmatpush2.msra.mxu0 %v3857_v54  ;;  %5081 = vmatprep.subr.mxu1 %v3792_v35  ;;  %v3839_v33 = vld [vmem:[#allocation13 + $0x1b10] sm:$0xff]  ;;  %v3838_v54 = vld [vmem:[#allocation13 + $0x1b08] sm:$0xff]  ;;  %v3773_v35 = vld [vmem:[#allocation13 + $0x1900] sm:$0xff]  ;;  %v7327_v29 = vrot.slane %v5405_v14, %v7079_v52 }
 0x59c   :  { %5152 = vmatprep.subr.mxu0 %v3856_v5  ;;  %5082 = vmatpush2.msra.mxu1 %v3791_v45  ;;  %v3837_v5 = vld [vmem:[#allocation13 + $0x1b00] sm:$0xff]  ;;  %v7324_v45 = vrot.slane %v2962_v32, %v7079_v52  ;;  %v3876_v32 = vld [vmem:[#allocation13 + $0x1c38] sm:$0xff]  ;;  %v3939_v14 = vld [vmem:[#allocation13 + $0x1e30] sm:$0xff] }
 0x59d   :  { %5153 = vmatpush2.msra.mxu0 %v3855_v0  ;;  %5083 = vmatprep.subr.mxu1 %v3790_v40  ;;  %v3963_v0 = vld [vmem:[#allocation13 + $0x1ef0] sm:$0xff]  ;;  %v4152_v52 = vcombine.high %v7327_v29, %v7327_v29 }
 0x59e   :  { %5154 = vmatprep.subr.mxu0 %v3854_v3  ;;  %5084 = vmatpush2.msra.mxu1 %v3789_v4  ;;  %v4151_v40 = vcombine.high %v7324_v45, %v7324_v45  ;;  %v3898_v3 = vld [vmem:[#allocation13 + $0x1ce8] sm:$0xff] }
 0x59f   :  { %5155 = vmatpush2.msra.mxu0 %v3853_v10  ;;  %5085 = vmatprep.subr.mxu1 %v3788_v11  ;;  %v3962_v4 = vld [vmem:[#allocation13 + $0x1ee8] sm:$0xff]  ;;  %v3893_v11 = vld [vmem:[#allocation13 + $0x1cc0] sm:$0xff] }
 0x5a0   :  { %5156 = vmatprep.subr.mxu0 %v3852_v13  ;;  %5086 = vmatpush2.msra.mxu1 %v3787_v55  ;;  %v3958_v10 = vld [vmem:[#allocation13 + $0x1ec8] sm:$0xff]  ;;  %v3892_v13 = vld [vmem:[#allocation13 + $0x1cb8] sm:$0xff] }
 0x5a1   :  { %5157 = vmatpush2.msra.mxu0 %v3851_v9  ;;  %5087 = vmatprep.subr.mxu1 %v3786_v41  ;;  %v3956_v55 = vld [vmem:[#allocation13 + $0x1eb8] sm:$0xff]  ;;  %v3890_v9 = vld [vmem:[#allocation13 + $0x1ca8] sm:$0xff] }
 0x5a2   :  { %5158 = vmatprep.subr.mxu0 %v3850_v28  ;;  %5088 = vmatpush2.msra.mxu1 %v3785_v22  ;;  %v3954_v41 = vld [vmem:[#allocation13 + $0x1ea8] sm:$0xff]  ;;  %v3888_v28 = vld [vmem:[#allocation13 + $0x1c98] sm:$0xff] }
 0x5a3   :  { %5159 = vmatpush2.msra.mxu0 %v3849_v34  ;;  %5089 = vmatprep.subr.mxu1 %v3784_v31  ;;  %v3952_v22 = vld [vmem:[#allocation13 + $0x1e98] sm:$0xff]  ;;  %v3886_v34 = vld [vmem:[#allocation13 + $0x1c88] sm:$0xff] }
 0x5a4   :  { %5160 = vmatprep.subr.mxu0 %v3848_v2  ;;  %5090 = vmatpush2.msra.mxu1 %v3783_v42  ;;  %v3950_v31 = vld [vmem:[#allocation13 + $0x1e88] sm:$0xff]  ;;  %v3949_v2 = vld [vmem:[#allocation13 + $0x1e80] sm:$0xff]  ;;  %v3884_v42 = vld [vmem:[#allocation13 + $0x1c78] sm:$0xff] }
 0x5a5   :  { %5161 = vmatpush2.msra.mxu0 %v3847_v38  ;;  %5091 = vmatprep.subr.mxu1 %v3782_v25  ;;  %v3883_v38 = vld [vmem:[#allocation13 + $0x1c70] sm:$0xff] }
 0x5a6   :  { %5162 = vmatprep.subr.mxu0 %v3846_v60  ;;  %5092 = vmatpush2.msra.mxu1 %v3781_v43  ;;  %v3947_v25 = vld [vmem:[#allocation13 + $0x1e70] sm:$0xff]  ;;  %v3882_v60 = vld [vmem:[#allocation13 + $0x1c68] sm:$0xff] }
 0x5a7   :  { %5163 = vmatpush2.msra.mxu0 %v3845_v50  ;;  %5093 = vmatprep.subr.mxu1 %v3780_v18  ;;  %v3946_v43 = vld [vmem:[#allocation13 + $0x1e68] sm:$0xff]  ;;  %v3945_v50 = vld [vmem:[#allocation13 + $0x1e60] sm:$0xff]  ;;  %v3880_v18 = vld [vmem:[#allocation13 + $0x1c58] sm:$0xff] }
 0x5a8   :  { %5164 = vmatprep.subr.mxu0 %v3844_v47  ;;  %5094 = vmatpush2.msra.mxu1 %v3779_v1  ;;  %v3944_v47 = vld [vmem:[#allocation13 + $0x1e58] sm:$0xff]  ;;  %v3879_v1 = vld [vmem:[#allocation13 + $0x1c50] sm:$0xff] }
 0x5a9   :  { %5165 = vmatpush2.msra.mxu0 %v3843_v49  ;;  %5095 = vmatprep.subr.mxu1 %v3778_v20  ;;  %v3878_v49 = vld [vmem:[#allocation13 + $0x1c48] sm:$0xff] }
 0x5aa   :  { %5166 = vmatprep.subr.mxu0 %v3842_v62  ;;  %5096 = vmatpush2.msra.mxu1 %v3777_v6  ;;  %v3942_v20 = vld [vmem:[#allocation13 + $0x1e48] sm:$0xff]  ;;  %v3877_v62 = vld [vmem:[#allocation13 + $0x1c40] sm:$0xff] }
 0x5ab   :  { %5167 = vmatpush2.msra.mxu0 %v3841_v57  ;;  %5097 = vmatprep.subr.mxu1 %v3776_v19  ;;  %v3941_v6 = vld [vmem:[#allocation13 + $0x1e40] sm:$0xff]  ;;  %v3940_v57 = vld [vmem:[#allocation13 + $0x1e38] sm:$0xff]  ;;  %v3875_v19 = vld [vmem:[#allocation13 + $0x1c30] sm:$0xff] }
 0x5ac   :  { %5168 = vmatprep.subr.mxu0 %v3840_v24  ;;  %5098 = vmatpush2.msra.mxu1 %v3775_v56  ;;  %v3874_v24 = vld [vmem:[#allocation13 + $0x1c28] sm:$0xff] }
 0x5ad   :  { %5169 = vmatpush2.msra.mxu0 %v3839_v33  ;;  %5099 = vmatprep.subr.mxu1 %v3774_v27  ;;  %v3938_v56 = vld [vmem:[#allocation13 + $0x1e28] sm:$0xff]  ;;  %v3873_v33 = vld [vmem:[#allocation13 + $0x1c20] sm:$0xff] }
 0x5ae   :  { %5170 = vmatprep.subr.mxu0 %v3838_v54  ;;  %5100 = vmatpush2.msra.mxu1 %v3773_v35  ;;  %v3937_v27 = vld [vmem:[#allocation13 + $0x1e20] sm:$0xff]  ;;  %v3872_v54 = vld [vmem:[#allocation13 + $0x1c18] sm:$0xff] }
 0x5af   :  { %5171 = vmatpush2.msra.mxu0 %v3837_v5  ;;  %5102 = vmatmul.mubr.f32.vlgmr.msra.gmra.mxu1 %v7291_v36  ;;  %v3960_v36 = vld [vmem:[#allocation13 + $0x1ed8] sm:$0xff]  ;;  %v3871_v5 = vld [vmem:[#allocation13 + $0x1c10] sm:$0xff] }
 0x5b0   :  { %5173 = vmatmul.mubr.f32.vlgmr.msra.gmra.mxu0 %v7294_v51  ;;  %5179 = vmatprep.subr.mxu1 %v3900_v61  ;;  %v3895_v51 = vld [vmem:[#allocation13 + $0x1cd0] sm:$0xff]  ;;  %v3936_v35 = vld [vmem:[#allocation13 + $0x1e18] sm:$0xff] }
 0x5b1   :  { %5250 = vmatprep.subr.mxu0 %v3964_v59  ;;  %5180 = vmatpush1.msra.mxu1 %v3899_v63  ;;  %v3935_v61 = vld [vmem:[#allocation13 + $0x1e10] sm:$0xff]  ;;  %v3870_v59 = vld [vmem:[#allocation13 + $0x1c08] sm:$0xff] }
 0x5b2   :  { %5243 = vmatprep.mubr.f32.mxu1 %v4151_v40  ;;  %5251 = vmatpush1.msra.mxu0 %v3963_v0  ;;  %v3934_v63 = vld [vmem:[#allocation13 + $0x1e08] sm:$0xff]  ;;  %v3869_v0 = vld [vmem:[#allocation13 + $0x1c00] sm:$0xff] }
 0x5b3   :  { %5314 = vmatprep.mubr.f32.mxu0 %v4152_v52  ;;  %5181 = vmatprep.subr.mxu1 %v3898_v3  ;;  %v3933_v40 = vld [vmem:[#allocation13 + $0x1e00] sm:$0xff]  ;;  %v3932_v3 = vld [vmem:[#allocation13 + $0x1df8] sm:$0xff] }
 0x5b4   :  { %5252 = vmatprep.subr.mxu0 %v3962_v4  ;;  %5182 = vmatpush1.msra.mxu1 %v3897_v58  ;;  %v3996_v52 = vld [vmem:[#allocation13 + $0x1ff8] sm:$0xff]  ;;  %v3931_v4 = vld [vmem:[#allocation13 + $0x1df0] sm:$0xff] }
 0x5b5   :  { %5253 = vmatpush1.msra.mxu0 %v3961_v7  ;;  %5183 = vmatprep.subr.mxu1 %v3896_v8  ;;  %v3995_v58 = vld [vmem:[#allocation13 + $0x1ff0] sm:$0xff]  ;;  %v3930_v7 = vld [vmem:[#allocation13 + $0x1de8] sm:$0xff] }
 0x5b6   :  { %5254 = vmatprep.subr.mxu0 %v3960_v36  ;;  %5184 = vmatpush1.msra.mxu1 %v3895_v51  ;;  %v3994_v8 = vld [vmem:[#allocation13 + $0x1fe8] sm:$0xff]  ;;  %v3929_v36 = vld [vmem:[#allocation13 + $0x1de0] sm:$0xff] }
 0x5b7   :  { %5255 = vmatpush1.msra.mxu0 %v3959_v53  ;;  %5185 = vmatprep.subr.mxu1 %v3894_v23  ;;  %v3993_v51 = vld [vmem:[#allocation13 + $0x1fe0] sm:$0xff]  ;;  %v3928_v53 = vld [vmem:[#allocation13 + $0x1dd8] sm:$0xff] }
 0x5b8   :  { %5256 = vmatprep.subr.mxu0 %v3958_v10  ;;  %5186 = vmatpush1.msra.mxu1 %v3893_v11  ;;  %v3992_v23 = vld [vmem:[#allocation13 + $0x1fd8] sm:$0xff]  ;;  %v3927_v10 = vld [vmem:[#allocation13 + $0x1dd0] sm:$0xff] }
 0x5b9   :  { %5257 = vmatpush1.msra.mxu0 %v3957_v15  ;;  %5187 = vmatprep.subr.mxu1 %v3892_v13  ;;  %v3991_v11 = vld [vmem:[#allocation13 + $0x1fd0] sm:$0xff]  ;;  %v3926_v15 = vld [vmem:[#allocation13 + $0x1dc8] sm:$0xff] }
 0x5ba   :  { %5258 = vmatprep.subr.mxu0 %v3956_v55  ;;  %5188 = vmatpush1.msra.mxu1 %v3891_v21  ;;  %v3990_v13 = vld [vmem:[#allocation13 + $0x1fc8] sm:$0xff]  ;;  %v3925_v55 = vld [vmem:[#allocation13 + $0x1dc0] sm:$0xff] }
 0x5bb   :  { %5259 = vmatpush1.msra.mxu0 %v3955_v48  ;;  %5189 = vmatprep.subr.mxu1 %v3890_v9  ;;  %v3989_v21 = vld [vmem:[#allocation13 + $0x1fc0] sm:$0xff]  ;;  %v3924_v48 = vld [vmem:[#allocation13 + $0x1db8] sm:$0xff] }
 0x5bc   :  { %5260 = vmatprep.subr.mxu0 %v3954_v41  ;;  %5190 = vmatpush1.msra.mxu1 %v3889_v17  ;;  %v3988_v9 = vld [vmem:[#allocation13 + $0x1fb8] sm:$0xff]  ;;  %v3923_v41 = vld [vmem:[#allocation13 + $0x1db0] sm:$0xff] }
 0x5bd   :  { %5261 = vmatpush1.msra.mxu0 %v3953_v39  ;;  %5191 = vmatprep.subr.mxu1 %v3888_v28  ;;  %v3987_v17 = vld [vmem:[#allocation13 + $0x1fb0] sm:$0xff]  ;;  %v3922_v39 = vld [vmem:[#allocation13 + $0x1da8] sm:$0xff] }
 0x5be   :  { %5262 = vmatprep.subr.mxu0 %v3952_v22  ;;  %5192 = vmatpush1.msra.mxu1 %v3887_v30  ;;  %v3986_v28 = vld [vmem:[#allocation13 + $0x1fa8] sm:$0xff]  ;;  %v3921_v22 = vld [vmem:[#allocation13 + $0x1da0] sm:$0xff] }
 0x5bf   :  { %5263 = vmatpush1.msra.mxu0 %v3951_v26  ;;  %5193 = vmatprep.subr.mxu1 %v3886_v34  ;;  %v3985_v30 = vld [vmem:[#allocation13 + $0x1fa0] sm:$0xff]  ;;  %v3920_v26 = vld [vmem:[#allocation13 + $0x1d98] sm:$0xff] }
 0x5c0   :  { %5264 = vmatprep.subr.mxu0 %v3950_v31  ;;  %5194 = vmatpush1.msra.mxu1 %v3885_v37  ;;  %v3984_v34 = vld [vmem:[#allocation13 + $0x1f98] sm:$0xff]  ;;  %v3919_v31 = vld [vmem:[#allocation13 + $0x1d90] sm:$0xff] }
 0x5c1   :  { %5265 = vmatpush1.msra.mxu0 %v3949_v2  ;;  %5195 = vmatprep.subr.mxu1 %v3884_v42  ;;  %v3983_v37 = vld [vmem:[#allocation13 + $0x1f90] sm:$0xff]  ;;  %v3918_v2 = vld [vmem:[#allocation13 + $0x1d88] sm:$0xff] }
 0x5c2   :  { %5266 = vmatprep.subr.mxu0 %v3948_v46  ;;  %5196 = vmatpush1.msra.mxu1 %v3883_v38  ;;  %v3982_v42 = vld [vmem:[#allocation13 + $0x1f88] sm:$0xff]  ;;  %v3917_v46 = vld [vmem:[#allocation13 + $0x1d80] sm:$0xff] }
 0x5c3   :  { %5267 = vmatpush1.msra.mxu0 %v3947_v25  ;;  %5197 = vmatprep.subr.mxu1 %v3882_v60  ;;  %v3981_v38 = vld [vmem:[#allocation13 + $0x1f80] sm:$0xff]  ;;  %v3916_v25 = vld [vmem:[#allocation13 + $0x1d78] sm:$0xff] }
 0x5c4   :  { %5268 = vmatprep.subr.mxu0 %v3946_v43  ;;  %5198 = vmatpush1.msra.mxu1 %v3881_v44  ;;  %v3980_v60 = vld [vmem:[#allocation13 + $0x1f78] sm:$0xff]  ;;  %v3915_v43 = vld [vmem:[#allocation13 + $0x1d70] sm:$0xff] }
 0x5c5   :  { %5269 = vmatpush1.msra.mxu0 %v3945_v50  ;;  %5199 = vmatprep.subr.mxu1 %v3880_v18  ;;  %v3979_v44 = vld [vmem:[#allocation13 + $0x1f70] sm:$0xff]  ;;  %v3914_v50 = vld [vmem:[#allocation13 + $0x1d68] sm:$0xff] }
 0x5c6   :  { %5270 = vmatprep.subr.mxu0 %v3944_v47  ;;  %5200 = vmatpush1.msra.mxu1 %v3879_v1  ;;  %v3978_v18 = vld [vmem:[#allocation13 + $0x1f68] sm:$0xff]  ;;  %v3913_v47 = vld [vmem:[#allocation13 + $0x1d60] sm:$0xff] }
 0x5c7   :  { %5271 = vmatpush1.msra.mxu0 %v3943_v12  ;;  %5201 = vmatprep.subr.mxu1 %v3878_v49  ;;  %v3977_v1 = vld [vmem:[#allocation13 + $0x1f60] sm:$0xff]  ;;  %v3912_v12 = vld [vmem:[#allocation13 + $0x1d58] sm:$0xff] }
 0x5c8   :  { %5272 = vmatprep.subr.mxu0 %v3942_v20  ;;  %5202 = vmatpush1.msra.mxu1 %v3877_v62  ;;  %v3976_v49 = vld [vmem:[#allocation13 + $0x1f58] sm:$0xff]  ;;  %v3911_v20 = vld [vmem:[#allocation13 + $0x1d50] sm:$0xff] }
 0x5c9   :  { %5273 = vmatpush1.msra.mxu0 %v3941_v6  ;;  %5203 = vmatprep.subr.mxu1 %v3876_v32  ;;  %v3975_v62 = vld [vmem:[#allocation13 + $0x1f50] sm:$0xff]  ;;  %v3910_v6 = vld [vmem:[#allocation13 + $0x1d48] sm:$0xff] }
 0x5ca   :  { %5274 = vmatprep.subr.mxu0 %v3940_v57  ;;  %5204 = vmatpush1.msra.mxu1 %v3875_v19  ;;  %v3974_v32 = vld [vmem:[#allocation13 + $0x1f48] sm:$0xff]  ;;  %v3909_v57 = vld [vmem:[#allocation13 + $0x1d40] sm:$0xff] }
 0x5cb   :  { %5275 = vmatpush1.msra.mxu0 %v3939_v14  ;;  %5205 = vmatprep.subr.mxu1 %v3874_v24  ;;  %v3973_v19 = vld [vmem:[#allocation13 + $0x1f40] sm:$0xff]  ;;  %v3908_v14 = vld [vmem:[#allocation13 + $0x1d38] sm:$0xff] }
 0x5cc   :  { %5276 = vmatprep.subr.mxu0 %v3938_v56  ;;  %5206 = vmatpush1.msra.mxu1 %v3873_v33  ;;  %v3972_v24 = vld [vmem:[#allocation13 + $0x1f38] sm:$0xff]  ;;  %v3907_v56 = vld [vmem:[#allocation13 + $0x1d30] sm:$0xff] }
 0x5cd   :  { %5277 = vmatpush1.msra.mxu0 %v3937_v27  ;;  %5207 = vmatprep.subr.mxu1 %v3872_v54  ;;  %v3971_v33 = vld [vmem:[#allocation13 + $0x1f30] sm:$0xff]  ;;  %v3906_v27 = vld [vmem:[#allocation13 + $0x1d28] sm:$0xff] }
 0x5ce   :  { %5278 = vmatprep.subr.mxu0 %v3936_v35  ;;  %5208 = vmatpush1.msra.mxu1 %v3871_v5  ;;  %v3970_v54 = vld [vmem:[#allocation13 + $0x1f28] sm:$0xff]  ;;  %v3905_v35 = vld [vmem:[#allocation13 + $0x1d20] sm:$0xff] }
 0x5cf   :  { %5279 = vmatpush1.msra.mxu0 %v3935_v61  ;;  %5209 = vmatprep.subr.mxu1 %v3870_v59  ;;  %v3969_v5 = vld [vmem:[#allocation13 + $0x1f20] sm:$0xff]  ;;  %v3904_v61 = vld [vmem:[#allocation13 + $0x1d18] sm:$0xff] }
 0x5d0   :  { %5280 = vmatprep.subr.mxu0 %v3934_v63  ;;  %5210 = vmatpush1.msra.mxu1 %v3869_v0  ;;  %v3968_v59 = vld [vmem:[#allocation13 + $0x1f18] sm:$0xff]  ;;  %v3903_v63 = vld [vmem:[#allocation13 + $0x1d10] sm:$0xff] }
 0x5d1   :  { %5281 = vmatpush1.msra.mxu0 %v3933_v40  ;;  %5211 = vmatprep.subr.mxu1 %v3932_v3  ;;  %v3967_v0 = vld [vmem:[#allocation13 + $0x1f10] sm:$0xff]  ;;  %v3902_v40 = vld [vmem:[#allocation13 + $0x1d08] sm:$0xff] }
 0x5d2   :  { %5282 = vmatprep.subr.mxu0 %v3996_v52  ;;  %5212 = vmatpush2.msra.mxu1 %v3931_v4  ;;  %v3966_v3 = vld [vmem:[#allocation13 + $0x1f08] sm:$0xff]  ;;  %v3901_v52 = vld [vmem:[#allocation13 + $0x1d00] sm:$0xff] }
 0x5d3   :  { %5283 = vmatpush2.msra.mxu0 %v3995_v58  ;;  %5213 = vmatprep.subr.mxu1 %v3930_v7  ;;  %v3965_v4 = vld [vmem:[#allocation13 + $0x1f00] sm:$0xff]  ;;  %v4001_v58 = vsub.s32 0, %v7059_v16 }
 0x5d4   :  { %5284 = vmatprep.subr.mxu0 %v3994_v8  ;;  %5214 = vmatpush2.msra.mxu1 %v3929_v36  ;;  %v3997_v7 = vld [vmem:[#allocation15] sm:$0x3]  ;;  %v4005_v8 = vsub.s32 1, %v7059_v16  ;;  %v4251_v36 = vpop.f32.mrf.mxu1 }
 0x5d5   :  { %5285 = vmatpush2.msra.mxu0 %v3993_v51  ;;  %5215 = vmatprep.subr.mxu1 %v3928_v53  ;;  %v4002_v51 = vrot.slane %v3997_v7, %v4001_v58 }
 0x5d6   :  { %5286 = vmatprep.subr.mxu0 %v3992_v23  ;;  %5216 = vmatpush2.msra.mxu1 %v3927_v10  ;;  %v4006_v53 = vrot.slane %v3997_v7, %v4005_v8  ;;  %v4253_v23 = vpop.f32.mrf.mxu1 }
 0x5d7   :  { %5287 = vmatpush2.msra.mxu0 %v3991_v11  ;;  %5217 = vmatprep.subr.mxu1 %v3926_v15  ;;  %v4252_v10 = vadd.f32 %v4251_v36, %v4002_v51  ;;  %v4322_v11 = vpop.f32.mrf.mxu0 }
 0x5d8   :  { %5288 = vmatprep.subr.mxu0 %v3990_v13  ;;  %5218 = vmatpush2.msra.mxu1 %v3925_v55  ;;  %v4393_v15 = vpop.f32.mrf.mxu1  ;;  %v4254_v13 = vadd.f32 %v4253_v23, %v4006_v53 }
 0x5d9   :  { %5289 = vmatpush2.msra.mxu0 %v3989_v21  ;;  %5219 = vmatprep.subr.mxu1 %v3924_v48  ;;  %v4324_v55 = vpop.f32.mrf.mxu0 }
 0x5da   :  { %5290 = vmatprep.subr.mxu0 %v3988_v9  ;;  %5220 = vmatpush2.msra.mxu1 %v3923_v41  ;;  %v4325_v21 = vadd.f32 %v4324_v55, %v4254_v13 }
 0x5db   :  { %5291 = vmatpush2.msra.mxu0 %v3987_v17  ;;  %5221 = vmatprep.subr.mxu1 %v3922_v39  ;;  %v4464_v9 = vpop.f32.mrf.mxu0 }
 0x5dc   :  { %5292 = vmatprep.subr.mxu0 %v3986_v28  ;;  %5222 = vmatpush2.msra.mxu1 %v3921_v22 }
 0x5dd   :  { %5293 = vmatpush2.msra.mxu0 %v3985_v30  ;;  %5223 = vmatprep.subr.mxu1 %v3920_v26  ;;  %v4466_v28 = vpop.f32.mrf.mxu0 }
 0x5de   :  { %5294 = vmatprep.subr.mxu0 %v3984_v34  ;;  %5224 = vmatpush2.msra.mxu1 %v3919_v31 }
 0x5df   :  { %5295 = vmatpush2.msra.mxu0 %v3983_v37  ;;  %5225 = vmatprep.subr.mxu1 %v3918_v2  ;;  %v4606_v34 = vpop.f32.mrf.mxu0 }
 0x5e0   :  { %5296 = vmatprep.subr.mxu0 %v3982_v42  ;;  %5226 = vmatpush2.msra.mxu1 %v3917_v46 }
 0x5e1   :  { %5297 = vmatpush2.msra.mxu0 %v3981_v38  ;;  %5227 = vmatprep.subr.mxu1 %v3916_v25  ;;  %v4608_v42 = vpop.f32.mrf.mxu0 }
 0x5e2   :  { %5298 = vmatprep.subr.mxu0 %v3980_v60  ;;  %5228 = vmatpush2.msra.mxu1 %v3915_v43 }
 0x5e3   :  { %5299 = vmatpush2.msra.mxu0 %v3979_v44  ;;  %5229 = vmatprep.subr.mxu1 %v3914_v50  ;;  %v4748_v60 = vpop.f32.mrf.mxu0 }
 0x5e4   :  { %5300 = vmatprep.subr.mxu0 %v3978_v18  ;;  %5230 = vmatpush2.msra.mxu1 %v3913_v47 }
 0x5e5   :  { %5301 = vmatpush2.msra.mxu0 %v3977_v1  ;;  %5231 = vmatprep.subr.mxu1 %v3912_v12  ;;  %v4750_v18 = vpop.f32.mrf.mxu0 }
 0x5e6   :  { %5302 = vmatprep.subr.mxu0 %v3976_v49  ;;  %5232 = vmatpush2.msra.mxu1 %v3911_v20 }
 0x5e7   :  { %5303 = vmatpush2.msra.mxu0 %v3975_v62  ;;  %5233 = vmatprep.subr.mxu1 %v3910_v6 }
 0x5e8   :  { %5304 = vmatprep.subr.mxu0 %v3974_v32  ;;  %5234 = vmatpush2.msra.mxu1 %v3909_v57 }
 0x5e9   :  { %5305 = vmatpush2.msra.mxu0 %v3973_v19  ;;  %5235 = vmatprep.subr.mxu1 %v3908_v14 }
 0x5ea   :  { %5306 = vmatprep.subr.mxu0 %v3972_v24  ;;  %5236 = vmatpush2.msra.mxu1 %v3907_v56 }
 0x5eb   :  { %5307 = vmatpush2.msra.mxu0 %v3971_v33  ;;  %5237 = vmatprep.subr.mxu1 %v3906_v27 }
 0x5ec   :  { %5308 = vmatprep.subr.mxu0 %v3970_v54  ;;  %5238 = vmatpush2.msra.mxu1 %v3905_v35  ;;  %v4890_v49 = vpop.f32.mrf.mxu0 }
 0x5ed   :  { %5309 = vmatpush2.msra.mxu0 %v3969_v5  ;;  %5239 = vmatprep.subr.mxu1 %v3904_v61 }
 0x5ee   :  { %5310 = vmatprep.subr.mxu0 %v3968_v59  ;;  %5240 = vmatpush2.msra.mxu1 %v3903_v63  ;;  %v4892_v32 = vpop.f32.mrf.mxu0 }
 0x5ef   :  { %5311 = vmatpush2.msra.mxu0 %v3967_v0  ;;  %5241 = vmatprep.subr.mxu1 %v3902_v40 }
 0x5f0   :  { %5312 = vmatprep.subr.mxu0 %v3966_v3  ;;  %5242 = vmatpush2.msra.mxu1 %v3901_v52  ;;  %v5323_v52 = vld [vmem:[#allocation16] sm:$0x3] }
 0x5f1   :  { %5313 = vmatpush2.msra.mxu0 %v3965_v4  ;;  %5244 = vmatmul.mubr.f32.vlgmr.msra.gmra.mxu1 %v7324_v45  ;;  %v4323_v45 = vadd.f32 %v4322_v11, %v4252_v10  ;;  %v5328_v23 = vrot.slane %v5323_v52, %v4001_v58 }
 0x5f2   :  { %5315 = vmatmul.mubr.f32.vlgmr.msra.gmra.mxu0 %v7327_v29  ;;  %v4395_v29 = vpop.f32.mrf.mxu1 }
 0x5f3   :  { %v4394_v48 = vadd.f32 %v4393_v15, %v4323_v45  ;;  %v4396_v17 = vadd.f32 %v4395_v29, %v4325_v21  ;;  %v5332_v45 = vrot.slane %v5323_v52, %v4005_v8 }
 0x5f4   :  { %v4535_v41 = vpop.f32.mrf.mxu1 }
 0x5f5   :  { %v4465_v39 = vadd.f32 %v4464_v9, %v4394_v48  ;;  %v4467_v30 = vadd.f32 %v4466_v28, %v4396_v17  ;;  %v5397_v17 = vld [vmem:[#allocation7] ss:$0 sm:$0xff] }
 0x5f6   :  { %v4537_v22 = vpop.f32.mrf.mxu1 }
 0x5f7   :  { %v4536_v26 = vadd.f32 %v4535_v41, %v4465_v39  ;;  %v4538_v37 = vadd.f32 %v4537_v22, %v4467_v30 }
 0x5f8   :  { %v4677_v31 = vpop.f32.mrf.mxu1 }
 0x5f9   :  { %v4607_v2 = vadd.f32 %v4606_v34, %v4536_v26  ;;  %v4609_v38 = vadd.f32 %v4608_v42, %v4538_v37 }
 0x5fa   :  { %v4679_v46 = vpop.f32.mrf.mxu1 }
 0x5fb   :  { %v4678_v25 = vadd.f32 %v4677_v31, %v4607_v2  ;;  %v4680_v44 = vadd.f32 %v4679_v46, %v4609_v38 }
 0x5fc   :  { %v4819_v43 = vpop.f32.mrf.mxu1 }
 0x5fd   :  { %v4749_v50 = vadd.f32 %v4748_v60, %v4678_v25  ;;  %v4751_v1 = vadd.f32 %v4750_v18, %v4680_v44 }
 0x5fe   :  { %v4821_v47 = vpop.f32.mrf.mxu1 }
 0x5ff   :  { %v4820_v12 = vadd.f32 %v4819_v43, %v4749_v50  ;;  %v4822_v62 = vadd.f32 %v4821_v47, %v4751_v1 }
 0x601   :  { %v4891_v6 = vadd.f32 %v4890_v49, %v4820_v12  ;;  %v4893_v19 = vadd.f32 %v4892_v32, %v4822_v62 }
 0x62d   :  { %v4961_v20 = vpop.f32.mrf.mxu1 }
 0x62e   :  { %v4962_v14 = vadd.f32 %v4961_v20, %v4891_v6  ;;  %v5032_v24 = vpop.f32.mrf.mxu0 }
 0x62f   :  { %v4963_v57 = vpop.f32.mrf.mxu1 }
 0x630   :  { %v4964_v33 = vadd.f32 %v4963_v57, %v4893_v19  ;;  %v5033_v27 = vadd.f32 %v5032_v24, %v4962_v14  ;;  %v5034_v54 = vpop.f32.mrf.mxu0 }
 0x632   :  { %v5035_v5 = vadd.f32 %v5034_v54, %v4964_v33 }
 0x66f   :  { %v5103_v56 = vpop.f32.mrf.mxu1 }
 0x670   :  { %v5104_v61 = vadd.f32 %v5103_v56, %v5033_v27  ;;  %v5174_v59 = vpop.f32.mrf.mxu0 }
 0x671   :  { %v5105_v35 = vpop.f32.mrf.mxu1 }
 0x672   :  { %v5106_v63 = vadd.f32 %v5105_v35, %v5035_v5  ;;  %v5175_v0 = vadd.f32 %v5174_v59, %v5104_v61  ;;  %v5176_v40 = vpop.f32.mrf.mxu0 }
 0x674   :  { %v5177_v4 = vadd.f32 %v5176_v40, %v5106_v63 }
 0x6b1   :  { %v5245_v3 = vpop.f32.mrf.mxu1 }
 0x6b2   :  { %v5246_v7 = vadd.f32 %v5245_v3, %v5175_v0  ;;  %v5316_v36 = vpop.f32.mrf.mxu0 }
 0x6b3   :  { %v5247_v51 = vpop.f32.mrf.mxu1 }
 0x6b4   :  { %v5317_v53 = vadd.f32 %v5316_v36, %v5246_v7  ;;  %v5248_v10 = vadd.f32 %v5247_v51, %v5177_v4  ;;  %v5318_v11 = vpop.f32.mrf.mxu0 }
 0x6b6   :  { %v5321_v15 = vmax.f32 %v5317_v53, 0.0  ;;  %v5319_v13 = vadd.f32 %v5318_v11, %v5248_v10 }
 0x6b8   :  { %v5335_v55 = vmul.f32 %v5328_v23, %v5321_v15  ;;  %v5322_v29 = vmax.f32 %v5319_v13, 0.0 }
 0x6ba   :  { %v5336_v21 = vmul.f32 %v5332_v45, %v5322_v29  ;;  %v5338_v48 = vsel %vm5337_vm5, %v5335_v55, 0.0 }
 0x6bc   :  { %v5339_v9 = vsel %vm5337_vm5, %v5336_v21, 0.0 }
 0x6bd   :  { %v5340_v41 = vadd.f32 %v5339_v9, %v5338_v48 }
 0x6bf   :  { %5341 = vadd.xlane.f32.xlu0 %v5340_v41 }
 0x748   :  { %v5342_v39 = vpop.xlane.xlu0 %5341 }
 0x749   :  { %v5350_v28 = vadd.f32 %v5397_v17, %v5342_v39 }
 0x74b   :  { %5642 = vtanh.f32 %v5350_v28 }
 0x758   :  { %v5643_v58 = vpop.eup %5642 }
 0x759   :  { %5353 = vst.msk [vmem:[%s7359_s9] sm:$0x3] %vm5352_vm6, %v5643_v58 }
 0x75a   :  { %5358 = vsyncpa [#allocation9], 1 }
 0x75b   :  { %5359 = vsyncpa [#allocation11], 1 }
 0x75c   :  { %5360 = vsyncpa [#allocation14], 1 }
 0x75d   :  { %5361 = vsyncpa [#allocation17], 1 }

</bundles_post_ra>
